<compile_context>
chip_gen: v7x
topology: tpu7x:2x2x1
jax: 0.10.0
libtpu: 0.0.40
codegen_flags: <defaults>
</compile_context>

<pallas_src>
import functools

import jax
import jax.numpy as jnp
import numpy as np
from jax.experimental import pallas as pl
from jax.experimental.pallas import tpu as pltpu

CIN, COUT, KH, KW = 32, 128, 4, 4
STRIDE, PAD = 2, 1
NEG_SLOPE = -0.51027
KPHASE = 4 * CIN      # 128: contraction = 2x2 taps x Cin
NPHASE = 4 * COUT     # 512: 4 stride phases x Cout, lane-dense RHS / output


def _phase_matmul_kernel(x_ref, w_ref, b_ref, y_ref, *, m_step, wp, out_rows):
    """In-kernel im2col + (M,128)@(128,512) MXU matmul + bias + leaky ReLU.

    x_ref: (1, m_step + 2*wp, CIN)    bf16  padded half-batch, rows flattened (+slack)
    w_ref: (KPHASE, NPHASE)           bf16  phase-concatenated weights
    b_ref: (1, NPHASE)                f32   bias tiled over the 4 phase blocks
    y_ref: (out_rows, 2, wp, 2*COUT)  bf16  rows = (img, r); dim1 = ph'; cols = (c, pw', co)
    """
    # The 2x2 taps of every window are four contiguous row-slabs of the flattened
    # padded images (wrap/garbage windows read zero padding and are discarded later).
    slabs = []
    for dh in (0, 1):
        for dw in (0, 1):
            slabs.append(x_ref[0, pl.ds(dh * wp + dw, m_step), :])   # (m_step, CIN)
    patches = jnp.concatenate(slabs, axis=-1)                        # (m_step, 128) bf16

    acc = jnp.dot(patches, w_ref[...], preferred_element_type=jnp.float32)  # (M, 512) f32
    acc = acc + b_ref[...]
    act = jnp.where(acc > 0, acc, acc * NEG_SLOPE).astype(y_ref.dtype)

    # Column halves of `act` are the two row-phase blocks (ph'=0 -> ph=1, ph'=1 -> ph=0).
    # Leading-dim split reshape (m_step,256)->(out_rows,wp,256) is tile-aligned (wp%8==0).
    y_ref[:, 0, :, :] = act[:, 0 * COUT:2 * COUT].reshape(out_rows, wp, 2 * COUT)
    y_ref[:, 1, :, :] = act[:, 2 * COUT:4 * COUT].reshape(out_rows, wp, 2 * COUT)


def conv_transpose_leaky(x_nchw, w_t, bias, *, out_dtype=jnp.bfloat16):
    """x_nchw: (N, 32, H, W) f32; w_t: (32, 128, 4, 4) ConvTranspose2d layout; bias: (128,)."""
    N, C, H, W = x_nchw.shape
    assert C == CIN
    Hout, Wout = H * STRIDE, W * STRIDE

    # ---- stride-phase RHS: column block (ph', pw') holds phase (ph=1-ph', pw=1-pw') ----
    blocks = []
    for phq in range(2):
        for pwq in range(2):
            ph, pw = 1 - phq, 1 - pwq
            taps = []
            for dh in range(2):
                for dw in range(2):
                    taps.append(w_t[:, :, 3 - ph - 2 * dh, 3 - pw - 2 * dw])  # (CIN,COUT)
            blocks.append(jnp.concatenate(taps, axis=0))                      # (128,COUT)
    wcat = jnp.concatenate(blocks, axis=1).astype(jnp.bfloat16)               # (128, 512)
    bcat = jnp.tile(bias, 4).reshape(1, NPHASE).astype(jnp.float32)

    # ---- padded NHWC bf16 input, batch folded into M, split into 2 parallel halves ----
    wp = ((W + 2 + 7) // 8) * 8          # padded width, rounded to a sublane multiple
    hp = H + 2                           # 1-row halo top + bottom; window rows per image

    n_steps = 2 if N % 2 == 0 else 1     # >=2 "parallel" steps so v7x uses both TCs
    ips = N // n_steps                   # images per grid step
    out_rows = ips * hp                  # (img, r) rows per step
    m_step = out_rows * wp               # windows (= matmul M) per step

    xpad = jnp.pad(jnp.transpose(x_nchw, (0, 2, 3, 1)).astype(jnp.bfloat16),
                   ((0, 0), (1, hp - 1 - H), (1, wp - 1 - W), (0, 0)))        # (N,hp,wp,CIN)
    # 2*wp rows of zero slack per half so trailing garbage windows never read OOB.
    xflat = jnp.pad(xpad.reshape(n_steps, m_step, CIN), ((0, 0), (0, 2 * wp), (0, 0)))
    # TODO(synk): for much larger spatial sizes, band the input BlockSpec (halo'd row
    # bands) instead of whole half-batches to stay within v7x's 64 MiB VMEM.

    kernel = functools.partial(_phase_matmul_kernel, m_step=m_step, wp=wp,
                               out_rows=out_rows)
    flops = 2 * n_steps * m_step * KPHASE * NPHASE
    out_elems = n_steps * out_rows * 2 * wp * 2 * COUT
    bytes_accessed = (xflat.size * 2 + wcat.size * 2 + bcat.size * 4
                      + out_elems * jnp.dtype(out_dtype).itemsize)

    y = pl.pallas_call(
        kernel,
        out_shape=jax.ShapeDtypeStruct((n_steps * out_rows, 2, wp, 2 * COUT), out_dtype),
        grid=(n_steps,),
        in_specs=[
            pl.BlockSpec((1, m_step + 2 * wp, CIN), lambda i: (i, 0, 0)),   # half-batch
            pl.BlockSpec((KPHASE, NPHASE), lambda i: (0, 0)),               # weights
            pl.BlockSpec((1, NPHASE), lambda i: (0, 0)),                    # bias
        ],
        out_specs=pl.BlockSpec((out_rows, 2, wp, 2 * COUT), lambda i: (i, 0, 0, 0)),
        compiler_params=pltpu.CompilerParams(
            dimension_semantics=("parallel",),
            vmem_limit_bytes=32 * 1024 * 1024,
        ),
        cost_estimate=pl.CostEstimate(flops=flops, transcendentals=0,
                                      bytes_accessed=bytes_accessed),
    )(xflat, wcat, bcat)

    # ---- phase de-interleave is now a single slice: out[oh, ow*C+co] = Y[oh+1, (ow+1)*C+co]
    yflat = y.reshape(N, 2 * hp, wp * 2 * COUT)
    nhwc = yflat[:, 1:1 + Hout, COUT:COUT + Wout * COUT].reshape(N, Hout, Wout, COUT)
    # TODO(synk): if the downstream consumer accepts NHWC (and bf16), return `nhwc`
    # directly and drop this final transpose (saves one full HBM pass over the output).
    return nhwc.astype(jnp.float32).transpose(0, 3, 1, 2)   # NCHW f32, matches the module


def reference(x_nchw, w_t, bias):
    """Pure-JAX reference via lax.conv_general_dilated (transposed-conv identity)."""
    w_conv = jnp.transpose(w_t[:, :, ::-1, ::-1], (1, 0, 2, 3))   # (Cout, Cin, kH, kW)
    out = jax.lax.conv_general_dilated(
        x_nchw, w_conv,
        window_strides=(1, 1),
        padding=((KH - 1 - PAD,) * 2, (KW - 1 - PAD,) * 2),
        lhs_dilation=(STRIDE, STRIDE),
        dimension_numbers=("NCHW", "OIHW", "NCHW"),
    )
    out = out + bias[None, :, None, None]
    return jnp.where(out > 0, out, out * NEG_SLOPE)


if __name__ == "__main__":
    key = jax.random.PRNGKey(0)
    kx, kw, kb = jax.random.split(key, 3)

    # module spec shape: y = torch.randn(8, 32, 10, 30)
    N, H, W = 8, 10, 30
    x = jax.random.normal(kx, (N, CIN, H, W), dtype=jnp.float32)

    # deterministic parameter init (ConvTranspose2d weight layout: (Cin, Cout, kH, kW))
    fan_in = CIN * KH * KW
    bound = 1.0 / np.sqrt(fan_in)
    w_t = jax.random.uniform(kw, (CIN, COUT, KH, KW), jnp.float32, -bound, bound)
    b = jax.random.uniform(kb, (COUT,), jnp.float32, -bound, bound)

    fwd = jax.jit(conv_transpose_leaky)
    out = jax.block_until_ready(fwd(x, w_t, b))
    ref = jax.block_until_ready(jax.jit(reference)(x, w_t, b))

    assert out.shape == (N, COUT, 2 * H, 2 * W), out.shape
    # bf16 LHS/RHS/store with f32 accumulation -> loosen tolerance vs the f32 reference
    np.testing.assert_allclose(np.asarray(out), np.asarray(ref), rtol=2e-2, atol=2e-2)

    print("KERNEL_OK")
</pallas_src>

<mosaic_0001>
module attributes {stable_mosaic.version = 11 : i64} {
  func.func @_phase_matmul_kernel(%arg0: i32, %arg1: memref<1x1600x32xbf16, #tpu.memory_space<vmem>>, %arg2: memref<128x512xbf16, #tpu.memory_space<vmem>>, %arg3: memref<1x512xf32, #tpu.memory_space<vmem>>, %arg4: memref<48x2x32x256xbf16, #tpu.memory_space<vmem>>) attributes {dimension_semantics = [#tpu.dimension_semantics<parallel>], iteration_bounds = array<i64: 2>, scalar_prefetch = 0 : i64, scratch_operands = 0 : i64, tpu.core_type = #tpu.core_type<tc>, window_params = [{transform_indices = @transform_0, window_bounds = array<i64: 1, 1600, 32>}, {pipeline_mode = #tpu.pipeline_mode<synchronous>, transform_indices = @transform_1, window_bounds = array<i64: 128, 512>}, {pipeline_mode = #tpu.pipeline_mode<synchronous>, transform_indices = @transform_2, window_bounds = array<i64: 1, 512>}, {transform_indices = @transform_3, window_bounds = array<i64: 48, 2, 32, 256>}]} {
    %c0 = arith.constant 0 : index
    %c0_0 = arith.constant 0 : index
    %c0_1 = arith.constant 0 : index
    %0 = vector.load %arg1[%c0, %c0_0, %c0_1] : memref<1x1600x32xbf16, #tpu.memory_space<vmem>>, vector<1x1536x32xbf16>
    %1 = vector.shape_cast %0 : vector<1x1536x32xbf16> to vector<1536x32xbf16>
    %c0_2 = arith.constant 0 : index
    %c1 = arith.constant 1 : index
    %c0_3 = arith.constant 0 : index
    %2 = vector.load %arg1[%c0_2, %c1, %c0_3] : memref<1x1600x32xbf16, #tpu.memory_space<vmem>>, vector<1x1536x32xbf16>
    %3 = vector.shape_cast %2 : vector<1x1536x32xbf16> to vector<1536x32xbf16>
    %c0_4 = arith.constant 0 : index
    %c32 = arith.constant 32 : index
    %c0_5 = arith.constant 0 : index
    %4 = vector.load %arg1[%c0_4, %c32, %c0_5] : memref<1x1600x32xbf16, #tpu.memory_space<vmem>>, vector<1x1536x32xbf16>
    %5 = vector.shape_cast %4 : vector<1x1536x32xbf16> to vector<1536x32xbf16>
    %c0_6 = arith.constant 0 : index
    %c33 = arith.constant 33 : index
    %c0_7 = arith.constant 0 : index
    %6 = vector.load %arg1[%c0_6, %c33, %c0_7] : memref<1x1600x32xbf16, #tpu.memory_space<vmem>>, vector<1x1536x32xbf16>
    %7 = vector.shape_cast %6 : vector<1x1536x32xbf16> to vector<1536x32xbf16>
    %8 = tpu.concatenate %1, %3, %5, %7 in 1 : vector<1536x32xbf16>, vector<1536x32xbf16>, vector<1536x32xbf16>, vector<1536x32xbf16> -> vector<1536x128xbf16>
    %c0_8 = arith.constant 0 : index
    %c0_9 = arith.constant 0 : index
    %9 = vector.load %arg2[%c0_8, %c0_9] : memref<128x512xbf16, #tpu.memory_space<vmem>>, vector<128x512xbf16>
    %cst = arith.constant dense<0.000000e+00> : vector<1536x512xf32>
    %10 = tpu.matmul %8, %9, %cst {dimension_numbers = #tpu.dot_dimension_numbers<[1], [0], [0], [1], [0, 0, 1, 1], [], []>} : vector<1536x128xbf16>, vector<128x512xbf16>, vector<1536x512xf32> -> vector<1536x512xf32>
    %c0_10 = arith.constant 0 : index
    %c0_11 = arith.constant 0 : index
    %11 = vector.load %arg3[%c0_10, %c0_11] : memref<1x512xf32, #tpu.memory_space<vmem>>, vector<1x512xf32>
    %12 = vector.broadcast %11 : vector<1x512xf32> to vector<1536x512xf32>
    %13 = arith.addf %10, %12 : vector<1536x512xf32>
    %cst_12 = arith.constant 0.000000e+00 : f32
    %14 = vector.broadcast %cst_12 : f32 to vector<1536x512xf32>
    %15 = arith.cmpf ogt, %13, %14 : vector<1536x512xf32>
    %cst_13 = arith.constant -5.102700e-01 : f32
    %16 = vector.broadcast %cst_13 : f32 to vector<1536x512xf32>
    %17 = arith.mulf %13, %16 : vector<1536x512xf32>
    %18 = arith.select %15, %13, %17 : vector<1536x512xi1>, vector<1536x512xf32>
    %19 = arith.truncf %18 : vector<1536x512xf32> to vector<1536x512xbf16>
    %20 = vector.extract_strided_slice %19 {offsets = [0, 0], sizes = [1536, 256], strides = [1, 1]} : vector<1536x512xbf16> to vector<1536x256xbf16>
    %21 = vector.shape_cast %20 : vector<1536x256xbf16> to vector<48x32x256xbf16>
    %c0_14 = arith.constant 0 : index
    %c0_15 = arith.constant 0 : index
    %c0_16 = arith.constant 0 : index
    %c0_17 = arith.constant 0 : index
    %22 = vector.load %arg4[%c0_14, %c0_15, %c0_16, %c0_17] : memref<48x2x32x256xbf16, #tpu.memory_space<vmem>>, vector<48x1x32x256xbf16>
    %23 = vector.shape_cast %22 : vector<48x1x32x256xbf16> to vector<48x32x256xbf16>
    %24 = vector.shape_cast %21 : vector<48x32x256xbf16> to vector<48x1x32x256xbf16>
    tpu.vector_store %arg4[%c0_14, %c0_15, %c0_16, %c0_17], %24 {strides = array<i32>} : memref<48x2x32x256xbf16, #tpu.memory_space<vmem>>, vector<48x1x32x256xbf16>,
    %25 = vector.extract_strided_slice %19 {offsets = [0, 256], sizes = [1536, 256], strides = [1, 1]} : vector<1536x512xbf16> to vector<1536x256xbf16>
    %26 = vector.shape_cast %25 : vector<1536x256xbf16> to vector<48x32x256xbf16>
    %c0_18 = arith.constant 0 : index
    %c1_19 = arith.constant 1 : index
    %c0_20 = arith.constant 0 : index
    %c0_21 = arith.constant 0 : index
    %27 = vector.load %arg4[%c0_18, %c1_19, %c0_20, %c0_21] : memref<48x2x32x256xbf16, #tpu.memory_space<vmem>>, vector<48x1x32x256xbf16>
    %28 = vector.shape_cast %27 : vector<48x1x32x256xbf16> to vector<48x32x256xbf16>
    %29 = vector.shape_cast %26 : vector<48x32x256xbf16> to vector<48x1x32x256xbf16>
    tpu.vector_store %arg4[%c0_18, %c1_19, %c0_20, %c0_21], %29 {strides = array<i32>} : memref<48x2x32x256xbf16, #tpu.memory_space<vmem>>, vector<48x1x32x256xbf16>,
    return
  }
  func.func @transform_0(%arg0: i32) -> (i32, i32, i32) {
    %c0_i32 = arith.constant 0 : i32
    %c0_i32_0 = arith.constant 0 : i32
    %c0_i32_1 = arith.constant 0 : i32
    return %arg0, %c0_i32, %c0_i32_0 : i32, i32, i32
  }
  func.func @transform_1(%arg0: i32) -> (i32, i32) {
    %c0_i32 = arith.constant 0 : i32
    %c0_i32_0 = arith.constant 0 : i32
    %c0_i32_1 = arith.constant 0 : i32
    return %c0_i32, %c0_i32_0 : i32, i32
  }
  func.func @transform_2(%arg0: i32) -> (i32, i32) {
    %c0_i32 = arith.constant 0 : i32
    %c0_i32_0 = arith.constant 0 : i32
    %c0_i32_1 = arith.constant 0 : i32
    return %c0_i32, %c0_i32_0 : i32, i32
  }
  func.func @transform_3(%arg0: i32) -> (i32, i32, i32, i32) {
    %c0_i32 = arith.constant 0 : i32
    %c0_i32_0 = arith.constant 0 : i32
    %c0_i32_1 = arith.constant 0 : i32
    %c0_i32_2 = arith.constant 0 : i32
    return %arg0, %c0_i32, %c0_i32_0, %c0_i32_1 : i32, i32, i32, i32
  }
}

</mosaic_0001>

<bundles_post_ra>
// kernel: tile.8
= control target key start
LH: loop header
LB: loop body
LE: loop exit
PB: predicated region body
PF: predicated region fallthrough
CT: control target
= control target key end

     0   :  { %2 = vsyncpa [#allocation1], 0  ;;  %s44_s6 = smov [#allocation0]   ;;  %s70_s0 = inlined_call_operand.hbm [shape: f32[128], index: 0, kind: input, shape index: {}]   ;;  %s71_s1 = inlined_call_operand.vmem [shape: f32[4,128], index: 1, kind: output, shape index: {}]  }
   0x1   :  { %s9_s7 = sshll.u32 %s44_s6, 4  ;;  %s20_s10 = scalar_lea.hbm %s70_s0, 16  ;;  %s10_s7 = int_to_ptr.vmem [resolvable:$true] %s9_s7 }
   0x2   :  { %p21_p0 = scmp.ne.s32.totalorder %s70_s0, %s20_s10  ;;  %p24_p1 = scmp.lt.u32.totalorder %s20_s10, %s70_s0 }
   0x4   :  { %p26_p2 = pnand %p24_p1, %p21_p0 }
   0x6   :  { %29 = shalt.err (!%p26_p2)
}
   0x7   :  { %s30_s15 = scalar_lea.vmem %s10_s7, 16  ;;  %s34_s16 = scalar_lea.vmem %s10_s7, 32 }
   0x8   :  { %p31_p3 = scmp.ne.s32.totalorder %s10_s7, %s30_s15  ;;  %p35_p4 = scmp.lt.s32.totalorder %s10_s7, %s10_s7 }
   0x9   :  { %p36_p5 = scmp.lt.s32.totalorder %s34_s16, %s30_s15 }
   0xb   :  { %p37_p6 = por %p36_p5, %p35_p4 }
   0xd   :  { %p38_p7 = pnand %p37_p6, %p31_p3 }
   0xf   :  { %41 = shalt.err (!%p38_p7)
}
  0x10   :  { %12 = dma.hbm_to_vmem [thread:$0]  %s70_s0, 16, %s10_s7, [#allocation1]  }
  0x11   :  { %42 = dma.done.wait [#allocation1], 16  }
  0x12   :  { %43 = vsyncadd [#allocation1], 4294967280  ;;  %v16_v0 = vld [vmem:[#allocation0] ss:$0 sm:$0xff] }
  0x13   :  { %17 = vst [vmem:[%s71_s1] sm:$0xf] %v16_v0 }
  0x14   :  { %18 = vsyncpa [#allocation1], 1 }

// kernel: conv_transpose_leaky.1
= control target key start
LH: loop header
LB: loop body
LE: loop exit
PB: predicated region body
PF: predicated region fallthrough
CT: control target
= control target key end

     0   :  { %s11544_s12 = smov 0   ;;  %s16842_s0 = inlined_call_operand.vmem [shape: bf16[2,1600,32], index: 0, kind: input, shape index: {}]   ;;  %s16843_s1 = inlined_call_operand.vmem [shape: bf16[128,512], index: 1, kind: input, shape index: {}]   ;;  %s16844_s2 = inlined_call_operand.vmem [shape: f32[1,512], index: 2, kind: input, shape index: {}]   ;;  %s16845_s3 = inlined_call_operand.vmem [shape: bf16[96,2,32,256], index: 3, kind: output, shape index: {}]  }
   0x1 LB: > { %s11550_s13 = sadd.s32 4294967295, %s11518_s12   ;;  %p10169_p0 = scmp.ge.s32.totalorder %s11518_s12, 1  ;;  %s11518_s12 = sphi %s11544_s12, %s13_s12  }
   0x2   : > { %p137_p1 = scmp.lt.s32.totalorder %s11518_s12, 3 }
   0x4   : > { %p138_p2 = pnand %p10169_p0, %p137_p1 }
   0x6   : > { %141 = sbr.rel (%p138_p2) target bundleno = 1341 (0x53d), region = 32 }
   0xd   : > { %p162_p3 = scmp.lt.s32.totalorder %s11550_s13, 1  ;;  %v11295_v0 = vld [vmem:[%s16843_s1 + $0x4] ss:$16 sps:$4 sm:$0xff]   ;;  %v11297_v1 = vld [vmem:[%s16843_s1 + $0xc] ss:$16 sps:$4 sm:$0xff]   ;;  %v16846_v15 = vmov 0  }
   0xe   : > { %v11299_v2 = vld [vmem:[%s16843_s1] ss:$16 sps:$4 sm:$0xff]   ;;  %3128 = vmatprep.subr.bf16.mxu0 %v11295_v0  ;;  %v11300_v3 = vld [vmem:[%s16843_s1 + $0x8] ss:$16 sps:$4 sm:$0xff]   ;;  %v11302_v4 = vld [vmem:[%s16843_s1 + $0x24] ss:$16 sps:$4 sm:$0xff]   ;;  %4121 = vmatprep.subr.bf16.mxu1 %v11297_v1 }
   0xf   : > { %s163_s16 = scalar_select %p162_p3, %s11550_s13, 1  ;;  %3129 = vmatpush1.bf16.msra.mxu0 %v11299_v2  ;;  %v11304_v5 = vld [vmem:[%s16843_s1 + $0x2c] ss:$16 sps:$4 sm:$0xff]   ;;  %4122 = vmatpush1.bf16.msra.mxu1 %v11300_v3  ;;  %v11306_v6 = vld [vmem:[%s16843_s1 + $0x20] ss:$16 sps:$4 sm:$0xff]   ;;  %vm2239_vm1 = vcmask 261120  }
  0x10   : > { %3130 = vmatprep.subr.bf16.mxu0 %v11302_v4  ;;  %v11307_v7 = vld [vmem:[%s16843_s1 + $0x28] ss:$16 sps:$4 sm:$0xff]   ;;  %vm856_vm0 = vsmask.f32 7424  ;;  %4123 = vmatprep.subr.bf16.mxu1 %v11304_v5  ;;  %v11308_v8 = vld [vmem:[%s16843_s1 + $0x44] ss:$16 sps:$4 sm:$0xff]  }
  0x11   : > { %s11268_s25 = smul.u32 800, %s163_s16  ;;  %3160 = vmatprep.mubr.bf16.mxu0 %v16846_v15  ;;  %4153 = vmatprep.mubr.bf16.mxu1 %v16846_v15  ;;  %s11521_s10 = smov 32   ;;  %v11310_v43 = vld [vmem:[%s16843_s1 + $0x4c] ss:$16 sps:$4 sm:$0xff]   ;;  %v11312_v45 = vld [vmem:[%s16843_s1 + $0x40] ss:$16 sps:$4 sm:$0xff]  }
  0x12   : > { %s11522_s11 = smov 96   ;;  %s11523_s14 = smov 64   ;;  %v11313_v48 = vld [vmem:[%s16843_s1 + $0x48] ss:$16 sps:$4 sm:$0xff]   ;;  %v11315_v50 = vld [vmem:[%s16843_s1 + $0x64] ss:$16 sps:$4 sm:$0xff]  }
  0x13   : > { %s11583_s7 = scalar_lea.vmem %s16842_s0, %s11268_s25  ;;  %3131 = vmatpush1.bf16.msra.mxu0 %v11306_v6  ;;  %4124 = vmatpush1.bf16.msra.mxu1 %v11307_v7  ;;  %v11317_v51 = vld [vmem:[%s16843_s1 + $0x6c] ss:$16 sps:$4 sm:$0xff]   ;;  %v11319_v52 = vld [vmem:[%s16843_s1 + $0x60] ss:$16 sps:$4 sm:$0xff]   ;;  %v11320_v55 = vld [vmem:[%s16843_s1 + $0x68] ss:$16 sps:$4 sm:$0xff]  }
  0x14   : > { %v11589_v9 = vld [vmem:[%s11583_s7] sm:$0xff]   ;;  %v11592_v10 = vld [vmem:[%s11583_s7 + $0x8] sm:$0xff]   ;;  %3132 = vmatprep.subr.bf16.mxu0 %v11308_v8  ;;  %v11598_v14 = vld [vmem:[%s11583_s7 + $0x10] sm:$0xff]   ;;  %4125 = vmatprep.subr.bf16.mxu1 %v11310_v43  ;;  %vm2432_vm2 = vcmask 523264   ;;  %vm2625_vm3 = vcmask 785408   ;;  %s167_s21 = smul.u32 48, %s11550_s13 }
  0x15   : > { %v858_v11 = vshrl.u32 %v11589_v9, 16  ;;  %v860_v12 = vshll.u32 %v11589_v9, 16  ;;  %v865_v13 = vshll.u32 %v11592_v10, 16  ;;  %v11284_v16 = vld [vmem:[%s11583_s7 + $0x18] sm:$0xff]   ;;  %v869_v17 = vshrl.u32 %v11592_v10, 16  ;;  %v11285_v22 = vld [vmem:[%s11583_s7 + $0x20] sm:$0xff]  }
  0x16   : > { %v873_v20 = vshll.u32 %v11598_v14, 16  ;;  %v877_v21 = vshrl.u32 %v11598_v14, 16  ;;  %v881_v23 = vshll.u32 %v11284_v16, 16  ;;  %v885_v27 = vshrl.u32 %v11284_v16, 16  ;;  %v11286_v33 = vld [vmem:[%s11583_s7 + $0x28] sm:$0xff]   ;;  %v11287_v40 = vld [vmem:[%s11583_s7 + $0x30] sm:$0xff]  }
  0x17   : > { %v862_v18 = vrot.slane %v860_v12, 1  ;;  %v867_v19 = vrot.slane %v865_v13, 1  ;;  %v889_v31 = vshll.u32 %v11285_v22, 16  ;;  %v893_v37 = vshrl.u32 %v11285_v22, 16  ;;  %v11627_v47 = vld [vmem:[%s11583_s7 + $0x38] sm:$0xff]   ;;  %3133 = vmatpush1.bf16.msra.mxu0 %v11312_v45  ;;  %4126 = vmatpush1.bf16.msra.mxu1 %v11313_v48  ;;  %v11289_v62 = vld [vmem:[%s11583_s7 + $0x40] sm:$0xff]  }
  0x18   : > { %v875_v25 = vrot.slane %v873_v20, 1  ;;  %v883_v26 = vrot.slane %v881_v23, 1  ;;  %v897_v38 = vshll.u32 %v11286_v33, 16  ;;  %v901_v44 = vshrl.u32 %v11286_v33, 16  ;;  %3134 = vmatprep.subr.bf16.mxu0 %v11315_v50  ;;  %v11321_v56 = vld [vmem:[%s16843_s1 + $0x84] ss:$16 sps:$4 sm:$0xff]   ;;  %4127 = vmatprep.subr.bf16.mxu1 %v11317_v51 }
  0x19   : > { %v863_v24 = vor.u32 %v862_v18, %v858_v11  ;;  %v871_v30 = vor.u32 %v869_v17, %v867_v19  ;;  %v891_v36 = vrot.slane %v889_v31, 1  ;;  %v905_v46 = vshll.u32 %v11287_v40, 16  ;;  %v11323_v59 = vld [vmem:[%s16843_s1 + $0x8c] ss:$16 sps:$4 sm:$0xff]   ;;  %v11325_v60 = vld [vmem:[%s16843_s1 + $0x80] ss:$16 sps:$4 sm:$0xff]  }
  0x1a   : > { %v879_v29 = vor.u32 %v877_v21, %v875_v25  ;;  %v887_v35 = vor.u32 %v885_v27, %v883_v26  ;;  %v899_v42 = vrot.slane %v897_v38, 1  ;;  %v909_v57 = vshrl.u32 %v11287_v40, 16  ;;  %v11326_v61 = vld [vmem:[%s16843_s1 + $0x88] ss:$16 sps:$4 sm:$0xff]   ;;  %v11328_v0 = vld [vmem:[%s16843_s1 + $0xa4] ss:$16 sps:$4 sm:$0xff]  }
  0x1b   : > { %v868_v28 = vsel %vm856_vm0, %v863_v24, %v867_v19  ;;  %v876_v34 = vsel %vm856_vm0, %v871_v30, %v875_v25  ;;  %v895_v41 = vor.u32 %v893_v37, %v891_v36  ;;  %v907_v54 = vrot.slane %v905_v46, 1  ;;  %3135 = vmatpush1.bf16.msra.mxu0 %v11319_v52  ;;  %4128 = vmatpush1.bf16.msra.mxu1 %v11320_v55  ;;  %v11330_v1 = vld [vmem:[%s16843_s1 + $0xac] ss:$16 sps:$4 sm:$0xff]   ;;  %v11332_v2 = vld [vmem:[%s16843_s1 + $0xa0] ss:$16 sps:$4 sm:$0xff]   ;;  %p12389_p4 = scmp.lt.s32.totalorder %s167_s21, 95 }
  0x1c   : > { %1629 = vrot.lane.b32.xlu0 %v868_v28, %s11521_s10  ;;  %v884_v32 = vsel %vm856_vm0, %v879_v29, %v883_v26  ;;  %v892_v39 = vsel %vm856_vm0, %v887_v35, %v891_v36  ;;  %v903_v53 = vor.u32 %v901_v44, %v899_v42  ;;  %v913_v58 = vshll.u32 %v11627_v47, 16  ;;  %3136 = vmatprep.subr.bf16.mxu0 %v11321_v56  ;;  %v11333_v5 = vld [vmem:[%s16843_s1 + $0xa8] ss:$16 sps:$4 sm:$0xff]   ;;  %v11334_v6 = vld [vmem:[%s16843_s1 + $0xc4] ss:$16 sps:$4 sm:$0xff]  }
  0x1d   : > { %2047 = vrot.lane.b32.xlu1 %v884_v32, %s11522_s11  ;;  %v900_v49 = vsel %vm856_vm0, %v895_v41, %v899_v42  ;;  %4129 = vmatprep.subr.bf16.mxu1 %v11323_v59  ;;  %v911_v3 = vor.u32 %v909_v57, %v907_v54  ;;  %v917_v7 = vshrl.u32 %v11627_v47, 16  ;;  %v921_v8 = vshll.u32 %v11289_v62, 16  ;;  %v11290_v11 = vld [vmem:[%s11583_s7 + $0x48] sm:$0xff]   ;;  %v11338_v13 = vld [vmem:[%s16843_s1 + $0xc0] ss:$16 sps:$4 sm:$0xff]   ;;  %v11314_v56 = vld [vmem:[%s11583_s7 + $0x78] sm:$0xff]  }
  0x1e   : > { %v908_v63 = vsel %vm856_vm0, %v903_v53, %v907_v54  ;;  %v915_v4 = vrot.slane %v913_v58, 1  ;;  %v11336_v12 = vld [vmem:[%s16843_s1 + $0xcc] ss:$16 sps:$4 sm:$0xff]   ;;  %v11339_v17 = vld [vmem:[%s16843_s1 + $0xc8] ss:$16 sps:$4 sm:$0xff]   ;;  %v925_v18 = vshrl.u32 %v11289_v62, 16 }
  0x1f   : > { %3137 = vmatpush1.bf16.msra.mxu0 %v11325_v60  ;;  %4130 = vmatpush1.bf16.msra.mxu1 %v11326_v61  ;;  %v11341_v19 = vld [vmem:[%s16843_s1 + $0xe4] ss:$16 sps:$4 sm:$0xff]   ;;  %v923_v21 = vrot.slane %v921_v8, 1  ;;  %v11343_v23 = vld [vmem:[%s16843_s1 + $0xec] ss:$16 sps:$4 sm:$0xff]   ;;  %v933_v31 = vshrl.u32 %v11290_v11, 16 }
  0x20   : > { %1831 = vrot.lane.b32.xlu0 %v11598_v14, %s11523_s14  ;;  %3138 = vmatprep.subr.bf16.mxu0 %v11328_v0  ;;  %v919_v20 = vor.u32 %v917_v7, %v915_v4  ;;  %v11345_v24 = vld [vmem:[%s16843_s1 + $0xe0] ss:$16 sps:$4 sm:$0xff]   ;;  %v11346_v25 = vld [vmem:[%s16843_s1 + $0xe8] ss:$16 sps:$4 sm:$0xff]   ;;  %v977_v61 = vshll.u32 %v11314_v56, 16  ;;  %s17175_s21 = smov (!%p12389_p4, %s167_s21), 95 }
  0x21   : > { %1631 = vrot.lane.b32.xlu1 %v876_v34, %s11521_s10  ;;  %4131 = vmatprep.subr.bf16.mxu1 %v11330_v1  ;;  %v11291_v26 = vld [vmem:[%s11583_s7 + $0x50] sm:$0xff]   ;;  %v927_v28 = vor.u32 %v925_v18, %v923_v21  ;;  %v11293_v38 = vld [vmem:[%s11583_s7 + $0x60] sm:$0xff]   ;;  %v11294_v45 = vld [vmem:[%s11583_s7 + $0x68] sm:$0xff]   ;;  %s10883_s13 = sshll.u32 %s17175_s21, 6 }
  0x22   : > { %v924_v27 = vsel %vm856_vm0, %v919_v20, %v923_v21  ;;  %v937_v30 = vshll.u32 %v11291_v26, 16  ;;  %v941_v35 = vshrl.u32 %v11291_v26, 16  ;;  %v953_v41 = vshll.u32 %v11293_v38, 16  ;;  %v11760_v20 = vld [vmem:[%s11583_s7 + $0x98] sm:$0xff]   ;;  %s12490_s25 = scalar_lea.vmem %s16845_s3, %s10883_s13 }
  0x23   : > { %3139 = vmatpush1.bf16.msra.mxu0 %v11332_v2  ;;  %4132 = vmatpush1.bf16.msra.mxu1 %v11333_v5  ;;  %v961_v50 = vshll.u32 %v11294_v45, 16  ;;  %v965_v51 = vshrl.u32 %v11294_v45, 16  ;;  %v979_v0 = vrot.slane %v977_v61, 1 }
  0x24   : > { %1833 = vrot.lane.b32.xlu0 %v11284_v16, %s11523_s14  ;;  %v916_v16 = vsel %vm856_vm0, %v911_v3, %v915_v4  ;;  %3140 = vmatprep.subr.bf16.mxu0 %v11334_v6  ;;  %v939_v34 = vrot.slane %v937_v30, 1  ;;  %v955_v44 = vrot.slane %v953_v41, 1  ;;  %v981_v3 = vshrl.u32 %v11314_v56, 16  ;;  %v11746_v6 = vld [vmem:[%s11583_s7 + $0x88] sm:$0xff]  }
  0x25   : > { %2049 = vrot.lane.b32.xlu1 %v892_v39, %s11522_s11  ;;  %4133 = vmatprep.subr.bf16.mxu1 %v11336_v12  ;;  %v963_v53 = vrot.slane %v961_v50, 1  ;;  %v11347_v12 = vld [vmem:[%s11583_s7 + $0x90] sm:$0xff]   ;;  %v1013_v30 = vshrl.u32 %v11760_v20, 16 }
  0x26   : > { %v943_v42 = vor.u32 %v941_v35, %v939_v34  ;;  %v983_v8 = vor.u32 %v981_v3, %v979_v0  ;;  %v1001_v18 = vshll.u32 %v11347_v12, 16 }
  0x27   : > { %3141 = vmatpush1.bf16.msra.mxu0 %v11338_v13  ;;  %4134 = vmatpush1.bf16.msra.mxu1 %v11339_v17  ;;  %v967_v60 = vor.u32 %v965_v51, %v963_v53  ;;  %v997_v13 = vshrl.u32 %v11746_v6, 16 }
  0x28   : > { %1633 = vrot.lane.b32.xlu0 %v884_v32, %s11521_s10  ;;  %3142 = vmatprep.subr.bf16.mxu0 %v11341_v19  ;;  %v11292_v32 = vld [vmem:[%s11583_s7 + $0x58] sm:$0xff]  }
  0x29   : > { %1835 = vrot.lane.b32.xlu1 %v11285_v22, %s11523_s14  ;;  %v929_v22 = vshll.u32 %v11290_v11, 16  ;;  %4135 = vmatprep.subr.bf16.mxu1 %v11343_v23  ;;  %v945_v37 = vshll.u32 %v11292_v32, 16  ;;  %v949_v43 = vshrl.u32 %v11292_v32, 16 }
  0x2b   : > { %v931_v29 = vrot.slane %v929_v22, 1  ;;  %3143 = vmatpush1.bf16.msra.mxu0 %v11345_v24  ;;  %4136 = vmatpush1.bf16.msra.mxu1 %v11346_v25  ;;  %v1003_v22 = vrot.slane %v1001_v18, 1  ;;  %v1005_v24 = vshrl.u32 %v11347_v12, 16  ;;  %v1009_v25 = vshll.u32 %v11760_v20, 16 }
  0x2c   : > { %2051 = vrot.lane.b32.xlu0 %v900_v49, %s11522_s11 }
  0x2d   : > { %1635 = vrot.lane.b32.xlu1 %v892_v39, %s11521_s10  ;;  %v935_v36 = vor.u32 %v933_v31, %v931_v29 }
  0x2f   : > { %v940_v39 = vsel %vm856_vm0, %v935_v36, %v939_v34 }
  0x30   : > { %1837 = vrot.lane.b32.xlu0 %v11286_v33, %s11523_s14  ;;  %v932_v33 = vsel %vm856_vm0, %v927_v28, %v931_v29  ;;  %v1007_v28 = vor.u32 %v1005_v24, %v1003_v22  ;;  %v1011_v29 = vrot.slane %v1009_v25, 1 }
  0x31   : > { %2053 = vrot.lane.b32.xlu1 %v908_v63, %s11522_s11 }
  0x32   : > { %v1015_v34 = vor.u32 %v1013_v30, %v1011_v29 }
  0x34   : > { %1637 = vrot.lane.b32.xlu0 %v900_v49, %s11521_s10  ;;  %v957_v49 = vshrl.u32 %v11293_v38, 16 }
  0x35   : > { %1839 = vrot.lane.b32.xlu1 %v11287_v40, %s11523_s14  ;;  %v947_v40 = vrot.slane %v945_v37, 1 }
  0x36   : > { %v959_v55 = vor.u32 %v957_v49, %v955_v44 }
  0x37   : > { %v948_v46 = vsel %vm856_vm0, %v943_v42, %v947_v40  ;;  %v951_v48 = vor.u32 %v949_v43, %v947_v40 }
  0x38   : > { %2055 = vrot.lane.b32.xlu0 %v916_v16, %s11522_s11  ;;  %v964_v57 = vsel %vm856_vm0, %v959_v55, %v963_v53  ;;  %v11353_v53 = vld [vmem:[%s11583_s7 + $0xc0] sm:$0xff]  }
  0x39   : > { %1639 = vrot.lane.b32.xlu1 %v908_v63, %s11521_s10  ;;  %v956_v52 = vsel %vm856_vm0, %v951_v48, %v955_v44 }
  0x3c   : > { %1841 = vrot.lane.b32.xlu0 %v11627_v47, %s11523_s14  ;;  %v11301_v47 = vld [vmem:[%s11583_s7 + $0x70] sm:$0xff]  }
  0x3d   : > { %2057 = vrot.lane.b32.xlu1 %v924_v27, %s11522_s11  ;;  %v969_v54 = vshll.u32 %v11301_v47, 16  ;;  %v973_v59 = vshrl.u32 %v11301_v47, 16 }
  0x3f   : > { %v971_v58 = vrot.slane %v969_v54, 1 }
  0x40   : > { %1641 = vrot.lane.b32.xlu0 %v916_v16, %s11521_s10 }
  0x41   : > { %1843 = vrot.lane.b32.xlu1 %v11289_v62, %s11523_s14  ;;  %v11327_v62 = vld [vmem:[%s11583_s7 + $0x80] sm:$0xff]   ;;  %v972_v63 = vsel %vm856_vm0, %v967_v60, %v971_v58  ;;  %v975_v2 = vor.u32 %v973_v59, %v971_v58 }
  0x42   : > { %v985_v1 = vshll.u32 %v11327_v62, 16  ;;  %v989_v4 = vshrl.u32 %v11327_v62, 16 }
  0x43   : > { %v980_v7 = vsel %vm856_vm0, %v975_v2, %v979_v0  ;;  %v11354_v0 = vld [vmem:[%s11583_s7 + $0xc8] sm:$0xff]  }
  0x44   : > { %2059 = vrot.lane.b32.xlu0 %v932_v33, %s11522_s11  ;;  %v987_v5 = vrot.slane %v985_v1, 1 }
  0x45   : > { %1643 = vrot.lane.b32.xlu1 %v924_v27, %s11521_s10 }
  0x46   : > { %v988_v16 = vsel %vm856_vm0, %v983_v8, %v987_v5  ;;  %v991_v19 = vor.u32 %v989_v4, %v987_v5  ;;  %v1057_v8 = vshll.u32 %v11354_v0, 16 }
  0x48   : > { %1845 = vrot.lane.b32.xlu0 %v11290_v11, %s11523_s14  ;;  %v993_v11 = vshll.u32 %v11746_v6, 16  ;;  %v1059_v18 = vrot.slane %v1057_v8, 1 }
  0x49   : > { %2061 = vrot.lane.b32.xlu1 %v940_v39, %s11522_s11 }
  0x4a   : > { %v995_v17 = vrot.slane %v993_v11, 1 }
  0x4c   : > { %1645 = vrot.lane.b32.xlu0 %v932_v33, %s11521_s10  ;;  %v996_v21 = vsel %vm856_vm0, %v991_v19, %v995_v17  ;;  %v999_v23 = vor.u32 %v997_v13, %v995_v17  ;;  %v11779_v33 = vld [vmem:[%s11583_s7 + $0xa8] sm:$0xff]  }
  0x4d   : > { %1847 = vrot.lane.b32.xlu1 %v11291_v26, %s11523_s14  ;;  %v11767_v26 = vld [vmem:[%s11583_s7 + $0xa0] sm:$0xff]   ;;  %v1025_v37 = vshll.u32 %v11779_v33, 16  ;;  %v1029_v42 = vshrl.u32 %v11779_v33, 16 }
  0x4e   : > { %v1004_v27 = vsel %vm856_vm0, %v999_v23, %v1003_v22  ;;  %v1017_v31 = vshll.u32 %v11767_v26, 16  ;;  %v1021_v36 = vshrl.u32 %v11767_v26, 16  ;;  %v1061_v23 = vshrl.u32 %v11354_v0, 16 }
  0x4f   : > { %v1027_v41 = vrot.slane %v1025_v37, 1 }
  0x50   : > { %2063 = vrot.lane.b32.xlu0 %v948_v46, %s11522_s11  ;;  %v1019_v35 = vrot.slane %v1017_v31, 1  ;;  %v1063_v31 = vor.u32 %v1061_v23, %v1059_v18 }
  0x51   : > { %1647 = vrot.lane.b32.xlu1 %v940_v39, %s11521_s10  ;;  %v11351_v39 = vld [vmem:[%s11583_s7 + $0xb0] sm:$0xff]  }
  0x52   : > { %v1023_v40 = vor.u32 %v1021_v36, %v1019_v35  ;;  %v1033_v43 = vshll.u32 %v11351_v39, 16  ;;  %v1037_v48 = vshrl.u32 %v11351_v39, 16  ;;  %v11429_v36 = vld [vmem:[%s11583_s7 + $0x18] sm:$0xff]  }
  0x54   : > { %1849 = vrot.lane.b32.xlu0 %v11292_v32, %s11523_s14  ;;  %v1012_v32 = vsel %vm856_vm0, %v1007_v28, %v1011_v29  ;;  %v1028_v44 = vsel %vm856_vm0, %v1023_v40, %v1027_v41  ;;  %v11356_v28 = vld [vmem:[%s11583_s7 + $0xd8] sm:$0xff]  }
  0x55   : > { %2065 = vrot.lane.b32.xlu1 %v956_v52, %s11522_s11 }
  0x58   : > { %1649 = vrot.lane.b32.xlu0 %v948_v46, %s11521_s10  ;;  %v1031_v46 = vor.u32 %v1029_v42, %v1027_v41  ;;  %v11357_v41 = vld [vmem:[%s11583_s7 + $0xe0] sm:$0xff]  }
  0x59   : > { %1851 = vrot.lane.b32.xlu1 %v11293_v38, %s11523_s14  ;;  %v1020_v38 = vsel %vm856_vm0, %v1015_v34, %v1019_v35  ;;  %v1073_v35 = vshll.u32 %v11356_v28, 16 }
  0x5c   : > { %2067 = vrot.lane.b32.xlu0 %v964_v57, %s11522_s11 }
  0x5d   : > { %1651 = vrot.lane.b32.xlu1 %v956_v52, %s11521_s10 }
  0x60   : > { %1853 = vrot.lane.b32.xlu0 %v11294_v45, %s11523_s14  ;;  %v11352_v45 = vld [vmem:[%s11583_s7 + $0xb8] sm:$0xff]  }
  0x61   : > { %2069 = vrot.lane.b32.xlu1 %v972_v63, %s11522_s11  ;;  %v1041_v49 = vshll.u32 %v11352_v45, 16  ;;  %v1045_v61 = vshrl.u32 %v11352_v45, 16 }
  0x63   : > { %v1043_v55 = vrot.slane %v1041_v49, 1  ;;  %v1081_v49 = vshll.u32 %v11357_v41, 16 }
  0x64   : > { %1653 = vrot.lane.b32.xlu0 %v964_v57, %s11521_s10 }
  0x65   : > { %1855 = vrot.lane.b32.xlu1 %v11301_v47, %s11523_s14  ;;  %v1035_v47 = vrot.slane %v1033_v43, 1  ;;  %v1047_v3 = vor.u32 %v1045_v61, %v1043_v55 }
  0x67   : > { %v1036_v51 = vsel %vm856_vm0, %v1031_v46, %v1035_v47  ;;  %v1039_v54 = vor.u32 %v1037_v48, %v1035_v47  ;;  %v1077_v48 = vshrl.u32 %v11356_v28, 16 }
  0x68   : > { %2071 = vrot.lane.b32.xlu0 %v980_v7, %s11522_s11 }
  0x69   : > { %1655 = vrot.lane.b32.xlu1 %v972_v63, %s11521_s10  ;;  %v1044_v63 = vsel %vm856_vm0, %v1039_v54, %v1043_v55 }
  0x6c   : > { %1857 = vrot.lane.b32.xlu0 %v11314_v56, %s11523_s14 }
  0x6d   : > { %2073 = vrot.lane.b32.xlu1 %v988_v16, %s11522_s11 }
  0x70   : > { %1657 = vrot.lane.b32.xlu0 %v980_v7, %s11521_s10  ;;  %v1053_v7 = vshrl.u32 %v11353_v53, 16 }
  0x71   : > { %1859 = vrot.lane.b32.xlu1 %v11327_v62, %s11523_s14  ;;  %v1049_v62 = vshll.u32 %v11353_v53, 16 }
  0x73   : > { %v1051_v4 = vrot.slane %v1049_v62, 1 }
  0x74   : > { %2075 = vrot.lane.b32.xlu0 %v996_v21, %s11522_s11 }
  0x75   : > { %1659 = vrot.lane.b32.xlu1 %v988_v16, %s11521_s10  ;;  %v1052_v13 = vsel %vm856_vm0, %v1047_v3, %v1051_v4  ;;  %v11355_v16 = vld [vmem:[%s11583_s7 + $0xd0] sm:$0xff]   ;;  %v1055_v17 = vor.u32 %v1053_v7, %v1051_v4  ;;  %v11431_v3 = vld [vmem:[%s11583_s7 + $0x28] sm:$0xff]  }
  0x76   : > { %v1065_v24 = vshll.u32 %v11355_v16, 16  ;;  %v1069_v34 = vshrl.u32 %v11355_v16, 16 }
  0x78   : > { %1861 = vrot.lane.b32.xlu0 %v11746_v6, %s11523_s14 }
  0x79   : > { %2077 = vrot.lane.b32.xlu1 %v1004_v27, %s11522_s11 }
  0x7c   : > { %1661 = vrot.lane.b32.xlu0 %v996_v21, %s11521_s10 }
  0x7d   : > { %1863 = vrot.lane.b32.xlu1 %v11347_v12, %s11523_s14 }
  0x80   : > { %2079 = vrot.lane.b32.xlu0 %v1012_v32, %s11522_s11 }
  0x81   : > { %1663 = vrot.lane.b32.xlu1 %v1004_v27, %s11521_s10  ;;  %v1060_v27 = vsel %vm856_vm0, %v1055_v17, %v1059_v18 }
  0x84   : > { %1865 = vrot.lane.b32.xlu0 %v11760_v20, %s11523_s14 }
  0x85   : > { %2081 = vrot.lane.b32.xlu1 %v1020_v38, %s11522_s11 }
  0x88   : > { %1665 = vrot.lane.b32.xlu0 %v1012_v32, %s11521_s10  ;;  %v1067_v32 = vrot.slane %v1065_v24, 1  ;;  %v11432_v24 = vld [vmem:[%s11583_s7 + $0x30] sm:$0xff]  }
  0x89   : > { %1867 = vrot.lane.b32.xlu1 %v11767_v26, %s11523_s14 }
  0x8a   : > { %v1068_v40 = vsel %vm856_vm0, %v1063_v31, %v1067_v32  ;;  %v1071_v43 = vor.u32 %v1069_v34, %v1067_v32 }
  0x8c   : > { %2083 = vrot.lane.b32.xlu0 %v1028_v44, %s11522_s11 }
  0x8d   : > { %1667 = vrot.lane.b32.xlu1 %v1020_v38, %s11521_s10 }
  0x8e   : > { %v1630_v50 = vpop.permute.xlu0 %1629 }
  0x8f   : > { %v2048_v52 = vpop.permute.xlu1 %2047  ;;  %v2241_v56 = vsel %vm2239_vm1, %v11589_v9, %v1630_v50 }
  0x90   : > { %1869 = vrot.lane.b32.xlu0 %v11779_v33, %s11523_s14 }
  0x91   : > { %2085 = vrot.lane.b32.xlu1 %v1036_v51, %s11522_s11 }
  0x92   : > { %v1832_v57 = vpop.permute.xlu0 %1831 }
  0x93   : > { %v2434_v58 = vsel %vm2432_vm2, %v2241_v56, %v1832_v57  ;;  %v1632_v59 = vpop.permute.xlu1 %1631  ;;  %v1083_v57 = vrot.slane %v1081_v49, 1 }
  0x94   : > { %v2627_v60 = vsel %vm2625_vm3, %v2434_v58, %v2048_v52  ;;  %1669 = vrot.lane.b32.xlu0 %v1028_v44, %s11521_s10  ;;  %v2243_v9 = vsel %vm2239_vm1, %v11592_v10, %v1632_v59  ;;  %v1075_v44 = vrot.slane %v1073_v35, 1  ;;  %v11430_v52 = vld [vmem:[%s11583_s7 + $0x20] sm:$0xff]   ;;  %v1085_v59 = vshrl.u32 %v11357_v41, 16 }
  0x95   : > { %3161 = vmatmul.mubr.bf16.vlgmr.msra.gmra.mrb[0].mxu0 %v2627_v60  ;;  %4154 = vmatmul.mubr.bf16.vlgmr.msra.gmra.mrb[0].mxu1 %v2627_v60 }
  0x96   : > { %v1834_v1 = vpop.permute.xlu0 %1833  ;;  %3170 = vmatprep.mubr.bf16.mxu0 %v16846_v15  ;;  %4163 = vmatprep.mubr.bf16.mxu1 %v16846_v15  ;;  %v1076_v50 = vsel %vm856_vm0, %v1071_v43, %v1075_v44  ;;  %v1079_v56 = vor.u32 %v1077_v48, %v1075_v44 }
  0x97   : > { %1871 = vrot.lane.b32.xlu1 %v11351_v39, %s11523_s14  ;;  %v2050_v2 = vpop.permute.xlu1 %2049  ;;  %v2436_v5 = vsel %vm2432_vm2, %v2243_v9, %v1834_v1  ;;  %v11861_v9 = vld [vmem:[%s11583_s7 + $0xf0] sm:$0xff]   ;;  %v1087_v1 = vor.u32 %v1085_v59, %v1083_v57 }
  0x98   : > { %2087 = vrot.lane.b32.xlu0 %v1044_v63, %s11522_s11  ;;  %v2630_v10 = vsel %vm2625_vm3, %v2436_v5, %v2050_v2 }
  0x9a   : > { %v1634_v11 = vpop.permute.xlu0 %1633 }
  0x9b   : > { %1671 = vrot.lane.b32.xlu1 %v1036_v51, %s11521_s10  ;;  %v1836_v12 = vpop.permute.xlu1 %1835  ;;  %v2245_v19 = vsel %vm2239_vm1, %v11598_v14, %v1634_v11  ;;  %v11358_v51 = vld [vmem:[%s11583_s7 + $0xe8] sm:$0xff]   ;;  %v1097_v11 = vshll.u32 %v11861_v9, 16 }
  0x9c   : > { %1873 = vrot.lane.b32.xlu0 %v11352_v45, %s11523_s14  ;;  %v2438_v25 = vsel %vm2432_vm2, %v2245_v19, %v1836_v12  ;;  %v1089_v60 = vshll.u32 %v11358_v51, 16  ;;  %v1093_v8 = vshrl.u32 %v11358_v51, 16 }
  0x9d   : > { %3171 = vmatmul.mubr.bf16.gmra.mrb[4].mxu0 %v2630_v10  ;;  %4164 = vmatmul.mubr.bf16.gmra.mrb[4].mxu1 %v2630_v10 }
  0x9e   : > { %v2052_v21 = vpop.permute.xlu0 %2051  ;;  %3180 = vmatprep.mubr.bf16.mxu0 %v16846_v15  ;;  %4173 = vmatprep.mubr.bf16.mxu1 %v16846_v15  ;;  %v1091_v2 = vrot.slane %v1089_v60, 1 }
  0x9f   : > { %2089 = vrot.lane.b32.xlu1 %v1052_v13, %s11522_s11  ;;  %v1636_v22 = vpop.permute.xlu1 %1635  ;;  %v2633_v14 = vsel %vm2625_vm3, %v2438_v25, %v2052_v21  ;;  %v1099_v21 = vrot.slane %v1097_v11, 1 }
  0xa0   : > { %1673 = vrot.lane.b32.xlu0 %v1044_v63, %s11521_s10  ;;  %v2247_v37 = vsel %vm2239_vm1, %v11429_v36, %v1636_v22  ;;  %v1092_v12 = vsel %vm856_vm0, %v1087_v1, %v1091_v2  ;;  %v1095_v19 = vor.u32 %v1093_v8, %v1091_v2  ;;  %v1101_v22 = vshrl.u32 %v11861_v9, 16  ;;  %v11933_v1 = vld [vmem:[%s11583_s7 + $0x118] sm:$0xff]  }
  0xa1   : > { %v1137_v11 = vshll.u32 %v11933_v1, 16 }
  0xa2   : > { %v1838_v29 = vpop.permute.xlu0 %1837  ;;  %v1103_v31 = vor.u32 %v1101_v22, %v1099_v21 }
  0xa3   : > { %1875 = vrot.lane.b32.xlu1 %v11353_v53, %s11523_s14  ;;  %v2054_v30 = vpop.permute.xlu1 %2053  ;;  %v2440_v42 = vsel %vm2432_vm2, %v2247_v37, %v1838_v29  ;;  %v1100_v29 = vsel %vm856_vm0, %v1095_v19, %v1099_v21  ;;  %v11958_v19 = vld [vmem:[%s11583_s7 + $0x120] sm:$0xff]  }
  0xa4   : > { %2091 = vrot.lane.b32.xlu0 %v1060_v27, %s11522_s11  ;;  %v2636_v46 = vsel %vm2625_vm3, %v2440_v42, %v2054_v30 }
  0xa5   : > { %3181 = vmatmul.mubr.bf16.gmra.mrb[8].mxu0 %v2633_v14  ;;  %4174 = vmatmul.mubr.bf16.gmra.mrb[8].mxu1 %v2633_v14  ;;  %v11888_v14 = vld [vmem:[%s11583_s7 + $0x100] sm:$0xff]  }
  0xa6   : > { %3190 = vmatprep.mubr.bf16.mxu0 %v16846_v15  ;;  %4183 = vmatprep.mubr.bf16.mxu1 %v16846_v15  ;;  %v1638_v38 = vpop.permute.xlu0 %1637  ;;  %v1117_v48 = vshrl.u32 %v11888_v14, 16 }
  0xa7   : > { %1675 = vrot.lane.b32.xlu1 %v1052_v13, %s11521_s10  ;;  %v1840_v39 = vpop.permute.xlu1 %1839  ;;  %v2249_v53 = vsel %vm2239_vm1, %v11430_v52, %v1638_v38  ;;  %v11873_v13 = vld [vmem:[%s11583_s7 + $0xf8] sm:$0xff]   ;;  %v1113_v38 = vshll.u32 %v11888_v14, 16 }
  0xa8   : > { %1877 = vrot.lane.b32.xlu0 %v11354_v0, %s11523_s14  ;;  %v2442_v58 = vsel %vm2432_vm2, %v2249_v53, %v1840_v39  ;;  %v1084_v0 = vsel %vm856_vm0, %v1079_v56, %v1083_v57  ;;  %v1105_v23 = vshll.u32 %v11873_v13, 16  ;;  %v1109_v37 = vshrl.u32 %v11873_v13, 16  ;;  %v11434_v57 = vld [vmem:[%s11583_s7 + $0x40] sm:$0xff]  }
  0xaa   : > { %v2056_v45 = vpop.permute.xlu0 %2055  ;;  %v1107_v32 = vrot.slane %v1105_v23, 1  ;;  %v1139_v23 = vrot.slane %v1137_v11, 1 }
  0xab   : > { %2093 = vrot.lane.b32.xlu1 %v1068_v40, %s11522_s11  ;;  %v1640_v47 = vpop.permute.xlu1 %1639  ;;  %v2639_v62 = vsel %vm2625_vm3, %v2442_v58, %v2056_v45 }
  0xac   : > { %1677 = vrot.lane.b32.xlu0 %v1060_v27, %s11521_s10  ;;  %v2251_v4 = vsel %vm2239_vm1, %v11431_v3, %v1640_v47  ;;  %v1108_v39 = vsel %vm856_vm0, %v1103_v31, %v1107_v32  ;;  %v1111_v45 = vor.u32 %v1109_v37, %v1107_v32  ;;  %v11366_v31 = vld [vmem:[%s11583_s7 + $0x128] sm:$0xff]   ;;  %v11436_v32 = vld [vmem:[%s11583_s7 + $0x50] sm:$0xff]  }
  0xad   : > { %3191 = vmatmul.mubr.bf16.gmra.mrb[12].mxu0 %v2636_v46  ;;  %4184 = vmatmul.mubr.bf16.gmra.mrb[12].mxu1 %v2636_v46  ;;  %v1115_v46 = vrot.slane %v1113_v38, 1 }
  0xae   : > { %3200 = vmatprep.mubr.bf16.mxu0 %v16846_v15  ;;  %4193 = vmatprep.mubr.bf16.mxu1 %v16846_v15  ;;  %v1842_v54 = vpop.permute.xlu0 %1841 }
  0xaf   : > { %1879 = vrot.lane.b32.xlu1 %v11355_v16, %s11523_s14  ;;  %v2058_v55 = vpop.permute.xlu1 %2057  ;;  %v2444_v10 = vsel %vm2432_vm2, %v2251_v4, %v1842_v54  ;;  %v1116_v53 = vsel %vm856_vm0, %v1111_v45, %v1115_v46  ;;  %v11918_v54 = vld [vmem:[%s11583_s7 + $0x110] sm:$0xff]  }
  0xb0   : > { %2095 = vrot.lane.b32.xlu0 %v1076_v50, %s11522_s11  ;;  %v2642_v17 = vsel %vm2625_vm3, %v2444_v10, %v2058_v55  ;;  %v1119_v55 = vor.u32 %v1117_v48, %v1115_v46  ;;  %v1133_v8 = vshrl.u32 %v11918_v54, 16  ;;  %v11435_v10 = vld [vmem:[%s11583_s7 + $0x48] sm:$0xff]  }
  0xb2   : > { %v1642_v61 = vpop.permute.xlu0 %1641 }
  0xb3   : > { %1679 = vrot.lane.b32.xlu1 %v1068_v40, %s11521_s10  ;;  %v1844_v63 = vpop.permute.xlu1 %1843  ;;  %v2253_v25 = vsel %vm2239_vm1, %v11432_v24, %v1642_v61  ;;  %v11898_v40 = vld [vmem:[%s11583_s7 + $0x108] sm:$0xff]  }
  0xb4   : > { %1881 = vrot.lane.b32.xlu0 %v11356_v28, %s11523_s14  ;;  %v2446_v30 = vsel %vm2432_vm2, %v2253_v25, %v1844_v63  ;;  %v1121_v49 = vshll.u32 %v11898_v40, 16  ;;  %v1125_v61 = vshrl.u32 %v11898_v40, 16 }
  0xb5   : > { %3201 = vmatmul.mubr.bf16.gmra.mrb[16].mxu0 %v2639_v62  ;;  %4194 = vmatmul.mubr.bf16.gmra.mrb[16].mxu1 %v2639_v62  ;;  %v1129_v62 = vshll.u32 %v11918_v54, 16 }
  0xb6   : > { %3210 = vmatprep.mubr.bf16.mxu0 %v16846_v15  ;;  %4203 = vmatprep.mubr.bf16.mxu1 %v16846_v15  ;;  %v2060_v5 = vpop.permute.xlu0 %2059  ;;  %v1123_v56 = vrot.slane %v1121_v49, 1 }
  0xb7   : > { %2097 = vrot.lane.b32.xlu1 %v1084_v0, %s11522_s11  ;;  %v1644_v7 = vpop.permute.xlu1 %1643  ;;  %v2645_v35 = vsel %vm2625_vm3, %v2446_v30, %v2060_v5 }
  0xb8   : > { %1681 = vrot.lane.b32.xlu0 %v1076_v50, %s11521_s10  ;;  %v1127_v5 = vor.u32 %v1125_v61, %v1123_v56 }
  0xba   : > { %v1846_v16 = vpop.permute.xlu0 %1845 }
  0xbb   : > { %1883 = vrot.lane.b32.xlu1 %v11357_v41, %s11523_s14  ;;  %v2062_v18 = vpop.permute.xlu1 %2061  ;;  %v11433_v41 = vld [vmem:[%s11583_s7 + $0x38] sm:$0xff]  }
  0xbc   : > { %2099 = vrot.lane.b32.xlu0 %v1092_v12, %s11522_s11  ;;  %v2255_v42 = vsel %vm2239_vm1, %v11433_v41, %v1644_v7  ;;  %v1131_v7 = vrot.slane %v1129_v62, 1  ;;  %v1149_v41 = vshrl.u32 %v11958_v19, 16 }
  0xbd   : > { %3211 = vmatmul.mubr.bf16.gmra.mrb[20].mxu0 %v2642_v17  ;;  %4204 = vmatmul.mubr.bf16.gmra.mrb[20].mxu1 %v2642_v17  ;;  %v2448_v47 = vsel %vm2432_vm2, %v2255_v42, %v1846_v16  ;;  %v1153_v42 = vshll.u32 %v11366_v31, 16 }
  0xbe   : > { %3220 = vmatprep.mubr.bf16.mxu0 %v16846_v15  ;;  %4213 = vmatprep.mubr.bf16.mxu1 %v16846_v15  ;;  %v1646_v27 = vpop.permute.xlu0 %1645  ;;  %v1135_v22 = vor.u32 %v1133_v8, %v1131_v7 }
  0xbf   : > { %1683 = vrot.lane.b32.xlu1 %v1084_v0, %s11521_s10  ;;  %v1848_v28 = vpop.permute.xlu1 %1847  ;;  %v2257_v58 = vsel %vm2239_vm1, %v11434_v57, %v1646_v27  ;;  %v1124_v0 = vsel %vm856_vm0, %v1119_v55, %v1123_v56  ;;  %v1155_v49 = vrot.slane %v1153_v42, 1  ;;  %v1157_v55 = vshrl.u32 %v11366_v31, 16 }
  0xc0   : > { %1885 = vrot.lane.b32.xlu0 %v11358_v51, %s11523_s14  ;;  %v2648_v51 = vsel %vm2625_vm3, %v2448_v47, %v2062_v18  ;;  %v2450_v63 = vsel %vm2432_vm2, %v2257_v58, %v1848_v28  ;;  %v1132_v18 = vsel %vm856_vm0, %v1127_v5, %v1131_v7  ;;  %v1141_v28 = vshrl.u32 %v11933_v1, 16  ;;  %v11367_v47 = vld [vmem:[%s11583_s7 + $0x130] sm:$0xff]   ;;  %v11438_v5 = vld [vmem:[%s11583_s7 + $0x60] sm:$0xff]  }
  0xc1   : > { %v1140_v30 = vsel %vm856_vm0, %v1135_v22, %v1139_v23  ;;  %v1161_v56 = vshll.u32 %v11367_v47, 16 }
  0xc2   : > { %v2064_v34 = vpop.permute.xlu0 %2063  ;;  %v1143_v37 = vor.u32 %v1141_v28, %v1139_v23 }
  0xc3   : > { %2101 = vrot.lane.b32.xlu1 %v1100_v29, %s11522_s11  ;;  %v1648_v36 = vpop.permute.xlu1 %1647  ;;  %v2651_v3 = vsel %vm2625_vm3, %v2450_v63, %v2064_v34  ;;  %v1159_v63 = vor.u32 %v1157_v55, %v1155_v49 }
  0xc4   : > { %1685 = vrot.lane.b32.xlu0 %v1092_v12, %s11521_s10  ;;  %v2259_v12 = vsel %vm2239_vm1, %v11435_v10, %v1648_v36  ;;  %v11369_v10 = vld [vmem:[%s11583_s7 + $0x140] sm:$0xff]  }
  0xc5   : > { %3221 = vmatmul.mubr.bf16.gmra.mrb[24].mxu0 %v2645_v35  ;;  %4214 = vmatmul.mubr.bf16.gmra.mrb[24].mxu1 %v2645_v35  ;;  %v1177_v28 = vshll.u32 %v11369_v10, 16 }
  0xc6   : > { %3230 = vmatprep.mubr.bf16.mxu0 %v16846_v15  ;;  %4223 = vmatprep.mubr.bf16.mxu1 %v16846_v15  ;;  %v1850_v43 = vpop.permute.xlu0 %1849 }
  0xc7   : > { %1887 = vrot.lane.b32.xlu1 %v11861_v9, %s11523_s14  ;;  %v2066_v44 = vpop.permute.xlu1 %2065  ;;  %v2452_v21 = vsel %vm2432_vm2, %v2259_v12, %v1850_v43 }
  0xc8   : > { %2103 = vrot.lane.b32.xlu0 %v1108_v39, %s11522_s11  ;;  %v2654_v25 = vsel %vm2625_vm3, %v2452_v21, %v2066_v44 }
  0xca   : > { %v1650_v50 = vpop.permute.xlu0 %1649 }
  0xcb   : > { %1687 = vrot.lane.b32.xlu1 %v1100_v29, %s11521_s10  ;;  %v11912_v52 = vpop.permute.xlu1 %1851  ;;  %v1145_v29 = vshll.u32 %v11958_v19, 16  ;;  %v2261_v34 = vsel %vm2239_vm1, %v11436_v32, %v1650_v50  ;;  %v11437_v50 = vld [vmem:[%s11583_s7 + $0x58] sm:$0xff]  }
  0xcc   : > { %1889 = vrot.lane.b32.xlu0 %v11873_v13, %s11523_s14 }
  0xcd   : > { %3231 = vmatmul.mubr.bf16.gmra.mrb[28].mxu0 %v2648_v51  ;;  %4224 = vmatmul.mubr.bf16.gmra.mrb[28].mxu1 %v2648_v51  ;;  %v1147_v38 = vrot.slane %v1145_v29, 1 }
  0xce   : > { %3240 = vmatprep.mubr.bf16.mxu0 %v16846_v15  ;;  %4233 = vmatprep.mubr.bf16.mxu1 %v16846_v15  ;;  %v2068_v59 = vpop.permute.xlu0 %2067 }
  0xcf   : > { %2105 = vrot.lane.b32.xlu1 %v1116_v53, %s11522_s11  ;;  %v11925_v60 = vpop.permute.xlu1 %1651  ;;  %v1148_v46 = vsel %vm856_vm0, %v1143_v37, %v1147_v38  ;;  %v1151_v48 = vor.u32 %v1149_v41, %v1147_v38  ;;  %v1179_v37 = vrot.slane %v1177_v28, 1 }
  0xd0   : > { %1689 = vrot.lane.b32.xlu0 %v1108_v39, %s11521_s10  ;;  %v2454_v39 = vsel %vm2432_vm2, %v2261_v34, %v11912_v52  ;;  %v2263_v51 = vsel %vm2239_vm1, %v11437_v50, %v11925_v60 }
  0xd1   : > { %v2657_v44 = vsel %vm2625_vm3, %v2454_v39, %v2068_v59  ;;  %v1156_v58 = vsel %vm856_vm0, %v1151_v48, %v1155_v49  ;;  %v11368_v59 = vld [vmem:[%s11583_s7 + $0x138] sm:$0xff]   ;;  %v11440_v49 = vld [vmem:[%s11583_s7 + $0x70] sm:$0xff]  }
  0xd2   : > { %v11935_v2 = vpop.permute.xlu0 %1853 }
  0xd3   : > { %1891 = vrot.lane.b32.xlu1 %v11888_v14, %s11523_s14  ;;  %v11940_v4 = vpop.permute.xlu1 %2069  ;;  %v2456_v57 = vsel %vm2432_vm2, %v2263_v51, %v11935_v2  ;;  %v1165_v2 = vshrl.u32 %v11367_v47, 16 }
  0xd4   : > { %2107 = vrot.lane.b32.xlu0 %v1124_v0, %s11522_s11  ;;  %v2660_v61 = vsel %vm2625_vm3, %v2456_v57, %v11940_v4 }
  0xd5   : > { %3241 = vmatmul.mubr.bf16.gmra.mrb[32].mxu0 %v2651_v3  ;;  %4234 = vmatmul.mubr.bf16.gmra.mrb[32].mxu1 %v2651_v3  ;;  %v1169_v3 = vshll.u32 %v11368_v59, 16 }
  0xd6   : > { %3250 = vmatprep.mubr.bf16.mxu0 %v16846_v15  ;;  %4243 = vmatprep.mubr.bf16.mxu1 %v16846_v15  ;;  %v11949_v16 = vpop.permute.xlu0 %1653 }
  0xd7   : > { %1691 = vrot.lane.b32.xlu1 %v1116_v53, %s11521_s10  ;;  %v11952_v17 = vpop.permute.xlu1 %1855  ;;  %v2265_v7 = vsel %vm2239_vm1, %v11438_v5, %v11949_v16  ;;  %v11441_v5 = vld [vmem:[%s11583_s7 + $0x78] sm:$0xff]  }
  0xd8   : > { %1893 = vrot.lane.b32.xlu0 %v11898_v40, %s11523_s14  ;;  %v2458_v12 = vsel %vm2432_vm2, %v2265_v7, %v11952_v17  ;;  %v11370_v17 = vld [vmem:[%s11583_s7 + $0x148] sm:$0xff]  }
  0xd9   : > { %v1185_v39 = vshll.u32 %v11370_v17, 16  ;;  %v1189_v55 = vshrl.u32 %v11370_v17, 16 }
  0xda   : > { %v11961_v24 = vpop.permute.xlu0 %2071 }
  0xdb   : > { %2109 = vrot.lane.b32.xlu1 %v1132_v18, %s11522_s11  ;;  %v11965_v27 = vpop.permute.xlu1 %1655  ;;  %v2663_v22 = vsel %vm2625_vm3, %v2458_v12, %v11961_v24  ;;  %v1187_v48 = vrot.slane %v1185_v39, 1 }
  0xdc   : > { %1693 = vrot.lane.b32.xlu0 %v1124_v0, %s11521_s10  ;;  %v1163_v0 = vrot.slane %v1161_v56, 1 }
  0xdd   : > { %3251 = vmatmul.mubr.bf16.gmra.mrb[36].mxu0 %v2654_v25  ;;  %4244 = vmatmul.mubr.bf16.gmra.mrb[36].mxu1 %v2654_v25  ;;  %v1173_v25 = vshrl.u32 %v11368_v59, 16 }
  0xde   : > { %3260 = vmatprep.mubr.bf16.mxu0 %v16846_v15  ;;  %4253 = vmatprep.mubr.bf16.mxu1 %v16846_v15  ;;  %v11976_v35 = vpop.permute.xlu0 %1857  ;;  %v1164_v11 = vsel %vm856_vm0, %v1159_v63, %v1163_v0  ;;  %v1167_v16 = vor.u32 %v1165_v2, %v1163_v0  ;;  %v1191_v63 = vor.u32 %v1189_v55, %v1187_v48 }
  0xdf   : > { %1895 = vrot.lane.b32.xlu1 %v11918_v54, %s11523_s14  ;;  %v11980_v36 = vpop.permute.xlu1 %2073 }
  0xe0   : > { %2111 = vrot.lane.b32.xlu0 %v1140_v30, %s11522_s11 }
  0xe2   : > { %v11986_v43 = vpop.permute.xlu0 %1657 }
  0xe3   : > { %1695 = vrot.lane.b32.xlu1 %v1132_v18, %s11521_s10  ;;  %v11990_v45 = vpop.permute.xlu1 %1859  ;;  %v1171_v18 = vrot.slane %v1169_v3, 1  ;;  %v2269_v50 = vsel %vm2239_vm1, %v11440_v49, %v11986_v43 }
  0xe4   : > { %1897 = vrot.lane.b32.xlu0 %v11933_v1, %s11523_s14  ;;  %v2462_v57 = vsel %vm2432_vm2, %v2269_v50, %v11990_v45 }
  0xe5   : > { %3261 = vmatmul.mubr.bf16.gmra.mrb[40].mxu0 %v2657_v44  ;;  %4254 = vmatmul.mubr.bf16.gmra.mrb[40].mxu1 %v2657_v44  ;;  %v1172_v29 = vsel %vm856_vm0, %v1167_v16, %v1171_v18  ;;  %v1175_v34 = vor.u32 %v1173_v25, %v1171_v18 }
  0xe6   : > { %3270 = vmatprep.mubr.bf16.mxu0 %v16846_v15  ;;  %4263 = vmatprep.mubr.bf16.mxu1 %v16846_v15  ;;  %v12001_v52 = vpop.permute.xlu0 %2075 }
  0xe7   : > { %2113 = vrot.lane.b32.xlu1 %v1148_v46, %s11522_s11  ;;  %v12004_v53 = vpop.permute.xlu1 %1659 }
  0xe8   : > { %1697 = vrot.lane.b32.xlu0 %v1140_v30, %s11521_s10  ;;  %v11439_v30 = vld [vmem:[%s11583_s7 + $0x68] sm:$0xff]   ;;  %v2271_v7 = vsel %vm2239_vm1, %v11441_v5, %v12004_v53 }
  0xea   : > { %v12011_v60 = vpop.permute.xlu0 %1861 }
  0xeb   : > { %1899 = vrot.lane.b32.xlu1 %v11958_v19, %s11523_s14  ;;  %v12017_v62 = vpop.permute.xlu1 %2077  ;;  %v2464_v12 = vsel %vm2432_vm2, %v2271_v7, %v12011_v60  ;;  %v11443_v7 = vld [vmem:[%s11583_s7 + $0x90] sm:$0xff]  }
  0xec   : > { %2115 = vrot.lane.b32.xlu0 %v1156_v58, %s11522_s11  ;;  %v2672_v25 = vsel %vm2625_vm3, %v2464_v12, %v12017_v62  ;;  %v11377_v12 = vld [vmem:[%s11583_s7 + $0x180] sm:$0xff]  }
  0xed   : > { %3271 = vmatmul.mubr.bf16.gmra.mrb[44].mxu0 %v2660_v61  ;;  %4264 = vmatmul.mubr.bf16.gmra.mrb[44].mxu1 %v2660_v61  ;;  %v2669_v61 = vsel %vm2625_vm3, %v2462_v57, %v12001_v52 }
  0xee   : > { %3280 = vmatprep.mubr.bf16.mxu0 %v16846_v15  ;;  %4273 = vmatprep.mubr.bf16.mxu1 %v16846_v15  ;;  %v12025_v4 = vpop.permute.xlu0 %1661 }
  0xef   : > { %1699 = vrot.lane.b32.xlu1 %v1148_v46, %s11521_s10  ;;  %v12028_v8 = vpop.permute.xlu1 %1863  ;;  %v1180_v46 = vsel %vm856_vm0, %v1175_v34, %v1179_v37 }
  0xf0   : > { %1901 = vrot.lane.b32.xlu0 %v11366_v31, %s11523_s14  ;;  %v2267_v31 = vsel %vm2239_vm1, %v11439_v30, %v11965_v27  ;;  %v1181_v27 = vshrl.u32 %v11369_v10, 16  ;;  %v11374_v30 = vld [vmem:[%s11583_s7 + $0x168] sm:$0xff]  }
  0xf1   : > { %v2460_v38 = vsel %vm2432_vm2, %v2267_v31, %v11976_v35  ;;  %v11442_v31 = vld [vmem:[%s11583_s7 + $0x80] sm:$0xff]  }
  0xf2   : > { %v12035_v21 = vpop.permute.xlu0 %2079  ;;  %v2666_v42 = vsel %vm2625_vm3, %v2460_v38, %v11980_v36  ;;  %v1183_v35 = vor.u32 %v1181_v27, %v1179_v37  ;;  %v2273_v34 = vsel %vm2239_vm1, %v11442_v31, %v12025_v4  ;;  %v1217_v4 = vshll.u32 %v11374_v30, 16 }
  0xf3   : > { %2117 = vrot.lane.b32.xlu1 %v1164_v11, %s11522_s11  ;;  %v12040_v23 = vpop.permute.xlu1 %1663  ;;  %v2466_v27 = vsel %vm2432_vm2, %v2273_v34, %v12028_v8  ;;  %v11378_v34 = vld [vmem:[%s11583_s7 + $0x188] sm:$0xff]  }
  0xf4   : > { %1701 = vrot.lane.b32.xlu0 %v1156_v58, %s11521_s10  ;;  %v1188_v43 = vsel %vm856_vm0, %v1183_v35, %v1187_v48  ;;  %v11372_v58 = vld [vmem:[%s11583_s7 + $0x158] sm:$0xff]   ;;  %v2675_v35 = vsel %vm2625_vm3, %v2466_v27, %v12035_v21  ;;  %v11375_v48 = vld [vmem:[%s11583_s7 + $0x170] sm:$0xff]   ;;  %v1219_v50 = vrot.slane %v1217_v4, 1  ;;  %v2275_v55 = vsel %vm2239_vm1, %v11746_v6, %v12040_v23 }
  0xf5   : > { %3281 = vmatmul.mubr.bf16.gmra.mrb[48].mxu0 %v2663_v22  ;;  %4274 = vmatmul.mubr.bf16.gmra.mrb[48].mxu1 %v2663_v22  ;;  %v1201_v3 = vshll.u32 %v11372_v58, 16  ;;  %v1205_v28 = vshrl.u32 %v11372_v58, 16  ;;  %v1225_v57 = vshll.u32 %v11375_v48, 16  ;;  %v11376_v23 = vld [vmem:[%s11583_s7 + $0x178] sm:$0xff]  }
  0xf6   : > { %3290 = vmatprep.mubr.bf16.mxu0 %v16846_v15  ;;  %4283 = vmatprep.mubr.bf16.mxu1 %v16846_v15  ;;  %v12050_v24 = vpop.permute.xlu0 %1865  ;;  %v1233_v5 = vshll.u32 %v11376_v23, 16 }
  0xf7   : > { %1903 = vrot.lane.b32.xlu1 %v11367_v47, %s11523_s14  ;;  %v12053_v32 = vpop.permute.xlu1 %2081  ;;  %v11371_v47 = vld [vmem:[%s11583_s7 + $0x150] sm:$0xff]   ;;  %v1203_v18 = vrot.slane %v1201_v3, 1  ;;  %v1229_v3 = vshrl.u32 %v11375_v48, 16 }
  0xf8   : > { %2119 = vrot.lane.b32.xlu0 %v1172_v29, %s11522_s11  ;;  %v1193_v56 = vshll.u32 %v11371_v47, 16  ;;  %v1197_v45 = vshrl.u32 %v11371_v47, 16 }
  0xf9   : > { %v1207_v37 = vor.u32 %v1205_v28, %v1203_v18 }
  0xfa   : > { %v12058_v41 = vpop.permute.xlu0 %1665  ;;  %v1195_v0 = vrot.slane %v1193_v56, 1  ;;  %v1221_v56 = vshrl.u32 %v11374_v30, 16 }
  0xfb   : > { %1703 = vrot.lane.b32.xlu1 %v1164_v11, %s11521_s10  ;;  %v12063_v44 = vpop.permute.xlu1 %1867 }
  0xfc   : > { %1905 = vrot.lane.b32.xlu0 %v11368_v59, %s11523_s14  ;;  %v1196_v11 = vsel %vm856_vm0, %v1191_v63, %v1195_v0  ;;  %v1199_v53 = vor.u32 %v1197_v45, %v1195_v0  ;;  %v1223_v0 = vor.u32 %v1221_v56, %v1219_v50  ;;  %v1227_v45 = vrot.slane %v1225_v57, 1 }
  0xfd   : > { %3291 = vmatmul.mubr.bf16.gmra.mrb[52].mxu0 %v2666_v42  ;;  %4284 = vmatmul.mubr.bf16.gmra.mrb[52].mxu1 %v2666_v42  ;;  %v1253_v57 = vshrl.u32 %v11378_v34, 16 }
  0xfe   : > { %3300 = vmatprep.mubr.bf16.mxu0 %v16846_v15  ;;  %4293 = vmatprep.mubr.bf16.mxu1 %v16846_v15  ;;  %v12073_v36 = vpop.permute.xlu0 %2083  ;;  %v1204_v60 = vsel %vm856_vm0, %v1199_v53, %v1203_v18 }
  0xff   : > { %2121 = vrot.lane.b32.xlu1 %v1180_v46, %s11522_s11  ;;  %v12076_v51 = vpop.permute.xlu1 %1667 }
 0x100   : > { %1705 = vrot.lane.b32.xlu0 %v1172_v29, %s11521_s10 }
 0x102   : > { %v12083_v59 = vpop.permute.xlu0 %1869 }
 0x103   : > { %1907 = vrot.lane.b32.xlu1 %v11369_v10, %s11523_s14  ;;  %v12089_v2 = vpop.permute.xlu1 %2085  ;;  %v11373_v10 = vld [vmem:[%s11583_s7 + $0x160] sm:$0xff]  }
 0x104   : > { %2123 = vrot.lane.b32.xlu0 %v1188_v43, %s11522_s11  ;;  %v1209_v29 = vshll.u32 %v11373_v10, 16  ;;  %v1213_v42 = vshrl.u32 %v11373_v10, 16 }
 0x105   : > { %3301 = vmatmul.mubr.bf16.gmra.mrb[56].mxu0 %v2669_v61  ;;  %4294 = vmatmul.mubr.bf16.gmra.mrb[56].mxu1 %v2669_v61 }
 0x106   : > { %3310 = vmatprep.mubr.bf16.mxu0 %v16846_v15  ;;  %4303 = vmatprep.mubr.bf16.mxu1 %v16846_v15  ;;  %v12096_v52 = vpop.permute.xlu0 %1669  ;;  %v1211_v38 = vrot.slane %v1209_v29, 1 }
 0x107   : > { %1707 = vrot.lane.b32.xlu1 %v1180_v46, %s11521_s10  ;;  %v2281_v56 = vsel %vm2239_vm1, %v11767_v26, %v12096_v52  ;;  %v11380_v26 = vld [vmem:[%s11583_s7 + $0x198] sm:$0xff]  }
 0x108   : > { %1909 = vrot.lane.b32.xlu0 %v11370_v17, %s11523_s14  ;;  %v1215_v49 = vor.u32 %v1213_v42, %v1211_v38 }
 0x109   : > { %v12104_v16 = vpop.permute.xlu1 %1871 }
 0x10a   : > { %v12106_v22 = vpop.permute.xlu0 %2087  ;;  %v1220_v6 = vsel %vm856_vm0, %v1215_v49, %v1219_v50  ;;  %v11379_v49 = vld [vmem:[%s11583_s7 + $0x190] sm:$0xff]  }
 0x10b   : > { %2125 = vrot.lane.b32.xlu1 %v1196_v11, %s11522_s11 }
 0x10c   : > { %1709 = vrot.lane.b32.xlu0 %v1188_v43, %s11521_s10  ;;  %v2468_v43 = vsel %vm2432_vm2, %v2275_v55, %v12050_v24 }
 0x10d   : > { %3311 = vmatmul.mubr.bf16.gmra.mrb[60].mxu0 %v2672_v25  ;;  %4304 = vmatmul.mubr.bf16.gmra.mrb[60].mxu1 %v2672_v25  ;;  %v12112_v17 = vpop.permute.xlu1 %1671  ;;  %v2678_v63 = vsel %vm2625_vm3, %v2468_v43, %v12053_v32  ;;  %v1235_v25 = vrot.slane %v1233_v5, 1  ;;  %v1257_v43 = vshll.u32 %v11379_v49, 16  ;;  %v1261_v5 = vshrl.u32 %v11379_v49, 16 }
 0x10e   : > { %3320 = vmatprep.mubr.bf16.mxu0 %v16846_v15  ;;  %4313 = vmatprep.mubr.bf16.mxu1 %v16846_v15  ;;  %v12121_v62 = vpop.permute.xlu0 %1873 }
 0x10f   : > { %1911 = vrot.lane.b32.xlu1 %v11371_v47, %s11523_s14  ;;  %v1212_v47 = vsel %vm856_vm0, %v1207_v37, %v1211_v38  ;;  %v2279_v37 = vsel %vm2239_vm1, %v11760_v20, %v12076_v51  ;;  %v1249_v20 = vshll.u32 %v11378_v34, 16 }
 0x110   : > { %2127 = vrot.lane.b32.xlu0 %v1204_v60, %s11522_s11  ;;  %v2472_v42 = vsel %vm2432_vm2, %v2279_v37, %v12083_v59  ;;  %v11444_v37 = vld [vmem:[%s11583_s7 + $0xb0] sm:$0xff]  }
 0x111   : > { %v12127_v39 = vpop.permute.xlu1 %2089  ;;  %v1251_v55 = vrot.slane %v1249_v20, 1 }
 0x112   : > { %v12129_v46 = vpop.permute.xlu0 %1673 }
 0x113   : > { %1711 = vrot.lane.b32.xlu1 %v1196_v11, %s11521_s10  ;;  %v2277_v11 = vsel %vm2239_vm1, %v11443_v7, %v12058_v41  ;;  %v1231_v41 = vor.u32 %v1229_v3, %v1227_v45  ;;  %v1259_v3 = vrot.slane %v1257_v43, 1  ;;  %v1265_v7 = vshll.u32 %v11380_v26, 16  ;;  %v11445_v43 = vld [vmem:[%s11583_s7 + $0xb8] sm:$0xff]  }
 0x114   : > { %1913 = vrot.lane.b32.xlu0 %v11372_v58, %s11523_s14  ;;  %v2470_v53 = vsel %vm2432_vm2, %v2277_v11, %v12063_v44  ;;  %v2283_v11 = vsel %vm2239_vm1, %v11779_v33, %v12112_v17 }
 0x115   : > { %3321 = vmatmul.mubr.bf16.gmra.mrb[64].mxu0 %v2675_v35  ;;  %4314 = vmatmul.mubr.bf16.gmra.mrb[64].mxu1 %v2675_v35  ;;  %v12137_v8 = vpop.permute.xlu1 %1875  ;;  %v2681_v29 = vsel %vm2625_vm3, %v2470_v53, %v12073_v36  ;;  %v1236_v44 = vsel %vm856_vm0, %v1231_v41, %v1235_v25  ;;  %v1245_v35 = vshrl.u32 %v11377_v12, 16  ;;  %v2476_v53 = vsel %vm2432_vm2, %v2283_v11, %v12121_v62 }
 0x116   : > { %3330 = vmatprep.mubr.bf16.mxu0 %v16846_v15  ;;  %4323 = vmatprep.mubr.bf16.mxu1 %v16846_v15  ;;  %v12144_v21 = vpop.permute.xlu0 %2091  ;;  %v1263_v33 = vor.u32 %v1261_v5, %v1259_v3  ;;  %v1267_v17 = vrot.slane %v1265_v7, 1  ;;  %v11384_v5 = vld [vmem:[%s11583_s7 + $0x1b8] sm:$0xff]  }
 0x117   : > { %2129 = vrot.lane.b32.xlu1 %v1212_v47, %s11522_s11 }
 0x118   : > { %1713 = vrot.lane.b32.xlu0 %v1204_v60, %s11521_s10  ;;  %v1237_v60 = vshrl.u32 %v11376_v23, 16  ;;  %v1268_v62 = vsel %vm856_vm0, %v1263_v33, %v1267_v17  ;;  %v1297_v33 = vshll.u32 %v11384_v5, 16 }
 0x119   : > { %v12150_v58 = vpop.permute.xlu1 %1675 }
 0x11a   : > { %v12154_v61 = vpop.permute.xlu0 %1877  ;;  %v1239_v38 = vor.u32 %v1237_v60, %v1235_v25  ;;  %v1269_v60 = vshrl.u32 %v11380_v26, 16 }
 0x11b   : > { %1915 = vrot.lane.b32.xlu1 %v11373_v10, %s11523_s14  ;;  %v1228_v10 = vsel %vm856_vm0, %v1223_v0, %v1227_v45  ;;  %v1255_v45 = vor.u32 %v1253_v57, %v1251_v55 }
 0x11c   : > { %2131 = vrot.lane.b32.xlu0 %v1220_v6, %s11522_s11 }
 0x11d   : > { %3331 = vmatmul.mubr.bf16.gmra.mrb[68].mxu0 %v2678_v63  ;;  %4324 = vmatmul.mubr.bf16.gmra.mrb[68].mxu1 %v2678_v63  ;;  %v12160_v24 = vpop.permute.xlu1 %2093 }
 0x11e   : > { %3340 = vmatprep.mubr.bf16.mxu0 %v16846_v15  ;;  %4333 = vmatprep.mubr.bf16.mxu1 %v16846_v15  ;;  %v12167_v32 = vpop.permute.xlu0 %1677 }
 0x11f   : > { %1715 = vrot.lane.b32.xlu1 %v1212_v47, %s11521_s10  ;;  %v2684_v47 = vsel %vm2625_vm3, %v2472_v42, %v12089_v2 }
 0x120   : > { %1917 = vrot.lane.b32.xlu0 %v11374_v30, %s11523_s14  ;;  %v1241_v30 = vshll.u32 %v11377_v12, 16 }
 0x121   : > { %v12175_v18 = vpop.permute.xlu1 %1879 }
 0x122   : > { %v12177_v28 = vpop.permute.xlu0 %2095  ;;  %v1243_v27 = vrot.slane %v1241_v30, 1 }
 0x123   : > { %2133 = vrot.lane.b32.xlu1 %v1228_v10, %s11522_s11 }
 0x124   : > { %1717 = vrot.lane.b32.xlu0 %v1220_v6, %s11521_s10  ;;  %v1247_v50 = vor.u32 %v1245_v35, %v1243_v27  ;;  %v2474_v6 = vsel %vm2432_vm2, %v2281_v56, %v12104_v16 }
 0x125   : > { %3341 = vmatmul.mubr.bf16.gmra.mrb[72].mxu0 %v2681_v29  ;;  %4334 = vmatmul.mubr.bf16.gmra.mrb[72].mxu1 %v2681_v29  ;;  %v12183_v31 = vpop.permute.xlu1 %1679  ;;  %v2687_v0 = vsel %vm2625_vm3, %v2474_v6, %v12106_v22  ;;  %v2690_v29 = vsel %vm2625_vm3, %v2476_v53, %v12127_v39  ;;  %v2287_v6 = vsel %vm2239_vm1, %v11445_v43, %v12150_v58 }
 0x126   : > { %3350 = vmatprep.mubr.bf16.mxu0 %v16846_v15  ;;  %4343 = vmatprep.mubr.bf16.mxu1 %v16846_v15  ;;  %v12192_v36 = vpop.permute.xlu0 %1881  ;;  %v1252_v63 = vsel %vm856_vm0, %v1247_v50, %v1251_v55  ;;  %v11383_v55 = vld [vmem:[%s11583_s7 + $0x1b0] sm:$0xff]  }
 0x127   : > { %1919 = vrot.lane.b32.xlu1 %v11375_v48, %s11523_s14  ;;  %v1244_v48 = vsel %vm856_vm0, %v1239_v38, %v1243_v27  ;;  %v2285_v38 = vsel %vm2239_vm1, %v11444_v37, %v12129_v46  ;;  %v1271_v27 = vor.u32 %v1269_v60, %v1267_v17  ;;  %v11446_v17 = vld [vmem:[%s11583_s7 + $0xc0] sm:$0xff]  }
 0x128   : > { %2135 = vrot.lane.b32.xlu0 %v1236_v44, %s11522_s11  ;;  %v2478_v35 = vsel %vm2432_vm2, %v2285_v38, %v12137_v8  ;;  %v2948_v38 = vlaneseq }
 0x129   : > { %v12198_v4 = vpop.permute.xlu1 %2097  ;;  %v2693_v50 = vsel %vm2625_vm3, %v2478_v35, %v12144_v21  ;;  %v11447_v35 = vld [vmem:[%s11583_s7 + $0xc8] sm:$0xff]  }
 0x12a   : > { %v12200_v51 = vpop.permute.xlu0 %1681 }
 0x12b   : > { %1719 = vrot.lane.b32.xlu1 %v1228_v10, %s11521_s10  ;;  %v1260_v10 = vsel %vm856_vm0, %v1255_v45, %v1259_v3 }
 0x12c   : > { %1921 = vrot.lane.b32.xlu0 %v11376_v23, %s11523_s14 }
 0x12d   : > { %3351 = vmatmul.mubr.bf16.gmra.mrb[76].mxu0 %v2684_v47  ;;  %4344 = vmatmul.mubr.bf16.gmra.mrb[76].mxu1 %v2684_v47  ;;  %v12208_v59 = vpop.permute.xlu1 %1883 }
 0x12e   : > { %3360 = vmatprep.mubr.bf16.mxu0 %v16846_v15  ;;  %4353 = vmatprep.mubr.bf16.mxu1 %v16846_v15  ;;  %v12215_v2 = vpop.permute.xlu0 %2099 }
 0x12f   : > { %2137 = vrot.lane.b32.xlu1 %v1244_v48, %s11522_s11 }
 0x130   : > { %1721 = vrot.lane.b32.xlu0 %v1236_v44, %s11521_s10 }
 0x131   : > { %v12221_v23 = vpop.permute.xlu1 %1683 }
 0x132   : > { %v12225_v52 = vpop.permute.xlu0 %1885 }
 0x133   : > { %1923 = vrot.lane.b32.xlu1 %v11377_v12, %s11523_s14  ;;  %v11381_v12 = vld [vmem:[%s11583_s7 + $0x1a0] sm:$0xff]  }
 0x134   : > { %2139 = vrot.lane.b32.xlu0 %v1252_v63, %s11522_s11  ;;  %v1273_v30 = vshll.u32 %v11381_v12, 16  ;;  %v1277_v46 = vshrl.u32 %v11381_v12, 16 }
 0x135   : > { %3361 = vmatmul.mubr.bf16.gmra.mrb[80].mxu0 %v2687_v0  ;;  %4354 = vmatmul.mubr.bf16.gmra.mrb[80].mxu1 %v2687_v0  ;;  %v12231_v16 = vpop.permute.xlu1 %2101  ;;  %v2480_v0 = vsel %vm2432_vm2, %v2287_v6, %v12154_v61  ;;  %v1293_v61 = vshrl.u32 %v11383_v55, 16 }
 0x136   : > { %3370 = vmatprep.mubr.bf16.mxu0 %v16846_v15  ;;  %4363 = vmatprep.mubr.bf16.mxu1 %v16846_v15  ;;  %v12238_v22 = vpop.permute.xlu0 %1685  ;;  %v1275_v42 = vrot.slane %v1273_v30, 1  ;;  %v2696_v7 = vsel %vm2625_vm3, %v2480_v0, %v12160_v24 }
 0x137   : > { %1723 = vrot.lane.b32.xlu1 %v1244_v48, %s11521_s10 }
 0x138   : > { %1925 = vrot.lane.b32.xlu0 %v11378_v34, %s11523_s14  ;;  %v11382_v34 = vld [vmem:[%s11583_s7 + $0x1a8] sm:$0xff]   ;;  %v1279_v8 = vor.u32 %v1277_v46, %v1275_v42  ;;  %v2291_v46 = vsel %vm2239_vm1, %v11447_v35, %v12183_v31 }
 0x139   : > { %v12246_v41 = vpop.permute.xlu1 %1887  ;;  %v1281_v47 = vshll.u32 %v11382_v34, 16  ;;  %v11451_v35 = vld [vmem:[%s11583_s7 + $0xe8] sm:$0xff]  }
 0x13a   : > { %v12248_v25 = vpop.permute.xlu0 %2103 }
 0x13b   : > { %2141 = vrot.lane.b32.xlu1 %v1260_v10, %s11522_s11  ;;  %v1283_v57 = vrot.slane %v1281_v47, 1 }
 0x13c   : > { %1725 = vrot.lane.b32.xlu0 %v1252_v63, %s11521_s10  ;;  %v1285_v63 = vshrl.u32 %v11382_v34, 16 }
 0x13d   : > { %3371 = vmatmul.mubr.bf16.gmra.mrb[84].mxu0 %v2690_v29  ;;  %4364 = vmatmul.mubr.bf16.gmra.mrb[84].mxu1 %v2690_v29  ;;  %v12254_v44 = vpop.permute.xlu1 %1687  ;;  %v1284_v58 = vsel %vm856_vm0, %v1279_v8, %v1283_v57  ;;  %v2289_v29 = vsel %vm2239_vm1, %v11446_v17, %v12167_v32  ;;  %v2484_v8 = vsel %vm2432_vm2, %v2291_v46, %v12192_v36  ;;  %v2946_v36 = vld [vmem:[%s16844_s2] sm:$0xf] }
 0x13e   : > { %3380 = vmatprep.mubr.bf16.mxu0 %v16846_v15  ;;  %4373 = vmatprep.mubr.bf16.mxu1 %v16846_v15  ;;  %v12263_v39 = vpop.permute.xlu0 %1889  ;;  %v1287_v11 = vor.u32 %v1285_v63, %v1283_v57  ;;  %v2482_v60 = vsel %vm2432_vm2, %v2289_v29, %v12175_v18  ;;  %v11385_v18 = vld [vmem:[%s11583_s7 + $0x1c0] sm:$0xff]   ;;  %v11449_v29 = vld [vmem:[%s11583_s7 + $0xd8] sm:$0xff]   ;;  %v2299_v46 = vsel %vm2239_vm1, %v11451_v35, %v12254_v44 }
 0x13f   : > { %1927 = vrot.lane.b32.xlu1 %v11379_v49, %s11523_s14  ;;  %v1276_v49 = vsel %vm856_vm0, %v1271_v27, %v1275_v42  ;;  %v2699_v27 = vsel %vm2625_vm3, %v2482_v60, %v12177_v28  ;;  %v1301_v28 = vshrl.u32 %v11384_v5, 16  ;;  %v1309_v60 = vshrl.u32 %v11385_v18, 16 }
 0x140   : > { %2143 = vrot.lane.b32.xlu0 %v1268_v62, %s11522_s11 }
 0x141   : > { %v12269_v20 = vpop.permute.xlu1 %2105 }
 0x142   : > { %v12271_v48 = vpop.permute.xlu0 %1689 }
 0x143   : > { %1727 = vrot.lane.b32.xlu1 %v1260_v10, %s11521_s10 }
 0x144   : > { %1929 = vrot.lane.b32.xlu0 %v11380_v26, %s11523_s14  ;;  %v1289_v26 = vshll.u32 %v11383_v55, 16 }
 0x145   : > { %3381 = vmatmul.mubr.bf16.gmra.mrb[88].mxu0 %v2693_v50  ;;  %4374 = vmatmul.mubr.bf16.gmra.mrb[88].mxu1 %v2693_v50  ;;  %v12279_v56 = vpop.permute.xlu1 %1891  ;;  %v12333_v50 = vshrl.u32 %v2948_v38, 7  ;;  %v11450_v38 = vld [vmem:[%s11583_s7 + $0xe0] sm:$0xff]  }
 0x146   : > { %3390 = vmatprep.mubr.bf16.mxu0 %v16846_v15  ;;  %4383 = vmatprep.mubr.bf16.mxu1 %v16846_v15  ;;  %v12286_v21 = vpop.permute.xlu0 %2107  ;;  %v1291_v10 = vrot.slane %v1289_v26, 1 }
 0x147   : > { %2145 = vrot.lane.b32.xlu1 %v1276_v49, %s11522_s11  ;;  %v2950_v63 = vsub.s32 0, %v12333_v50  ;;  %v2958_v26 = vsub.s32 2, %v12333_v50 }
 0x148   : > { %1729 = vrot.lane.b32.xlu0 %v1268_v62, %s11521_s10  ;;  %v1292_v24 = vsel %vm856_vm0, %v1287_v11, %v1291_v10  ;;  %v1295_v32 = vor.u32 %v1293_v61, %v1291_v10  ;;  %v1299_v62 = vrot.slane %v1297_v33, 1  ;;  %v2954_v11 = vsub.s32 1, %v12333_v50 }
 0x149   : > { %v12292_v45 = vpop.permute.xlu1 %1691  ;;  %v12363_v61 = vrot.slane %v2946_v36, %v2950_v63  ;;  %v12365_v33 = vrot.slane %v2946_v36, %v2958_v26 }
 0x14a   : > { %v12295_v3 = vpop.permute.xlu0 %1893  ;;  %v1300_v42 = vsel %vm856_vm0, %v1295_v32, %v1299_v62  ;;  %v1303_v31 = vor.u32 %v1301_v28, %v1299_v62  ;;  %v12376_v62 = vrot.slane %v2946_v36, %v2954_v11 }
 0x14b   : > { %1931 = vrot.lane.b32.xlu1 %v11381_v12, %s11523_s14 }
 0x14c   : > { %2147 = vrot.lane.b32.xlu0 %v1284_v58, %s11522_s11 }
 0x14d   : > { %3391 = vmatmul.mubr.bf16.gmra.mrb[92].mxu0 %v2696_v7  ;;  %4384 = vmatmul.mubr.bf16.gmra.mrb[92].mxu1 %v2696_v7  ;;  %v12302_v53 = vpop.permute.xlu1 %2109 }
 0x14e   : > { %3400 = vmatprep.mubr.bf16.mxu0 %v16846_v15  ;;  %4393 = vmatprep.mubr.bf16.mxu1 %v16846_v15  ;;  %v12309_v12 = vpop.permute.xlu0 %1693 }
 0x14f   : > { %1731 = vrot.lane.b32.xlu1 %v1276_v49, %s11521_s10  ;;  %v1305_v49 = vshll.u32 %v11385_v18, 16 }
 0x150   : > { %1933 = vrot.lane.b32.xlu0 %v11382_v34, %s11523_s14 }
 0x151   : > { %v12316_v30 = vpop.permute.xlu1 %1895  ;;  %v1307_v43 = vrot.slane %v1305_v49, 1 }
 0x152   : > { %v12318_v37 = vpop.permute.xlu0 %2111 }
 0x153   : > { %2149 = vrot.lane.b32.xlu1 %v1292_v24, %s11522_s11  ;;  %v1308_v0 = vsel %vm856_vm0, %v1303_v31, %v1307_v43  ;;  %v1311_v44 = vor.u32 %v1309_v60, %v1307_v43 }
 0x154   : > { %1733 = vrot.lane.b32.xlu0 %v1284_v58, %s11521_s10  ;;  %v11448_v58 = vld [vmem:[%s11583_s7 + $0xd0] sm:$0xff]  }
 0x155   : > { %3401 = vmatmul.mubr.bf16.gmra.mrb[96].mxu0 %v2699_v27  ;;  %4394 = vmatmul.mubr.bf16.gmra.mrb[96].mxu1 %v2699_v27  ;;  %v1696_v34 = vpop.permute.xlu1 %1695  ;;  %v2293_v7 = vsel %vm2239_vm1, %v11448_v58, %v12200_v51  ;;  %v2962_v51 = vsub.s32 3, %v12333_v50  ;;  %v2297_v27 = vsel %vm2239_vm1, %v11450_v38, %v12238_v22  ;;  %v2305_v22 = vsel %vm2239_vm1, %v11888_v14, %v12309_v12 }
 0x156   : > { %3410 = vmatprep.mubr.bf16.mxu0 %v16846_v15  ;;  %4403 = vmatprep.mubr.bf16.mxu1 %v16846_v15  ;;  %v12331_v47 = vpop.permute.xlu0 %1897  ;;  %v2486_v17 = vsel %vm2432_vm2, %v2293_v7, %v12208_v59  ;;  %v2301_v59 = vsel %vm2239_vm1, %v11861_v9, %v12271_v48  ;;  %v2307_v49 = vsel %vm2239_vm1, %v11898_v40, %v1696_v34 }
 0x157   : > { %1935 = vrot.lane.b32.xlu1 %v11383_v55, %s11523_s14  ;;  %v2702_v55 = vsel %vm2625_vm3, %v2484_v8, %v12198_v4  ;;  %v2705_v9 = vsel %vm2625_vm3, %v2486_v17, %v12215_v2  ;;  %v2490_v14 = vsel %vm2432_vm2, %v2297_v27, %v12246_v41  ;;  %v2494_v40 = vsel %vm2432_vm2, %v2301_v59, %v12279_v56 }
 0x158   : > { %2151 = vrot.lane.b32.xlu0 %v1300_v42, %s11522_s11  ;;  %v2498_v41 = vsel %vm2432_vm2, %v2305_v22, %v12316_v30  ;;  %v12443_v12 = vsel %vm2625_vm3, %v2490_v14, %v12248_v25 }
 0x159   : > { %v12339_v57 = vpop.permute.xlu1 %2113  ;;  %v12463_v43 = vsel %vm2625_vm3, %v2498_v41, %v12318_v37 }
 0x15a   : > { %v1698_v6 = vpop.permute.xlu0 %1697 }
 0x15b   : > { %1735 = vrot.lane.b32.xlu1 %v1292_v24, %s11521_s10  ;;  %v2295_v24 = vsel %vm2239_vm1, %v11449_v29, %v12221_v23 }
 0x15c   : > { %1937 = vrot.lane.b32.xlu0 %v11384_v5, %s11523_s14  ;;  %v12361_v5 = vld [vmem:[%s11583_s7 + $0x1c8] sm:$0xff]   ;;  %v2488_v48 = vsel %vm2432_vm2, %v2295_v24, %v12225_v52 }
 0x15d   : > { %3411 = vmatmul.mubr.bf16.gmra.mrb[100].mxu0 %v2702_v55  ;;  %4404 = vmatmul.mubr.bf16.gmra.mrb[100].mxu1 %v2702_v55  ;;  %v1900_v10 = vpop.permute.xlu1 %1899  ;;  %v1313_v32 = vshll.u32 %v12361_v5, 16 }
 0x15e   : > { %3420 = vmatprep.mubr.bf16.mxu0 %v16846_v15  ;;  %4413 = vmatprep.mubr.bf16.mxu1 %v16846_v15  ;;  %v12358_v4 = vpop.permute.xlu0 %2115 }
 0x15f   : > { %2153 = vrot.lane.b32.xlu1 %v1308_v0, %s11522_s11  ;;  %v12399_v28 = vrot.slane %v1313_v32, 1 }
 0x160   : > { %1737 = vrot.lane.b32.xlu0 %v1300_v42, %s11521_s10  ;;  %v2303_v42 = vsel %vm2239_vm1, %v11873_v13, %v12292_v45  ;;  %v2309_v13 = vsel %vm2239_vm1, %v11918_v54, %v1698_v6  ;;  %v2492_v45 = vsel %vm2432_vm2, %v2299_v46, %v12263_v39  ;;  %v2500_v39 = vsel %vm2432_vm2, %v2307_v49, %v12331_v47 }
 0x161   : > { %v1700_v23 = vpop.permute.xlu1 %1699  ;;  %v12418_v52 = vsel %vm856_vm0, %v1311_v44, %v12399_v28  ;;  %v2496_v54 = vsel %vm2432_vm2, %v2303_v42, %v12295_v3  ;;  %v2502_v56 = vsel %vm2432_vm2, %v2309_v13, %v1900_v10  ;;  %v2708_v3 = vsel %vm2625_vm3, %v2488_v48, %v12231_v16 }
 0x162   : > { %v1902_v50 = vpop.permute.xlu0 %1901  ;;  %v2311_v2 = vsel %vm2239_vm1, %v11933_v1, %v1700_v23  ;;  %v12432_v1 = vrot.slane %v2946_v36, %v2962_v51  ;;  %v12451_v31 = vsel %vm2625_vm3, %v2492_v45, %v12269_v20  ;;  %v12455_v16 = vsel %vm2625_vm3, %v2494_v40, %v12286_v21 }
 0x163   : > { %1939 = vrot.lane.b32.xlu1 %v11385_v18, %s11523_s14  ;;  %v2504_v30 = vsel %vm2432_vm2, %v2311_v2, %v1902_v50  ;;  %v12459_v25 = vsel %vm2625_vm3, %v2496_v54, %v12302_v53  ;;  %v12469_v20 = vsel %vm2625_vm3, %v2500_v39, %v12339_v57  ;;  %v12473_v21 = vsel %vm2625_vm3, %v2502_v56, %v12358_v4 }
 0x164   : > { %2155 = vrot.lane.b32.xlu0 %v12418_v52, %s11522_s11 }
 0x165   : > { %3421 = vmatmul.mubr.bf16.gmra.mrb[104].mxu0 %v2705_v9  ;;  %4414 = vmatmul.mubr.bf16.gmra.mrb[104].mxu1 %v2705_v9  ;;  %v2118_v34 = vpop.permute.xlu1 %2117 }
 0x166   : > { %3430 = vmatprep.mubr.bf16.mxu0 %v16846_v15  ;;  %4423 = vmatprep.mubr.bf16.mxu1 %v16846_v15  ;;  %v1702_v18 = vpop.permute.xlu0 %1701  ;;  %v12479_v58 = vsel %vm2625_vm3, %v2504_v30, %v2118_v34 }
 0x167   : > { %1739 = vrot.lane.b32.xlu1 %v1308_v0, %s11521_s10  ;;  %v2313_v7 = vsel %vm2239_vm1, %v11958_v19, %v1702_v18 }
 0x168   : > { %v3162_v47 = vpop.f32.mrb[0].mxu0  ;;  %v4155_v8 = vpop.f32.mrb[0].mxu1  ;;  %1941 = vrot.lane.b32.xlu0 %v12361_v5, %s11523_s14 }
 0x169   : > { %v3163_v6 = vadd.f32 %v3162_v47, %v12363_v61  ;;  %v4156_v63 = vadd.f32 %v4155_v8, %v12365_v33  ;;  %v3164_v26 = vpop.f32.mrb[1].mxu0  ;;  %v4157_v55 = vpop.f32.mrb[1].mxu1 }
 0x16a   : > { %v3165_v53 = vadd.f32 %v3164_v26, %v12376_v62  ;;  %v4158_v37 = vadd.f32 %v4157_v55, %v12432_v1  ;;  %v3166_v36 = vpop.f32.mrb[2].mxu0  ;;  %v4159_v0 = vpop.f32.mrb[2].mxu1 }
 0x16b   : > { %vm5114_vm4 = vcmp.gt.f32.partialorder %v3163_v6, 0.0  ;;  %v5882_v57 = vmul.f32 -0.51027, %v3163_v6  ;;  %vm5116_vm5 = vcmp.gt.f32.partialorder %v4156_v63, 0.0  ;;  %v5884_v11 = vmul.f32 -0.51027, %v4156_v63  ;;  %v1904_v35 = vpop.permute.xlu1 %1903 }
 0x16c   : > { %vm5115_vm6 = vcmp.gt.f32.partialorder %v3165_v53, 0.0  ;;  %v5883_v10 = vmul.f32 -0.51027, %v3165_v53  ;;  %vm5117_vm7 = vcmp.gt.f32.partialorder %v4158_v37, 0.0  ;;  %v5885_v4 = vmul.f32 -0.51027, %v4158_v37  ;;  %1741 = vrot.lane.b32.xlu0 %v12418_v52, %s11521_s10 }
 0x16d   : > { %v6650_v51 = vsel %vm5114_vm4, %v3163_v6, %v5882_v57  ;;  %v6652_v17 = vsel %vm5116_vm5, %v4156_v63, %v5884_v11  ;;  %v3167_v29 = vadd.f32 %v3166_v36, %v12363_v61  ;;  %v4160_v24 = vadd.f32 %v4159_v0, %v12365_v33  ;;  %v3168_v60 = vpop.f32.mrb[3].mxu0  ;;  %v4161_v32 = vpop.f32.mrb[3].mxu1  ;;  %3431 = vmatmul.mubr.bf16.gmra.mrb[108].mxu0 %v2708_v3 }
 0x16e   : > { %v6651_v19 = vsel %vm5115_vm6, %v3165_v53, %v5883_v10  ;;  %v6653_v5 = vsel %vm5117_vm7, %v4158_v37, %v5885_v4  ;;  %v3169_v38 = vadd.f32 %v3168_v60, %v12376_v62  ;;  %v4162_v27 = vadd.f32 %v4161_v32, %v12432_v1  ;;  %4424 = vmatmul.mubr.bf16.gmra.mrb[108].mxu1 %v2708_v3 }
 0x16f   : > { %v10884_v46 = vpack.c.bf16 %v6651_v19, %v6650_v51  ;;  %v11076_v59 = vpack.c.bf16 %v6653_v5, %v6652_v17  ;;  %vm5118_vm8 = vcmp.gt.f32.partialorder %v3167_v29, 0.0  ;;  %v5886_v23 = vmul.f32 -0.51027, %v3167_v29  ;;  %3440 = vmatprep.mubr.bf16.mxu0 %v16846_v15  ;;  %4433 = vmatprep.mubr.bf16.mxu1 %v16846_v15 }
 0x170   : > { %vm5120_vm9 = vcmp.gt.f32.partialorder %v4160_v24, 0.0  ;;  %v5888_v42 = vmul.f32 -0.51027, %v4160_v24  ;;  %vm5119_vm10 = vcmp.gt.f32.partialorder %v3169_v38, 0.0  ;;  %v5887_v22 = vmul.f32 -0.51027, %v3169_v38 }
 0x171   : > { %8762 = vst [vmem:[%s12490_s25] sm:$0xff] %v10884_v46  ;;  %10689 = vst [vmem:[%s12490_s25 + $0x20] sm:$0xff] %v11076_v59  ;;  %v6654_v50 = vsel %vm5118_vm8, %v3167_v29, %v5886_v23  ;;  %vm5121_vm11 = vcmp.gt.f32.partialorder %v4162_v27, 0.0  ;;  %v5889_v44 = vmul.f32 -0.51027, %v4162_v27  ;;  %v3172_v9 = vpop.f32.mrb[4].mxu0  ;;  %v4165_v48 = vpop.f32.mrb[4].mxu1  ;;  %v12501_v49 = vsel %vm2432_vm2, %v2313_v7, %v1904_v35 }
 0x172   : > { %v6656_v13 = vsel %vm5120_vm9, %v4160_v24, %v5888_v42  ;;  %v6655_v14 = vsel %vm5119_vm10, %v3169_v38, %v5887_v22  ;;  %v3173_v45 = vadd.f32 %v3172_v9, %v12363_v61  ;;  %v4166_v2 = vadd.f32 %v4165_v48, %v12365_v33  ;;  %v3174_v40 = vpop.f32.mrb[5].mxu0  ;;  %v4167_v54 = vpop.f32.mrb[5].mxu1 }
 0x173   : > { %v10885_v52 = vpack.c.bf16 %v6655_v14, %v6654_v50  ;;  %v6657_v41 = vsel %vm5121_vm11, %v4162_v27, %v5889_v44  ;;  %v3175_v39 = vadd.f32 %v3174_v40, %v12376_v62  ;;  %v4168_v56 = vadd.f32 %v4167_v54, %v12432_v1  ;;  %v3176_v3 = vpop.f32.mrb[6].mxu0  ;;  %v4169_v30 = vpop.f32.mrb[6].mxu1 }
 0x174   : > { %v11077_v34 = vpack.c.bf16 %v6657_v41, %v6656_v13  ;;  %vm5122_vm12 = vcmp.gt.f32.partialorder %v3173_v45, 0.0  ;;  %v5890_v18 = vmul.f32 -0.51027, %v3173_v45  ;;  %vm5124_vm13 = vcmp.gt.f32.partialorder %v4166_v2, 0.0  ;;  %v3178_v47 = vpop.f32.mrb[7].mxu0  ;;  %v4171_v8 = vpop.f32.mrb[7].mxu1 }
 0x175   : > { %8763 = vst [vmem:[%s12490_s25 + $0x8] sm:$0xff] %v10885_v52  ;;  %v5892_v6 = vmul.f32 -0.51027, %v4166_v2  ;;  %vm5123_vm14 = vcmp.gt.f32.partialorder %v3175_v39, 0.0  ;;  %v5891_v63 = vmul.f32 -0.51027, %v3175_v39  ;;  %3441 = vmatmul.mubr.bf16.gmra.mrb[112].mxu0 %v12443_v12  ;;  %v3177_v53 = vadd.f32 %v3176_v3, %v12363_v61 }
 0x176   : > { %vm5125_vm15 = vcmp.gt.f32.partialorder %v4168_v56, 0.0  ;;  %10690 = vst [vmem:[%s12490_s25 + $0x28] sm:$0xff] %v11077_v34  ;;  %v6658_v26 = vsel %vm5122_vm12, %v3173_v45, %v5890_v18  ;;  %v5893_v55 = vmul.f32 -0.51027, %v4168_v56  ;;  %v4170_v37 = vadd.f32 %v4169_v30, %v12365_v33  ;;  %4434 = vmatmul.mubr.bf16.gmra.mrb[112].mxu1 %v12443_v12  ;;  %3450 = vmatprep.mubr.bf16.mxu0 %v16846_v15 }
 0x177   : > { %v6660_v36 = vsel %vm5124_vm13, %v4166_v2, %v5892_v6  ;;  %v6659_v0 = vsel %vm5123_vm14, %v3175_v39, %v5891_v63  ;;  %v3179_v7 = vadd.f32 %v3178_v47, %v12376_v62  ;;  %v4172_v57 = vadd.f32 %v4171_v8, %v12432_v1  ;;  %4443 = vmatprep.mubr.bf16.mxu1 %v16846_v15 }
 0x178   : > { %v10886_v11 = vpack.c.bf16 %v6659_v0, %v6658_v26  ;;  %v6661_v10 = vsel %vm5125_vm15, %v4168_v56, %v5893_v55  ;;  %vm5126_vm4 = vcmp.gt.f32.partialorder %v3177_v53, 0.0  ;;  %v5894_v4 = vmul.f32 -0.51027, %v3177_v53  ;;  %v3182_v51 = vpop.f32.mrb[8].mxu0  ;;  %v4175_v17 = vpop.f32.mrb[8].mxu1 }
 0x179   : > { %v11078_v12 = vpack.c.bf16 %v6661_v10, %v6660_v36  ;;  %vm5128_vm5 = vcmp.gt.f32.partialorder %v4170_v37, 0.0  ;;  %v5896_v29 = vmul.f32 -0.51027, %v4170_v37  ;;  %vm5127_vm6 = vcmp.gt.f32.partialorder %v3179_v7, 0.0  ;;  %v3184_v24 = vpop.f32.mrb[9].mxu0  ;;  %v4177_v60 = vpop.f32.mrb[9].mxu1 }
 0x17a   : > { %8764 = vst [vmem:[%s12490_s25 + $0x10] sm:$0xff] %v10886_v11  ;;  %v6662_v32 = vsel %vm5126_vm4, %v3177_v53, %v5894_v4  ;;  %v5895_v19 = vmul.f32 -0.51027, %v3179_v7  ;;  %vm5129_vm7 = vcmp.gt.f32.partialorder %v4172_v57, 0.0  ;;  %v5897_v5 = vmul.f32 -0.51027, %v4172_v57 }
 0x17b   : > { %v3186_v38 = vpop.f32.mrb[10].mxu0  ;;  %10691 = vst [vmem:[%s12490_s25 + $0x30] sm:$0xff] %v11078_v12  ;;  %v6664_v27 = vsel %vm5128_vm5, %v4170_v37, %v5896_v29  ;;  %v3183_v35 = vadd.f32 %v3182_v51, %v12363_v61  ;;  %v4176_v46 = vadd.f32 %v4175_v17, %v12365_v33  ;;  %v3185_v59 = vadd.f32 %v3184_v24, %v12376_v62  ;;  %v4179_v23 = vpop.f32.mrb[10].mxu1 }
 0x17c   : > { %v3188_v42 = vpop.f32.mrb[11].mxu0  ;;  %v6663_v22 = vsel %vm5127_vm6, %v3179_v7, %v5895_v19  ;;  %v6665_v50 = vsel %vm5129_vm7, %v4172_v57, %v5897_v5  ;;  %v4178_v44 = vadd.f32 %v4177_v60, %v12432_v1  ;;  %v3187_v9 = vadd.f32 %v3186_v38, %v12363_v61  ;;  %v4181_v48 = vpop.f32.mrb[11].mxu1 }
 0x17d   : > { %v10887_v13 = vpack.c.bf16 %v6663_v22, %v6662_v32  ;;  %v11079_v14 = vpack.c.bf16 %v6665_v50, %v6664_v27  ;;  %vm5130_vm8 = vcmp.gt.f32.partialorder %v3183_v35, 0.0  ;;  %v5898_v45 = vmul.f32 -0.51027, %v3183_v35  ;;  %3451 = vmatmul.mubr.bf16.gmra.mrb[116].mxu0 %v12451_v31 }
 0x17e   : > { %vm5132_vm9 = vcmp.gt.f32.partialorder %v4176_v46, 0.0  ;;  %v5900_v2 = vmul.f32 -0.51027, %v4176_v46  ;;  %vm5131_vm10 = vcmp.gt.f32.partialorder %v3185_v59, 0.0  ;;  %v5899_v40 = vmul.f32 -0.51027, %v3185_v59  ;;  %4444 = vmatmul.mubr.bf16.gmra.mrb[116].mxu1 %v12451_v31  ;;  %3460 = vmatprep.mubr.bf16.mxu0 %v16846_v15 }
 0x17f   : > { %8765 = vst [vmem:[%s12490_s25 + $0x18] sm:$0xff] %v10887_v13  ;;  %10692 = vst [vmem:[%s12490_s25 + $0x38] sm:$0xff] %v11079_v14  ;;  %v6666_v54 = vsel %vm5130_vm8, %v3183_v35, %v5898_v45  ;;  %vm5133_vm11 = vcmp.gt.f32.partialorder %v4178_v44, 0.0  ;;  %v5901_v52 = vmul.f32 -0.51027, %v4178_v44  ;;  %vm5134_vm12 = vcmp.gt.f32.partialorder %v3187_v9, 0.0  ;;  %4453 = vmatprep.mubr.bf16.mxu1 %v16846_v15 }
 0x180   : > { %v6668_v41 = vsel %vm5132_vm9, %v4176_v46, %v5900_v2  ;;  %v6667_v39 = vsel %vm5131_vm10, %v3185_v59, %v5899_v40  ;;  %v5902_v56 = vmul.f32 -0.51027, %v3187_v9  ;;  %v4180_v3 = vadd.f32 %v4179_v23, %v12365_v33  ;;  %v3192_v30 = vpop.f32.mrb[12].mxu0  ;;  %v4185_v34 = vpop.f32.mrb[12].mxu1 }
 0x181   : > { %v10888_v18 = vpack.c.bf16 %v6667_v39, %v6666_v54  ;;  %v6669_v31 = vsel %vm5133_vm11, %v4178_v44, %v5901_v52  ;;  %v3189_v47 = vadd.f32 %v3188_v42, %v12376_v62  ;;  %v4182_v8 = vadd.f32 %v4181_v48, %v12432_v1  ;;  %v3194_v6 = vpop.f32.mrb[13].mxu0  ;;  %v4187_v63 = vpop.f32.mrb[13].mxu1 }
 0x182   : > { %v11080_v26 = vpack.c.bf16 %v6669_v31, %v6668_v41  ;;  %v6670_v55 = vsel %vm5134_vm12, %v3187_v9, %v5902_v56  ;;  %vm5136_vm13 = vcmp.gt.f32.partialorder %v4180_v3, 0.0  ;;  %v5904_v53 = vmul.f32 -0.51027, %v4180_v3  ;;  %v3196_v37 = vpop.f32.mrb[14].mxu0  ;;  %v4189_v36 = vpop.f32.mrb[14].mxu1 }
 0x183   : > { %8766 = vst [vmem:[%s12490_s25 + $0x40] sm:$0xff] %v10888_v18  ;;  %vm5135_vm14 = vcmp.gt.f32.partialorder %v3189_v47, 0.0  ;;  %v5903_v0 = vmul.f32 -0.51027, %v3189_v47  ;;  %vm5137_vm15 = vcmp.gt.f32.partialorder %v4182_v8, 0.0  ;;  %v3193_v11 = vadd.f32 %v3192_v30, %v12363_v61  ;;  %v3198_v51 = vpop.f32.mrb[15].mxu0 }
 0x184   : > { %v5905_v7 = vmul.f32 -0.51027, %v4182_v8  ;;  %10693 = vst [vmem:[%s12490_s25 + $0x60] sm:$0xff] %v11080_v26  ;;  %v6672_v57 = vsel %vm5136_vm13, %v4180_v3, %v5904_v53  ;;  %v4186_v10 = vadd.f32 %v4185_v34, %v12365_v33  ;;  %v3195_v4 = vadd.f32 %v3194_v6, %v12376_v62  ;;  %v4191_v17 = vpop.f32.mrb[15].mxu1 }
 0x185   : > { %v6671_v12 = vsel %vm5135_vm14, %v3189_v47, %v5903_v0  ;;  %v4188_v24 = vadd.f32 %v4187_v63, %v12432_v1  ;;  %v3197_v60 = vadd.f32 %v3196_v37, %v12363_v61  ;;  %3461 = vmatmul.mubr.bf16.gmra.mrb[120].mxu0 %v12455_v16  ;;  %vm5138_vm4 = vcmp.gt.f32.partialorder %v3193_v11, 0.0 }
 0x186   : > { %v6673_v29 = vsel %vm5137_vm15, %v4182_v8, %v5905_v7  ;;  %v10889_v32 = vpack.c.bf16 %v6671_v12, %v6670_v55  ;;  %v5906_v5 = vmul.f32 -0.51027, %v3193_v11  ;;  %4454 = vmatmul.mubr.bf16.gmra.mrb[120].mxu1 %v12455_v16  ;;  %3470 = vmatprep.mubr.bf16.mxu0 %v16846_v15  ;;  %vm5140_vm5 = vcmp.gt.f32.partialorder %v4186_v10, 0.0 }
 0x187   : > { %v11081_v19 = vpack.c.bf16 %v6673_v29, %v6672_v57  ;;  %v5908_v38 = vmul.f32 -0.51027, %v4186_v10  ;;  %vm5139_vm6 = vcmp.gt.f32.partialorder %v3195_v4, 0.0  ;;  %v5907_v27 = vmul.f32 -0.51027, %v3195_v4  ;;  %4463 = vmatprep.mubr.bf16.mxu1 %v16846_v15 }
 0x188   : > { %8767 = vst [vmem:[%s12490_s25 + $0x48] sm:$0xff] %v10889_v32  ;;  %v6674_v35 = vsel %vm5138_vm4, %v3193_v11, %v5906_v5  ;;  %vm5141_vm7 = vcmp.gt.f32.partialorder %v4188_v24, 0.0  ;;  %v5909_v46 = vmul.f32 -0.51027, %v4188_v24  ;;  %vm5142_vm8 = vcmp.gt.f32.partialorder %v3197_v60, 0.0  ;;  %v3202_v59 = vpop.f32.mrb[16].mxu0 }
 0x189   : > { %10694 = vst [vmem:[%s12490_s25 + $0x68] sm:$0xff] %v11081_v19  ;;  %v4195_v23 = vpop.f32.mrb[16].mxu1  ;;  %v6676_v42 = vsel %vm5140_vm5, %v4186_v10, %v5908_v38  ;;  %v6675_v22 = vsel %vm5139_vm6, %v3195_v4, %v5907_v27  ;;  %v5910_v50 = vmul.f32 -0.51027, %v3197_v60  ;;  %v4190_v16 = vadd.f32 %v4189_v36, %v12365_v33  ;;  %v3204_v44 = vpop.f32.mrb[17].mxu0 }
 0x18a   : > { %v4197_v9 = vpop.f32.mrb[17].mxu1  ;;  %v10890_v48 = vpack.c.bf16 %v6675_v22, %v6674_v35  ;;  %v6677_v13 = vsel %vm5141_vm7, %v4188_v24, %v5909_v46  ;;  %v3199_v14 = vadd.f32 %v3198_v51, %v12376_v62  ;;  %v4192_v45 = vadd.f32 %v4191_v17, %v12432_v1  ;;  %v3206_v2 = vpop.f32.mrb[18].mxu0 }
 0x18b   : > { %v4199_v40 = vpop.f32.mrb[18].mxu1  ;;  %v11082_v54 = vpack.c.bf16 %v6677_v13, %v6676_v42  ;;  %v6678_v52 = vsel %vm5142_vm8, %v3197_v60, %v5910_v50  ;;  %vm5144_vm9 = vcmp.gt.f32.partialorder %v4190_v16, 0.0  ;;  %v5912_v41 = vmul.f32 -0.51027, %v4190_v16  ;;  %v3208_v39 = vpop.f32.mrb[19].mxu0 }
 0x18c   : > { %v4201_v56 = vpop.f32.mrb[19].mxu1  ;;  %8768 = vst [vmem:[%s12490_s25 + $0x50] sm:$0xff] %v10890_v48  ;;  %vm5143_vm10 = vcmp.gt.f32.partialorder %v3199_v14, 0.0  ;;  %v5911_v3 = vmul.f32 -0.51027, %v3199_v14  ;;  %vm5145_vm11 = vcmp.gt.f32.partialorder %v4192_v45, 0.0  ;;  %v3203_v18 = vadd.f32 %v3202_v59, %v12363_v61 }
 0x18d   : > { %v5913_v30 = vmul.f32 -0.51027, %v4192_v45  ;;  %10695 = vst [vmem:[%s12490_s25 + $0x70] sm:$0xff] %v11082_v54  ;;  %v6680_v34 = vsel %vm5144_vm9, %v4190_v16, %v5912_v41  ;;  %v4196_v31 = vadd.f32 %v4195_v23, %v12365_v33  ;;  %v3205_v47 = vadd.f32 %v3204_v44, %v12376_v62  ;;  %3471 = vmatmul.mubr.bf16.gmra.mrb[124].mxu0 %v12459_v25 }
 0x18e   : > { %v6679_v8 = vsel %vm5143_vm10, %v3199_v14, %v5911_v3  ;;  %v4198_v63 = vadd.f32 %v4197_v9, %v12432_v1  ;;  %v3207_v26 = vadd.f32 %v3206_v2, %v12363_v61  ;;  %4464 = vmatmul.mubr.bf16.gmra.mrb[124].mxu1 %v12459_v25  ;;  %vm5146_vm12 = vcmp.gt.f32.partialorder %v3203_v18, 0.0  ;;  %3480 = vmatprep.mubr.bf16.mxu0 %v16846_v15 }
 0x18f   : > { %v6681_v6 = vsel %vm5145_vm11, %v4192_v45, %v5913_v30  ;;  %v10891_v55 = vpack.c.bf16 %v6679_v8, %v6678_v52  ;;  %v5914_v37 = vmul.f32 -0.51027, %v3203_v18  ;;  %4473 = vmatprep.mubr.bf16.mxu1 %v16846_v15  ;;  %vm5148_vm13 = vcmp.gt.f32.partialorder %v4196_v31, 0.0 }
 0x190   : > { %v11083_v53 = vpack.c.bf16 %v6681_v6, %v6680_v34  ;;  %v5916_v36 = vmul.f32 -0.51027, %v4196_v31  ;;  %vm5147_vm14 = vcmp.gt.f32.partialorder %v3205_v47, 0.0  ;;  %v5915_v0 = vmul.f32 -0.51027, %v3205_v47  ;;  %v3212_v11 = vpop.f32.mrb[20].mxu0 }
 0x191   : > { %8769 = vst [vmem:[%s12490_s25 + $0x58] sm:$0xff] %v10891_v55  ;;  %v6682_v7 = vsel %vm5146_vm12, %v3203_v18, %v5914_v37  ;;  %vm5149_vm15 = vcmp.gt.f32.partialorder %v4198_v63, 0.0  ;;  %v5917_v57 = vmul.f32 -0.51027, %v4198_v63  ;;  %vm5150_vm4 = vcmp.gt.f32.partialorder %v3207_v26, 0.0  ;;  %v4205_v25 = vpop.f32.mrb[20].mxu1 }
 0x192   : > { %10696 = vst [vmem:[%s12490_s25 + $0x78] sm:$0xff] %v11083_v53  ;;  %v6684_v10 = vsel %vm5148_vm13, %v4196_v31, %v5916_v36  ;;  %v6683_v4 = vsel %vm5147_vm14, %v3205_v47, %v5915_v0  ;;  %v5918_v51 = vmul.f32 -0.51027, %v3207_v26  ;;  %v4200_v17 = vadd.f32 %v4199_v40, %v12365_v33  ;;  %v3214_v12 = vpop.f32.mrb[21].mxu0  ;;  %v4207_v29 = vpop.f32.mrb[21].mxu1 }
 0x193   : > { %v10892_v24 = vpack.c.bf16 %v6683_v4, %v6682_v7  ;;  %v6685_v60 = vsel %vm5149_vm15, %v4198_v63, %v5917_v57  ;;  %v3209_v32 = vadd.f32 %v3208_v39, %v12376_v62  ;;  %v4202_v19 = vadd.f32 %v4201_v56, %v12432_v1  ;;  %v3216_v5 = vpop.f32.mrb[22].mxu0  ;;  %v4209_v38 = vpop.f32.mrb[22].mxu1 }
 0x194   : > { %v11084_v27 = vpack.c.bf16 %v6685_v60, %v6684_v10  ;;  %v6686_v35 = vsel %vm5150_vm4, %v3207_v26, %v5918_v51  ;;  %vm5152_vm5 = vcmp.gt.f32.partialorder %v4200_v17, 0.0  ;;  %v5920_v46 = vmul.f32 -0.51027, %v4200_v17  ;;  %v3218_v59 = vpop.f32.mrb[23].mxu0  ;;  %v4211_v23 = vpop.f32.mrb[23].mxu1 }
 0x195   : > { %8770 = vst [vmem:[%s12490_s25 + $0x80] sm:$0xff] %v10892_v24  ;;  %vm5151_vm6 = vcmp.gt.f32.partialorder %v3209_v32, 0.0  ;;  %v5919_v42 = vmul.f32 -0.51027, %v3209_v32  ;;  %vm5153_vm7 = vcmp.gt.f32.partialorder %v4202_v19, 0.0  ;;  %3481 = vmatmul.mubr.bf16.gmra.mrb[128].mxu0 %v12463_v43  ;;  %v3213_v16 = vadd.f32 %v3212_v11, %v12363_v61 }
 0x196   : > { %v5921_v22 = vmul.f32 -0.51027, %v4202_v19  ;;  %10697 = vst [vmem:[%s12490_s25 + $0xa0] sm:$0xff] %v11084_v27  ;;  %v6688_v50 = vsel %vm5152_vm5, %v4200_v17, %v5920_v46  ;;  %v4206_v44 = vadd.f32 %v4205_v25, %v12365_v33  ;;  %v3215_v9 = vadd.f32 %v3214_v12, %v12376_v62  ;;  %4474 = vmatmul.mubr.bf16.gmra.mrb[128].mxu1 %v12463_v43 }
 0x197   : > { %v6687_v48 = vsel %vm5151_vm6, %v3209_v32, %v5919_v42  ;;  %v4208_v14 = vadd.f32 %v4207_v29, %v12432_v1  ;;  %v3217_v45 = vadd.f32 %v3216_v5, %v12363_v61  ;;  %3490 = vmatprep.mubr.bf16.mxu0 %v16846_v15  ;;  %vm5154_vm8 = vcmp.gt.f32.partialorder %v3213_v16, 0.0  ;;  %4483 = vmatprep.mubr.bf16.mxu1 %v16846_v15 }
 0x198   : > { %v6689_v13 = vsel %vm5153_vm7, %v4202_v19, %v5921_v22  ;;  %v10893_v2 = vpack.c.bf16 %v6687_v48, %v6686_v35  ;;  %v5922_v54 = vmul.f32 -0.51027, %v3213_v16  ;;  %v3222_v52 = vpop.f32.mrb[24].mxu0  ;;  %v4215_v41 = vpop.f32.mrb[24].mxu1  ;;  %vm5156_vm9 = vcmp.gt.f32.partialorder %v4206_v44, 0.0 }
 0x199   : > { %v11085_v40 = vpack.c.bf16 %v6689_v13, %v6688_v50  ;;  %v5924_v43 = vmul.f32 -0.51027, %v4206_v44  ;;  %vm5155_vm10 = vcmp.gt.f32.partialorder %v3215_v9, 0.0  ;;  %v5923_v39 = vmul.f32 -0.51027, %v3215_v9  ;;  %v3224_v30 = vpop.f32.mrb[25].mxu0 }
 0x19a   : > { %8771 = vst [vmem:[%s12490_s25 + $0x88] sm:$0xff] %v10893_v2  ;;  %v6690_v56 = vsel %vm5154_vm8, %v3213_v16, %v5922_v54  ;;  %vm5157_vm11 = vcmp.gt.f32.partialorder %v4208_v14, 0.0  ;;  %v5925_v3 = vmul.f32 -0.51027, %v4208_v14  ;;  %vm5158_vm12 = vcmp.gt.f32.partialorder %v3217_v45, 0.0  ;;  %v4217_v34 = vpop.f32.mrb[25].mxu1 }
 0x19b   : > { %10698 = vst [vmem:[%s12490_s25 + $0xa8] sm:$0xff] %v11085_v40  ;;  %v6692_v18 = vsel %vm5156_vm9, %v4206_v44, %v5924_v43  ;;  %v6691_v31 = vsel %vm5155_vm10, %v3215_v9, %v5923_v39  ;;  %v5926_v47 = vmul.f32 -0.51027, %v3217_v45  ;;  %v4210_v8 = vadd.f32 %v4209_v38, %v12365_v33  ;;  %v3226_v6 = vpop.f32.mrb[26].mxu0  ;;  %v4219_v63 = vpop.f32.mrb[26].mxu1 }
 0x19c   : > { %v10894_v26 = vpack.c.bf16 %v6691_v31, %v6690_v56  ;;  %v6693_v55 = vsel %vm5157_vm11, %v4208_v14, %v5925_v3  ;;  %v3219_v53 = vadd.f32 %v3218_v59, %v12376_v62  ;;  %v4212_v37 = vadd.f32 %v4211_v23, %v12432_v1  ;;  %v3228_v36 = vpop.f32.mrb[27].mxu0  ;;  %v4221_v0 = vpop.f32.mrb[27].mxu1 }
 0x19d   : > { %v11086_v7 = vpack.c.bf16 %v6693_v55, %v6692_v18  ;;  %v6694_v57 = vsel %vm5158_vm12, %v3217_v45, %v5926_v47  ;;  %vm5160_vm13 = vcmp.gt.f32.partialorder %v4210_v8, 0.0  ;;  %v5928_v11 = vmul.f32 -0.51027, %v4210_v8  ;;  %3491 = vmatmul.mubr.bf16.gmra.mrb[132].mxu0 %v12469_v20 }
 0x19e   : > { %8772 = vst [vmem:[%s12490_s25 + $0x90] sm:$0xff] %v10894_v26  ;;  %vm5159_vm14 = vcmp.gt.f32.partialorder %v3219_v53, 0.0  ;;  %v5927_v25 = vmul.f32 -0.51027, %v3219_v53  ;;  %vm5161_vm15 = vcmp.gt.f32.partialorder %v4212_v37, 0.0  ;;  %4484 = vmatmul.mubr.bf16.gmra.mrb[132].mxu1 %v12469_v20  ;;  %3500 = vmatprep.mubr.bf16.mxu0 %v16846_v15  ;;  %v3223_v51 = vadd.f32 %v3222_v52, %v12363_v61 }
 0x19f   : > { %v5929_v10 = vmul.f32 -0.51027, %v4212_v37  ;;  %10699 = vst [vmem:[%s12490_s25 + $0xb0] sm:$0xff] %v11086_v7  ;;  %v6696_v4 = vsel %vm5160_vm13, %v4210_v8, %v5928_v11  ;;  %v4216_v17 = vadd.f32 %v4215_v41, %v12365_v33  ;;  %v3225_v12 = vadd.f32 %v3224_v30, %v12376_v62  ;;  %4493 = vmatprep.mubr.bf16.mxu1 %v16846_v15 }
 0x1a0   : > { %v6695_v29 = vsel %vm5159_vm14, %v3219_v53, %v5927_v25  ;;  %v4218_v60 = vadd.f32 %v4217_v34, %v12432_v1  ;;  %v3227_v20 = vadd.f32 %v3226_v6, %v12363_v61  ;;  %v3232_v32 = vpop.f32.mrb[28].mxu0  ;;  %v4225_v19 = vpop.f32.mrb[28].mxu1  ;;  %vm5162_vm4 = vcmp.gt.f32.partialorder %v3223_v51, 0.0 }
 0x1a1   : > { %v6697_v24 = vsel %vm5161_vm15, %v4212_v37, %v5929_v10  ;;  %v10895_v5 = vpack.c.bf16 %v6695_v29, %v6694_v57  ;;  %v5930_v27 = vmul.f32 -0.51027, %v3223_v51  ;;  %v3234_v35 = vpop.f32.mrb[29].mxu0  ;;  %v4227_v46 = vpop.f32.mrb[29].mxu1  ;;  %vm5164_vm5 = vcmp.gt.f32.partialorder %v4216_v17, 0.0 }
 0x1a2   : > { %v11087_v38 = vpack.c.bf16 %v6697_v24, %v6696_v4  ;;  %v5932_v59 = vmul.f32 -0.51027, %v4216_v17  ;;  %vm5163_vm6 = vcmp.gt.f32.partialorder %v3225_v12, 0.0  ;;  %v5931_v23 = vmul.f32 -0.51027, %v3225_v12  ;;  %v3236_v50 = vpop.f32.mrb[30].mxu0 }
 0x1a3   : > { %8773 = vst [vmem:[%s12490_s25 + $0x98] sm:$0xff] %v10895_v5  ;;  %v6698_v42 = vsel %vm5162_vm4, %v3223_v51, %v5930_v27  ;;  %vm5165_vm7 = vcmp.gt.f32.partialorder %v4218_v60, 0.0  ;;  %v5933_v22 = vmul.f32 -0.51027, %v4218_v60  ;;  %vm5166_vm8 = vcmp.gt.f32.partialorder %v3227_v20, 0.0  ;;  %v4229_v16 = vpop.f32.mrb[30].mxu1 }
 0x1a4   : > { %10700 = vst [vmem:[%s12490_s25 + $0xb8] sm:$0xff] %v11087_v38  ;;  %v6700_v44 = vsel %vm5164_vm5, %v4216_v17, %v5932_v59  ;;  %v6699_v9 = vsel %vm5163_vm6, %v3225_v12, %v5931_v23  ;;  %v5934_v48 = vmul.f32 -0.51027, %v3227_v20  ;;  %v4220_v13 = vadd.f32 %v4219_v63, %v12365_v33  ;;  %v3238_v14 = vpop.f32.mrb[31].mxu0  ;;  %v4231_v45 = vpop.f32.mrb[31].mxu1 }
 0x1a5   : > { %v10896_v2 = vpack.c.bf16 %v6699_v9, %v6698_v42  ;;  %v6701_v40 = vsel %vm5165_vm7, %v4218_v60, %v5933_v22  ;;  %v3229_v54 = vadd.f32 %v3228_v36, %v12376_v62  ;;  %v4222_v52 = vadd.f32 %v4221_v0, %v12432_v1  ;;  %3501 = vmatmul.mubr.bf16.gmra.mrb[136].mxu0 %v12473_v21 }
 0x1a6   : > { %v11088_v41 = vpack.c.bf16 %v6701_v40, %v6700_v44  ;;  %v6702_v43 = vsel %vm5166_vm8, %v3227_v20, %v5934_v48  ;;  %vm5168_vm9 = vcmp.gt.f32.partialorder %v4220_v13, 0.0  ;;  %v5936_v39 = vmul.f32 -0.51027, %v4220_v13  ;;  %4494 = vmatmul.mubr.bf16.gmra.mrb[136].mxu1 %v12473_v21  ;;  %3510 = vmatprep.mubr.bf16.mxu0 %v16846_v15 }
 0x1a7   : > { %8774 = vst [vmem:[%s12490_s25 + $0xc0] sm:$0xff] %v10896_v2  ;;  %vm5167_vm10 = vcmp.gt.f32.partialorder %v3229_v54, 0.0  ;;  %v5935_v56 = vmul.f32 -0.51027, %v3229_v54  ;;  %vm5169_vm11 = vcmp.gt.f32.partialorder %v4222_v52, 0.0  ;;  %4503 = vmatprep.mubr.bf16.mxu1 %v16846_v15  ;;  %v3233_v34 = vadd.f32 %v3232_v32, %v12363_v61 }
 0x1a8   : > { %v5937_v3 = vmul.f32 -0.51027, %v4222_v52  ;;  %10701 = vst [vmem:[%s12490_s25 + $0xe0] sm:$0xff] %v11088_v41  ;;  %v6704_v30 = vsel %vm5168_vm9, %v4220_v13, %v5936_v39  ;;  %v4226_v18 = vadd.f32 %v4225_v19, %v12365_v33  ;;  %v3235_v31 = vadd.f32 %v3234_v35, %v12376_v62  ;;  %v3242_v47 = vpop.f32.mrb[32].mxu0  ;;  %v4235_v8 = vpop.f32.mrb[32].mxu1 }
 0x1a9   : > { %v6703_v21 = vsel %vm5167_vm10, %v3229_v54, %v5935_v56  ;;  %v4228_v63 = vadd.f32 %v4227_v46, %v12432_v1  ;;  %v3237_v26 = vadd.f32 %v3236_v50, %v12363_v61  ;;  %v3244_v55 = vpop.f32.mrb[33].mxu0  ;;  %v4237_v53 = vpop.f32.mrb[33].mxu1  ;;  %vm5170_vm12 = vcmp.gt.f32.partialorder %v3233_v34, 0.0 }
 0x1aa   : > { %v6705_v6 = vsel %vm5169_vm11, %v4222_v52, %v5937_v3  ;;  %v10897_v37 = vpack.c.bf16 %v6703_v21, %v6702_v43  ;;  %v5938_v0 = vmul.f32 -0.51027, %v3233_v34  ;;  %v3246_v7 = vpop.f32.mrb[34].mxu0  ;;  %v12613_v57 = vpop.f32.mrb[34].mxu1  ;;  %vm5172_vm13 = vcmp.gt.f32.partialorder %v4226_v18, 0.0 }
 0x1ab   : > { %v11089_v36 = vpack.c.bf16 %v6705_v6, %v6704_v30  ;;  %v5940_v11 = vmul.f32 -0.51027, %v4226_v18  ;;  %vm5171_vm14 = vcmp.gt.f32.partialorder %v3235_v31, 0.0  ;;  %v5939_v25 = vmul.f32 -0.51027, %v3235_v31  ;;  %v3248_v51 = vpop.f32.mrb[35].mxu0  ;;  %v12633_v56 = vpop.permute.xlu0 %2119 }
 0x1ac   : > { %8775 = vst [vmem:[%s12490_s25 + $0xc8] sm:$0xff] %v10897_v37  ;;  %v6706_v10 = vsel %vm5170_vm12, %v3233_v34, %v5938_v0  ;;  %vm5173_vm15 = vcmp.gt.f32.partialorder %v4228_v63, 0.0  ;;  %v5941_v4 = vmul.f32 -0.51027, %v4228_v63  ;;  %vm5174_vm4 = vcmp.gt.f32.partialorder %v3237_v26, 0.0  ;;  %v4241_v17 = vpop.f32.mrb[35].mxu1 }
 0x1ad   : > { %10702 = vst [vmem:[%s12490_s25 + $0xe8] sm:$0xff] %v11089_v36  ;;  %v6708_v12 = vsel %vm5172_vm13, %v4226_v18, %v5940_v11  ;;  %v6707_v29 = vsel %vm5171_vm14, %v3235_v31, %v5939_v25  ;;  %v5942_v24 = vmul.f32 -0.51027, %v3237_v26  ;;  %v4230_v60 = vadd.f32 %v4229_v16, %v12365_v33  ;;  %3511 = vmatmul.mubr.bf16.gmra.mrb[140].mxu0 %v12479_v58 }
 0x1ae   : > { %v10898_v20 = vpack.c.bf16 %v6707_v29, %v6706_v10  ;;  %v6709_v32 = vsel %vm5173_vm15, %v4228_v63, %v5941_v4  ;;  %v3239_v19 = vadd.f32 %v3238_v14, %v12376_v62  ;;  %v4232_v5 = vadd.f32 %v4231_v45, %v12432_v1  ;;  %4504 = vmatmul.mubr.bf16.gmra.mrb[140].mxu1 %v12479_v58 }
 0x1af   : > { %v11090_v38 = vpack.c.bf16 %v6709_v32, %v6708_v12  ;;  %v6710_v27 = vsel %vm5174_vm4, %v3237_v26, %v5942_v24  ;;  %vm5176_vm5 = vcmp.gt.f32.partialorder %v4230_v60, 0.0  ;;  %v5944_v35 = vmul.f32 -0.51027, %v4230_v60  ;;  %3520 = vmatprep.mubr.bf16.mxu0 %v16846_v15  ;;  %4513 = vmatprep.mubr.bf16.mxu1 %v16846_v15  ;;  %v12648_v10 = vpop.permute.xlu0 %1905 }
 0x1b0   : > { %8776 = vst [vmem:[%s12490_s25 + $0xd0] sm:$0xff] %v10898_v20  ;;  %vm5175_vm6 = vcmp.gt.f32.partialorder %v3239_v19, 0.0  ;;  %v5943_v46 = vmul.f32 -0.51027, %v3239_v19  ;;  %vm5177_vm7 = vcmp.gt.f32.partialorder %v4232_v5, 0.0  ;;  %v3243_v42 = vadd.f32 %v3242_v47, %v12363_v61  ;;  %v3252_v50 = vpop.f32.mrb[36].mxu0 }
 0x1b1   : > { %v5945_v59 = vmul.f32 -0.51027, %v4232_v5  ;;  %10703 = vst [vmem:[%s12490_s25 + $0xf0] sm:$0xff] %v11090_v38  ;;  %v6712_v23 = vsel %vm5176_vm5, %v4230_v60, %v5944_v35  ;;  %v4236_v22 = vadd.f32 %v4235_v8, %v12365_v33  ;;  %v3245_v58 = vadd.f32 %v3244_v55, %v12376_v62  ;;  %v4245_v16 = vpop.f32.mrb[36].mxu1  ;;  %v3254_v14 = vpop.f32.mrb[37].mxu0 }
 0x1b2   : > { %v6711_v44 = vsel %vm5175_vm6, %v3239_v19, %v5943_v46  ;;  %v4238_v48 = vadd.f32 %v4237_v53, %v12432_v1  ;;  %v3247_v13 = vadd.f32 %v3246_v7, %v12363_v61  ;;  %v4247_v45 = vpop.f32.mrb[37].mxu1  ;;  %vm5178_vm8 = vcmp.gt.f32.partialorder %v3243_v42, 0.0  ;;  %v3256_v52 = vpop.f32.mrb[38].mxu0 }
 0x1b3   : > { %v6713_v9 = vsel %vm5177_vm7, %v4232_v5, %v5945_v59  ;;  %v10899_v2 = vpack.c.bf16 %v6711_v44, %v6710_v27  ;;  %v5946_v54 = vmul.f32 -0.51027, %v3243_v42  ;;  %v12631_v41 = vpop.f32.mrb[38].mxu1  ;;  %vm5180_vm9 = vcmp.gt.f32.partialorder %v4236_v22, 0.0  ;;  %v3258_v34 = vpop.f32.mrb[39].mxu0 }
 0x1b4   : > { %v11091_v40 = vpack.c.bf16 %v6713_v9, %v6712_v23  ;;  %v5948_v43 = vmul.f32 -0.51027, %v4236_v22  ;;  %vm5179_vm10 = vcmp.gt.f32.partialorder %v3245_v58, 0.0  ;;  %v5947_v39 = vmul.f32 -0.51027, %v3245_v58  ;;  %v4251_v18 = vpop.f32.mrb[39].mxu1  ;;  %v12641_v53 = vpop.permute.xlu1 %1703 }
 0x1b5   : > { %8777 = vst [vmem:[%s12490_s25 + $0xd8] sm:$0xff] %v10899_v2  ;;  %v6714_v3 = vsel %vm5178_vm8, %v3243_v42, %v5946_v54  ;;  %vm5181_vm11 = vcmp.gt.f32.partialorder %v4238_v48, 0.0  ;;  %v5949_v30 = vmul.f32 -0.51027, %v4238_v48  ;;  %vm5182_vm12 = vcmp.gt.f32.partialorder %v3247_v13, 0.0 }
 0x1b6   : > { %10704 = vst [vmem:[%s12490_s25 + $0xf8] sm:$0xff] %v11091_v40  ;;  %v6716_v31 = vsel %vm5180_vm9, %v4236_v22, %v5948_v43  ;;  %v6715_v47 = vsel %vm5179_vm10, %v3245_v58, %v5947_v39  ;;  %v5950_v8 = vmul.f32 -0.51027, %v3247_v13  ;;  %v4240_v21 = vadd.f32 %v12613_v57, %v12365_v33 }
 0x1b7   : > { %v10900_v6 = vpack.c.bf16 %v6715_v47, %v6714_v3  ;;  %v6717_v63 = vsel %vm5181_vm11, %v4238_v48, %v5949_v30  ;;  %v3249_v26 = vadd.f32 %v3248_v51, %v12376_v62  ;;  %v4242_v55 = vadd.f32 %v4241_v17, %v12432_v1 }
 0x1b8   : > { %v11092_v37 = vpack.c.bf16 %v6717_v63, %v6716_v31  ;;  %v6718_v36 = vsel %vm5182_vm12, %v3247_v13, %v5950_v8  ;;  %vm5184_vm13 = vcmp.gt.f32.partialorder %v4240_v21, 0.0  ;;  %v5952_v0 = vmul.f32 -0.51027, %v4240_v21  ;;  %v12643_v7 = vpop.f32.mrb[40].mxu0  ;;  %v12645_v11 = vpop.f32.mrb[40].mxu1 }
 0x1b9   : > { %8778 = vst [vmem:[%s12490_s25 + $0x100] sm:$0xff] %v10900_v6  ;;  %vm5183_vm14 = vcmp.gt.f32.partialorder %v3249_v26, 0.0  ;;  %v5951_v57 = vmul.f32 -0.51027, %v3249_v26  ;;  %vm5185_vm15 = vcmp.gt.f32.partialorder %v4242_v55, 0.0  ;;  %v3253_v51 = vadd.f32 %v3252_v50, %v12363_v61  ;;  %v12654_v29 = vpop.f32.mrb[41].mxu0 }
 0x1ba   : > { %v5953_v25 = vmul.f32 -0.51027, %v4242_v55  ;;  %10705 = vst [vmem:[%s12490_s25 + $0x120] sm:$0xff] %v11092_v37  ;;  %v6720_v4 = vsel %vm5184_vm13, %v4240_v21, %v5952_v0  ;;  %v4246_v17 = vadd.f32 %v4245_v16, %v12365_v33  ;;  %v3255_v12 = vadd.f32 %v3254_v14, %v12376_v62  ;;  %v12656_v24 = vpop.f32.mrb[41].mxu1  ;;  %v12660_v5 = vpop.f32.mrb[42].mxu0  ;;  %v11452_v21 = vld [vmem:[%s11583_s7 + $0x128] sm:$0xff]  }
 0x1bb   : > { %v6719_v60 = vsel %vm5183_vm14, %v3249_v26, %v5951_v57  ;;  %v4248_v32 = vadd.f32 %v4247_v45, %v12432_v1  ;;  %v3257_v19 = vadd.f32 %v3256_v52, %v12363_v61  ;;  %v12662_v38 = vpop.f32.mrb[42].mxu1  ;;  %vm5186_vm4 = vcmp.gt.f32.partialorder %v3253_v51, 0.0  ;;  %v12664_v59 = vpop.f32.mrb[43].mxu0 }
 0x1bc   : > { %v6721_v20 = vsel %vm5185_vm15, %v4242_v55, %v5953_v25  ;;  %v10901_v27 = vpack.c.bf16 %v6719_v60, %v6718_v36  ;;  %v5954_v46 = vmul.f32 -0.51027, %v3253_v51  ;;  %v12666_v23 = vpop.f32.mrb[43].mxu1  ;;  %vm5188_vm5 = vcmp.gt.f32.partialorder %v4246_v17, 0.0  ;;  %v12670_v16 = vpop.permute.xlu1 %2121 }
 0x1bd   : > { %v11093_v35 = vpack.c.bf16 %v6721_v20, %v6720_v4  ;;  %v5956_v42 = vmul.f32 -0.51027, %v4246_v17  ;;  %vm5187_vm6 = vcmp.gt.f32.partialorder %v3255_v12, 0.0  ;;  %v5955_v22 = vmul.f32 -0.51027, %v3255_v12 }
 0x1be   : > { %8779 = vst [vmem:[%s12490_s25 + $0x108] sm:$0xff] %v10901_v27  ;;  %v6722_v58 = vsel %vm5186_vm4, %v3253_v51, %v5954_v46  ;;  %vm5189_vm7 = vcmp.gt.f32.partialorder %v4248_v32, 0.0  ;;  %v5957_v50 = vmul.f32 -0.51027, %v4248_v32  ;;  %vm5190_vm8 = vcmp.gt.f32.partialorder %v3257_v19, 0.0 }
 0x1bf   : > { %10706 = vst [vmem:[%s12490_s25 + $0x128] sm:$0xff] %v11093_v35  ;;  %v6724_v44 = vsel %vm5188_vm5, %v4246_v17, %v5956_v42  ;;  %v6723_v9 = vsel %vm5187_vm6, %v3255_v12, %v5955_v22  ;;  %v5958_v48 = vmul.f32 -0.51027, %v3257_v19  ;;  %v4250_v13 = vadd.f32 %v12631_v41, %v12365_v33  ;;  %v12733_v42 = vld [vmem:[%s11583_s7 + $0x1d0] sm:$0xff]  }
 0x1c0   : > { %v10902_v14 = vpack.c.bf16 %v6723_v9, %v6722_v58  ;;  %v6725_v45 = vsel %vm5189_vm7, %v4248_v32, %v5957_v50  ;;  %v3259_v2 = vadd.f32 %v3258_v34, %v12376_v62  ;;  %v4252_v40 = vadd.f32 %v4251_v18, %v12432_v1  ;;  %v12676_v54 = vpop.f32.mrb[44].mxu0  ;;  %v12678_v52 = vpop.f32.mrb[44].mxu1 }
 0x1c1   : > { %v11094_v43 = vpack.c.bf16 %v6725_v45, %v6724_v44  ;;  %v6726_v39 = vsel %vm5190_vm8, %v3257_v19, %v5958_v48  ;;  %vm5192_vm9 = vcmp.gt.f32.partialorder %v4250_v13, 0.0  ;;  %v5960_v3 = vmul.f32 -0.51027, %v4250_v13  ;;  %v12680_v30 = vpop.f32.mrb[45].mxu0  ;;  %v12682_v31 = vpop.f32.mrb[45].mxu1 }
 0x1c2   : > { %8780 = vst [vmem:[%s12490_s25 + $0x110] sm:$0xff] %v10902_v14  ;;  %vm5191_vm10 = vcmp.gt.f32.partialorder %v3259_v2, 0.0  ;;  %v5959_v41 = vmul.f32 -0.51027, %v3259_v2  ;;  %vm5193_vm11 = vcmp.gt.f32.partialorder %v4252_v40, 0.0  ;;  %v12685_v18 = vpop.permute.xlu0 %1705  ;;  %v12687_v47 = vpop.permute.xlu1 %1907  ;;  %v2315_v6 = vsel %vm2239_vm1, %v11452_v21, %v12641_v53  ;;  %v11454_v21 = vld [vmem:[%s11583_s7 + $0x130] sm:$0xff]  }
 0x1c3   : > { %v5961_v34 = vmul.f32 -0.51027, %v4252_v40  ;;  %10707 = vst [vmem:[%s12490_s25 + $0x130] sm:$0xff] %v11094_v43  ;;  %v6728_v8 = vsel %vm5192_vm9, %v4250_v13, %v5960_v3  ;;  %v2735_v63 = vsel %vm2625_vm3, %v12501_v49, %v12633_v56  ;;  %v3263_v26 = vadd.f32 %v12643_v7, %v12363_v61  ;;  %v12698_v55 = vpop.f32.mrb[46].mxu0  ;;  %v12700_v37 = vpop.f32.mrb[46].mxu1  ;;  %v12709_v49 = vld [vmem:[%s11583_s7 + $0x1c8] sm:$0xff]  }
 0x1c4   : > { %v6727_v36 = vsel %vm5191_vm10, %v3259_v2, %v5959_v41  ;;  %3521 = vmatmul.mubr.bf16.gmra.mrb[144].mxu0 %v2735_v63  ;;  %4514 = vmatmul.mubr.bf16.gmra.mrb[144].mxu1 %v2735_v63  ;;  %v4256_v57 = vadd.f32 %v12645_v11, %v12365_v33  ;;  %v12704_v53 = vpop.f32.mrb[47].mxu0  ;;  %v12706_v25 = vpop.f32.mrb[47].mxu1  ;;  %v1317_v56 = vshrl.u32 %v12709_v49, 16  ;;  %v2508_v17 = vsel %vm2432_vm2, %v2315_v6, %v12648_v10 }
 0x1c5   : > { %v6729_v0 = vsel %vm5193_vm11, %v4252_v40, %v5961_v34  ;;  %v10903_v7 = vpack.c.bf16 %v6727_v36, %v6726_v39  ;;  %vm5194_vm12 = vcmp.gt.f32.partialorder %v3263_v26, 0.0  ;;  %v5962_v51 = vmul.f32 -0.51027, %v3263_v26  ;;  %3530 = vmatprep.mubr.bf16.mxu0 %v16846_v15  ;;  %4523 = vmatprep.mubr.bf16.mxu1 %v16846_v15 }
 0x1c6   : > { %v11095_v4 = vpack.c.bf16 %v6729_v0, %v6728_v8  ;;  %vm5196_vm13 = vcmp.gt.f32.partialorder %v4256_v57, 0.0  ;;  %v5964_v11 = vmul.f32 -0.51027, %v4256_v57  ;;  %v3265_v12 = vadd.f32 %v12654_v29, %v12376_v62  ;;  %v12737_v58 = vpop.permute.xlu1 %1707 }
 0x1c7   : > { %8781 = vst [vmem:[%s12490_s25 + $0x118] sm:$0xff] %v10903_v7  ;;  %v6730_v60 = vsel %vm5194_vm12, %v3263_v26, %v5962_v51  ;;  %v4258_v20 = vadd.f32 %v12656_v24, %v12432_v1  ;;  %v3267_v32 = vadd.f32 %v12660_v5, %v12363_v61  ;;  %v4260_v19 = vadd.f32 %v12662_v38, %v12365_v33  ;;  %v12735_v5 = vpop.permute.xlu0 %2123 }
 0x1c8   : > { %10708 = vst [vmem:[%s12490_s25 + $0x138] sm:$0xff] %v11095_v4  ;;  %v6732_v27 = vsel %vm5196_vm13, %v4256_v57, %v5964_v11  ;;  %vm5195_vm14 = vcmp.gt.f32.partialorder %v3265_v12, 0.0  ;;  %v5963_v35 = vmul.f32 -0.51027, %v3265_v12  ;;  %v3269_v10 = vadd.f32 %v12664_v59, %v12376_v62  ;;  %v12728_v46 = vpop.f32.mrb[48].mxu0  ;;  %v12730_v29 = vpop.f32.mrb[48].mxu1 }
 0x1c9   : > { %vm5197_vm15 = vcmp.gt.f32.partialorder %v4258_v20, 0.0  ;;  %v5965_v24 = vmul.f32 -0.51027, %v4258_v20  ;;  %vm5198_vm4 = vcmp.gt.f32.partialorder %v3267_v32, 0.0  ;;  %v5966_v22 = vmul.f32 -0.51027, %v3267_v32 }
 0x1ca   : > { %v6731_v38 = vsel %vm5195_vm14, %v3265_v12, %v5963_v35  ;;  %vm5200_vm5 = vcmp.gt.f32.partialorder %v4260_v19, 0.0  ;;  %v5968_v50 = vmul.f32 -0.51027, %v4260_v19  ;;  %vm5199_vm6 = vcmp.gt.f32.partialorder %v3269_v10, 0.0  ;;  %v12739_v59 = vpop.f32.mrb[49].mxu0  ;;  %v12741_v44 = vpop.f32.mrb[49].mxu1 }
 0x1cb   : > { %v10904_v9 = vpack.c.bf16 %v6731_v38, %v6730_v60  ;;  %v6733_v48 = vsel %vm5197_vm15, %v4258_v20, %v5965_v24  ;;  %v6734_v13 = vsel %vm5198_vm4, %v3267_v32, %v5966_v22  ;;  %v5967_v14 = vmul.f32 -0.51027, %v3269_v10  ;;  %v12743_v45 = vpop.f32.mrb[50].mxu0  ;;  %v12745_v2 = vpop.f32.mrb[50].mxu1 }
 0x1cc   : > { %v11096_v40 = vpack.c.bf16 %v6733_v48, %v6732_v27  ;;  %v6736_v43 = vsel %vm5200_vm5, %v4260_v19, %v5968_v50  ;;  %v4262_v39 = vadd.f32 %v12666_v23, %v12432_v1  ;;  %v2738_v3 = vsel %vm2625_vm3, %v2508_v17, %v12670_v16  ;;  %v12751_v41 = vpop.f32.mrb[51].mxu0  ;;  %v12753_v34 = vpop.f32.mrb[51].mxu1 }
 0x1cd   : > { %8782 = vst [vmem:[%s12490_s25 + $0x140] sm:$0xff] %v10904_v9  ;;  %v6735_v8 = vsel %vm5199_vm6, %v3269_v10, %v5967_v14  ;;  %3531 = vmatmul.mubr.bf16.gmra.mrb[148].mxu0 %v2738_v3  ;;  %4524 = vmatmul.mubr.bf16.gmra.mrb[148].mxu1 %v2738_v3  ;;  %v2317_v6 = vsel %vm2239_vm1, %v11454_v21, %v12685_v18  ;;  %v1321_v63 = vshll.u32 %v12733_v42, 16  ;;  %v1910_v57 = vpop.permute.xlu0 %1909  ;;  %v11455_v3 = vld [vmem:[%s11583_s7 + $0x138] sm:$0xff]  }
 0x1ce   : > { %v3273_v23 = vadd.f32 %v12676_v54, %v12363_v61  ;;  %10709 = vst [vmem:[%s12490_s25 + $0x160] sm:$0xff] %v11096_v40  ;;  %v10905_v16 = vpack.c.bf16 %v6735_v8, %v6734_v13  ;;  %vm5201_vm7 = vcmp.gt.f32.partialorder %v4262_v39, 0.0  ;;  %v5969_v26 = vmul.f32 -0.51027, %v4262_v39  ;;  %3540 = vmatprep.mubr.bf16.mxu0 %v16846_v15  ;;  %4533 = vmatprep.mubr.bf16.mxu1 %v16846_v15 }
 0x1cf   : > { %v2510_v36 = vsel %vm2432_vm2, %v2317_v6, %v12687_v47  ;;  %v4266_v18 = vadd.f32 %v12678_v52, %v12365_v33  ;;  %v3275_v54 = vadd.f32 %v12680_v30, %v12376_v62  ;;  %v4268_v4 = vadd.f32 %v12682_v31, %v12432_v1 }
 0x1d0   : > { %vm5202_vm8 = vcmp.gt.f32.partialorder %v3273_v23, 0.0  ;;  %v5970_v0 = vmul.f32 -0.51027, %v3273_v23  ;;  %8783 = vst [vmem:[%s12490_s25 + $0x148] sm:$0xff] %v10905_v16  ;;  %v6737_v7 = vsel %vm5201_vm7, %v4262_v39, %v5969_v26  ;;  %v3277_v47 = vadd.f32 %v12698_v55, %v12363_v61  ;;  %v12779_v11 = vpop.f32.mrb[52].mxu0  ;;  %v12781_v17 = vpop.f32.mrb[52].mxu1 }
 0x1d1   : > { %v4270_v51 = vadd.f32 %v12700_v37, %v12365_v33  ;;  %v11097_v52 = vpack.c.bf16 %v6737_v7, %v6736_v43  ;;  %vm5204_vm9 = vcmp.gt.f32.partialorder %v4266_v18, 0.0  ;;  %v5972_v30 = vmul.f32 -0.51027, %v4266_v18  ;;  %v12783_v60 = vpop.f32.mrb[53].mxu0  ;;  %v12785_v20 = vpop.f32.mrb[53].mxu1 }
 0x1d2   : > { %v6738_v12 = vsel %vm5202_vm8, %v3273_v23, %v5970_v0  ;;  %vm5203_vm10 = vcmp.gt.f32.partialorder %v3275_v54, 0.0  ;;  %v5971_v31 = vmul.f32 -0.51027, %v3275_v54  ;;  %vm5205_vm11 = vcmp.gt.f32.partialorder %v4268_v4, 0.0  ;;  %v12787_v55 = vpop.permute.xlu1 %2125  ;;  %v12790_v27 = vpop.f32.mrb[54].mxu0 }
 0x1d3   : > { %v5973_v32 = vmul.f32 -0.51027, %v4268_v4  ;;  %10710 = vst [vmem:[%s12490_s25 + $0x168] sm:$0xff] %v11097_v52  ;;  %v6740_v37 = vsel %vm5204_vm9, %v4266_v18, %v5972_v30  ;;  %vm5206_vm12 = vcmp.gt.f32.partialorder %v3277_v47, 0.0  ;;  %v5974_v19 = vmul.f32 -0.51027, %v3277_v47  ;;  %v1710_v23 = vpop.permute.xlu0 %1709 }
 0x1d4   : > { %vm5208_vm13 = vcmp.gt.f32.partialorder %v4270_v51, 0.0  ;;  %v12792_v35 = vpop.f32.mrb[54].mxu1  ;;  %v6739_v10 = vsel %vm5203_vm10, %v3275_v54, %v5971_v31  ;;  %v5976_v22 = vmul.f32 -0.51027, %v4270_v51  ;;  %v3279_v38 = vadd.f32 %v12704_v53, %v12376_v62  ;;  %v12796_v50 = vpop.f32.mrb[55].mxu0 }
 0x1d5   : > { %v6741_v24 = vsel %vm5205_vm11, %v4268_v4, %v5973_v32  ;;  %v12798_v9 = vpop.f32.mrb[55].mxu1  ;;  %v10906_v48 = vpack.c.bf16 %v6739_v10, %v6738_v12  ;;  %v6742_v14 = vsel %vm5206_vm12, %v3277_v47, %v5974_v19  ;;  %v4272_v40 = vadd.f32 %v12706_v25, %v12432_v1 }
 0x1d6   : > { %v11098_v13 = vpack.c.bf16 %v6741_v24, %v6740_v37  ;;  %v6744_v43 = vsel %vm5208_vm13, %v4270_v51, %v5976_v22  ;;  %vm5207_vm14 = vcmp.gt.f32.partialorder %v3279_v38, 0.0  ;;  %v5975_v39 = vmul.f32 -0.51027, %v3279_v38  ;;  %v12811_v16 = vpop.permute.xlu1 %1911 }
 0x1d7   : > { %v2319_v8 = vsel %vm2239_vm1, %v11455_v3, %v12737_v58  ;;  %8784 = vst [vmem:[%s12490_s25 + $0x150] sm:$0xff] %v10906_v48  ;;  %vm5209_vm15 = vcmp.gt.f32.partialorder %v4272_v40, 0.0  ;;  %v5977_v53 = vmul.f32 -0.51027, %v4272_v40  ;;  %v2741_v21 = vsel %vm2625_vm3, %v2510_v36, %v12735_v5 }
 0x1d8   : > { %10711 = vst [vmem:[%s12490_s25 + $0x170] sm:$0xff] %v11098_v13  ;;  %v3283_v6 = vadd.f32 %v12728_v46, %v12363_v61  ;;  %v6743_v25 = vsel %vm5207_vm14, %v3279_v38, %v5975_v39  ;;  %3541 = vmatmul.mubr.bf16.gmra.mrb[152].mxu0 %v2741_v21  ;;  %4534 = vmatmul.mubr.bf16.gmra.mrb[152].mxu1 %v2741_v21  ;;  %v12818_v0 = vrot.slane %v1321_v63, 1  ;;  %v12820_v18 = vpop.f32.mrb[56].mxu0  ;;  %v12822_v5 = vpop.f32.mrb[56].mxu1 }
 0x1d9   : > { %v4276_v26 = vadd.f32 %v12730_v29, %v12365_v33  ;;  %v2512_v58 = vsel %vm2432_vm2, %v2319_v8, %v1910_v57  ;;  %v10907_v46 = vpack.c.bf16 %v6743_v25, %v6742_v14  ;;  %v6745_v36 = vsel %vm5209_vm15, %v4272_v40, %v5977_v53  ;;  %3550 = vmatprep.mubr.bf16.mxu0 %v16846_v15  ;;  %v12826_v29 = vpop.f32.mrb[57].mxu0  ;;  %v12828_v57 = vpop.f32.mrb[57].mxu1 }
 0x1da   : > { %vm5210_vm4 = vcmp.gt.f32.partialorder %v3283_v6, 0.0  ;;  %v5978_v54 = vmul.f32 -0.51027, %v3283_v6  ;;  %4543 = vmatprep.mubr.bf16.mxu1 %v16846_v15  ;;  %v11099_v63 = vpack.c.bf16 %v6745_v36, %v6744_v43  ;;  %v3285_v4 = vadd.f32 %v12739_v59, %v12376_v62  ;;  %v12832_v47 = vpop.f32.mrb[58].mxu0  ;;  %v12834_v51 = vpop.f32.mrb[58].mxu1 }
 0x1db   : > { %vm5212_vm5 = vcmp.gt.f32.partialorder %v4276_v26, 0.0  ;;  %v5980_v7 = vmul.f32 -0.51027, %v4276_v26  ;;  %8785 = vst [vmem:[%s12490_s25 + $0x158] sm:$0xff] %v10907_v46  ;;  %v4278_v12 = vadd.f32 %v12741_v44, %v12432_v1  ;;  %v3287_v30 = vadd.f32 %v12743_v45, %v12363_v61  ;;  %v12843_v32 = vpop.f32.mrb[59].mxu0  ;;  %v12845_v37 = vpop.f32.mrb[59].mxu1 }
 0x1dc   : > { %v6746_v52 = vsel %vm5210_vm4, %v3283_v6, %v5978_v54  ;;  %v4280_v31 = vadd.f32 %v12745_v2, %v12365_v33  ;;  %10712 = vst [vmem:[%s12490_s25 + $0x178] sm:$0xff] %v11099_v63  ;;  %vm5211_vm6 = vcmp.gt.f32.partialorder %v3285_v4, 0.0  ;;  %v5979_v19 = vmul.f32 -0.51027, %v3285_v4  ;;  %v12850_v14 = vpop.permute.xlu0 %2127  ;;  %v12852_v40 = vpop.permute.xlu1 %1711  ;;  %v11456_v6 = vld [vmem:[%s11583_s7 + $0x140] sm:$0xff]  }
 0x1dd   : > { %v6748_v59 = vsel %vm5212_vm5, %v4276_v26, %v5980_v7  ;;  %v3289_v10 = vadd.f32 %v12751_v41, %v12376_v62  ;;  %vm5213_vm7 = vcmp.gt.f32.partialorder %v4278_v12, 0.0  ;;  %v5981_v24 = vmul.f32 -0.51027, %v4278_v12 }
 0x1de   : > { %vm5214_vm8 = vcmp.gt.f32.partialorder %v3287_v30, 0.0  ;;  %v5982_v44 = vmul.f32 -0.51027, %v3287_v30  ;;  %v6747_v22 = vsel %vm5211_vm6, %v3285_v4, %v5979_v19  ;;  %vm5216_vm9 = vcmp.gt.f32.partialorder %v4280_v31, 0.0 }
 0x1df   : > { %v5984_v45 = vmul.f32 -0.51027, %v4280_v31  ;;  %vm5215_vm10 = vcmp.gt.f32.partialorder %v3289_v10, 0.0  ;;  %v10908_v2 = vpack.c.bf16 %v6747_v22, %v6746_v52  ;;  %v6749_v38 = vsel %vm5213_vm7, %v4278_v12, %v5981_v24 }
 0x1e0   : > { %v6750_v48 = vsel %vm5214_vm8, %v3287_v30, %v5982_v44  ;;  %v5983_v13 = vmul.f32 -0.51027, %v3289_v10  ;;  %v11100_v43 = vpack.c.bf16 %v6749_v38, %v6748_v59  ;;  %v4282_v39 = vadd.f32 %v12753_v34, %v12432_v1  ;;  %v12858_v8 = vpop.f32.mrb[60].mxu0  ;;  %v12860_v53 = vpop.f32.mrb[60].mxu1 }
 0x1e1   : > { %v6752_v41 = vsel %vm5216_vm9, %v4280_v31, %v5984_v45  ;;  %v2744_v3 = vsel %vm2625_vm3, %v2512_v58, %v12787_v55  ;;  %8786 = vst [vmem:[%s12490_s25 + $0x180] sm:$0xff] %v10908_v2  ;;  %v2321_v25 = vsel %vm2239_vm1, %v11456_v6, %v1710_v23  ;;  %v3293_v26 = vadd.f32 %v12779_v11, %v12363_v61  ;;  %v12868_v34 = vpop.f32.mrb[61].mxu0  ;;  %v12870_v36 = vpop.f32.mrb[61].mxu1 }
 0x1e2   : > { %v6751_v21 = vsel %vm5215_vm10, %v3289_v10, %v5983_v13  ;;  %3551 = vmatmul.mubr.bf16.gmra.mrb[156].mxu0 %v2744_v3  ;;  %4544 = vmatmul.mubr.bf16.gmra.mrb[156].mxu1 %v2744_v3  ;;  %v1325_v46 = vshrl.u32 %v12733_v42, 16  ;;  %10713 = vst [vmem:[%s12490_s25 + $0x1a0] sm:$0xff] %v11100_v43  ;;  %vm5217_vm11 = vcmp.gt.f32.partialorder %v4282_v39, 0.0  ;;  %v5985_v58 = vmul.f32 -0.51027, %v4282_v39  ;;  %v12877_v23 = vpop.f32.mrb[62].mxu0  ;;  %v12897_v45 = vpop.permute.xlu1 %2129 }
 0x1e3   : > { %v10909_v55 = vpack.c.bf16 %v6751_v21, %v6750_v48  ;;  %v2514_v54 = vsel %vm2432_vm2, %v2321_v25, %v12811_v16  ;;  %3560 = vmatprep.mubr.bf16.mxu0 %v16846_v15  ;;  %4553 = vmatprep.mubr.bf16.mxu1 %v16846_v15  ;;  %v12879_v11 = vpop.f32.mrb[62].mxu1  ;;  %vm5218_vm12 = vcmp.gt.f32.partialorder %v3293_v26, 0.0  ;;  %v5986_v63 = vmul.f32 -0.51027, %v3293_v26  ;;  %v12885_v52 = vpop.f32.mrb[63].mxu0  ;;  %v12902_v48 = vld [vmem:[%s11583_s7 + $0x1d8] sm:$0xff]  }
 0x1e4   : > { %v4286_v7 = vadd.f32 %v12781_v17, %v12365_v33  ;;  %v3295_v4 = vadd.f32 %v12783_v60, %v12376_v62  ;;  %v12887_v16 = vpop.f32.mrb[63].mxu1  ;;  %v6753_v12 = vsel %vm5217_vm11, %v4282_v39, %v5985_v58  ;;  %v4288_v30 = vadd.f32 %v12785_v20, %v12432_v1  ;;  %v1914_v20 = vpop.permute.xlu0 %1913 }
 0x1e5   : > { %8787 = vst [vmem:[%s12490_s25 + $0x188] sm:$0xff] %v10909_v55  ;;  %v3297_v31 = vadd.f32 %v12790_v27, %v12363_v61  ;;  %v4290_v59 = vadd.f32 %v12792_v35, %v12365_v33  ;;  %v11101_v17 = vpack.c.bf16 %v6753_v12, %v6752_v41  ;;  %v6754_v19 = vsel %vm5218_vm12, %v3293_v26, %v5986_v63  ;;  %v11457_v55 = vld [vmem:[%s11583_s7 + $0x148] sm:$0xff]  }
 0x1e6   : > { %vm5220_vm13 = vcmp.gt.f32.partialorder %v4286_v7, 0.0  ;;  %v5988_v60 = vmul.f32 -0.51027, %v4286_v7  ;;  %vm5219_vm14 = vcmp.gt.f32.partialorder %v3295_v4, 0.0  ;;  %v5987_v10 = vmul.f32 -0.51027, %v3295_v4 }
 0x1e7   : > { %vm5221_vm15 = vcmp.gt.f32.partialorder %v4288_v30, 0.0  ;;  %v5989_v24 = vmul.f32 -0.51027, %v4288_v30  ;;  %10714 = vst [vmem:[%s12490_s25 + $0x1a8] sm:$0xff] %v11101_v17  ;;  %vm5222_vm4 = vcmp.gt.f32.partialorder %v3297_v31, 0.0  ;;  %vm5224_vm5 = vcmp.gt.f32.partialorder %v4290_v59, 0.0 }
 0x1e8   : > { %v6756_v44 = vsel %vm5220_vm13, %v4286_v7, %v5988_v60  ;;  %v5990_v22 = vmul.f32 -0.51027, %v3297_v31  ;;  %v6755_v27 = vsel %vm5219_vm14, %v3295_v4, %v5987_v10  ;;  %v5992_v2 = vmul.f32 -0.51027, %v4290_v59  ;;  %v12904_v13 = vpop.f32.mrb[64].mxu0  ;;  %v12906_v43 = vpop.f32.mrb[64].mxu1 }
 0x1e9   : > { %v6757_v35 = vsel %vm5221_vm15, %v4288_v30, %v5989_v24  ;;  %v3299_v38 = vadd.f32 %v12796_v50, %v12376_v62  ;;  %v10910_v41 = vpack.c.bf16 %v6755_v27, %v6754_v19  ;;  %v4292_v21 = vadd.f32 %v12798_v9, %v12432_v1  ;;  %v12910_v6 = vpop.f32.mrb[65].mxu0  ;;  %v12912_v25 = vpop.f32.mrb[65].mxu1 }
 0x1ea   : > { %v11102_v39 = vpack.c.bf16 %v6757_v35, %v6756_v44  ;;  %v6758_v3 = vsel %vm5222_vm4, %v3297_v31, %v5990_v22  ;;  %v6760_v50 = vsel %vm5224_vm5, %v4290_v59, %v5992_v2  ;;  %v2323_v58 = vsel %vm2239_vm1, %v11457_v55, %v12852_v40  ;;  %v12918_v63 = vpop.f32.mrb[66].mxu0  ;;  %v12920_v7 = vpop.f32.mrb[66].mxu1 }
 0x1eb   : > { %vm5223_vm6 = vcmp.gt.f32.partialorder %v3299_v38, 0.0  ;;  %v5991_v26 = vmul.f32 -0.51027, %v3299_v38  ;;  %8788 = vst [vmem:[%s12490_s25 + $0x190] sm:$0xff] %v10910_v41  ;;  %vm5225_vm7 = vcmp.gt.f32.partialorder %v4292_v21, 0.0  ;;  %v2747_v4 = vsel %vm2625_vm3, %v2514_v54, %v12850_v14  ;;  %v12929_v30 = vpop.f32.mrb[67].mxu0  ;;  %v1916_v44 = vpop.permute.xlu1 %1915 }
 0x1ec   : > { %10715 = vst [vmem:[%s12490_s25 + $0x1b0] sm:$0xff] %v11102_v39  ;;  %v5993_v9 = vmul.f32 -0.51027, %v4292_v21  ;;  %v1319_v12 = vor.u32 %v1317_v56, %v12399_v28  ;;  %v12931_v31 = vpop.f32.mrb[67].mxu1  ;;  %3561 = vmatmul.mubr.bf16.gmra.mrb[160].mxu0 %v2747_v4  ;;  %4554 = vmatmul.mubr.bf16.gmra.mrb[160].mxu1 %v2747_v4  ;;  %v3303_v59 = vadd.f32 %v12820_v18, %v12363_v61  ;;  %v1329_v14 = vshll.u32 %v12902_v48, 16 }
 0x1ed   : > { %v6759_v40 = vsel %vm5223_vm6, %v3299_v38, %v5991_v26  ;;  %v4296_v17 = vadd.f32 %v12822_v5, %v12365_v33  ;;  %v2516_v49 = vsel %vm2432_vm2, %v2323_v58, %v1914_v20  ;;  %3570 = vmatprep.mubr.bf16.mxu0 %v16846_v15  ;;  %4563 = vmatprep.mubr.bf16.mxu1 %v16846_v15 }
 0x1ee   : > { %v10911_v54 = vpack.c.bf16 %v6759_v40, %v6758_v3  ;;  %v6761_v19 = vsel %vm5225_vm7, %v4292_v21, %v5993_v9  ;;  %v1324_v28 = vsel %vm856_vm0, %v1319_v12, %v12818_v0  ;;  %vm5226_vm8 = vcmp.gt.f32.partialorder %v3303_v59, 0.0  ;;  %v1714_v21 = vpop.permute.xlu0 %1713 }
 0x1ef   : > { %v11103_v56 = vpack.c.bf16 %v6761_v19, %v6760_v50  ;;  %2157 = vrot.lane.b32.xlu1 %v1324_v28, %s11522_s11  ;;  %v5994_v18 = vmul.f32 -0.51027, %v3303_v59  ;;  %vm5228_vm9 = vcmp.gt.f32.partialorder %v4296_v17, 0.0  ;;  %v5996_v5 = vmul.f32 -0.51027, %v4296_v17 }
 0x1f0   : > { %8789 = vst [vmem:[%s12490_s25 + $0x198] sm:$0xff] %v10911_v54  ;;  %v3305_v60 = vadd.f32 %v12826_v29, %v12376_v62  ;;  %v4298_v10 = vadd.f32 %v12828_v57, %v12432_v1  ;;  %v3307_v24 = vadd.f32 %v12832_v47, %v12363_v61  ;;  %v4300_v20 = vadd.f32 %v12834_v51, %v12365_v33  ;;  %v12958_v2 = vpop.f32.mrb[68].mxu0  ;;  %v12960_v29 = vpop.f32.mrb[68].mxu1 }
 0x1f1   : > { %10716 = vst [vmem:[%s12490_s25 + $0x1b8] sm:$0xff] %v11103_v56  ;;  %v6762_v22 = vsel %vm5226_vm8, %v3303_v59, %v5994_v18  ;;  %v3309_v27 = vadd.f32 %v12843_v32, %v12376_v62  ;;  %v4302_v35 = vadd.f32 %v12845_v37, %v12432_v1  ;;  %v6764_v57 = vsel %vm5228_vm9, %v4296_v17, %v5996_v5  ;;  %v12962_v47 = vpop.f32.mrb[69].mxu0  ;;  %v12964_v41 = vpop.f32.mrb[69].mxu1  ;;  %v11458_v18 = vld [vmem:[%s11583_s7 + $0x150] sm:$0xff]  }
 0x1f2   : > { %vm5227_vm10 = vcmp.gt.f32.partialorder %v3305_v60, 0.0  ;;  %v5995_v38 = vmul.f32 -0.51027, %v3305_v60  ;;  %vm5229_vm11 = vcmp.gt.f32.partialorder %v4298_v10, 0.0  ;;  %v5997_v39 = vmul.f32 -0.51027, %v4298_v10 }
 0x1f3   : > { %vm5230_vm12 = vcmp.gt.f32.partialorder %v3307_v24, 0.0  ;;  %v5998_v51 = vmul.f32 -0.51027, %v3307_v24  ;;  %vm5232_vm13 = vcmp.gt.f32.partialorder %v4300_v20, 0.0  ;;  %1943 = vrot.lane.b32.xlu1 %v12733_v42, %s11523_s14  ;;  %v6000_v37 = vmul.f32 -0.51027, %v4300_v20 }
 0x1f4   : > { %v6763_v32 = vsel %vm5227_vm10, %v3305_v60, %v5995_v38  ;;  %vm5231_vm14 = vcmp.gt.f32.partialorder %v3309_v27, 0.0  ;;  %v5999_v3 = vmul.f32 -0.51027, %v3309_v27  ;;  %v12968_v50 = vpop.f32.mrb[70].mxu0  ;;  %v6765_v55 = vsel %vm5229_vm11, %v4298_v10, %v5997_v39  ;;  %v12970_v9 = vpop.f32.mrb[70].mxu1 }
 0x1f5   : > { %v10912_v26 = vpack.c.bf16 %v6763_v32, %v6762_v22  ;;  %v6766_v58 = vsel %vm5230_vm12, %v3307_v24, %v5998_v51  ;;  %vm5233_vm15 = vcmp.gt.f32.partialorder %v4302_v35, 0.0  ;;  %v12972_v4 = vpop.f32.mrb[71].mxu0  ;;  %v11104_v12 = vpack.c.bf16 %v6765_v55, %v6764_v57  ;;  %v12974_v54 = vpop.f32.mrb[71].mxu1 }
 0x1f6   : > { %v6768_v40 = vsel %vm5232_vm13, %v4300_v20, %v6000_v37  ;;  %v6767_v59 = vsel %vm5231_vm14, %v3309_v27, %v5999_v3  ;;  %v6001_v17 = vmul.f32 -0.51027, %v4302_v35  ;;  %v2750_v56 = vsel %vm2625_vm3, %v2516_v49, %v12897_v45  ;;  %v1716_v22 = vpop.permute.xlu1 %1715  ;;  %v2132_v57 = vpop.permute.xlu0 %2131 }
 0x1f7   : > { %8790 = vst [vmem:[%s12490_s25 + $0x1c0] sm:$0xff] %v10912_v26  ;;  %v10913_v19 = vpack.c.bf16 %v6767_v59, %v6766_v58  ;;  %v2325_v5 = vsel %vm2239_vm1, %v11458_v18, %v1714_v21  ;;  %v1327_v60 = vor.u32 %v1325_v46, %v12818_v0  ;;  %1743 = vrot.lane.b32.xlu1 %v1324_v28, %s11521_s10  ;;  %10717 = vst [vmem:[%s12490_s25 + $0x1e0] sm:$0xff] %v11104_v12 }
 0x1f8   : > { %v6769_v10 = vsel %vm5233_vm15, %v4302_v35, %v6001_v17  ;;  %3571 = vmatmul.mubr.bf16.gmra.mrb[164].mxu0 %v2750_v56  ;;  %4564 = vmatmul.mubr.bf16.gmra.mrb[164].mxu1 %v2750_v56  ;;  %v12989_v24 = vrot.slane %v1329_v14, 1  ;;  %v2518_v45 = vsel %vm2432_vm2, %v2325_v5, %v1916_v44  ;;  %v3313_v49 = vadd.f32 %v12858_v8, %v12363_v61  ;;  %v13002_v14 = vpop.f32.mrb[72].mxu0  ;;  %v13004_v44 = vpop.f32.mrb[72].mxu1  ;;  %v13035_v17 = vld [vmem:[%s11583_s7 + $0x1e0] sm:$0xff]  }
 0x1f9   : > { %8791 = vst [vmem:[%s12490_s25 + $0x1c8] sm:$0xff] %v10913_v19  ;;  %v11105_v42 = vpack.c.bf16 %v6769_v10, %v6768_v40  ;;  %v4306_v0 = vadd.f32 %v12860_v53, %v12365_v33  ;;  %v3315_v46 = vadd.f32 %v12868_v34, %v12376_v62  ;;  %v4308_v28 = vadd.f32 %v12870_v36, %v12432_v1  ;;  %v13013_v34 = vpop.f32.mrb[73].mxu0  ;;  %v13015_v36 = vpop.f32.mrb[73].mxu1  ;;  %v11459_v10 = vld [vmem:[%s11583_s7 + $0x158] sm:$0xff]  }
 0x1fa   : > { %3580 = vmatprep.mubr.bf16.mxu0 %v16846_v15  ;;  %v13008_v8 = vsel %vm856_vm0, %v1327_v60, %v12989_v24  ;;  %vm5234_vm4 = vcmp.gt.f32.partialorder %v3313_v49, 0.0  ;;  %v6002_v20 = vmul.f32 -0.51027, %v3313_v49  ;;  %v3317_v53 = vadd.f32 %v12877_v23, %v12363_v61  ;;  %4573 = vmatprep.mubr.bf16.mxu1 %v16846_v15  ;;  %v13020_v23 = vpop.f32.mrb[74].mxu0  ;;  %v13022_v51 = vpop.f32.mrb[74].mxu1 }
 0x1fb   : > { %10718 = vst [vmem:[%s12490_s25 + $0x1e8] sm:$0xff] %v11105_v42  ;;  %2159 = vrot.lane.b32.xlu0 %v13008_v8, %s11522_s11  ;;  %vm5236_vm5 = vcmp.gt.f32.partialorder %v4306_v0, 0.0  ;;  %v6004_v27 = vmul.f32 -0.51027, %v4306_v0  ;;  %vm5235_vm6 = vcmp.gt.f32.partialorder %v3315_v46, 0.0  ;;  %vm5237_vm7 = vcmp.gt.f32.partialorder %v4308_v28, 0.0  ;;  %v1918_v60 = vpop.permute.xlu0 %1917 }
 0x1fc   : > { %v6003_v35 = vmul.f32 -0.51027, %v3315_v46  ;;  %v6770_v38 = vsel %vm5234_vm4, %v3313_v49, %v6002_v20  ;;  %v6005_v39 = vmul.f32 -0.51027, %v4308_v28  ;;  %vm5238_vm8 = vcmp.gt.f32.partialorder %v3317_v53, 0.0  ;;  %v13026_v26 = vpop.f32.mrb[75].mxu0 }
 0x1fd   : > { %v6772_v32 = vsel %vm5236_vm5, %v4306_v0, %v6004_v27  ;;  %v6006_v3 = vmul.f32 -0.51027, %v3317_v53  ;;  %v4310_v21 = vadd.f32 %v12879_v11, %v12365_v33  ;;  %v13028_v55 = vpop.f32.mrb[75].mxu1  ;;  %v3319_v40 = vadd.f32 %v12885_v52, %v12376_v62  ;;  %v13040_v52 = vpop.permute.xlu1 %2133 }
 0x1fe   : > { %v6771_v37 = vsel %vm5235_vm6, %v3315_v46, %v6003_v35  ;;  %v6773_v12 = vsel %vm5237_vm7, %v4308_v28, %v6005_v39  ;;  %v4312_v59 = vadd.f32 %v12887_v16, %v12432_v1  ;;  %v2327_v49 = vsel %vm2239_vm1, %v11459_v10, %v1716_v22 }
 0x1ff   : > { %v10914_v58 = vpack.c.bf16 %v6771_v37, %v6770_v38  ;;  %v11106_v19 = vpack.c.bf16 %v6773_v12, %v6772_v32  ;;  %v6774_v56 = vsel %vm5238_vm8, %v3317_v53, %v6006_v3  ;;  %vm5240_vm9 = vcmp.gt.f32.partialorder %v4310_v21, 0.0  ;;  %1945 = vrot.lane.b32.xlu0 %v12902_v48, %s11523_s14 }
 0x200   : > { %v6008_v11 = vmul.f32 -0.51027, %v4310_v21  ;;  %vm5239_vm10 = vcmp.gt.f32.partialorder %v3319_v40, 0.0  ;;  %v6007_v18 = vmul.f32 -0.51027, %v3319_v40  ;;  %vm5241_vm11 = vcmp.gt.f32.partialorder %v4312_v59, 0.0 }
 0x201   : > { %8792 = vst [vmem:[%s12490_s25 + $0x1d0] sm:$0xff] %v10914_v58  ;;  %v6009_v5 = vmul.f32 -0.51027, %v4312_v59  ;;  %10719 = vst [vmem:[%s12490_s25 + $0x1f0] sm:$0xff] %v11106_v19  ;;  %v2753_v42 = vsel %vm2625_vm3, %v2518_v45, %v2132_v57  ;;  %v1333_v0 = vshrl.u32 %v12902_v48, 16  ;;  %v13047_v46 = vpop.f32.mrb[76].mxu0  ;;  %v3323_v35 = vadd.f32 %v12904_v13, %v12363_v61 }
 0x202   : > { %v6776_v16 = vsel %vm5240_vm9, %v4310_v21, %v6008_v11  ;;  %v13049_v28 = vpop.f32.mrb[76].mxu1  ;;  %v6775_v20 = vsel %vm5239_vm10, %v3319_v40, %v6007_v18  ;;  %3581 = vmatmul.mubr.bf16.gmra.mrb[168].mxu0 %v2753_v42  ;;  %4574 = vmatmul.mubr.bf16.gmra.mrb[168].mxu1 %v2753_v42  ;;  %v1337_v27 = vshll.u32 %v13035_v17, 16  ;;  %v13054_v38 = vpop.f32.mrb[77].mxu0  ;;  %v4316_v39 = vadd.f32 %v12906_v43, %v12365_v33 }
 0x203   : > { %v6777_v53 = vsel %vm5241_vm11, %v4312_v59, %v6009_v5  ;;  %v13056_v22 = vpop.f32.mrb[77].mxu1  ;;  %v10915_v45 = vpack.c.bf16 %v6775_v20, %v6774_v56  ;;  %v1335_v57 = vor.u32 %v1333_v0, %v12989_v24  ;;  %1745 = vrot.lane.b32.xlu0 %v13008_v8, %s11521_s10  ;;  %v13063_v32 = vpop.f32.mrb[78].mxu0  ;;  %vm5242_vm12 = vcmp.gt.f32.partialorder %v3323_v35, 0.0  ;;  %3590 = vmatprep.mubr.bf16.mxu0 %v16846_v15 }
 0x204   : > { %v11107_v48 = vpack.c.bf16 %v6777_v53, %v6776_v16  ;;  %v13065_v37 = vpop.f32.mrb[78].mxu1  ;;  %v13067_v13 = vrot.slane %v1337_v27, 1  ;;  %v6010_v3 = vmul.f32 -0.51027, %v3323_v35  ;;  %v2520_v21 = vsel %vm2432_vm2, %v2327_v49, %v1918_v60  ;;  %4583 = vmatprep.mubr.bf16.mxu1 %v16846_v15  ;;  %v13072_v24 = vpop.f32.mrb[79].mxu0  ;;  %v13097_v49 = vld [vmem:[%s11583_s7 + $0x1e8] sm:$0xff]  }
 0x205   : > { %v13074_v43 = vpop.f32.mrb[79].mxu1  ;;  %8793 = vst [vmem:[%s12490_s25 + $0x1d8] sm:$0xff] %v10915_v45  ;;  %vm5244_vm13 = vcmp.gt.f32.partialorder %v4316_v39, 0.0  ;;  %v6012_v8 = vmul.f32 -0.51027, %v4316_v39  ;;  %v3325_v58 = vadd.f32 %v12910_v6, %v12376_v62  ;;  %v4318_v12 = vadd.f32 %v12912_v25, %v12432_v1  ;;  %v1718_v5 = vpop.permute.xlu0 %1717 }
 0x206   : > { %10720 = vst [vmem:[%s12490_s25 + $0x1f8] sm:$0xff] %v11107_v48  ;;  %v13084_v40 = vsel %vm856_vm0, %v1335_v57, %v13067_v13  ;;  %v6778_v59 = vsel %vm5242_vm12, %v3323_v35, %v6010_v3  ;;  %v3327_v19 = vadd.f32 %v12918_v63, %v12363_v61  ;;  %v4320_v56 = vadd.f32 %v12920_v7, %v12365_v33  ;;  %v1920_v60 = vpop.permute.xlu1 %1919 }
 0x207   : > { %2161 = vrot.lane.b32.xlu1 %v13084_v40, %s11522_s11  ;;  %v6780_v11 = vsel %vm5244_vm13, %v4316_v39, %v6012_v8  ;;  %vm5243_vm14 = vcmp.gt.f32.partialorder %v3325_v58, 0.0  ;;  %v6011_v6 = vmul.f32 -0.51027, %v3325_v58  ;;  %vm5245_vm15 = vcmp.gt.f32.partialorder %v4318_v12, 0.0 }
 0x208   : > { %v6013_v25 = vmul.f32 -0.51027, %v4318_v12  ;;  %vm5246_vm4 = vcmp.gt.f32.partialorder %v3327_v19, 0.0  ;;  %v6014_v18 = vmul.f32 -0.51027, %v3327_v19  ;;  %vm5248_vm5 = vcmp.gt.f32.partialorder %v4320_v56, 0.0 }
 0x209   : > { %v6779_v16 = vsel %vm5243_vm14, %v3325_v58, %v6011_v6  ;;  %v6016_v10 = vmul.f32 -0.51027, %v4320_v56  ;;  %v3329_v63 = vadd.f32 %v12929_v30, %v12376_v62  ;;  %v4322_v7 = vadd.f32 %v12931_v31, %v12432_v1  ;;  %v13099_v42 = vpop.f32.mrb[80].mxu0  ;;  %v13101_v0 = vpop.f32.mrb[80].mxu1 }
 0x20a   : > { %v10916_v20 = vpack.c.bf16 %v6779_v16, %v6778_v59  ;;  %v6781_v53 = vsel %vm5245_vm15, %v4318_v12, %v6013_v25  ;;  %v6782_v27 = vsel %vm5246_vm4, %v3327_v19, %v6014_v18  ;;  %v2756_v35 = vsel %vm2625_vm3, %v2520_v21, %v13040_v52  ;;  %v13105_v45 = vpop.f32.mrb[81].mxu0  ;;  %v13107_v30 = vpop.f32.mrb[81].mxu1  ;;  %v11460_v52 = vld [vmem:[%s11583_s7 + $0x160] sm:$0xff]  }
 0x20b   : > { %v11108_v48 = vpack.c.bf16 %v6781_v53, %v6780_v11  ;;  %v6784_v31 = vsel %vm5248_vm5, %v4320_v56, %v6016_v10  ;;  %vm5247_vm6 = vcmp.gt.f32.partialorder %v3329_v63, 0.0  ;;  %v6015_v57 = vmul.f32 -0.51027, %v3329_v63  ;;  %3591 = vmatmul.mubr.bf16.gmra.mrb[172].mxu0 %v2756_v35  ;;  %4584 = vmatmul.mubr.bf16.gmra.mrb[172].mxu1 %v2756_v35  ;;  %v13110_v39 = vpop.f32.mrb[82].mxu0  ;;  %v13112_v3 = vpop.f32.mrb[82].mxu1 }
 0x20c   : > { %8794 = vst [vmem:[%s12490_s25 + $0x200] sm:$0xff] %v10916_v20  ;;  %vm5249_vm7 = vcmp.gt.f32.partialorder %v4322_v7, 0.0  ;;  %v6017_v8 = vmul.f32 -0.51027, %v4322_v7  ;;  %v2329_v21 = vsel %vm2239_vm1, %v11460_v52, %v1718_v5  ;;  %1947 = vrot.lane.b32.xlu1 %v13035_v17, %s11523_s14  ;;  %v1341_v58 = vshrl.u32 %v13035_v17, 16  ;;  %3600 = vmatprep.mubr.bf16.mxu0 %v16846_v15  ;;  %v13121_v12 = vpop.f32.mrb[83].mxu0 }
 0x20d   : > { %v13123_v59 = vpop.f32.mrb[83].mxu1  ;;  %10721 = vst [vmem:[%s12490_s25 + $0x220] sm:$0xff] %v11108_v48  ;;  %v6783_v19 = vsel %vm5247_vm6, %v3329_v63, %v6015_v57  ;;  %v1345_v56 = vshll.u32 %v13097_v49, 16  ;;  %v2522_v11 = vsel %vm2432_vm2, %v2329_v21, %v1920_v60  ;;  %v3333_v6 = vadd.f32 %v12958_v2, %v12363_v61  ;;  %4593 = vmatprep.mubr.bf16.mxu1 %v16846_v15 }
 0x20e   : > { %v10917_v17 = vpack.c.bf16 %v6783_v19, %v6782_v27  ;;  %v6785_v25 = vsel %vm5249_vm7, %v4322_v7, %v6017_v8  ;;  %v1343_v18 = vor.u32 %v1341_v58, %v13067_v13  ;;  %v4326_v5 = vadd.f32 %v12960_v29, %v12365_v33  ;;  %v2136_v7 = vpop.permute.xlu0 %2135  ;;  %v1720_v13 = vpop.permute.xlu1 %1719  ;;  %v13166_v19 = vld [vmem:[%s11583_s7 + $0x1f0] sm:$0xff]  }
 0x20f   : > { %v11109_v16 = vpack.c.bf16 %v6785_v25, %v6784_v31  ;;  %v13136_v10 = vrot.slane %v1345_v56, 1  ;;  %vm5250_vm8 = vcmp.gt.f32.partialorder %v3333_v6, 0.0  ;;  %v6018_v63 = vmul.f32 -0.51027, %v3333_v6 }
 0x210   : > { %8795 = vst [vmem:[%s12490_s25 + $0x208] sm:$0xff] %v10917_v17  ;;  %vm5252_vm9 = vcmp.gt.f32.partialorder %v4326_v5, 0.0  ;;  %v6020_v60 = vmul.f32 -0.51027, %v4326_v5  ;;  %v3335_v2 = vadd.f32 %v12962_v47, %v12376_v62  ;;  %v4328_v20 = vadd.f32 %v12964_v41, %v12432_v1  ;;  %1747 = vrot.lane.b32.xlu1 %v13084_v40, %s11521_s10  ;;  %v13152_v47 = vpop.f32.mrb[84].mxu0  ;;  %v13154_v48 = vpop.f32.mrb[84].mxu1 }
 0x211   : > { %10722 = vst [vmem:[%s12490_s25 + $0x228] sm:$0xff] %v11109_v16  ;;  %v1348_v29 = vsel %vm856_vm0, %v1343_v18, %v13136_v10  ;;  %v6786_v53 = vsel %vm5250_vm8, %v3333_v6, %v6018_v63  ;;  %v3337_v27 = vadd.f32 %v12968_v50, %v12363_v61  ;;  %v4330_v35 = vadd.f32 %v12970_v9, %v12365_v33  ;;  %v13157_v31 = vpop.f32.mrb[85].mxu0  ;;  %v13159_v57 = vpop.f32.mrb[85].mxu1 }
 0x212   : > { %2163 = vrot.lane.b32.xlu0 %v1348_v29, %s11522_s11  ;;  %v6788_v41 = vsel %vm5252_vm9, %v4326_v5, %v6020_v60  ;;  %vm5251_vm10 = vcmp.gt.f32.partialorder %v3335_v2, 0.0  ;;  %v6019_v40 = vmul.f32 -0.51027, %v3335_v2  ;;  %vm5253_vm11 = vcmp.gt.f32.partialorder %v4328_v20, 0.0  ;;  %v13168_v56 = vpop.f32.mrb[86].mxu0  ;;  %v13170_v6 = vpop.f32.mrb[86].mxu1 }
 0x213   : > { %v6021_v50 = vmul.f32 -0.51027, %v4328_v20  ;;  %vm5254_vm12 = vcmp.gt.f32.partialorder %v3337_v27, 0.0  ;;  %v6022_v8 = vmul.f32 -0.51027, %v3337_v27  ;;  %vm5256_vm13 = vcmp.gt.f32.partialorder %v4330_v35, 0.0 }
 0x214   : > { %v6787_v9 = vsel %vm5251_vm10, %v3335_v2, %v6019_v40  ;;  %v6024_v52 = vmul.f32 -0.51027, %v4330_v35  ;;  %v3339_v21 = vadd.f32 %v12972_v4, %v12376_v62  ;;  %v4332_v58 = vadd.f32 %v12974_v54, %v12432_v1  ;;  %v11461_v5 = vld [vmem:[%s11583_s7 + $0x168] sm:$0xff]   ;;  %v13174_v63 = vpop.f32.mrb[87].mxu0  ;;  %v13176_v4 = vpop.f32.mrb[87].mxu1 }
 0x215   : > { %v10918_v17 = vpack.c.bf16 %v6787_v9, %v6786_v53  ;;  %v6789_v25 = vsel %vm5253_vm11, %v4328_v20, %v6021_v50  ;;  %v6790_v18 = vsel %vm5254_vm12, %v3337_v27, %v6022_v8  ;;  %v2331_v16 = vsel %vm2239_vm1, %v11461_v5, %v1720_v13  ;;  %v1922_v40 = vpop.permute.xlu0 %1921  ;;  %v2138_v8 = vpop.permute.xlu1 %2137 }
 0x216   : > { %v11110_v60 = vpack.c.bf16 %v6789_v25, %v6788_v41  ;;  %v6792_v54 = vsel %vm5256_vm13, %v4330_v35, %v6024_v52  ;;  %vm5255_vm14 = vcmp.gt.f32.partialorder %v3339_v21, 0.0  ;;  %v6023_v2 = vmul.f32 -0.51027, %v3339_v21  ;;  %1949 = vrot.lane.b32.xlu0 %v13097_v49, %s11523_s14 }
 0x217   : > { %8796 = vst [vmem:[%s12490_s25 + $0x210] sm:$0xff] %v10918_v17  ;;  %vm5257_vm15 = vcmp.gt.f32.partialorder %v4332_v58, 0.0  ;;  %v6025_v20 = vmul.f32 -0.51027, %v4332_v58  ;;  %v2759_v53 = vsel %vm2625_vm3, %v2522_v11, %v2136_v7  ;;  %v1349_v13 = vshrl.u32 %v13097_v49, 16 }
 0x218   : > { %10723 = vst [vmem:[%s12490_s25 + $0x230] sm:$0xff] %v11110_v60  ;;  %v6791_v27 = vsel %vm5255_vm14, %v3339_v21, %v6023_v2  ;;  %3601 = vmatmul.mubr.bf16.gmra.mrb[176].mxu0 %v2759_v53  ;;  %4594 = vmatmul.mubr.bf16.gmra.mrb[176].mxu1 %v2759_v53  ;;  %v1353_v41 = vshll.u32 %v13166_v19, 16  ;;  %v3343_v35 = vadd.f32 %v13002_v14, %v12363_v61  ;;  %v13193_v7 = vpop.f32.mrb[88].mxu0  ;;  %v13195_v21 = vpop.f32.mrb[88].mxu1 }
 0x219   : > { %v4336_v50 = vadd.f32 %v13004_v44, %v12365_v33  ;;  %v10919_v9 = vpack.c.bf16 %v6791_v27, %v6790_v18  ;;  %v6793_v52 = vsel %vm5257_vm15, %v4332_v58, %v6025_v20  ;;  %v1351_v11 = vor.u32 %v1349_v13, %v13136_v10  ;;  %3610 = vmatprep.mubr.bf16.mxu0 %v16846_v15  ;;  %v13201_v58 = vpop.f32.mrb[89].mxu0  ;;  %v13203_v10 = vpop.f32.mrb[89].mxu1 }
 0x21a   : > { %v2524_v49 = vsel %vm2432_vm2, %v2331_v16, %v1922_v40  ;;  %v11111_v17 = vpack.c.bf16 %v6793_v52, %v6792_v54  ;;  %v13197_v14 = vrot.slane %v1353_v41, 1  ;;  %vm5258_vm4 = vcmp.gt.f32.partialorder %v3343_v35, 0.0  ;;  %1749 = vrot.lane.b32.xlu0 %v1348_v29, %s11521_s10  ;;  %4603 = vmatprep.mubr.bf16.mxu1 %v16846_v15  ;;  %v13210_v16 = vpop.f32.mrb[90].mxu0  ;;  %v13212_v60 = vpop.f32.mrb[90].mxu1  ;;  %v13234_v52 = vld [vmem:[%s11583_s7 + $0x1f8] sm:$0xff]  }
 0x21b   : > { %v6026_v44 = vmul.f32 -0.51027, %v3343_v35  ;;  %8797 = vst [vmem:[%s12490_s25 + $0x218] sm:$0xff] %v10919_v9  ;;  %vm5260_vm5 = vcmp.gt.f32.partialorder %v4336_v50, 0.0  ;;  %v6028_v25 = vmul.f32 -0.51027, %v4336_v50  ;;  %v3345_v18 = vadd.f32 %v13013_v34, %v12376_v62  ;;  %v1722_v9 = vpop.permute.xlu0 %1721 }
 0x21c   : > { %v4338_v5 = vadd.f32 %v13015_v36, %v12432_v1  ;;  %10724 = vst [vmem:[%s12490_s25 + $0x238] sm:$0xff] %v11111_v17  ;;  %v13217_v29 = vsel %vm856_vm0, %v1351_v11, %v13197_v14  ;;  %v3347_v2 = vadd.f32 %v13020_v23, %v12363_v61  ;;  %v4340_v40 = vadd.f32 %v13022_v51, %v12365_v33  ;;  %v13223_v34 = vpop.f32.mrb[91].mxu0  ;;  %v13225_v36 = vpop.f32.mrb[91].mxu1 }
 0x21d   : > { %v6794_v54 = vsel %vm5258_vm4, %v3343_v35, %v6026_v44  ;;  %2165 = vrot.lane.b32.xlu1 %v13217_v29, %s11522_s11  ;;  %v6796_v20 = vsel %vm5260_vm5, %v4336_v50, %v6028_v25  ;;  %vm5259_vm6 = vcmp.gt.f32.partialorder %v3345_v18, 0.0  ;;  %v6027_v53 = vmul.f32 -0.51027, %v3345_v18  ;;  %v1924_v25 = vpop.permute.xlu1 %1923 }
 0x21e   : > { %vm5261_vm7 = vcmp.gt.f32.partialorder %v4338_v5, 0.0  ;;  %v6029_v13 = vmul.f32 -0.51027, %v4338_v5  ;;  %vm5262_vm8 = vcmp.gt.f32.partialorder %v3347_v2, 0.0  ;;  %v6030_v27 = vmul.f32 -0.51027, %v3347_v2 }
 0x21f   : > { %vm5264_vm9 = vcmp.gt.f32.partialorder %v4340_v40, 0.0  ;;  %v6795_v23 = vsel %vm5259_vm6, %v3345_v18, %v6027_v53  ;;  %v6032_v41 = vmul.f32 -0.51027, %v4340_v40  ;;  %v3349_v51 = vadd.f32 %v13026_v26, %v12376_v62 }
 0x220   : > { %v4342_v35 = vadd.f32 %v13028_v55, %v12432_v1  ;;  %v10920_v50 = vpack.c.bf16 %v6795_v23, %v6794_v54  ;;  %v6797_v11 = vsel %vm5261_vm7, %v4338_v5, %v6029_v13  ;;  %v6798_v17 = vsel %vm5262_vm8, %v3347_v2, %v6030_v27  ;;  %v13237_v26 = vpop.f32.mrb[92].mxu0  ;;  %v13239_v55 = vpop.f32.mrb[92].mxu1  ;;  %v11462_v23 = vld [vmem:[%s11583_s7 + $0x170] sm:$0xff]  }
 0x221   : > { %v2762_v44 = vsel %vm2625_vm3, %v2524_v49, %v2138_v8  ;;  %v11112_v15 = vpack.c.bf16 %v6797_v11, %v6796_v20  ;;  %v6800_v18 = vsel %vm5264_vm9, %v4340_v40, %v6032_v41  ;;  %vm5263_vm10 = vcmp.gt.f32.partialorder %v3349_v51, 0.0  ;;  %1951 = vrot.lane.b32.xlu1 %v13166_v19, %s11523_s14  ;;  %v13248_v2 = vpop.f32.mrb[93].mxu0  ;;  %v13250_v40 = vpop.f32.mrb[93].mxu1 }
 0x222   : > { %v6031_v53 = vmul.f32 -0.51027, %v3349_v51  ;;  %3611 = vmatmul.mubr.bf16.gmra.mrb[180].mxu0 %v2762_v44  ;;  %4604 = vmatmul.mubr.bf16.gmra.mrb[180].mxu1 %v2762_v44  ;;  %8798 = vst [vmem:[%s12490_s25 + $0x240] sm:$0xff] %v10920_v50  ;;  %vm5265_vm11 = vcmp.gt.f32.partialorder %v4342_v35, 0.0  ;;  %v6033_v54 = vmul.f32 -0.51027, %v4342_v35  ;;  %v2333_v5 = vsel %vm2239_vm1, %v11462_v23, %v1722_v9 }
 0x223   : > { %v1357_v8 = vshrl.u32 %v13166_v19, 16  ;;  %v16849_v49 = vmov 0   ;;  %10725 = vst [vmem:[%s12490_s25 + $0x260] sm:$0xff] %v11112_v15  ;;  %v1361_v13 = vshll.u32 %v13234_v52, 16  ;;  %v13256_v27 = vsel %vm2432_vm2, %v2333_v5, %v1924_v25  ;;  %v13261_v19 = vpop.f32.mrb[94].mxu0  ;;  %v13263_v9 = vpop.f32.mrb[94].mxu1 }
 0x224   : > { %3620 = vmatprep.mubr.bf16.mxu0 %v16849_v49  ;;  %v6799_v20 = vsel %vm5263_vm10, %v3349_v51, %v6031_v53  ;;  %v3353_v41 = vadd.f32 %v13047_v46, %v12363_v61  ;;  %4613 = vmatprep.mubr.bf16.mxu1 %v16849_v49  ;;  %16850 = vst [vmem:[#allocation2_spill] sm:$0xff] %v13261_v19  ;;  %16851 = vst [vmem:[#allocation3_spill] sm:$0xff] %v13263_v9  ;;  %v13269_v44 = vpop.f32.mrb[95].mxu0  ;;  %v13271_v25 = vpop.f32.mrb[95].mxu1 }
 0x225   : > { %v10921_v50 = vpack.c.bf16 %v6799_v20, %v6798_v17  ;;  %v6801_v15 = vsel %vm5265_vm11, %v4342_v35, %v6033_v54  ;;  %v1359_v51 = vor.u32 %v1357_v8, %v13197_v14  ;;  %v4346_v11 = vadd.f32 %v13049_v28, %v12365_v33  ;;  %16852 = vst [vmem:[#allocation4_spill] sm:$0xff] %v13269_v44  ;;  %v2140_v5 = vpop.permute.xlu0 %2139  ;;  %v11463_v44 = vld [vmem:[%s11583_s7 + $0x178] sm:$0xff]  }
 0x226   : > { %16853 = vst [vmem:[#allocation5_spill] sm:$0xff] %v13271_v25  ;;  %v11113_v46 = vpack.c.bf16 %v6801_v15, %v6800_v18  ;;  %v13273_v53 = vrot.slane %v1361_v13, 1  ;;  %vm5266_vm12 = vcmp.gt.f32.partialorder %v3353_v41, 0.0  ;;  %v6034_v23 = vmul.f32 -0.51027, %v3353_v41  ;;  %1751 = vrot.lane.b32.xlu1 %v13217_v29, %s11521_s10  ;;  %v1724_v13 = vpop.permute.xlu1 %1723 }
 0x227   : > { %8799 = vst [vmem:[%s12490_s25 + $0x248] sm:$0xff] %v10921_v50  ;;  %vm5268_vm13 = vcmp.gt.f32.partialorder %v4346_v11, 0.0  ;;  %v6036_v17 = vmul.f32 -0.51027, %v4346_v11  ;;  %v3355_v35 = vadd.f32 %v13054_v38, %v12376_v62  ;;  %v4348_v14 = vadd.f32 %v13056_v22, %v12432_v1 }
 0x228   : > { %10726 = vst [vmem:[%s12490_s25 + $0x268] sm:$0xff] %v11113_v46  ;;  %v1364_v28 = vsel %vm856_vm0, %v1359_v51, %v13273_v53  ;;  %v6802_v18 = vsel %vm5266_vm12, %v3353_v41, %v6034_v23  ;;  %v3357_v54 = vadd.f32 %v13063_v32, %v12363_v61  ;;  %v4350_v8 = vadd.f32 %v13065_v37, %v12365_v33  ;;  %v13295_v51 = vld [vmem:[%s11583_s7 + $0x200] sm:$0xff]   ;;  %v13299_v46 = vpop.f32.mrb[96].mxu1 }
 0x229   : > { %2167 = vrot.lane.b32.xlu0 %v1364_v28, %s11522_s11  ;;  %v6804_v38 = vsel %vm5268_vm13, %v4346_v11, %v6036_v17  ;;  %vm5267_vm14 = vcmp.gt.f32.partialorder %v3355_v35, 0.0  ;;  %v6035_v22 = vmul.f32 -0.51027, %v3355_v35  ;;  %vm5269_vm15 = vcmp.gt.f32.partialorder %v4348_v14, 0.0  ;;  %v1926_v41 = vpop.permute.xlu0 %1925  ;;  %v13297_v11 = vpop.f32.mrb[96].mxu0  ;;  %16854 = vst [vmem:[#allocation6_spill] sm:$0xff] %v13299_v46 }
 0x22a   : > { %v6037_v20 = vmul.f32 -0.51027, %v4348_v14  ;;  %vm5270_vm4 = vcmp.gt.f32.partialorder %v3357_v54, 0.0  ;;  %v6038_v29 = vmul.f32 -0.51027, %v3357_v54  ;;  %vm5272_vm5 = vcmp.gt.f32.partialorder %v4350_v8, 0.0 }
 0x22b   : > { %v6803_v50 = vsel %vm5267_vm14, %v3355_v35, %v6035_v22  ;;  %v6040_v15 = vmul.f32 -0.51027, %v4350_v8  ;;  %v3359_v32 = vadd.f32 %v13072_v24, %v12376_v62  ;;  %v4352_v37 = vadd.f32 %v13074_v43, %v12432_v1  ;;  %v13303_v22 = vpop.f32.mrb[97].mxu0  ;;  %v13305_v24 = vpop.f32.mrb[97].mxu1 }
 0x22c   : > { %v10922_v23 = vpack.c.bf16 %v6803_v50, %v6802_v18  ;;  %v6805_v17 = vsel %vm5269_vm15, %v4348_v14, %v6037_v20  ;;  %v6806_v25 = vsel %vm5270_vm4, %v3357_v54, %v6038_v29  ;;  %v2335_v35 = vsel %vm2239_vm1, %v11463_v44, %v1724_v13  ;;  %v13310_v46 = vpop.f32.mrb[98].mxu0  ;;  %v13312_v14 = vpop.f32.mrb[98].mxu1 }
 0x22d   : > { %v11114_v9 = vpack.c.bf16 %v6805_v17, %v6804_v38  ;;  %v6808_v43 = vsel %vm5272_vm5, %v4350_v8, %v6040_v15  ;;  %vm5271_vm6 = vcmp.gt.f32.partialorder %v3359_v32, 0.0  ;;  %v6039_v19 = vmul.f32 -0.51027, %v3359_v32  ;;  %1953 = vrot.lane.b32.xlu0 %v13234_v52, %s11523_s14  ;;  %v13318_v38 = vpop.f32.mrb[99].mxu0  ;;  %v13320_v8 = vpop.f32.mrb[99].mxu1 }
 0x22e   : > { %8800 = vst [vmem:[%s12490_s25 + $0x250] sm:$0xff] %v10922_v23  ;;  %vm5273_vm7 = vcmp.gt.f32.partialorder %v4352_v37, 0.0  ;;  %v6041_v44 = vmul.f32 -0.51027, %v4352_v37  ;;  %v2765_v18 = vsel %vm2625_vm3, %v13256_v27, %v2140_v5  ;;  %v1365_v54 = vshrl.u32 %v13234_v52, 16  ;;  %v2142_v23 = vpop.permute.xlu1 %2141 }
 0x22f   : > { %10727 = vst [vmem:[%s12490_s25 + $0x270] sm:$0xff] %v11114_v9  ;;  %v6807_v20 = vsel %vm5271_vm6, %v3359_v32, %v6039_v19  ;;  %3621 = vmatmul.mubr.bf16.gmra.mrb[184].mxu0 %v2765_v18  ;;  %4614 = vmatmul.mubr.bf16.gmra.mrb[184].mxu1 %v2765_v18  ;;  %v1369_v29 = vshll.u32 %v13295_v51, 16  ;;  %v3363_v13 = vadd.f32 %v13099_v42, %v12363_v61 }
 0x230   : > { %v4356_v50 = vadd.f32 %v13101_v0, %v12365_v33  ;;  %v10923_v27 = vpack.c.bf16 %v6807_v20, %v6806_v25  ;;  %v6809_v5 = vsel %vm5273_vm7, %v4352_v37, %v6041_v44  ;;  %v1367_v52 = vor.u32 %v1365_v54, %v13273_v53  ;;  %3630 = vmatprep.mubr.bf16.mxu0 %v16849_v49  ;;  %v13340_v53 = vpop.f32.mrb[100].mxu0 }
 0x231   : > { %v2528_v15 = vsel %vm2432_vm2, %v2335_v35, %v1926_v41  ;;  %v11115_v19 = vpack.c.bf16 %v6809_v5, %v6808_v43  ;;  %v13331_v9 = vrot.slane %v1369_v29, 1  ;;  %vm5274_vm8 = vcmp.gt.f32.partialorder %v3363_v13, 0.0  ;;  %1753 = vrot.lane.b32.xlu0 %v1364_v28, %s11521_s10  ;;  %4623 = vmatprep.mubr.bf16.mxu1 %v16849_v49  ;;  %v13342_v41 = vpop.f32.mrb[100].mxu1 }
 0x232   : > { %v6042_v32 = vmul.f32 -0.51027, %v3363_v13  ;;  %8801 = vst [vmem:[%s12490_s25 + $0x258] sm:$0xff] %v10923_v27  ;;  %vm5276_vm9 = vcmp.gt.f32.partialorder %v4356_v50, 0.0  ;;  %v6044_v42 = vmul.f32 -0.51027, %v4356_v50  ;;  %v3365_v0 = vadd.f32 %v13105_v45, %v12376_v62 }
 0x233   : > { %v4358_v25 = vadd.f32 %v13107_v30, %v12432_v1  ;;  %10728 = vst [vmem:[%s12490_s25 + $0x278] sm:$0xff] %v11115_v19  ;;  %v13347_v37 = vsel %vm856_vm0, %v1367_v52, %v13331_v9  ;;  %v3367_v17 = vadd.f32 %v13110_v39, %v12363_v61  ;;  %v4360_v35 = vadd.f32 %v13112_v3, %v12365_v33  ;;  %v13353_v45 = vpop.f32.mrb[101].mxu0  ;;  %v13355_v43 = vpop.f32.mrb[101].mxu1 }
 0x234   : > { %v6810_v28 = vsel %vm5274_vm8, %v3363_v13, %v6042_v32  ;;  %16855 = vst [vmem:[#allocation7_spill] sm:$0xff] %v13355_v43  ;;  %2169 = vrot.lane.b32.xlu1 %v13347_v37, %s11522_s11  ;;  %v6812_v30 = vsel %vm5276_vm9, %v4356_v50, %v6044_v42  ;;  %vm5275_vm10 = vcmp.gt.f32.partialorder %v3365_v0, 0.0  ;;  %v6043_v44 = vmul.f32 -0.51027, %v3365_v0  ;;  %v13359_v18 = vpop.f32.mrb[102].mxu0  ;;  %v13361_v54 = vpop.f32.mrb[102].mxu1 }
 0x235   : > { %vm5277_vm11 = vcmp.gt.f32.partialorder %v4358_v25, 0.0  ;;  %16856 = vst [vmem:[#allocation8_spill] sm:$0xff] %v13359_v18  ;;  %16857 = vst [vmem:[#allocation9_spill] sm:$0xff] %v13361_v54  ;;  %v6045_v39 = vmul.f32 -0.51027, %v4358_v25  ;;  %vm5278_vm12 = vcmp.gt.f32.partialorder %v3367_v17, 0.0  ;;  %v3369_v13 = vadd.f32 %v13121_v12, %v12376_v62 }
 0x236   : > { %v6046_v20 = vmul.f32 -0.51027, %v3367_v17  ;;  %vm5280_vm13 = vcmp.gt.f32.partialorder %v4360_v35, 0.0  ;;  %v6811_v3 = vsel %vm5275_vm10, %v3365_v0, %v6043_v44  ;;  %v6048_v29 = vmul.f32 -0.51027, %v4360_v35  ;;  %v13368_v50 = vld [vmem:[%s11583_s7 + $0x208] sm:$0xff]   ;;  %v1928_v44 = vpop.permute.xlu1 %1927 }
 0x237   : > { %v4362_v27 = vadd.f32 %v13123_v59, %v12432_v1  ;;  %v13370_v5 = vpop.f32.mrb[103].mxu0  ;;  %v13372_v52 = vpop.f32.mrb[103].mxu1  ;;  %v10924_v19 = vpack.c.bf16 %v6811_v3, %v6810_v28  ;;  %v6813_v32 = vsel %vm5277_vm11, %v4358_v25, %v6045_v39  ;;  %v2768_v0 = vsel %vm2625_vm3, %v2528_v15, %v2142_v23  ;;  %v11464_v43 = vld [vmem:[%s11583_s7 + $0x180] sm:$0xff]  }
 0x238   : > { %16858 = vst [vmem:[#allocation10_spill] sm:$0xff] %v13370_v5  ;;  %16859 = vst [vmem:[#allocation11_spill] sm:$0xff] %v13372_v52  ;;  %v6814_v42 = vsel %vm5278_vm12, %v3367_v17, %v6046_v20  ;;  %v11116_v54 = vpack.c.bf16 %v6813_v32, %v6812_v30  ;;  %v6816_v12 = vsel %vm5280_vm13, %v4360_v35, %v6048_v29  ;;  %vm5279_vm14 = vcmp.gt.f32.partialorder %v3369_v13, 0.0  ;;  %v1726_v59 = vpop.permute.xlu0 %1725  ;;  %v13390_v35 = vpop.f32.mrb[104].mxu0 }
 0x239   : > { %v6047_v18 = vmul.f32 -0.51027, %v3369_v13  ;;  %3631 = vmatmul.mubr.bf16.gmra.mrb[188].mxu0 %v2768_v0  ;;  %4624 = vmatmul.mubr.bf16.gmra.mrb[188].mxu1 %v2768_v0  ;;  %8802 = vst [vmem:[%s12490_s25 + $0x280] sm:$0xff] %v10924_v19  ;;  %vm5281_vm15 = vcmp.gt.f32.partialorder %v4362_v27, 0.0  ;;  %v6049_v5 = vmul.f32 -0.51027, %v4362_v27  ;;  %v2337_v52 = vsel %vm2239_vm1, %v11464_v43, %v1726_v59 }
 0x23a   : > { %1955 = vrot.lane.b32.xlu1 %v13295_v51, %s11523_s14  ;;  %v1373_v15 = vshrl.u32 %v13295_v51, 16  ;;  %3640 = vmatprep.mubr.bf16.mxu0 %v16849_v49  ;;  %10729 = vst [vmem:[%s12490_s25 + $0x2a0] sm:$0xff] %v11116_v54  ;;  %v1377_v25 = vshll.u32 %v13368_v50, 16  ;;  %v13385_v28 = vsel %vm2432_vm2, %v2337_v52, %v1928_v44  ;;  %v3373_v17 = vadd.f32 %v13152_v47, %v12363_v61  ;;  %v13392_v43 = vpop.f32.mrb[104].mxu1  ;;  %v13398_v39 = vpop.f32.mrb[105].mxu0 }
 0x23b   : > { %v6815_v23 = vsel %vm5279_vm14, %v3369_v13, %v6047_v18  ;;  %4633 = vmatprep.mubr.bf16.mxu1 %v16849_v49  ;;  %v6817_v30 = vsel %vm5281_vm15, %v4362_v27, %v6049_v5  ;;  %v4366_v54 = vadd.f32 %v13154_v48, %v12365_v33  ;;  %v13400_v20 = vpop.f32.mrb[105].mxu1  ;;  %v13404_v13 = vpop.f32.mrb[106].mxu0  ;;  %v3375_v48 = vadd.f32 %v13157_v31, %v12376_v62 }
 0x23c   : > { %v10925_v51 = vpack.c.bf16 %v6815_v23, %v6814_v42  ;;  %v1375_v18 = vor.u32 %v1373_v15, %v13331_v9  ;;  %v11117_v47 = vpack.c.bf16 %v6817_v30, %v6816_v12  ;;  %v13402_v3 = vrot.slane %v1377_v25, 1  ;;  %v13406_v52 = vpop.f32.mrb[106].mxu1  ;;  %v13415_v5 = vpop.f32.mrb[107].mxu0 }
 0x23d   : > { %vm5282_vm4 = vcmp.gt.f32.partialorder %v3373_v17, 0.0  ;;  %v6050_v29 = vmul.f32 -0.51027, %v3373_v17  ;;  %vm5284_vm5 = vcmp.gt.f32.partialorder %v4366_v54, 0.0  ;;  %v6052_v9 = vmul.f32 -0.51027, %v4366_v54  ;;  %v2144_v0 = vpop.permute.xlu0 %2143 }
 0x23e   : > { %8803 = vst [vmem:[%s12490_s25 + $0x288] sm:$0xff] %v10925_v51  ;;  %v4368_v27 = vadd.f32 %v13159_v57, %v12432_v1  ;;  %1755 = vrot.lane.b32.xlu1 %v13347_v37, %s11521_s10  ;;  %v13417_v19 = vpop.f32.mrb[107].mxu1  ;;  %10730 = vst [vmem:[%s12490_s25 + $0x2a8] sm:$0xff] %v11117_v47  ;;  %v1380_v32 = vsel %vm856_vm0, %v1375_v18, %v13402_v3  ;;  %v3377_v44 = vadd.f32 %v13168_v56, %v12363_v61 }
 0x23f   : > { %16860 = vst [vmem:[#allocation12_spill] sm:$0xff] %v13417_v19  ;;  %v6818_v42 = vsel %vm5282_vm4, %v3373_v17, %v6050_v29  ;;  %v4370_v31 = vadd.f32 %v13170_v6, %v12365_v33  ;;  %2171 = vrot.lane.b32.xlu0 %v1380_v32, %s11522_s11  ;;  %v6820_v57 = vsel %vm5284_vm5, %v4366_v54, %v6052_v9  ;;  %vm5283_vm6 = vcmp.gt.f32.partialorder %v3375_v48, 0.0  ;;  %v1728_v6 = vpop.permute.xlu1 %1727  ;;  %v13432_v17 = vld [vmem:[%s11583_s7 + $0x210] sm:$0xff]   ;;  %v11465_v54 = vld [vmem:[%s11583_s7 + $0x188] sm:$0xff]  }
 0x240   : > { %v6051_v37 = vmul.f32 -0.51027, %v3375_v48  ;;  %vm5285_vm7 = vcmp.gt.f32.partialorder %v4368_v27, 0.0  ;;  %v6053_v12 = vmul.f32 -0.51027, %v4368_v27  ;;  %vm5286_vm8 = vcmp.gt.f32.partialorder %v3377_v44, 0.0 }
 0x241   : > { %v6054_v59 = vmul.f32 -0.51027, %v3377_v44  ;;  %vm5288_vm9 = vcmp.gt.f32.partialorder %v4370_v31, 0.0  ;;  %v6056_v23 = vmul.f32 -0.51027, %v4370_v31  ;;  %v3379_v56 = vadd.f32 %v13174_v63, %v12376_v62  ;;  %v1930_v29 = vpop.permute.xlu0 %1929  ;;  %v13436_v9 = vpop.f32.mrb[108].mxu0 }
 0x242   : > { %v6819_v15 = vsel %vm5283_vm6, %v3375_v48, %v6051_v37  ;;  %v4372_v25 = vadd.f32 %v13176_v4, %v12432_v1  ;;  %v6821_v30 = vsel %vm5285_vm7, %v4368_v27, %v6053_v12  ;;  %v2339_v47 = vsel %vm2239_vm1, %v11465_v54, %v1728_v6  ;;  %v13440_v4 = vpop.f32.mrb[108].mxu1  ;;  %v13442_v19 = vpop.f32.mrb[109].mxu0 }
 0x243   : > { %v10926_v51 = vpack.c.bf16 %v6819_v15, %v6818_v42  ;;  %v6822_v18 = vsel %vm5286_vm8, %v3377_v44, %v6054_v59  ;;  %v11118_v48 = vpack.c.bf16 %v6821_v30, %v6820_v57  ;;  %v6824_v37 = vsel %vm5288_vm9, %v4370_v31, %v6056_v23  ;;  %1957 = vrot.lane.b32.xlu0 %v13368_v50, %s11523_s14  ;;  %v13448_v12 = vpop.f32.mrb[109].mxu1  ;;  %v13450_v31 = vpop.f32.mrb[110].mxu0 }
 0x244   : > { %vm5287_vm10 = vcmp.gt.f32.partialorder %v3379_v56, 0.0  ;;  %v6055_v63 = vmul.f32 -0.51027, %v3379_v56  ;;  %vm5289_vm11 = vcmp.gt.f32.partialorder %v4372_v25, 0.0  ;;  %v6057_v27 = vmul.f32 -0.51027, %v4372_v25 }
 0x245   : > { %8804 = vst [vmem:[%s12490_s25 + $0x290] sm:$0xff] %v10926_v51  ;;  %v2771_v42 = vsel %vm2625_vm3, %v13385_v28, %v2144_v0  ;;  %v1381_v44 = vshrl.u32 %v13368_v50, 16  ;;  %10731 = vst [vmem:[%s12490_s25 + $0x2b0] sm:$0xff] %v11118_v48  ;;  %v1385_v59 = vshll.u32 %v13432_v17, 16  ;;  %v3383_v15 = vadd.f32 %v13193_v7, %v12363_v61  ;;  %v13458_v28 = vpop.f32.mrb[110].mxu1  ;;  %v13460_v50 = vpop.f32.mrb[111].mxu0 }
 0x246   : > { %v6823_v57 = vsel %vm5287_vm10, %v3379_v56, %v6055_v63  ;;  %3641 = vmatmul.mubr.bf16.gmra.mrb[192].mxu0 %v2771_v42  ;;  %4634 = vmatmul.mubr.bf16.gmra.mrb[192].mxu1 %v2771_v42  ;;  %v4376_v23 = vadd.f32 %v13195_v21, %v12365_v33  ;;  %v6825_v6 = vsel %vm5289_vm11, %v4372_v25, %v6057_v27  ;;  %v13466_v30 = vpop.f32.mrb[111].mxu1  ;;  %v2146_v48 = vpop.permute.xlu1 %2145 }
 0x247   : > { %v10927_v0 = vpack.c.bf16 %v6823_v57, %v6822_v18  ;;  %v1383_v56 = vor.u32 %v1381_v44, %v13402_v3  ;;  %v2532_v51 = vsel %vm2432_vm2, %v2339_v47, %v1930_v29  ;;  %3650 = vmatprep.mubr.bf16.mxu0 %v16849_v49  ;;  %v11119_v7 = vpack.c.bf16 %v6825_v6, %v6824_v37  ;;  %v1730_v44 = vpop.permute.xlu0 %1729 }
 0x248   : > { %v13468_v54 = vrot.slane %v1385_v59, 1  ;;  %vm5290_vm12 = vcmp.gt.f32.partialorder %v3383_v15, 0.0  ;;  %v6058_v21 = vmul.f32 -0.51027, %v3383_v15  ;;  %1757 = vrot.lane.b32.xlu0 %v1380_v32, %s11521_s10  ;;  %4643 = vmatprep.mubr.bf16.mxu1 %v16849_v49  ;;  %vm5292_vm13 = vcmp.gt.f32.partialorder %v4376_v23, 0.0 }
 0x249   : > { %8805 = vst [vmem:[%s12490_s25 + $0x298] sm:$0xff] %v10927_v0  ;;  %v6060_v3 = vmul.f32 -0.51027, %v4376_v23  ;;  %v3385_v25 = vadd.f32 %v13201_v58, %v12376_v62  ;;  %v4378_v18 = vadd.f32 %v13203_v10, %v12432_v1  ;;  %10732 = vst [vmem:[%s12490_s25 + $0x2b8] sm:$0xff] %v11119_v7  ;;  %v3387_v32 = vadd.f32 %v13210_v16, %v12363_v61  ;;  %v13488_v10 = vpop.f32.mrb[112].mxu0  ;;  %v13497_v0 = vpop.f32.mrb[112].mxu1 }
 0x24a   : > { %v13480_v47 = vsel %vm856_vm0, %v1383_v56, %v13468_v54  ;;  %v6826_v29 = vsel %vm5290_vm12, %v3383_v15, %v6058_v21  ;;  %v4380_v37 = vadd.f32 %v13212_v60, %v12365_v33  ;;  %v1932_v57 = vpop.permute.xlu1 %1931  ;;  %v3389_v60 = vadd.f32 %v13223_v34, %v12376_v62  ;;  %16861 = vst [vmem:[#allocation13_spill] sm:$0xff] %v13497_v0  ;;  %v13499_v6 = vpop.f32.mrb[113].mxu0 }
 0x24b   : > { %2173 = vrot.lane.b32.xlu1 %v13480_v47, %s11522_s11  ;;  %v6828_v58 = vsel %vm5292_vm13, %v4376_v23, %v6060_v3  ;;  %vm5291_vm14 = vcmp.gt.f32.partialorder %v3385_v25, 0.0  ;;  %v6059_v63 = vmul.f32 -0.51027, %v3385_v25  ;;  %vm5293_vm15 = vcmp.gt.f32.partialorder %v4378_v18, 0.0  ;;  %v13495_v23 = vld [vmem:[%s11583_s7 + $0x218] sm:$0xff]   ;;  %16862 = vst [vmem:[#allocation14_spill] sm:$0xff] %v13499_v6 }
 0x24c   : > { %v6061_v27 = vmul.f32 -0.51027, %v4378_v18  ;;  %vm5294_vm4 = vcmp.gt.f32.partialorder %v3387_v32, 0.0  ;;  %v6062_v42 = vmul.f32 -0.51027, %v3387_v32  ;;  %vm5296_vm5 = vcmp.gt.f32.partialorder %v4380_v37, 0.0 }
 0x24d   : > { %v6827_v16 = vsel %vm5291_vm14, %v3385_v25, %v6059_v63  ;;  %v6064_v59 = vmul.f32 -0.51027, %v4380_v37  ;;  %v4382_v15 = vadd.f32 %v13225_v36, %v12432_v1  ;;  %v2774_v3 = vsel %vm2625_vm3, %v2532_v51, %v2146_v48  ;;  %v13503_v25 = vpop.f32.mrb[113].mxu1  ;;  %v13505_v34 = vpop.f32.mrb[114].mxu0  ;;  %v11466_v51 = vld [vmem:[%s11583_s7 + $0x190] sm:$0xff]  }
 0x24e   : > { %v10928_v56 = vpack.c.bf16 %v6827_v16, %v6826_v29  ;;  %v6829_v7 = vsel %vm5293_vm15, %v4378_v18, %v6061_v27  ;;  %v6830_v21 = vsel %vm5294_vm4, %v3387_v32, %v6062_v42  ;;  %vm5295_vm6 = vcmp.gt.f32.partialorder %v3389_v60, 0.0  ;;  %3651 = vmatmul.mubr.bf16.gmra.mrb[196].mxu0 %v2774_v3  ;;  %4644 = vmatmul.mubr.bf16.gmra.mrb[196].mxu1 %v2774_v3  ;;  %v13508_v6 = vpop.f32.mrb[114].mxu1  ;;  %v13510_v29 = vpop.f32.mrb[115].mxu0 }
 0x24f   : > { %v11120_v63 = vpack.c.bf16 %v6829_v7, %v6828_v58  ;;  %v6832_v36 = vsel %vm5296_vm5, %v4380_v37, %v6064_v59  ;;  %v6063_v0 = vmul.f32 -0.51027, %v3389_v60  ;;  %vm5297_vm7 = vcmp.gt.f32.partialorder %v4382_v15, 0.0  ;;  %1959 = vrot.lane.b32.xlu1 %v13432_v17, %s11523_s14  ;;  %3660 = vmatprep.mubr.bf16.mxu0 %v16849_v49  ;;  %v13519_v37 = vpop.f32.mrb[115].mxu1 }
 0x250   : > { %8806 = vst [vmem:[%s12490_s25 + $0x2c0] sm:$0xff] %v10928_v56  ;;  %v6065_v18 = vmul.f32 -0.51027, %v4382_v15  ;;  %v2341_v48 = vsel %vm2239_vm1, %v11466_v51, %v1730_v44  ;;  %v1389_v32 = vshrl.u32 %v13432_v17, 16  ;;  %16863 = vst [vmem:[#allocation15_spill] sm:$0xff] %v13519_v37  ;;  %v1393_v27 = vshll.u32 %v13495_v23, 16  ;;  %4653 = vmatprep.mubr.bf16.mxu1 %v16849_v49 }
 0x251   : > { %10733 = vst [vmem:[%s12490_s25 + $0x2e0] sm:$0xff] %v11120_v63  ;;  %v6831_v58 = vsel %vm5295_vm6, %v3389_v60, %v6063_v0  ;;  %v2534_v42 = vsel %vm2432_vm2, %v2341_v48, %v1932_v57  ;;  %v3393_v44 = vadd.f32 %v13237_v26, %v12363_v61  ;;  %v4386_v56 = vadd.f32 %v13239_v55, %v12365_v33  ;;  %v2148_v0 = vpop.permute.xlu0 %2147  ;;  %v13533_v57 = vpop.f32.mrb[116].mxu0 }
 0x252   : > { %v10929_v16 = vpack.c.bf16 %v6831_v58, %v6830_v21  ;;  %v6833_v59 = vsel %vm5297_vm7, %v4382_v15, %v6065_v18  ;;  %v1391_v17 = vor.u32 %v1389_v32, %v13468_v54  ;;  %v13531_v3 = vrot.slane %v1393_v27, 1  ;;  %16864 = vst [vmem:[#allocation16_spill] sm:$0xff] %v13533_v57  ;;  %v13542_v55 = vpop.f32.mrb[116].mxu1  ;;  %v13544_v21 = vpop.f32.mrb[117].mxu0  ;;  %v16867_v18 = vld [vmem:[#allocation2_spill] sm:$0xff] }
 0x253   : > { %v11121_v7 = vpack.c.bf16 %v6833_v59, %v6832_v36  ;;  %vm5298_vm8 = vcmp.gt.f32.partialorder %v3393_v44, 0.0  ;;  %v6066_v60 = vmul.f32 -0.51027, %v3393_v44  ;;  %vm5300_vm9 = vcmp.gt.f32.partialorder %v4386_v56, 0.0  ;;  %1759 = vrot.lane.b32.xlu1 %v13480_v47, %s11521_s10  ;;  %16865 = vst [vmem:[#allocation17_spill] sm:$0xff] %v13542_v55  ;;  %16866 = vst [vmem:[#allocation18_spill] sm:$0xff] %v13544_v21 }
 0x254   : > { %8807 = vst [vmem:[%s12490_s25 + $0x2c8] sm:$0xff] %v10929_v16  ;;  %v6068_v26 = vmul.f32 -0.51027, %v4386_v56  ;;  %v3395_v15 = vadd.f32 %v13248_v2, %v12376_v62  ;;  %v4388_v54 = vadd.f32 %v13250_v40, %v12432_v1  ;;  %v1396_v63 = vsel %vm856_vm0, %v1391_v17, %v13531_v3  ;;  %v16868_v2 = vld [vmem:[#allocation3_spill] sm:$0xff]  ;;  %v13553_v32 = vpop.f32.mrb[117].mxu1  ;;  %v13555_v40 = vpop.f32.mrb[118].mxu0 }
 0x255   : > { %10734 = vst [vmem:[%s12490_s25 + $0x2e8] sm:$0xff] %v11121_v7  ;;  %v6834_v36 = vsel %vm5298_vm8, %v3393_v44, %v6066_v60  ;;  %v3397_v51 = vadd.f32 %v16867_v18, %v12363_v61  ;;  %v4390_v48 = vadd.f32 %v16868_v2, %v12365_v33  ;;  %16869 = vst [vmem:[#allocation2_spill] sm:$0xff] %v13553_v32  ;;  %2175 = vrot.lane.b32.xlu0 %v1396_v63, %s11522_s11  ;;  %v13558_v27 = vpop.f32.mrb[118].mxu1  ;;  %v13560_v44 = vpop.f32.mrb[119].mxu0  ;;  %v16873_v60 = vld [vmem:[#allocation4_spill] sm:$0xff]  ;;  %v16874_v2 = vld [vmem:[#allocation5_spill] sm:$0xff] }
 0x256   : > { %16870 = vst [vmem:[#allocation3_spill] sm:$0xff] %v13555_v40  ;;  %v6836_v47 = vsel %vm5300_vm9, %v4386_v56, %v6068_v26  ;;  %vm5299_vm10 = vcmp.gt.f32.partialorder %v3395_v15, 0.0  ;;  %v6067_v58 = vmul.f32 -0.51027, %v3395_v15  ;;  %vm5301_vm11 = vcmp.gt.f32.partialorder %v4388_v54, 0.0  ;;  %16871 = vst [vmem:[#allocation19_spill] sm:$0xff] %v13558_v27  ;;  %v1732_v26 = vpop.permute.xlu1 %1731 }
 0x257   : > { %16872 = vst [vmem:[#allocation20_spill] sm:$0xff] %v13560_v44  ;;  %v6069_v16 = vmul.f32 -0.51027, %v4388_v54  ;;  %vm5302_vm12 = vcmp.gt.f32.partialorder %v3397_v51, 0.0  ;;  %v6070_v59 = vmul.f32 -0.51027, %v3397_v51  ;;  %v3399_v18 = vadd.f32 %v16873_v60, %v12376_v62 }
 0x258   : > { %vm5304_vm13 = vcmp.gt.f32.partialorder %v4390_v48, 0.0  ;;  %v6835_v17 = vsel %vm5299_vm10, %v3395_v15, %v6067_v58  ;;  %v6072_v7 = vmul.f32 -0.51027, %v4390_v48  ;;  %v4392_v56 = vadd.f32 %v16874_v2, %v12432_v1  ;;  %v13567_v40 = vld [vmem:[%s11583_s7 + $0x220] sm:$0xff]   ;;  %v13569_v27 = vpop.f32.mrb[119].mxu1  ;;  %v11467_v55 = vld [vmem:[%s11583_s7 + $0x198] sm:$0xff]   ;;  %v1934_v2 = vpop.permute.xlu0 %1933 }
 0x259   : > { %16875 = vst [vmem:[#allocation4_spill] sm:$0xff] %v13569_v27  ;;  %v10930_v32 = vpack.c.bf16 %v6835_v17, %v6834_v36  ;;  %v6837_v44 = vsel %vm5301_vm11, %v4388_v54, %v6069_v16  ;;  %v6838_v21 = vsel %vm5302_vm12, %v3397_v51, %v6070_v59  ;;  %v2343_v15 = vsel %vm2239_vm1, %v11467_v55, %v1732_v26  ;;  %v13578_v36 = vpop.f32.mrb[120].mxu0 }
 0x25a   : > { %v11122_v58 = vpack.c.bf16 %v6837_v44, %v6836_v47  ;;  %v6840_v57 = vsel %vm5304_vm13, %v4390_v48, %v6072_v7  ;;  %vm5303_vm14 = vcmp.gt.f32.partialorder %v3399_v18, 0.0  ;;  %v6071_v60 = vmul.f32 -0.51027, %v3399_v18  ;;  %1961 = vrot.lane.b32.xlu0 %v13495_v23, %s11523_s14  ;;  %v16876_v47 = vld [vmem:[#allocation6_spill] sm:$0xff]  ;;  %v13586_v44 = vpop.f32.mrb[120].mxu1  ;;  %v13588_v16 = vpop.f32.mrb[121].mxu0 }
 0x25b   : > { %8808 = vst [vmem:[%s12490_s25 + $0x2d0] sm:$0xff] %v10930_v32  ;;  %vm5305_vm15 = vcmp.gt.f32.partialorder %v4392_v56, 0.0  ;;  %v6073_v37 = vmul.f32 -0.51027, %v4392_v56  ;;  %v2777_v27 = vsel %vm2625_vm3, %v2534_v42, %v2148_v0  ;;  %v1397_v54 = vshrl.u32 %v13495_v23, 16  ;;  %v13595_v17 = vpop.f32.mrb[122].mxu0 }
 0x25c   : > { %10735 = vst [vmem:[%s12490_s25 + $0x2f0] sm:$0xff] %v11122_v58  ;;  %v6839_v51 = vsel %vm5303_vm14, %v3399_v18, %v6071_v60  ;;  %3661 = vmatmul.mubr.bf16.gmra.mrb[200].mxu0 %v2777_v27  ;;  %4654 = vmatmul.mubr.bf16.gmra.mrb[200].mxu1 %v2777_v27  ;;  %v1401_v55 = vshll.u32 %v13567_v40, 16  ;;  %v3403_v48 = vadd.f32 %v13297_v11, %v12363_v61  ;;  %v13593_v27 = vpop.f32.mrb[121].mxu1 }
 0x25d   : > { %v4396_v32 = vadd.f32 %v16876_v47, %v12365_v33  ;;  %v10931_v23 = vpack.c.bf16 %v6839_v51, %v6838_v21  ;;  %v6841_v42 = vsel %vm5305_vm15, %v4392_v56, %v6073_v37  ;;  %v1399_v0 = vor.u32 %v1397_v54, %v13531_v3  ;;  %3670 = vmatprep.mubr.bf16.mxu0 %v16849_v49  ;;  %v13601_v37 = vpop.f32.mrb[122].mxu1  ;;  %v13603_v3 = vpop.f32.mrb[123].mxu0 }
 0x25e   : > { %v2536_v59 = vsel %vm2432_vm2, %v2343_v15, %v1934_v2  ;;  %v11123_v11 = vpack.c.bf16 %v6841_v42, %v6840_v57  ;;  %v13597_v7 = vrot.slane %v1401_v55, 1  ;;  %vm5306_vm4 = vcmp.gt.f32.partialorder %v3403_v48, 0.0  ;;  %1761 = vrot.lane.b32.xlu0 %v1396_v63, %s11521_s10  ;;  %4663 = vmatprep.mubr.bf16.mxu1 %v16849_v49  ;;  %16877 = vst [vmem:[#allocation5_spill] sm:$0xff] %v13603_v3  ;;  %v2150_v56 = vpop.permute.xlu1 %2149  ;;  %v13610_v15 = vpop.f32.mrb[123].mxu1 }
 0x25f   : > { %v6074_v18 = vmul.f32 -0.51027, %v3403_v48  ;;  %8809 = vst [vmem:[%s12490_s25 + $0x2d8] sm:$0xff] %v10931_v23  ;;  %vm5308_vm5 = vcmp.gt.f32.partialorder %v4396_v32, 0.0  ;;  %v6076_v21 = vmul.f32 -0.51027, %v4396_v32  ;;  %v3405_v26 = vadd.f32 %v13303_v22, %v12376_v62  ;;  %v1734_v55 = vpop.permute.xlu0 %1733 }
 0x260   : > { %v4398_v57 = vadd.f32 %v13305_v24, %v12432_v1  ;;  %16878 = vst [vmem:[#allocation6_spill] sm:$0xff] %v13610_v15  ;;  %10736 = vst [vmem:[%s12490_s25 + $0x2f8] sm:$0xff] %v11123_v11  ;;  %v13615_v63 = vsel %vm856_vm0, %v1399_v0, %v13597_v7  ;;  %v3407_v60 = vadd.f32 %v13310_v46, %v12363_v61  ;;  %v13628_v23 = vld [vmem:[%s11583_s7 + $0x228] sm:$0xff]  }
 0x261   : > { %v6842_v58 = vsel %vm5306_vm4, %v3403_v48, %v6074_v18  ;;  %v4400_v2 = vadd.f32 %v13312_v14, %v12365_v33  ;;  %2177 = vrot.lane.b32.xlu1 %v13615_v63, %s11522_s11  ;;  %v6844_v22 = vsel %vm5308_vm5, %v4396_v32, %v6076_v21  ;;  %vm5307_vm6 = vcmp.gt.f32.partialorder %v3405_v26, 0.0  ;;  %v13630_v32 = vpop.f32.mrb[124].mxu0 }
 0x262   : > { %v6075_v24 = vmul.f32 -0.51027, %v3405_v26  ;;  %vm5309_vm7 = vcmp.gt.f32.partialorder %v4398_v57, 0.0  ;;  %v6077_v54 = vmul.f32 -0.51027, %v4398_v57  ;;  %vm5310_vm8 = vcmp.gt.f32.partialorder %v3407_v60, 0.0  ;;  %v1936_v42 = vpop.permute.xlu1 %1935 }
 0x263   : > { %v6078_v51 = vmul.f32 -0.51027, %v3407_v60  ;;  %vm5312_vm9 = vcmp.gt.f32.partialorder %v4400_v2, 0.0  ;;  %v6080_v47 = vmul.f32 -0.51027, %v4400_v2  ;;  %v3409_v46 = vadd.f32 %v13318_v38, %v12376_v62 }
 0x264   : > { %v6843_v48 = vsel %vm5307_vm6, %v3405_v26, %v6075_v24  ;;  %v4402_v14 = vadd.f32 %v13320_v8, %v12432_v1  ;;  %v6845_v11 = vsel %vm5309_vm7, %v4398_v57, %v6077_v54  ;;  %v2780_v21 = vsel %vm2625_vm3, %v2536_v59, %v2150_v56  ;;  %v13633_v26 = vpop.f32.mrb[124].mxu1  ;;  %v13635_v24 = vpop.f32.mrb[125].mxu0  ;;  %v11468_v59 = vld [vmem:[%s11583_s7 + $0x1a0] sm:$0xff]  }
 0x265   : > { %v10932_v0 = vpack.c.bf16 %v6843_v48, %v6842_v58  ;;  %v6846_v18 = vsel %vm5310_vm8, %v3407_v60, %v6078_v51  ;;  %v11124_v38 = vpack.c.bf16 %v6845_v11, %v6844_v22  ;;  %v6848_v15 = vsel %vm5312_vm9, %v4400_v2, %v6080_v47  ;;  %3671 = vmatmul.mubr.bf16.gmra.mrb[204].mxu0 %v2780_v21  ;;  %v13638_v3 = vpop.f32.mrb[125].mxu1  ;;  %v13640_v58 = vpop.f32.mrb[126].mxu0 }
 0x266   : > { %vm5311_vm10 = vcmp.gt.f32.partialorder %v3409_v46, 0.0  ;;  %v6079_v8 = vmul.f32 -0.51027, %v3409_v46  ;;  %4664 = vmatmul.mubr.bf16.gmra.mrb[204].mxu1 %v2780_v21  ;;  %16879 = vst [vmem:[#allocation21_spill] sm:$0xff] %v13638_v3  ;;  %16880 = vst [vmem:[#allocation22_spill] sm:$0xff] %v13640_v58  ;;  %vm5313_vm11 = vcmp.gt.f32.partialorder %v4402_v14, 0.0  ;;  %v2345_v56 = vsel %vm2239_vm1, %v11468_v59, %v1734_v55  ;;  %1963 = vrot.lane.b32.xlu1 %v13567_v40, %s11523_s14 }
 0x267   : > { %8810 = vst [vmem:[%s12490_s25 + $0x300] sm:$0xff] %v10932_v0  ;;  %v6081_v57 = vmul.f32 -0.51027, %v4402_v14  ;;  %v1405_v60 = vshrl.u32 %v13567_v40, 16  ;;  %3680 = vmatprep.mubr.bf16.mxu0 %v16849_v49  ;;  %v13649_v2 = vpop.f32.mrb[126].mxu1  ;;  %v13651_v22 = vpop.f32.mrb[127].mxu0  ;;  %v2538_v48 = vsel %vm2432_vm2, %v2345_v56, %v1936_v42  ;;  %v3413_v55 = vadd.f32 %v13340_v53, %v12363_v61  ;;  %4673 = vmatprep.mubr.bf16.mxu1 %v16849_v49 }
 0x268   : > { %16881 = vst [vmem:[#allocation23_spill] sm:$0xff] %v13649_v2  ;;  %16882 = vst [vmem:[#allocation24_spill] sm:$0xff] %v13651_v22  ;;  %v6847_v54 = vsel %vm5311_vm10, %v3409_v46, %v6079_v8  ;;  %v1409_v51 = vshll.u32 %v13628_v23, 16  ;;  %v13660_v40 = vpop.f32.mrb[127].mxu1  ;;  %v4406_v46 = vadd.f32 %v13342_v41, %v12365_v33  ;;  %v3415_v8 = vadd.f32 %v13353_v45, %v12376_v62  ;;  %v16886_v56 = vld [vmem:[#allocation9_spill] sm:$0xff]  ;;  %v11469_v2 = vld [vmem:[%s11583_s7 + $0x1a8] sm:$0xff]  }
 0x269   : > { %10737 = vst [vmem:[%s12490_s25 + $0x320] sm:$0xff] %v11124_v38  ;;  %16883 = vst [vmem:[#allocation25_spill] sm:$0xff] %v13660_v40  ;;  %v10933_v47 = vpack.c.bf16 %v6847_v54, %v6846_v18  ;;  %v6849_v0 = vsel %vm5313_vm11, %v4402_v14, %v6081_v57  ;;  %v1407_v11 = vor.u32 %v1405_v60, %v13597_v7  ;;  %vm5314_vm12 = vcmp.gt.f32.partialorder %v3413_v55, 0.0  ;;  %v16884_v18 = vld [vmem:[#allocation7_spill] sm:$0xff]  ;;  %v16885_v14 = vld [vmem:[#allocation8_spill] sm:$0xff]  ;;  %v13682_v54 = vpop.f32.mrb[128].mxu0 }
 0x26a   : > { %v11125_v21 = vpack.c.bf16 %v6849_v0, %v6848_v15  ;;  %v13666_v38 = vrot.slane %v1409_v51, 1  ;;  %v6082_v42 = vmul.f32 -0.51027, %v3413_v55  ;;  %vm5316_vm13 = vcmp.gt.f32.partialorder %v4406_v46, 0.0  ;;  %1763 = vrot.lane.b32.xlu1 %v13615_v63, %s11521_s10  ;;  %v2152_v15 = vpop.permute.xlu0 %2151  ;;  %16887 = vst [vmem:[#allocation7_spill] sm:$0xff] %v13682_v54  ;;  %v13685_v51 = vpop.f32.mrb[128].mxu1 }
 0x26b   : > { %8811 = vst [vmem:[%s12490_s25 + $0x308] sm:$0xff] %v10933_v47  ;;  %v6084_v53 = vmul.f32 -0.51027, %v4406_v46  ;;  %v4408_v59 = vadd.f32 %v16884_v18, %v12432_v1  ;;  %v3417_v57 = vadd.f32 %v16885_v14, %v12363_v61  ;;  %v4410_v60 = vadd.f32 %v16886_v56, %v12365_v33  ;;  %16888 = vst [vmem:[#allocation8_spill] sm:$0xff] %v13685_v51  ;;  %v13687_v47 = vpop.f32.mrb[129].mxu0  ;;  %v16890_v18 = vld [vmem:[#allocation10_spill] sm:$0xff] }
 0x26c   : > { %10738 = vst [vmem:[%s12490_s25 + $0x328] sm:$0xff] %v11125_v21  ;;  %v1412_v41 = vsel %vm856_vm0, %v1407_v11, %v13666_v38  ;;  %v6850_v7 = vsel %vm5314_vm12, %v3413_v55, %v6082_v42  ;;  %vm5315_vm14 = vcmp.gt.f32.partialorder %v3415_v8, 0.0  ;;  %v6083_v63 = vmul.f32 -0.51027, %v3415_v8  ;;  %16889 = vst [vmem:[#allocation9_spill] sm:$0xff] %v13687_v47  ;;  %v1736_v11 = vpop.permute.xlu1 %1735  ;;  %v13694_v56 = vld [vmem:[%s11583_s7 + $0x230] sm:$0xff]  }
 0x26d   : > { %2179 = vrot.lane.b32.xlu0 %v1412_v41, %s11522_s11  ;;  %v6852_v45 = vsel %vm5316_vm13, %v4406_v46, %v6084_v53  ;;  %vm5317_vm15 = vcmp.gt.f32.partialorder %v4408_v59, 0.0  ;;  %v6085_v55 = vmul.f32 -0.51027, %v4408_v59  ;;  %vm5318_vm4 = vcmp.gt.f32.partialorder %v3417_v57, 0.0  ;;  %v16891_v46 = vld [vmem:[#allocation11_spill] sm:$0xff]  ;;  %v13696_v54 = vpop.f32.mrb[129].mxu1 }
 0x26e   : > { %v6086_v0 = vmul.f32 -0.51027, %v3417_v57  ;;  %vm5320_vm5 = vcmp.gt.f32.partialorder %v4410_v60, 0.0  ;;  %v6851_v21 = vsel %vm5315_vm14, %v3415_v8, %v6083_v63  ;;  %v6088_v42 = vmul.f32 -0.51027, %v4410_v60  ;;  %v13698_v47 = vpop.f32.mrb[130].mxu0  ;;  %v1938_v63 = vpop.permute.xlu0 %1937 }
 0x26f   : > { %v3419_v14 = vadd.f32 %v16890_v18, %v12376_v62  ;;  %v4412_v53 = vadd.f32 %v16891_v46, %v12432_v1  ;;  %16892 = vst [vmem:[#allocation10_spill] sm:$0xff] %v13698_v47  ;;  %v10934_v51 = vpack.c.bf16 %v6851_v21, %v6850_v7  ;;  %v6853_v40 = vsel %vm5317_vm15, %v4408_v59, %v6085_v55  ;;  %v13703_v18 = vpop.f32.mrb[130].mxu1  ;;  %v13708_v47 = vpop.f32.mrb[131].mxu0 }
 0x270   : > { %v6854_v22 = vsel %vm5318_vm4, %v3417_v57, %v6086_v0  ;;  %v2347_v8 = vsel %vm2239_vm1, %v11469_v2, %v1736_v11  ;;  %v11126_v58 = vpack.c.bf16 %v6853_v40, %v6852_v45  ;;  %v6856_v46 = vsel %vm5320_vm5, %v4410_v60, %v6088_v42  ;;  %v13710_v7 = vpop.f32.mrb[131].mxu1 }
 0x271   : > { %vm5319_vm6 = vcmp.gt.f32.partialorder %v3419_v14, 0.0  ;;  %v6087_v3 = vmul.f32 -0.51027, %v3419_v14  ;;  %1965 = vrot.lane.b32.xlu0 %v13628_v23, %s11523_s14  ;;  %8812 = vst [vmem:[%s12490_s25 + $0x310] sm:$0xff] %v10934_v51  ;;  %vm5321_vm7 = vcmp.gt.f32.partialorder %v4412_v53, 0.0  ;;  %v2783_v2 = vsel %vm2625_vm3, %v2538_v48, %v2152_v15 }
 0x272   : > { %v6089_v59 = vmul.f32 -0.51027, %v4412_v53  ;;  %v1413_v57 = vshrl.u32 %v13628_v23, 16  ;;  %10739 = vst [vmem:[%s12490_s25 + $0x330] sm:$0xff] %v11126_v58  ;;  %3681 = vmatmul.mubr.bf16.gmra.mrb[208].mxu0 %v2783_v2  ;;  %4674 = vmatmul.mubr.bf16.gmra.mrb[208].mxu1 %v2783_v2  ;;  %v1417_v60 = vshll.u32 %v13694_v56, 16  ;;  %v3423_v45 = vadd.f32 %v13390_v35, %v12363_v61  ;;  %v2154_v23 = vpop.permute.xlu1 %2153 }
 0x273   : > { %v6855_v40 = vsel %vm5319_vm6, %v3419_v14, %v6087_v3  ;;  %v4416_v55 = vadd.f32 %v13392_v43, %v12365_v33  ;;  %v2540_v48 = vsel %vm2432_vm2, %v2347_v8, %v1938_v63  ;;  %3690 = vmatprep.mubr.bf16.mxu0 %v16849_v49  ;;  %v13724_v3 = vpop.f32.mrb[132].mxu0  ;;  %4683 = vmatprep.mubr.bf16.mxu1 %v16849_v49  ;;  %v13730_v43 = vpop.f32.mrb[132].mxu1 }
 0x274   : > { %v10935_v51 = vpack.c.bf16 %v6855_v40, %v6854_v22  ;;  %v6857_v0 = vsel %vm5321_vm7, %v4412_v53, %v6089_v59  ;;  %v1415_v11 = vor.u32 %v1413_v57, %v13666_v38  ;;  %v13726_v15 = vrot.slane %v1417_v60, 1  ;;  %v13732_v22 = vpop.f32.mrb[133].mxu0  ;;  %v13739_v14 = vpop.f32.mrb[133].mxu1 }
 0x275   : > { %v11127_v58 = vpack.c.bf16 %v6857_v0, %v6856_v46  ;;  %vm5322_vm8 = vcmp.gt.f32.partialorder %v3423_v45, 0.0  ;;  %v6090_v35 = vmul.f32 -0.51027, %v3423_v45  ;;  %1765 = vrot.lane.b32.xlu0 %v1412_v41, %s11521_s10  ;;  %vm5324_vm9 = vcmp.gt.f32.partialorder %v4416_v55, 0.0  ;;  %v13741_v53 = vpop.f32.mrb[134].mxu0 }
 0x276   : > { %8813 = vst [vmem:[%s12490_s25 + $0x318] sm:$0xff] %v10935_v51  ;;  %v6092_v38 = vmul.f32 -0.51027, %v4416_v55  ;;  %v3425_v21 = vadd.f32 %v13398_v39, %v12376_v62  ;;  %v4418_v42 = vadd.f32 %v13400_v20, %v12432_v1  ;;  %v13746_v41 = vsel %vm856_vm0, %v1415_v11, %v13726_v15  ;;  %v13752_v39 = vpop.f32.mrb[134].mxu1  ;;  %v13754_v20 = vpop.f32.mrb[135].mxu0  ;;  %v16896_v51 = vld [vmem:[#allocation12_spill] sm:$0xff] }
 0x277   : > { %10740 = vst [vmem:[%s12490_s25 + $0x338] sm:$0xff] %v11127_v58  ;;  %v6858_v8 = vsel %vm5322_vm8, %v3423_v45, %v6090_v35  ;;  %v3427_v63 = vadd.f32 %v13404_v13, %v12363_v61  ;;  %v4420_v46 = vadd.f32 %v13406_v52, %v12365_v33  ;;  %16893 = vst [vmem:[#allocation11_spill] sm:$0xff] %v13752_v39  ;;  %2181 = vrot.lane.b32.xlu1 %v13746_v41, %s11522_s11  ;;  %v13758_v57 = vpop.f32.mrb[135].mxu1  ;;  %v13765_v11 = vld [vmem:[%s11583_s7 + $0x238] sm:$0xff]  }
 0x278   : > { %16894 = vst [vmem:[#allocation26_spill] sm:$0xff] %v13754_v20  ;;  %v6860_v59 = vsel %vm5324_vm9, %v4416_v55, %v6092_v38  ;;  %vm5323_vm10 = vcmp.gt.f32.partialorder %v3425_v21, 0.0  ;;  %v6091_v2 = vmul.f32 -0.51027, %v3425_v21  ;;  %vm5325_vm11 = vcmp.gt.f32.partialorder %v4418_v42, 0.0  ;;  %16895 = vst [vmem:[#allocation27_spill] sm:$0xff] %v13758_v57  ;;  %v1940_v57 = vpop.permute.xlu1 %1939 }
 0x279   : > { %v6093_v40 = vmul.f32 -0.51027, %v4418_v42  ;;  %vm5326_vm12 = vcmp.gt.f32.partialorder %v3427_v63, 0.0  ;;  %v6094_v13 = vmul.f32 -0.51027, %v3427_v63  ;;  %vm5328_vm13 = vcmp.gt.f32.partialorder %v4420_v46, 0.0 }
 0x27a   : > { %v6859_v60 = vsel %vm5323_vm10, %v3425_v21, %v6091_v2  ;;  %v6096_v52 = vmul.f32 -0.51027, %v4420_v46  ;;  %v3429_v45 = vadd.f32 %v13415_v5, %v12376_v62  ;;  %v4422_v0 = vadd.f32 %v16896_v51, %v12432_v1  ;;  %v1738_v5 = vpop.permute.xlu0 %1737  ;;  %v13768_v2 = vpop.f32.mrb[136].mxu0 }
 0x27b   : > { %v10936_v55 = vpack.c.bf16 %v6859_v60, %v6858_v8  ;;  %v6861_v58 = vsel %vm5325_vm11, %v4418_v42, %v6093_v40  ;;  %v6862_v35 = vsel %vm5326_vm12, %v3427_v63, %v6094_v13  ;;  %v2786_v38 = vsel %vm2625_vm3, %v2540_v48, %v2154_v23  ;;  %v11470_v8 = vld [vmem:[%s11583_s7 + $0x1b0] sm:$0xff]   ;;  %1967 = vrot.lane.b32.xlu1 %v13694_v56, %s11523_s14  ;;  %v13777_v23 = vpop.f32.mrb[136].mxu1  ;;  %v13779_v63 = vpop.f32.mrb[137].mxu0 }
 0x27c   : > { %v11128_v20 = vpack.c.bf16 %v6861_v58, %v6860_v59  ;;  %v6864_v39 = vsel %vm5328_vm13, %v4420_v46, %v6096_v52  ;;  %vm5327_vm14 = vcmp.gt.f32.partialorder %v3429_v45, 0.0  ;;  %v6095_v21 = vmul.f32 -0.51027, %v3429_v45  ;;  %3691 = vmatmul.mubr.bf16.gmra.mrb[212].mxu0 %v2786_v38  ;;  %4684 = vmatmul.mubr.bf16.gmra.mrb[212].mxu1 %v2786_v38  ;;  %v13790_v60 = vpop.f32.mrb[138].mxu0 }
 0x27d   : > { %8814 = vst [vmem:[%s12490_s25 + $0x340] sm:$0xff] %v10936_v55  ;;  %vm5329_vm15 = vcmp.gt.f32.partialorder %v4422_v0, 0.0  ;;  %v6097_v51 = vmul.f32 -0.51027, %v4422_v0  ;;  %v2349_v42 = vsel %vm2239_vm1, %v11470_v8, %v1738_v5  ;;  %v1421_v48 = vshrl.u32 %v13694_v56, 16  ;;  %3700 = vmatprep.mubr.bf16.mxu0 %v16849_v49  ;;  %4693 = vmatprep.mubr.bf16.mxu1 %v16849_v49  ;;  %v13788_v56 = vpop.f32.mrb[137].mxu1 }
 0x27e   : > { %10741 = vst [vmem:[%s12490_s25 + $0x360] sm:$0xff] %v11128_v20  ;;  %v6863_v46 = vsel %vm5327_vm14, %v3429_v45, %v6095_v21  ;;  %v1425_v59 = vshll.u32 %v13765_v11, 16  ;;  %v2542_v40 = vsel %vm2432_vm2, %v2349_v42, %v1940_v57  ;;  %v3433_v13 = vadd.f32 %v13436_v9, %v12363_v61  ;;  %v13796_v57 = vpop.f32.mrb[138].mxu1  ;;  %v13798_v58 = vpop.f32.mrb[139].mxu0 }
 0x27f   : > { %v10937_v52 = vpack.c.bf16 %v6863_v46, %v6862_v35  ;;  %v6865_v55 = vsel %vm5329_vm15, %v4422_v0, %v6097_v51  ;;  %v1423_v20 = vor.u32 %v1421_v48, %v13726_v15  ;;  %v4426_v45 = vadd.f32 %v13440_v4, %v12365_v33  ;;  %v13802_v5 = vpop.f32.mrb[139].mxu1  ;;  %1767 = vrot.lane.b32.xlu1 %v13746_v41, %s11521_s10  ;;  %v2156_v41 = vpop.permute.xlu0 %2155 }
 0x280   : > { %v11129_v9 = vpack.c.bf16 %v6865_v55, %v6864_v39  ;;  %v13800_v38 = vrot.slane %v1425_v59, 1  ;;  %vm5330_vm4 = vcmp.gt.f32.partialorder %v3433_v13, 0.0  ;;  %v6098_v21 = vmul.f32 -0.51027, %v3433_v13  ;;  %16897 = vst [vmem:[#allocation12_spill] sm:$0xff] %v13802_v5  ;;  %v13826_v55 = vpop.f32.mrb[140].mxu0 }
 0x281   : > { %8815 = vst [vmem:[%s12490_s25 + $0x348] sm:$0xff] %v10937_v52  ;;  %vm5332_vm5 = vcmp.gt.f32.partialorder %v4426_v45, 0.0  ;;  %v6100_v0 = vmul.f32 -0.51027, %v4426_v45  ;;  %v3435_v15 = vadd.f32 %v13442_v19, %v12376_v62  ;;  %v4428_v4 = vadd.f32 %v13448_v12, %v12432_v1  ;;  %v13824_v52 = vld [vmem:[%s11583_s7 + $0x240] sm:$0xff]   ;;  %16898 = vst [vmem:[#allocation28_spill] sm:$0xff] %v13826_v55 }
 0x282   : > { %10742 = vst [vmem:[%s12490_s25 + $0x368] sm:$0xff] %v11129_v9  ;;  %v1428_v39 = vsel %vm856_vm0, %v1423_v20, %v13800_v38  ;;  %v6866_v35 = vsel %vm5330_vm4, %v3433_v13, %v6098_v21  ;;  %v3437_v51 = vadd.f32 %v13450_v31, %v12363_v61  ;;  %v4430_v8 = vadd.f32 %v13458_v28, %v12365_v33  ;;  %v1740_v13 = vpop.permute.xlu1 %1739  ;;  %v11471_v21 = vld [vmem:[%s11583_s7 + $0x1b8] sm:$0xff]  }
 0x283   : > { %2183 = vrot.lane.b32.xlu0 %v1428_v39, %s11522_s11  ;;  %v6868_v19 = vsel %vm5332_vm5, %v4426_v45, %v6100_v0  ;;  %vm5331_vm6 = vcmp.gt.f32.partialorder %v3435_v15, 0.0  ;;  %v6099_v12 = vmul.f32 -0.51027, %v3435_v15  ;;  %vm5333_vm7 = vcmp.gt.f32.partialorder %v4428_v4, 0.0  ;;  %v1942_v55 = vpop.permute.xlu0 %1941 }
 0x284   : > { %v6101_v42 = vmul.f32 -0.51027, %v4428_v4  ;;  %vm5334_vm8 = vcmp.gt.f32.partialorder %v3437_v51, 0.0  ;;  %v6102_v48 = vmul.f32 -0.51027, %v3437_v51  ;;  %vm5336_vm9 = vcmp.gt.f32.partialorder %v4430_v8, 0.0 }
 0x285   : > { %v6867_v46 = vsel %vm5331_vm6, %v3435_v15, %v6099_v12  ;;  %v6104_v59 = vmul.f32 -0.51027, %v4430_v8  ;;  %v3439_v31 = vadd.f32 %v13460_v50, %v12376_v62  ;;  %v4432_v28 = vadd.f32 %v13466_v30, %v12432_v1  ;;  %v13830_v15 = vpop.f32.mrb[140].mxu1  ;;  %v13832_v12 = vpop.f32.mrb[141].mxu0 }
 0x286   : > { %v10938_v20 = vpack.c.bf16 %v6867_v46, %v6866_v35  ;;  %v6869_v45 = vsel %vm5333_vm7, %v4428_v4, %v6101_v42  ;;  %v6870_v9 = vsel %vm5334_vm8, %v3437_v51, %v6102_v48  ;;  %v2351_v0 = vsel %vm2239_vm1, %v11471_v21, %v1740_v13  ;;  %v13837_v35 = vpop.f32.mrb[141].mxu1  ;;  %v13842_v48 = vpop.f32.mrb[142].mxu0  ;;  %v16899_v13 = vld [vmem:[#allocation13_spill] sm:$0xff] }
 0x287   : > { %v11130_v50 = vpack.c.bf16 %v6869_v45, %v6868_v19  ;;  %v6872_v30 = vsel %vm5336_vm9, %v4430_v8, %v6104_v59  ;;  %vm5335_vm10 = vcmp.gt.f32.partialorder %v3439_v31, 0.0  ;;  %v6103_v5 = vmul.f32 -0.51027, %v3439_v31  ;;  %1969 = vrot.lane.b32.xlu0 %v13765_v11, %s11523_s14  ;;  %v13844_v19 = vpop.f32.mrb[142].mxu1 }
 0x288   : > { %8816 = vst [vmem:[%s12490_s25 + $0x350] sm:$0xff] %v10938_v20  ;;  %vm5337_vm11 = vcmp.gt.f32.partialorder %v4432_v28, 0.0  ;;  %v6105_v4 = vmul.f32 -0.51027, %v4432_v28  ;;  %v2789_v51 = vsel %vm2625_vm3, %v2542_v40, %v2156_v41  ;;  %v1429_v42 = vshrl.u32 %v13765_v11, 16  ;;  %v13852_v40 = vpop.f32.mrb[143].mxu0 }
 0x289   : > { %10743 = vst [vmem:[%s12490_s25 + $0x370] sm:$0xff] %v11130_v50  ;;  %v6871_v8 = vsel %vm5335_vm10, %v3439_v31, %v6103_v5  ;;  %3701 = vmatmul.mubr.bf16.gmra.mrb[216].mxu0 %v2789_v51  ;;  %4694 = vmatmul.mubr.bf16.gmra.mrb[216].mxu1 %v2789_v51  ;;  %v1433_v46 = vshll.u32 %v13824_v52, 16  ;;  %v3443_v59 = vadd.f32 %v13488_v10, %v12363_v61  ;;  %16900 = vst [vmem:[#allocation13_spill] sm:$0xff] %v13852_v40  ;;  %v13854_v11 = vpop.f32.mrb[143].mxu1  ;;  %v16902_v51 = vld [vmem:[#allocation14_spill] sm:$0xff] }
 0x28a   : > { %v4436_v20 = vadd.f32 %v16899_v13, %v12365_v33  ;;  %16901 = vst [vmem:[#allocation29_spill] sm:$0xff] %v13854_v11  ;;  %v10939_v41 = vpack.c.bf16 %v6871_v8, %v6870_v9  ;;  %v6873_v45 = vsel %vm5337_vm11, %v4432_v28, %v6105_v4  ;;  %v1431_v5 = vor.u32 %v1429_v42, %v13800_v38  ;;  %v11472_v11 = vld [vmem:[%s11583_s7 + $0x1c0] sm:$0xff]  }
 0x28b   : > { %v2544_v31 = vsel %vm2432_vm2, %v2351_v0, %v1942_v55  ;;  %3710 = vmatprep.mubr.bf16.mxu0 %v16849_v49  ;;  %v11131_v21 = vpack.c.bf16 %v6873_v45, %v6872_v30  ;;  %v1435_v50 = vrot.slane %v1433_v46, 1  ;;  %vm5338_vm12 = vcmp.gt.f32.partialorder %v3443_v59, 0.0  ;;  %1769 = vrot.lane.b32.xlu0 %v1428_v39, %s11521_s10  ;;  %v2158_v30 = vpop.permute.xlu1 %2157 }
 0x28c   : > { %v6106_v10 = vmul.f32 -0.51027, %v3443_v59  ;;  %4703 = vmatprep.mubr.bf16.mxu1 %v16849_v49  ;;  %8817 = vst [vmem:[%s12490_s25 + $0x358] sm:$0xff] %v10939_v41  ;;  %vm5340_vm13 = vcmp.gt.f32.partialorder %v4436_v20, 0.0  ;;  %v6108_v9 = vmul.f32 -0.51027, %v4436_v20  ;;  %v3445_v28 = vadd.f32 %v16902_v51, %v12376_v62 }
 0x28d   : > { %v4438_v38 = vadd.f32 %v13503_v25, %v12432_v1  ;;  %10744 = vst [vmem:[%s12490_s25 + $0x378] sm:$0xff] %v11131_v21  ;;  %v1436_v55 = vsel %vm856_vm0, %v1431_v5, %v1435_v50  ;;  %v3447_v39 = vadd.f32 %v13505_v34, %v12363_v61  ;;  %v4440_v4 = vadd.f32 %v13508_v6, %v12365_v33  ;;  %v16903_v34 = vld [vmem:[#allocation15_spill] sm:$0xff] }
 0x28e   : > { %v6874_v0 = vsel %vm5338_vm12, %v3443_v59, %v6106_v10  ;;  %2185 = vrot.lane.b32.xlu1 %v1436_v55, %s11522_s11  ;;  %v6876_v42 = vsel %vm5340_vm13, %v4436_v20, %v6108_v9  ;;  %vm5339_vm14 = vcmp.gt.f32.partialorder %v3445_v28, 0.0  ;;  %v6107_v8 = vmul.f32 -0.51027, %v3445_v28  ;;  %v13879_v6 = vld [vmem:[%s11583_s7 + $0x248] sm:$0xff]  }
 0x28f   : > { %vm5341_vm15 = vcmp.gt.f32.partialorder %v4438_v38, 0.0  ;;  %v6109_v46 = vmul.f32 -0.51027, %v4438_v38  ;;  %vm5342_vm4 = vcmp.gt.f32.partialorder %v3447_v39, 0.0  ;;  %v6110_v25 = vmul.f32 -0.51027, %v3447_v39  ;;  %v1944_v9 = vpop.permute.xlu1 %1943 }
 0x290   : > { %vm5344_vm5 = vcmp.gt.f32.partialorder %v4440_v4, 0.0  ;;  %v6875_v13 = vsel %vm5339_vm14, %v3445_v28, %v6107_v8  ;;  %v6112_v59 = vmul.f32 -0.51027, %v4440_v4  ;;  %v3449_v41 = vadd.f32 %v13510_v29, %v12376_v62  ;;  %v1742_v29 = vpop.permute.xlu0 %1741 }
 0x291   : > { %v4442_v45 = vadd.f32 %v16903_v34, %v12432_v1  ;;  %v10940_v20 = vpack.c.bf16 %v6875_v13, %v6874_v0  ;;  %v6877_v5 = vsel %vm5341_vm15, %v4438_v38, %v6109_v46  ;;  %v6878_v21 = vsel %vm5342_vm4, %v3447_v39, %v6110_v25  ;;  %v16904_v39 = vld [vmem:[#allocation16_spill] sm:$0xff] }
 0x292   : > { %v2792_v10 = vsel %vm2625_vm3, %v2544_v31, %v2158_v30  ;;  %v11132_v51 = vpack.c.bf16 %v6877_v5, %v6876_v42  ;;  %v6880_v28 = vsel %vm5344_vm5, %v4440_v4, %v6112_v59  ;;  %vm5343_vm6 = vcmp.gt.f32.partialorder %v3449_v41, 0.0  ;;  %1971 = vrot.lane.b32.xlu1 %v13824_v52, %s11523_s14 }
 0x293   : > { %v6111_v8 = vmul.f32 -0.51027, %v3449_v41  ;;  %3711 = vmatmul.mubr.bf16.gmra.mrb[220].mxu0 %v2792_v10  ;;  %4704 = vmatmul.mubr.bf16.gmra.mrb[220].mxu1 %v2792_v10  ;;  %8818 = vst [vmem:[%s12490_s25 + $0x380] sm:$0xff] %v10940_v20  ;;  %vm5345_vm7 = vcmp.gt.f32.partialorder %v4442_v45, 0.0  ;;  %v6113_v34 = vmul.f32 -0.51027, %v4442_v45  ;;  %v2353_v40 = vsel %vm2239_vm1, %v11472_v11, %v1742_v29 }
 0x294   : > { %v1437_v31 = vshrl.u32 %v13824_v52, 16  ;;  %3720 = vmatprep.mubr.bf16.mxu0 %v16849_v49  ;;  %10745 = vst [vmem:[%s12490_s25 + $0x3a0] sm:$0xff] %v11132_v51  ;;  %v1441_v0 = vshll.u32 %v13879_v6, 16  ;;  %v2546_v30 = vsel %vm2432_vm2, %v2353_v40, %v1944_v9  ;;  %v3453_v4 = vadd.f32 %v16904_v39, %v12363_v61  ;;  %4713 = vmatprep.mubr.bf16.mxu1 %v16849_v49  ;;  %v16905_v52 = vld [vmem:[#allocation17_spill] sm:$0xff]  ;;  %v16906_v20 = vld [vmem:[#allocation18_spill] sm:$0xff] }
 0x295   : > { %v6879_v38 = vsel %vm5343_vm6, %v3449_v41, %v6111_v8  ;;  %v6881_v42 = vsel %vm5345_vm7, %v4442_v45, %v6113_v34  ;;  %v4446_v25 = vadd.f32 %v16905_v52, %v12365_v33  ;;  %v3455_v5 = vadd.f32 %v16906_v20, %v12376_v62  ;;  %v16907_v10 = vld [vmem:[#allocation2_spill] sm:$0xff]  ;;  %v1744_v52 = vpop.permute.xlu1 %1743 }
 0x296   : > { %v10941_v11 = vpack.c.bf16 %v6879_v38, %v6878_v21  ;;  %v1439_v46 = vor.u32 %v1437_v31, %v1435_v50  ;;  %v11133_v13 = vpack.c.bf16 %v6881_v42, %v6880_v28  ;;  %v13897_v59 = vrot.slane %v1441_v0, 1  ;;  %1771 = vrot.lane.b32.xlu1 %v1436_v55, %s11521_s10  ;;  %v16908_v21 = vld [vmem:[#allocation3_spill] sm:$0xff]  ;;  %v2160_v55 = vpop.permute.xlu0 %2159  ;;  %v16911_v42 = vld [vmem:[#allocation4_spill] sm:$0xff] }
 0x297   : > { %vm5346_vm8 = vcmp.gt.f32.partialorder %v3453_v4, 0.0  ;;  %v6114_v41 = vmul.f32 -0.51027, %v3453_v4  ;;  %vm5348_vm9 = vcmp.gt.f32.partialorder %v4446_v25, 0.0  ;;  %v6116_v40 = vmul.f32 -0.51027, %v4446_v25 }
 0x298   : > { %8819 = vst [vmem:[%s12490_s25 + $0x388] sm:$0xff] %v10941_v11  ;;  %v4448_v9 = vadd.f32 %v16907_v10, %v12432_v1  ;;  %10746 = vst [vmem:[%s12490_s25 + $0x3a8] sm:$0xff] %v11133_v13  ;;  %v1444_v50 = vsel %vm856_vm0, %v1439_v46, %v13897_v59  ;;  %v3457_v51 = vadd.f32 %v16908_v21, %v12363_v61  ;;  %v16909_v28 = vld [vmem:[#allocation19_spill] sm:$0xff]  ;;  %vm5347_vm10 = vcmp.gt.f32.partialorder %v3455_v5, 0.0  ;;  %v13918_v13 = vld [vmem:[%s11583_s7 + $0x250] sm:$0xff]  }
 0x299   : > { %v6882_v45 = vsel %vm5346_vm8, %v3453_v4, %v6114_v41  ;;  %v4450_v8 = vadd.f32 %v16909_v28, %v12365_v33  ;;  %2187 = vrot.lane.b32.xlu0 %v1444_v50, %s11522_s11  ;;  %v6884_v29 = vsel %vm5348_vm9, %v4446_v25, %v6116_v40  ;;  %v6115_v34 = vmul.f32 -0.51027, %v3455_v5  ;;  %v16910_v4 = vld [vmem:[#allocation20_spill] sm:$0xff]  ;;  %v13920_v25 = vpop.f32.mrb[144].mxu0  ;;  %v11473_v10 = vld [vmem:[%s11583_s7 + $0x1c8] sm:$0xff]  }
 0x29a   : > { %vm5349_vm11 = vcmp.gt.f32.partialorder %v4448_v9, 0.0  ;;  %v6117_v31 = vmul.f32 -0.51027, %v4448_v9  ;;  %vm5350_vm12 = vcmp.gt.f32.partialorder %v3457_v51, 0.0  ;;  %v6118_v38 = vmul.f32 -0.51027, %v3457_v51 }
 0x29b   : > { %vm5352_vm13 = vcmp.gt.f32.partialorder %v4450_v8, 0.0  ;;  %v6883_v0 = vsel %vm5347_vm10, %v3455_v5, %v6115_v34  ;;  %v6120_v39 = vmul.f32 -0.51027, %v4450_v8  ;;  %v3459_v11 = vadd.f32 %v16910_v4, %v12376_v62  ;;  %16912 = vst [vmem:[#allocation14_spill] sm:$0xff] %v13920_v25  ;;  %v13924_v5 = vpop.f32.mrb[144].mxu1  ;;  %v13926_v28 = vpop.f32.mrb[145].mxu0 }
 0x29c   : > { %v4452_v46 = vadd.f32 %v16911_v42, %v12432_v1  ;;  %v10942_v41 = vpack.c.bf16 %v6883_v0, %v6882_v45  ;;  %v6885_v40 = vsel %vm5349_vm11, %v4448_v9, %v6117_v31  ;;  %v6886_v20 = vsel %vm5350_vm12, %v3457_v51, %v6118_v38  ;;  %v1946_v25 = vpop.permute.xlu0 %1945  ;;  %v13931_v45 = vpop.f32.mrb[145].mxu1 }
 0x29d   : > { %v2355_v21 = vsel %vm2239_vm1, %v11473_v10, %v1744_v52  ;;  %v11134_v34 = vpack.c.bf16 %v6885_v40, %v6884_v29  ;;  %v6888_v4 = vsel %vm5352_vm13, %v4450_v8, %v6120_v39  ;;  %vm5351_vm14 = vcmp.gt.f32.partialorder %v3459_v11, 0.0  ;;  %1973 = vrot.lane.b32.xlu0 %v13879_v6, %s11523_s14  ;;  %v13936_v38 = vpop.f32.mrb[146].mxu0  ;;  %v13938_v29 = vpop.f32.mrb[146].mxu1 }
 0x29e   : > { %v6119_v42 = vmul.f32 -0.51027, %v3459_v11  ;;  %8820 = vst [vmem:[%s12490_s25 + $0x390] sm:$0xff] %v10942_v41  ;;  %vm5353_vm15 = vcmp.gt.f32.partialorder %v4452_v46, 0.0  ;;  %v6121_v9 = vmul.f32 -0.51027, %v4452_v46  ;;  %v2795_v51 = vsel %vm2625_vm3, %v2546_v30, %v2160_v55 }
 0x29f   : > { %v1445_v31 = vshrl.u32 %v13879_v6, 16  ;;  %10747 = vst [vmem:[%s12490_s25 + $0x3b0] sm:$0xff] %v11134_v34  ;;  %3721 = vmatmul.mubr.bf16.gmra.mrb[224].mxu0 %v2795_v51  ;;  %4714 = vmatmul.mubr.bf16.gmra.mrb[224].mxu1 %v2795_v51  ;;  %v1449_v0 = vshll.u32 %v13918_v13, 16  ;;  %v3463_v39 = vadd.f32 %v13578_v36, %v12363_v61  ;;  %v4456_v52 = vadd.f32 %v13586_v44, %v12365_v33  ;;  %v13946_v30 = vpop.f32.mrb[147].mxu0  ;;  %v13948_v6 = vpop.f32.mrb[147].mxu1 }
 0x2a0   : > { %v6887_v8 = vsel %vm5351_vm14, %v3459_v11, %v6119_v42  ;;  %v6889_v41 = vsel %vm5353_vm15, %v4452_v46, %v6121_v9  ;;  %v2548_v40 = vsel %vm2432_vm2, %v2355_v21, %v1946_v25  ;;  %3730 = vmatprep.mubr.bf16.mxu0 %v16849_v49  ;;  %v2162_v44 = vpop.permute.xlu1 %2161  ;;  %4723 = vmatprep.mubr.bf16.mxu1 %v16849_v49  ;;  %v13976_v9 = vpop.f32.mrb[148].mxu1 }
 0x2a1   : > { %v10943_v55 = vpack.c.bf16 %v6887_v8, %v6886_v20  ;;  %v1447_v11 = vor.u32 %v1445_v31, %v13897_v59  ;;  %v11135_v10 = vpack.c.bf16 %v6889_v41, %v6888_v4  ;;  %v13954_v36 = vrot.slane %v1449_v0, 1  ;;  %1773 = vrot.lane.b32.xlu0 %v1444_v50, %s11521_s10  ;;  %16914 = vst [vmem:[#allocation16_spill] sm:$0xff] %v13976_v9  ;;  %v13983_v41 = vld [vmem:[%s11583_s7 + $0x258] sm:$0xff]  }
 0x2a2   : > { %vm5354_vm4 = vcmp.gt.f32.partialorder %v3463_v39, 0.0  ;;  %v6122_v34 = vmul.f32 -0.51027, %v3463_v39  ;;  %vm5356_vm5 = vcmp.gt.f32.partialorder %v4456_v52, 0.0  ;;  %v6124_v46 = vmul.f32 -0.51027, %v4456_v52 }
 0x2a3   : > { %8821 = vst [vmem:[%s12490_s25 + $0x398] sm:$0xff] %v10943_v55  ;;  %v3465_v59 = vadd.f32 %v13588_v16, %v12376_v62  ;;  %v4458_v25 = vadd.f32 %v13593_v27, %v12432_v1  ;;  %10748 = vst [vmem:[%s12490_s25 + $0x3b8] sm:$0xff] %v11135_v10  ;;  %v13966_v20 = vsel %vm856_vm0, %v1447_v11, %v13954_v36  ;;  %v13974_v27 = vpop.f32.mrb[148].mxu0  ;;  %v16916_v55 = vld [vmem:[#allocation6_spill] sm:$0xff]  ;;  %v13987_v10 = vpop.f32.mrb[149].mxu1 }
 0x2a4   : > { %v6890_v21 = vsel %vm5354_vm4, %v3463_v39, %v6122_v34  ;;  %v3467_v50 = vadd.f32 %v13595_v17, %v12363_v61  ;;  %v4460_v4 = vadd.f32 %v13601_v37, %v12365_v33  ;;  %2189 = vrot.lane.b32.xlu1 %v13966_v20, %s11522_s11  ;;  %v6892_v16 = vsel %vm5356_vm5, %v4456_v52, %v6124_v46  ;;  %v1948_v17 = vpop.permute.xlu1 %1947  ;;  %v16915_v37 = vld [vmem:[#allocation5_spill] sm:$0xff]  ;;  %v13985_v11 = vpop.f32.mrb[149].mxu0 }
 0x2a5   : > { %vm5355_vm6 = vcmp.gt.f32.partialorder %v3465_v59, 0.0  ;;  %v6123_v42 = vmul.f32 -0.51027, %v3465_v59  ;;  %vm5357_vm7 = vcmp.gt.f32.partialorder %v4458_v25, 0.0  ;;  %16913 = vst [vmem:[#allocation15_spill] sm:$0xff] %v13974_v27  ;;  %v3469_v39 = vadd.f32 %v16915_v37, %v12376_v62  ;;  %16917 = vst [vmem:[#allocation17_spill] sm:$0xff] %v13985_v11 }
 0x2a6   : > { %v6125_v51 = vmul.f32 -0.51027, %v4458_v25  ;;  %vm5358_vm8 = vcmp.gt.f32.partialorder %v3467_v50, 0.0  ;;  %v6126_v31 = vmul.f32 -0.51027, %v3467_v50  ;;  %vm5360_vm9 = vcmp.gt.f32.partialorder %v4460_v4, 0.0 }
 0x2a7   : > { %v6891_v8 = vsel %vm5355_vm6, %v3465_v59, %v6123_v42  ;;  %v6128_v0 = vmul.f32 -0.51027, %v4460_v4  ;;  %v4462_v52 = vadd.f32 %v16916_v55, %v12432_v1  ;;  %16918 = vst [vmem:[#allocation18_spill] sm:$0xff] %v13987_v10  ;;  %v2798_v59 = vsel %vm2625_vm3, %v2548_v40, %v2162_v44  ;;  %v13991_v42 = vpop.f32.mrb[150].mxu0  ;;  %v13993_v37 = vpop.f32.mrb[150].mxu1 }
 0x2a8   : > { %v10944_v34 = vpack.c.bf16 %v6891_v8, %v6890_v21  ;;  %v6893_v46 = vsel %vm5357_vm7, %v4458_v25, %v6125_v51  ;;  %v6894_v9 = vsel %vm5358_vm8, %v3467_v50, %v6126_v31  ;;  %vm5359_vm10 = vcmp.gt.f32.partialorder %v3469_v39, 0.0  ;;  %3731 = vmatmul.mubr.bf16.gmra.mrb[228].mxu0 %v2798_v59  ;;  %4724 = vmatmul.mubr.bf16.gmra.mrb[228].mxu1 %v2798_v59  ;;  %v1746_v10 = vpop.permute.xlu0 %1745  ;;  %v13996_v21 = vpop.f32.mrb[151].mxu0  ;;  %v11474_v50 = vld [vmem:[%s11583_s7 + $0x1d0] sm:$0xff]   ;;  %v16922_v59 = vld [vmem:[#allocation22_spill] sm:$0xff] }
 0x2a9   : > { %v11136_v27 = vpack.c.bf16 %v6893_v46, %v6892_v16  ;;  %v6896_v55 = vsel %vm5360_vm9, %v4460_v4, %v6128_v0  ;;  %v6127_v11 = vmul.f32 -0.51027, %v3469_v39  ;;  %16919 = vst [vmem:[#allocation2_spill] sm:$0xff] %v13996_v21  ;;  %vm5361_vm11 = vcmp.gt.f32.partialorder %v4462_v52, 0.0  ;;  %1975 = vrot.lane.b32.xlu1 %v13918_v13, %s11523_s14  ;;  %3740 = vmatprep.mubr.bf16.mxu0 %v16849_v49  ;;  %v14005_v4 = vpop.f32.mrb[151].mxu1 }
 0x2aa   : > { %8822 = vst [vmem:[%s12490_s25 + $0x3c0] sm:$0xff] %v10944_v34  ;;  %v6129_v25 = vmul.f32 -0.51027, %v4462_v52  ;;  %v2357_v40 = vsel %vm2239_vm1, %v11474_v50, %v1746_v10  ;;  %v1453_v44 = vshrl.u32 %v13918_v13, 16  ;;  %16920 = vst [vmem:[#allocation3_spill] sm:$0xff] %v14005_v4  ;;  %v1457_v51 = vshll.u32 %v13983_v41, 16  ;;  %4733 = vmatprep.mubr.bf16.mxu1 %v16849_v49 }
 0x2ab   : > { %10749 = vst [vmem:[%s12490_s25 + $0x3e0] sm:$0xff] %v11136_v27  ;;  %v6895_v16 = vsel %vm5359_vm10, %v3469_v39, %v6127_v11  ;;  %v2550_v31 = vsel %vm2432_vm2, %v2357_v40, %v1948_v17  ;;  %v3473_v8 = vadd.f32 %v13630_v32, %v12363_v61  ;;  %v4466_v34 = vadd.f32 %v13633_v26, %v12365_v33  ;;  %v16921_v11 = vld [vmem:[#allocation21_spill] sm:$0xff] }
 0x2ac   : > { %v10945_v0 = vpack.c.bf16 %v6895_v16, %v6894_v9  ;;  %v6897_v13 = vsel %vm5361_vm11, %v4462_v52, %v6129_v25  ;;  %v1455_v10 = vor.u32 %v1453_v44, %v13954_v36  ;;  %v14017_v46 = vrot.slane %v1457_v51, 1  ;;  %v2164_v52 = vpop.permute.xlu0 %2163  ;;  %v16923_v25 = vld [vmem:[#allocation23_spill] sm:$0xff]  ;;  %v14036_v44 = vpop.f32.mrb[152].mxu1 }
 0x2ad   : > { %v11137_v27 = vpack.c.bf16 %v6897_v13, %v6896_v55  ;;  %vm5362_vm12 = vcmp.gt.f32.partialorder %v3473_v8, 0.0  ;;  %v6130_v39 = vmul.f32 -0.51027, %v3473_v8  ;;  %vm5364_vm13 = vcmp.gt.f32.partialorder %v4466_v34, 0.0  ;;  %1775 = vrot.lane.b32.xlu1 %v13966_v20, %s11521_s10  ;;  %v14034_v20 = vpop.f32.mrb[152].mxu0  ;;  %16925 = vst [vmem:[#allocation20_spill] sm:$0xff] %v14036_v44 }
 0x2ae   : > { %8823 = vst [vmem:[%s12490_s25 + $0x3c8] sm:$0xff] %v10945_v0  ;;  %v6132_v17 = vmul.f32 -0.51027, %v4466_v34  ;;  %v3475_v32 = vadd.f32 %v13635_v24, %v12376_v62  ;;  %v4468_v9 = vadd.f32 %v16921_v11, %v12432_v1  ;;  %v1460_v26 = vsel %vm856_vm0, %v1455_v10, %v14017_v46  ;;  %16924 = vst [vmem:[#allocation19_spill] sm:$0xff] %v14034_v20  ;;  %v16926_v13 = vld [vmem:[#allocation24_spill] sm:$0xff]  ;;  %v14045_v11 = vpop.f32.mrb[153].mxu0 }
 0x2af   : > { %10750 = vst [vmem:[%s12490_s25 + $0x3e8] sm:$0xff] %v11137_v27  ;;  %v6898_v36 = vsel %vm5362_vm12, %v3473_v8, %v6130_v39  ;;  %v3477_v55 = vadd.f32 %v16922_v59, %v12363_v61  ;;  %v4470_v50 = vadd.f32 %v16923_v25, %v12365_v33  ;;  %2191 = vrot.lane.b32.xlu0 %v1460_v26, %s11522_s11  ;;  %v16927_v27 = vld [vmem:[#allocation25_spill] sm:$0xff]  ;;  %v1748_v39 = vpop.permute.xlu1 %1747  ;;  %16928 = vst [vmem:[#allocation4_spill] sm:$0xff] %v14045_v11 }
 0x2b0   : > { %v6900_v24 = vsel %vm5364_vm13, %v4466_v34, %v6132_v17  ;;  %vm5363_vm14 = vcmp.gt.f32.partialorder %v3475_v32, 0.0  ;;  %v6131_v40 = vmul.f32 -0.51027, %v3475_v32  ;;  %vm5365_vm15 = vcmp.gt.f32.partialorder %v4468_v9, 0.0  ;;  %v14043_v17 = vld [vmem:[%s11583_s7 + $0x260] sm:$0xff]   ;;  %v11475_v20 = vld [vmem:[%s11583_s7 + $0x1d8] sm:$0xff]   ;;  %v1950_v11 = vpop.permute.xlu0 %1949 }
 0x2b1   : > { %v6133_v16 = vmul.f32 -0.51027, %v4468_v9  ;;  %vm5366_vm4 = vcmp.gt.f32.partialorder %v3477_v55, 0.0  ;;  %v6134_v51 = vmul.f32 -0.51027, %v3477_v55  ;;  %vm5368_vm5 = vcmp.gt.f32.partialorder %v4470_v50, 0.0 }
 0x2b2   : > { %v6899_v8 = vsel %vm5363_vm14, %v3475_v32, %v6131_v40  ;;  %v6136_v0 = vmul.f32 -0.51027, %v4470_v50  ;;  %v3479_v10 = vadd.f32 %v16926_v13, %v12376_v62  ;;  %v4472_v34 = vadd.f32 %v16927_v27, %v12432_v1  ;;  %v14049_v32 = vpop.f32.mrb[153].mxu1  ;;  %v14051_v40 = vpop.f32.mrb[154].mxu0 }
 0x2b3   : > { %v10946_v59 = vpack.c.bf16 %v6899_v8, %v6898_v36  ;;  %v6901_v25 = vsel %vm5365_vm15, %v4468_v9, %v6133_v16  ;;  %v6902_v44 = vsel %vm5366_vm4, %v3477_v55, %v6134_v51  ;;  %v2359_v4 = vsel %vm2239_vm1, %v11475_v20, %v1748_v39  ;;  %1977 = vrot.lane.b32.xlu0 %v13983_v41, %s11523_s14  ;;  %v14056_v36 = vpop.f32.mrb[154].mxu1  ;;  %v14061_v16 = vpop.f32.mrb[155].mxu0  ;;  %v16930_v8 = vld [vmem:[#allocation7_spill] sm:$0xff]  ;;  %v16931_v39 = vld [vmem:[#allocation8_spill] sm:$0xff] }
 0x2b4   : > { %v11138_v13 = vpack.c.bf16 %v6901_v25, %v6900_v24  ;;  %v6904_v27 = vsel %vm5368_vm5, %v4470_v50, %v6136_v0  ;;  %vm5367_vm6 = vcmp.gt.f32.partialorder %v3479_v10, 0.0  ;;  %v6135_v21 = vmul.f32 -0.51027, %v3479_v10  ;;  %v14063_v24 = vpop.f32.mrb[155].mxu1 }
 0x2b5   : > { %8824 = vst [vmem:[%s12490_s25 + $0x3d0] sm:$0xff] %v10946_v59  ;;  %vm5369_vm7 = vcmp.gt.f32.partialorder %v4472_v34, 0.0  ;;  %v6137_v9 = vmul.f32 -0.51027, %v4472_v34  ;;  %v2801_v55 = vsel %vm2625_vm3, %v2550_v31, %v2164_v52  ;;  %v1461_v20 = vshrl.u32 %v13983_v41, 16  ;;  %16929 = vst [vmem:[#allocation5_spill] sm:$0xff] %v14063_v24 }
 0x2b6   : > { %10751 = vst [vmem:[%s12490_s25 + $0x3f0] sm:$0xff] %v11138_v13  ;;  %v6903_v50 = vsel %vm5367_vm6, %v3479_v10, %v6135_v21  ;;  %3741 = vmatmul.mubr.bf16.gmra.mrb[232].mxu0 %v2801_v55  ;;  %4734 = vmatmul.mubr.bf16.gmra.mrb[232].mxu1 %v2801_v55  ;;  %v1465_v51 = vshll.u32 %v14043_v17, 16  ;;  %v3483_v0 = vadd.f32 %v16930_v8, %v12363_v61  ;;  %v2166_v55 = vpop.permute.xlu1 %2165  ;;  %v11476_v24 = vld [vmem:[%s11583_s7 + $0x1e0] sm:$0xff]  }
 0x2b7   : > { %v4476_v59 = vadd.f32 %v16931_v39, %v12365_v33  ;;  %v10947_v31 = vpack.c.bf16 %v6903_v50, %v6902_v44  ;;  %v6905_v52 = vsel %vm5369_vm7, %v4472_v34, %v6137_v9  ;;  %v1463_v41 = vor.u32 %v1461_v20, %v14017_v46  ;;  %3750 = vmatprep.mubr.bf16.mxu0 %v16849_v49  ;;  %v16932_v46 = vld [vmem:[#allocation9_spill] sm:$0xff]  ;;  %v16935_v20 = vld [vmem:[#allocation10_spill] sm:$0xff] }
 0x2b8   : > { %v2552_v25 = vsel %vm2432_vm2, %v2359_v4, %v1950_v11  ;;  %v11139_v21 = vpack.c.bf16 %v6905_v52, %v6904_v27  ;;  %v14074_v10 = vrot.slane %v1465_v51, 1  ;;  %vm5370_vm8 = vcmp.gt.f32.partialorder %v3483_v0, 0.0  ;;  %1777 = vrot.lane.b32.xlu0 %v1460_v26, %s11521_s10  ;;  %4743 = vmatprep.mubr.bf16.mxu1 %v16849_v49  ;;  %v14083_v11 = vpop.f32.mrb[156].mxu0  ;;  %v14085_v27 = vpop.f32.mrb[156].mxu1 }
 0x2b9   : > { %v6138_v13 = vmul.f32 -0.51027, %v3483_v0  ;;  %8825 = vst [vmem:[%s12490_s25 + $0x3d8] sm:$0xff] %v10947_v31  ;;  %vm5372_vm9 = vcmp.gt.f32.partialorder %v4476_v59, 0.0  ;;  %v6140_v44 = vmul.f32 -0.51027, %v4476_v59  ;;  %v3485_v34 = vadd.f32 %v16932_v46, %v12376_v62 }
 0x2ba   : > { %v4478_v4 = vadd.f32 %v13696_v54, %v12432_v1  ;;  %16933 = vst [vmem:[#allocation6_spill] sm:$0xff] %v14083_v11  ;;  %16934 = vst [vmem:[#allocation21_spill] sm:$0xff] %v14085_v27  ;;  %v14090_v9 = vsel %vm856_vm0, %v1463_v41, %v14074_v10  ;;  %v3487_v50 = vadd.f32 %v16935_v20, %v12363_v61  ;;  %v14096_v8 = vpop.f32.mrb[157].mxu0  ;;  %v14098_v39 = vpop.f32.mrb[157].mxu1 }
 0x2bb   : > { %10752 = vst [vmem:[%s12490_s25 + $0x3f8] sm:$0xff] %v11139_v21  ;;  %v6906_v26 = vsel %vm5370_vm8, %v3483_v0, %v6138_v13  ;;  %v4480_v51 = vadd.f32 %v13703_v18, %v12365_v33  ;;  %16936 = vst [vmem:[#allocation22_spill] sm:$0xff] %v14096_v8  ;;  %2193 = vrot.lane.b32.xlu1 %v14090_v9, %s11522_s11  ;;  %v6908_v54 = vsel %vm5372_vm9, %v4476_v59, %v6140_v44  ;;  %v14102_v52 = vpop.f32.mrb[158].mxu0  ;;  %v14104_v0 = vpop.f32.mrb[158].mxu1  ;;  %v14111_v59 = vld [vmem:[%s11583_s7 + $0x268] sm:$0xff]  }
 0x2bc   : > { %16937 = vst [vmem:[#allocation23_spill] sm:$0xff] %v14098_v39  ;;  %vm5371_vm10 = vcmp.gt.f32.partialorder %v3485_v34, 0.0  ;;  %v6139_v31 = vmul.f32 -0.51027, %v3485_v34  ;;  %vm5373_vm11 = vcmp.gt.f32.partialorder %v4478_v4, 0.0  ;;  %16938 = vst [vmem:[#allocation24_spill] sm:$0xff] %v14102_v52  ;;  %v3489_v46 = vadd.f32 %v13708_v47, %v12376_v62  ;;  %v1952_v27 = vpop.permute.xlu1 %1951 }
 0x2bd   : > { %16939 = vst [vmem:[#allocation25_spill] sm:$0xff] %v14104_v0  ;;  %v6141_v41 = vmul.f32 -0.51027, %v4478_v4  ;;  %vm5374_vm12 = vcmp.gt.f32.partialorder %v3487_v50, 0.0  ;;  %v6142_v21 = vmul.f32 -0.51027, %v3487_v50  ;;  %v4482_v20 = vadd.f32 %v13710_v7, %v12432_v1 }
 0x2be   : > { %vm5376_vm13 = vcmp.gt.f32.partialorder %v4480_v51, 0.0  ;;  %v6907_v18 = vsel %vm5371_vm10, %v3485_v34, %v6139_v31  ;;  %v6144_v13 = vmul.f32 -0.51027, %v4480_v51  ;;  %v14113_v44 = vpop.f32.mrb[159].mxu0  ;;  %v14115_v52 = vpop.f32.mrb[159].mxu1  ;;  %v2804_v34 = vsel %vm2625_vm3, %v2552_v25, %v2166_v55 }
 0x2bf   : > { %16940 = vst [vmem:[#allocation7_spill] sm:$0xff] %v14113_v44  ;;  %16941 = vst [vmem:[#allocation8_spill] sm:$0xff] %v14115_v52  ;;  %v10948_v0 = vpack.c.bf16 %v6907_v18, %v6906_v26  ;;  %v6909_v39 = vsel %vm5373_vm11, %v4478_v4, %v6141_v41  ;;  %v6910_v8 = vsel %vm5374_vm12, %v3487_v50, %v6142_v21  ;;  %v1750_v31 = vpop.permute.xlu0 %1749  ;;  %vm5375_vm14 = vcmp.gt.f32.partialorder %v3489_v46, 0.0  ;;  %v16942_v18 = vld [vmem:[#allocation11_spill] sm:$0xff] }
 0x2c0   : > { %v11140_v47 = vpack.c.bf16 %v6909_v39, %v6908_v54  ;;  %v6912_v11 = vsel %vm5376_vm13, %v4480_v51, %v6144_v13  ;;  %v6143_v7 = vmul.f32 -0.51027, %v3489_v46  ;;  %3751 = vmatmul.mubr.bf16.gmra.mrb[236].mxu0 %v2804_v34  ;;  %4744 = vmatmul.mubr.bf16.gmra.mrb[236].mxu1 %v2804_v34  ;;  %vm5377_vm15 = vcmp.gt.f32.partialorder %v4482_v20, 0.0  ;;  %v14152_v13 = vpop.f32.mrb[160].mxu1 }
 0x2c1   : > { %8826 = vst [vmem:[%s12490_s25 + $0x400] sm:$0xff] %v10948_v0  ;;  %v6145_v44 = vmul.f32 -0.51027, %v4482_v20  ;;  %v2361_v52 = vsel %vm2239_vm1, %v11476_v24, %v1750_v31  ;;  %1979 = vrot.lane.b32.xlu1 %v14043_v17, %s11523_s14  ;;  %v1469_v25 = vshrl.u32 %v14043_v17, 16  ;;  %3760 = vmatprep.mubr.bf16.mxu0 %v16849_v49  ;;  %v1473_v4 = vshll.u32 %v14111_v59, 16 }
 0x2c2   : > { %10753 = vst [vmem:[%s12490_s25 + $0x420] sm:$0xff] %v11140_v47  ;;  %v6911_v55 = vsel %vm5375_vm14, %v3489_v46, %v6143_v7  ;;  %v2554_v26 = vsel %vm2432_vm2, %v2361_v52, %v1952_v27  ;;  %v3493_v50 = vadd.f32 %v13724_v3, %v12363_v61  ;;  %4753 = vmatprep.mubr.bf16.mxu1 %v16849_v49  ;;  %v16943_v7 = vld [vmem:[#allocation26_spill] sm:$0xff] }
 0x2c3   : > { %v10949_v24 = vpack.c.bf16 %v6911_v55, %v6910_v8  ;;  %v6913_v51 = vsel %vm5377_vm15, %v4482_v20, %v6145_v44  ;;  %v1471_v39 = vor.u32 %v1469_v25, %v14074_v10  ;;  %v4486_v17 = vadd.f32 %v13730_v43, %v12365_v33  ;;  %v2168_v52 = vpop.permute.xlu0 %2167  ;;  %v14143_v10 = vpop.f32.mrb[160].mxu0  ;;  %v16944_v55 = vld [vmem:[#allocation27_spill] sm:$0xff] }
 0x2c4   : > { %v11141_v54 = vpack.c.bf16 %v6913_v51, %v6912_v11  ;;  %v14134_v0 = vrot.slane %v1473_v4, 1  ;;  %vm5378_vm4 = vcmp.gt.f32.partialorder %v3493_v50, 0.0  ;;  %v6146_v41 = vmul.f32 -0.51027, %v3493_v50  ;;  %v14157_v20 = vpop.f32.mrb[161].mxu1 }
 0x2c5   : > { %8827 = vst [vmem:[%s12490_s25 + $0x408] sm:$0xff] %v10949_v24  ;;  %vm5380_vm5 = vcmp.gt.f32.partialorder %v4486_v17, 0.0  ;;  %v6148_v27 = vmul.f32 -0.51027, %v4486_v17  ;;  %v3495_v3 = vadd.f32 %v13732_v22, %v12376_v62  ;;  %v4488_v8 = vadd.f32 %v13739_v14, %v12432_v1  ;;  %1779 = vrot.lane.b32.xlu1 %v14090_v9, %s11521_s10  ;;  %v14154_v14 = vpop.f32.mrb[161].mxu0  ;;  %v14166_v24 = vld [vmem:[%s11583_s7 + $0x270] sm:$0xff]  }
 0x2c6   : > { %10754 = vst [vmem:[%s12490_s25 + $0x428] sm:$0xff] %v11141_v54  ;;  %v1476_v43 = vsel %vm856_vm0, %v1471_v39, %v14134_v0  ;;  %v6914_v11 = vsel %vm5378_vm4, %v3493_v50, %v6146_v41  ;;  %v3497_v21 = vadd.f32 %v13741_v53, %v12363_v61  ;;  %v4490_v22 = vadd.f32 %v16942_v18, %v12365_v33  ;;  %v14159_v44 = vpop.f32.mrb[162].mxu0  ;;  %v1752_v50 = vpop.permute.xlu1 %1751  ;;  %v11477_v41 = vld [vmem:[%s11583_s7 + $0x1e8] sm:$0xff]  }
 0x2c7   : > { %2195 = vrot.lane.b32.xlu0 %v1476_v43, %s11522_s11  ;;  %v6916_v9 = vsel %vm5380_vm5, %v4486_v17, %v6148_v27  ;;  %vm5379_vm6 = vcmp.gt.f32.partialorder %v3495_v3, 0.0  ;;  %v6147_v46 = vmul.f32 -0.51027, %v3495_v3  ;;  %vm5381_vm7 = vcmp.gt.f32.partialorder %v4488_v8, 0.0  ;;  %v14168_v51 = vpop.f32.mrb[162].mxu1 }
 0x2c8   : > { %v6149_v53 = vmul.f32 -0.51027, %v4488_v8  ;;  %vm5382_vm8 = vcmp.gt.f32.partialorder %v3497_v21, 0.0  ;;  %v6150_v34 = vmul.f32 -0.51027, %v3497_v21  ;;  %vm5384_vm9 = vcmp.gt.f32.partialorder %v4490_v22, 0.0 }
 0x2c9   : > { %v6915_v31 = vsel %vm5379_vm6, %v3495_v3, %v6147_v46  ;;  %v6152_v47 = vmul.f32 -0.51027, %v4490_v22  ;;  %v3499_v25 = vadd.f32 %v16943_v7, %v12376_v62  ;;  %v4492_v4 = vadd.f32 %v16944_v55, %v12432_v1  ;;  %16945 = vst [vmem:[#allocation9_spill] sm:$0xff] %v14168_v51  ;;  %v14172_v3 = vpop.f32.mrb[163].mxu0  ;;  %v14174_v18 = vpop.f32.mrb[163].mxu1 }
 0x2ca   : > { %v10950_v39 = vpack.c.bf16 %v6915_v31, %v6914_v11  ;;  %v6917_v17 = vsel %vm5381_vm7, %v4488_v8, %v6149_v53  ;;  %v6918_v54 = vsel %vm5382_vm8, %v3497_v21, %v6150_v34  ;;  %v2363_v27 = vsel %vm2239_vm1, %v11477_v41, %v1752_v50  ;;  %v1954_v51 = vpop.permute.xlu0 %1953 }
 0x2cb   : > { %v11142_v46 = vpack.c.bf16 %v6917_v17, %v6916_v9  ;;  %v6920_v7 = vsel %vm5384_vm9, %v4490_v22, %v6152_v47  ;;  %vm5383_vm10 = vcmp.gt.f32.partialorder %v3499_v25, 0.0  ;;  %v6151_v55 = vmul.f32 -0.51027, %v3499_v25  ;;  %1981 = vrot.lane.b32.xlu0 %v14111_v59, %s11523_s14 }
 0x2cc   : > { %8828 = vst [vmem:[%s12490_s25 + $0x410] sm:$0xff] %v10950_v39  ;;  %vm5385_vm11 = vcmp.gt.f32.partialorder %v4492_v4, 0.0  ;;  %v6153_v8 = vmul.f32 -0.51027, %v4492_v4  ;;  %v2807_v11 = vsel %vm2625_vm3, %v2554_v26, %v2168_v52  ;;  %v1477_v21 = vshrl.u32 %v14111_v59, 16  ;;  %v2170_v39 = vpop.permute.xlu1 %2169 }
 0x2cd   : > { %10755 = vst [vmem:[%s12490_s25 + $0x430] sm:$0xff] %v11142_v46  ;;  %v6919_v53 = vsel %vm5383_vm10, %v3499_v25, %v6151_v55  ;;  %3761 = vmatmul.mubr.bf16.gmra.mrb[240].mxu0 %v2807_v11  ;;  %4754 = vmatmul.mubr.bf16.gmra.mrb[240].mxu1 %v2807_v11  ;;  %v1481_v22 = vshll.u32 %v14166_v24, 16  ;;  %v3503_v9 = vadd.f32 %v13768_v2, %v12363_v61 }
 0x2ce   : > { %v4496_v34 = vadd.f32 %v13777_v23, %v12365_v33  ;;  %v10951_v31 = vpack.c.bf16 %v6919_v53, %v6918_v54  ;;  %v6921_v47 = vsel %vm5385_vm11, %v4492_v4, %v6153_v8  ;;  %v1479_v50 = vor.u32 %v1477_v21, %v14134_v0  ;;  %3770 = vmatprep.mubr.bf16.mxu0 %v16849_v49  ;;  %v14200_v4 = vpop.f32.mrb[164].mxu0  ;;  %v16947_v53 = vld [vmem:[#allocation12_spill] sm:$0xff] }
 0x2cf   : > { %v2556_v26 = vsel %vm2432_vm2, %v2363_v27, %v1954_v51  ;;  %v11143_v59 = vpack.c.bf16 %v6921_v47, %v6920_v7  ;;  %v14191_v52 = vrot.slane %v1481_v22, 1  ;;  %vm5386_vm12 = vcmp.gt.f32.partialorder %v3503_v9, 0.0  ;;  %1781 = vrot.lane.b32.xlu0 %v1476_v43, %s11521_s10  ;;  %4763 = vmatprep.mubr.bf16.mxu1 %v16849_v49  ;;  %v14202_v51 = vpop.f32.mrb[164].mxu1 }
 0x2d0   : > { %v6154_v25 = vmul.f32 -0.51027, %v3503_v9  ;;  %8829 = vst [vmem:[%s12490_s25 + $0x418] sm:$0xff] %v10951_v31  ;;  %vm5388_vm13 = vcmp.gt.f32.partialorder %v4496_v34, 0.0  ;;  %v6156_v2 = vmul.f32 -0.51027, %v4496_v34  ;;  %v3505_v23 = vadd.f32 %v13779_v63, %v12376_v62 }
 0x2d1   : > { %v4498_v0 = vadd.f32 %v13788_v56, %v12432_v1  ;;  %10756 = vst [vmem:[%s12490_s25 + $0x438] sm:$0xff] %v11143_v59  ;;  %v14207_v17 = vsel %vm856_vm0, %v1479_v50, %v14191_v52  ;;  %v3507_v54 = vadd.f32 %v13790_v60, %v12363_v61  ;;  %v4500_v41 = vadd.f32 %v13796_v57, %v12365_v33  ;;  %v14213_v63 = vpop.f32.mrb[165].mxu0  ;;  %v14215_v27 = vpop.f32.mrb[165].mxu1 }
 0x2d2   : > { %v6922_v43 = vsel %vm5386_vm12, %v3503_v9, %v6154_v25  ;;  %2197 = vrot.lane.b32.xlu1 %v14207_v17, %s11522_s11  ;;  %v6924_v56 = vsel %vm5388_vm13, %v4496_v34, %v6156_v2  ;;  %vm5387_vm14 = vcmp.gt.f32.partialorder %v3505_v23, 0.0  ;;  %v6155_v46 = vmul.f32 -0.51027, %v3505_v23  ;;  %v14219_v7 = vpop.f32.mrb[166].mxu0  ;;  %v14221_v55 = vpop.f32.mrb[166].mxu1  ;;  %v14228_v9 = vld [vmem:[%s11583_s7 + $0x278] sm:$0xff]  }
 0x2d3   : > { %vm5389_vm15 = vcmp.gt.f32.partialorder %v4498_v0, 0.0  ;;  %16946 = vst [vmem:[#allocation10_spill] sm:$0xff] %v14221_v55  ;;  %v6157_v60 = vmul.f32 -0.51027, %v4498_v0  ;;  %vm5390_vm4 = vcmp.gt.f32.partialorder %v3507_v54, 0.0  ;;  %vm5392_vm5 = vcmp.gt.f32.partialorder %v4500_v41, 0.0  ;;  %v1754_v2 = vpop.permute.xlu0 %1753 }
 0x2d4   : > { %v6158_v8 = vmul.f32 -0.51027, %v3507_v54  ;;  %v6923_v57 = vsel %vm5387_vm14, %v3505_v23, %v6155_v46  ;;  %v6160_v11 = vmul.f32 -0.51027, %v4500_v41  ;;  %v3509_v21 = vadd.f32 %v13798_v58, %v12376_v62  ;;  %v14230_v34 = vpop.f32.mrb[167].mxu0  ;;  %v14232_v31 = vpop.f32.mrb[167].mxu1 }
 0x2d5   : > { %v4502_v22 = vadd.f32 %v16947_v53, %v12432_v1  ;;  %16948 = vst [vmem:[#allocation11_spill] sm:$0xff] %v14230_v34  ;;  %16949 = vst [vmem:[#allocation26_spill] sm:$0xff] %v14232_v31  ;;  %v10952_v47 = vpack.c.bf16 %v6923_v57, %v6922_v43  ;;  %v6925_v50 = vsel %vm5389_vm15, %v4498_v0, %v6157_v60  ;;  %v1956_v23 = vpop.permute.xlu1 %1955  ;;  %v11478_v55 = vld [vmem:[%s11583_s7 + $0x1f0] sm:$0xff]   ;;  %v1489_v0 = vshll.u32 %v14228_v9, 16 }
 0x2d6   : > { %v6926_v59 = vsel %vm5390_vm4, %v3507_v54, %v6158_v8  ;;  %v2810_v25 = vsel %vm2625_vm3, %v2556_v26, %v2170_v39  ;;  %v11144_v58 = vpack.c.bf16 %v6925_v50, %v6924_v56  ;;  %v6928_v46 = vsel %vm5392_vm5, %v4500_v41, %v6160_v11  ;;  %1983 = vrot.lane.b32.xlu1 %v14166_v24, %s11523_s14  ;;  %v16950_v54 = vld [vmem:[#allocation28_spill] sm:$0xff] }
 0x2d7   : > { %vm5391_vm6 = vcmp.gt.f32.partialorder %v3509_v21, 0.0  ;;  %v6159_v53 = vmul.f32 -0.51027, %v3509_v21  ;;  %3771 = vmatmul.mubr.bf16.gmra.mrb[244].mxu0 %v2810_v25  ;;  %4764 = vmatmul.mubr.bf16.gmra.mrb[244].mxu1 %v2810_v25  ;;  %8830 = vst [vmem:[%s12490_s25 + $0x440] sm:$0xff] %v10952_v47  ;;  %vm5393_vm7 = vcmp.gt.f32.partialorder %v4502_v22, 0.0  ;;  %v2365_v31 = vsel %vm2239_vm1, %v11478_v55, %v1754_v2 }
 0x2d8   : > { %v6161_v34 = vmul.f32 -0.51027, %v4502_v22  ;;  %v1485_v26 = vshrl.u32 %v14166_v24, 16  ;;  %3780 = vmatprep.mubr.bf16.mxu0 %v16849_v49  ;;  %10757 = vst [vmem:[%s12490_s25 + $0x460] sm:$0xff] %v11144_v58  ;;  %v2558_v43 = vsel %vm2432_vm2, %v2365_v31, %v1956_v23  ;;  %v3513_v41 = vadd.f32 %v16950_v54, %v12363_v61  ;;  %4773 = vmatprep.mubr.bf16.mxu1 %v16849_v49  ;;  %v14255_v31 = vpop.f32.mrb[168].mxu1  ;;  %v16954_v54 = vld [vmem:[#allocation29_spill] sm:$0xff] }
 0x2d9   : > { %v6927_v39 = vsel %vm5391_vm6, %v3509_v21, %v6159_v53  ;;  %v4506_v24 = vadd.f32 %v13830_v15, %v12365_v33  ;;  %v14251_v57 = vrot.slane %v1489_v0, 1  ;;  %v14253_v21 = vpop.f32.mrb[168].mxu0  ;;  %v3517_v25 = vadd.f32 %v13842_v48, %v12363_v61  ;;  %v14273_v2 = vpop.f32.mrb[169].mxu1 }
 0x2da   : > { %v10953_v56 = vpack.c.bf16 %v6927_v39, %v6926_v59  ;;  %v6929_v55 = vsel %vm5393_vm7, %v4502_v22, %v6161_v34  ;;  %v1487_v60 = vor.u32 %v1485_v26, %v14191_v52  ;;  %vm5394_vm8 = vcmp.gt.f32.partialorder %v3513_v41, 0.0  ;;  %v2172_v34 = vpop.permute.xlu0 %2171  ;;  %1783 = vrot.lane.b32.xlu1 %v14207_v17, %s11521_s10  ;;  %v14264_v15 = vpop.f32.mrb[169].mxu0  ;;  %v16953_v39 = vld [vmem:[#allocation13_spill] sm:$0xff] }
 0x2db   : > { %v11145_v8 = vpack.c.bf16 %v6929_v55, %v6928_v46  ;;  %v6162_v11 = vmul.f32 -0.51027, %v3513_v41  ;;  %vm5396_vm9 = vcmp.gt.f32.partialorder %v4506_v24, 0.0  ;;  %v6164_v47 = vmul.f32 -0.51027, %v4506_v24  ;;  %v14278_v58 = vpop.f32.mrb[170].mxu1 }
 0x2dc   : > { %8831 = vst [vmem:[%s12490_s25 + $0x448] sm:$0xff] %v10953_v56  ;;  %v3515_v22 = vadd.f32 %v13832_v12, %v12376_v62  ;;  %v4508_v52 = vadd.f32 %v13837_v35, %v12432_v1  ;;  %v1492_v50 = vsel %vm856_vm0, %v1487_v60, %v14251_v57  ;;  %v4510_v12 = vadd.f32 %v13844_v19, %v12365_v33  ;;  %v14275_v35 = vpop.f32.mrb[170].mxu0  ;;  %v1756_v56 = vpop.permute.xlu1 %1755  ;;  %v14287_v55 = vld [vmem:[%s11583_s7 + $0x280] sm:$0xff]  }
 0x2dd   : > { %10758 = vst [vmem:[%s12490_s25 + $0x468] sm:$0xff] %v11145_v8  ;;  %v6930_v59 = vsel %vm5394_vm8, %v3513_v41, %v6162_v11  ;;  %2199 = vrot.lane.b32.xlu0 %v1492_v50, %s11522_s11  ;;  %v6932_v17 = vsel %vm5396_vm9, %v4506_v24, %v6164_v47  ;;  %16951 = vst [vmem:[#allocation27_spill] sm:$0xff] %v14278_v58  ;;  %v14280_v46 = vpop.f32.mrb[171].mxu0  ;;  %vm5398_vm12 = vcmp.gt.f32.partialorder %v3517_v25, 0.0  ;;  %v6166_v53 = vmul.f32 -0.51027, %v3517_v25 }
 0x2de   : > { %vm5395_vm10 = vcmp.gt.f32.partialorder %v3515_v22, 0.0  ;;  %v6163_v23 = vmul.f32 -0.51027, %v3515_v22  ;;  %vm5397_vm11 = vcmp.gt.f32.partialorder %v4508_v52, 0.0  ;;  %16952 = vst [vmem:[#allocation12_spill] sm:$0xff] %v14280_v46  ;;  %vm5400_vm13 = vcmp.gt.f32.partialorder %v4510_v12, 0.0 }
 0x2df   : > { %v6165_v48 = vmul.f32 -0.51027, %v4508_v52  ;;  %v6168_v26 = vmul.f32 -0.51027, %v4510_v12  ;;  %v3519_v0 = vadd.f32 %v16953_v39, %v12376_v62  ;;  %v4512_v41 = vadd.f32 %v16954_v54, %v12432_v1  ;;  %v14289_v60 = vpop.f32.mrb[171].mxu1  ;;  %v11479_v47 = vld [vmem:[%s11583_s7 + $0x1f8] sm:$0xff]   ;;  %v1958_v54 = vpop.permute.xlu0 %1957 }
 0x2e0   : > { %v6931_v19 = vsel %vm5395_vm10, %v3515_v22, %v6163_v23  ;;  %16955 = vst [vmem:[#allocation28_spill] sm:$0xff] %v14289_v60  ;;  %v6934_v11 = vsel %vm5398_vm12, %v3517_v25, %v6166_v53  ;;  %v2367_v22 = vsel %vm2239_vm1, %v11479_v47, %v1756_v56  ;;  %v2813_v60 = vsel %vm2625_vm3, %v2558_v43, %v2172_v34  ;;  %v14304_v53 = vpop.f32.mrb[172].mxu0 }
 0x2e1   : > { %v10954_v24 = vpack.c.bf16 %v6931_v19, %v6930_v59  ;;  %v6933_v8 = vsel %vm5397_vm11, %v4508_v52, %v6165_v48  ;;  %v6936_v46 = vsel %vm5400_vm13, %v4510_v12, %v6168_v26  ;;  %vm5399_vm14 = vcmp.gt.f32.partialorder %v3519_v0, 0.0  ;;  %1985 = vrot.lane.b32.xlu0 %v14228_v9, %s11523_s14  ;;  %3781 = vmatmul.mubr.bf16.gmra.mrb[248].mxu0 %v2813_v60  ;;  %v16956_v12 = vld [vmem:[#allocation14_spill] sm:$0xff]  ;;  %v14306_v19 = vpop.f32.mrb[172].mxu1 }
 0x2e2   : > { %v11146_v23 = vpack.c.bf16 %v6933_v8, %v6932_v17  ;;  %v6167_v39 = vmul.f32 -0.51027, %v3519_v0  ;;  %vm5401_vm15 = vcmp.gt.f32.partialorder %v4512_v41, 0.0  ;;  %v6169_v58 = vmul.f32 -0.51027, %v4512_v41  ;;  %4774 = vmatmul.mubr.bf16.gmra.mrb[248].mxu1 %v2813_v60  ;;  %3790 = vmatprep.mubr.bf16.mxu0 %v16849_v49  ;;  %v14313_v56 = vpop.f32.mrb[173].mxu1 }
 0x2e3   : > { %8832 = vst [vmem:[%s12490_s25 + $0x450] sm:$0xff] %v10954_v24  ;;  %v1493_v59 = vshrl.u32 %v14228_v9, 16  ;;  %v1497_v25 = vshll.u32 %v14287_v55, 16  ;;  %v3523_v17 = vadd.f32 %v16956_v12, %v12363_v61  ;;  %v4516_v48 = vadd.f32 %v13924_v5, %v12365_v33  ;;  %4783 = vmatprep.mubr.bf16.mxu1 %v16849_v49 }
 0x2e4   : > { %10759 = vst [vmem:[%s12490_s25 + $0x470] sm:$0xff] %v11146_v23  ;;  %v6935_v52 = vsel %vm5399_vm14, %v3519_v0, %v6167_v39  ;;  %v6937_v34 = vsel %vm5401_vm15, %v4512_v41, %v6169_v58  ;;  %v2560_v26 = vsel %vm2432_vm2, %v2367_v22, %v1958_v54  ;;  %v14311_v0 = vpop.f32.mrb[173].mxu0  ;;  %v3525_v41 = vadd.f32 %v13926_v28, %v12376_v62  ;;  %v2174_v22 = vpop.permute.xlu1 %2173 }
 0x2e5   : > { %v10955_v43 = vpack.c.bf16 %v6935_v52, %v6934_v11  ;;  %v1495_v9 = vor.u32 %v1493_v59, %v14251_v57  ;;  %v11147_v60 = vpack.c.bf16 %v6937_v34, %v6936_v46  ;;  %v14315_v5 = vrot.slane %v1497_v25, 1  ;;  %1785 = vrot.lane.b32.xlu0 %v1492_v50, %s11521_s10  ;;  %v14319_v58 = vpop.f32.mrb[174].mxu0  ;;  %v14326_v46 = vpop.f32.mrb[174].mxu1 }
 0x2e6   : > { %vm5402_vm4 = vcmp.gt.f32.partialorder %v3523_v17, 0.0  ;;  %v6170_v24 = vmul.f32 -0.51027, %v3523_v17  ;;  %vm5404_vm5 = vcmp.gt.f32.partialorder %v4516_v48, 0.0  ;;  %v6172_v57 = vmul.f32 -0.51027, %v4516_v48  ;;  %v1758_v25 = vpop.permute.xlu0 %1757 }
 0x2e7   : > { %8833 = vst [vmem:[%s12490_s25 + $0x458] sm:$0xff] %v10955_v43  ;;  %v4518_v8 = vadd.f32 %v13931_v45, %v12432_v1  ;;  %v14328_v11 = vpop.f32.mrb[175].mxu0  ;;  %10760 = vst [vmem:[%s12490_s25 + $0x478] sm:$0xff] %v11147_v60  ;;  %v1500_v50 = vsel %vm856_vm0, %v1495_v9, %v14315_v5  ;;  %v3527_v23 = vadd.f32 %v13936_v38, %v12363_v61  ;;  %v14337_v28 = vpop.f32.mrb[175].mxu1  ;;  %vm5403_vm6 = vcmp.gt.f32.partialorder %v3525_v41, 0.0  ;;  %v14345_v43 = vld [vmem:[%s11583_s7 + $0x288] sm:$0xff]  }
 0x2e8   : > { %v6938_v47 = vsel %vm5402_vm4, %v3523_v17, %v6170_v24  ;;  %v4520_v39 = vadd.f32 %v13938_v29, %v12365_v33  ;;  %16957 = vst [vmem:[#allocation13_spill] sm:$0xff] %v14337_v28  ;;  %2201 = vrot.lane.b32.xlu1 %v1500_v50, %s11522_s11  ;;  %v6940_v45 = vsel %vm5404_vm5, %v4516_v48, %v6172_v57  ;;  %v6171_v54 = vmul.f32 -0.51027, %v3525_v41  ;;  %v1960_v24 = vpop.permute.xlu1 %1959 }
 0x2e9   : > { %vm5405_vm7 = vcmp.gt.f32.partialorder %v4518_v8, 0.0  ;;  %v6173_v59 = vmul.f32 -0.51027, %v4518_v8  ;;  %vm5406_vm8 = vcmp.gt.f32.partialorder %v3527_v23, 0.0  ;;  %v6174_v52 = vmul.f32 -0.51027, %v3527_v23 }
 0x2ea   : > { %vm5408_vm9 = vcmp.gt.f32.partialorder %v4520_v39, 0.0  ;;  %v6939_v12 = vsel %vm5403_vm6, %v3525_v41, %v6171_v54  ;;  %v6176_v38 = vmul.f32 -0.51027, %v4520_v39  ;;  %v3529_v29 = vadd.f32 %v13946_v30, %v12376_v62 }
 0x2eb   : > { %v4522_v17 = vadd.f32 %v13948_v6, %v12432_v1  ;;  %v10956_v48 = vpack.c.bf16 %v6939_v12, %v6938_v47  ;;  %v6941_v34 = vsel %vm5405_vm7, %v4518_v8, %v6173_v59  ;;  %v6942_v9 = vsel %vm5406_vm8, %v3527_v23, %v6174_v52  ;;  %v11480_v6 = vld [vmem:[%s11583_s7 + $0x200] sm:$0xff]   ;;  %v16958_v23 = vld [vmem:[#allocation15_spill] sm:$0xff]  ;;  %v2176_v12 = vpop.permute.xlu0 %2175 }
 0x2ec   : > { %v2816_v60 = vsel %vm2625_vm3, %v2560_v26, %v2174_v22  ;;  %v11148_v57 = vpack.c.bf16 %v6941_v34, %v6940_v45  ;;  %v6944_v41 = vsel %vm5408_vm9, %v4520_v39, %v6176_v38  ;;  %vm5407_vm10 = vcmp.gt.f32.partialorder %v3529_v29, 0.0  ;;  %1987 = vrot.lane.b32.xlu1 %v14287_v55, %s11523_s14  ;;  %v14368_v34 = vpop.f32.mrb[176].mxu1 }
 0x2ed   : > { %v6175_v54 = vmul.f32 -0.51027, %v3529_v29  ;;  %3791 = vmatmul.mubr.bf16.gmra.mrb[252].mxu0 %v2816_v60  ;;  %4784 = vmatmul.mubr.bf16.gmra.mrb[252].mxu1 %v2816_v60  ;;  %8834 = vst [vmem:[%s12490_s25 + $0x480] sm:$0xff] %v10956_v48  ;;  %vm5409_vm11 = vcmp.gt.f32.partialorder %v4522_v17, 0.0  ;;  %v6177_v30 = vmul.f32 -0.51027, %v4522_v17  ;;  %v2369_v28 = vsel %vm2239_vm1, %v11480_v6, %v1758_v25 }
 0x2ee   : > { %v1501_v8 = vshrl.u32 %v14287_v55, 16  ;;  %3800 = vmatprep.mubr.bf16.mxu0 %v16849_v49  ;;  %10761 = vst [vmem:[%s12490_s25 + $0x4a0] sm:$0xff] %v11148_v57  ;;  %v1505_v47 = vshll.u32 %v14345_v43, 16  ;;  %v2562_v22 = vsel %vm2432_vm2, %v2369_v28, %v1960_v24  ;;  %v3533_v39 = vadd.f32 %v16958_v23, %v12363_v61  ;;  %4793 = vmatprep.mubr.bf16.mxu1 %v16849_v49  ;;  %v16959_v55 = vld [vmem:[#allocation16_spill] sm:$0xff]  ;;  %v14366_v28 = vpop.f32.mrb[176].mxu0  ;;  %v16961_v60 = vld [vmem:[#allocation18_spill] sm:$0xff]  ;;  %v1760_v57 = vpop.permute.xlu1 %1759 }
 0x2ef   : > { %v6943_v26 = vsel %vm5407_vm10, %v3529_v29, %v6175_v54  ;;  %v6945_v59 = vsel %vm5409_vm11, %v4522_v17, %v6177_v30  ;;  %v4526_v25 = vadd.f32 %v16959_v55, %v12365_v33  ;;  %v4528_v24 = vadd.f32 %v16961_v60, %v12432_v1 }
 0x2f0   : > { %v10957_v45 = vpack.c.bf16 %v6943_v26, %v6942_v9  ;;  %v1503_v52 = vor.u32 %v1501_v8, %v14315_v5  ;;  %v11149_v38 = vpack.c.bf16 %v6945_v59, %v6944_v41  ;;  %v14364_v29 = vrot.slane %v1505_v47, 1  ;;  %v16960_v5 = vld [vmem:[#allocation17_spill] sm:$0xff]  ;;  %1787 = vrot.lane.b32.xlu1 %v1500_v50, %s11521_s10  ;;  %v14376_v41 = vpop.f32.mrb[177].mxu0  ;;  %v14385_v26 = vld [vmem:[%s11583_s7 + $0x290] sm:$0xff]   ;;  %v14387_v47 = vpop.f32.mrb[177].mxu1 }
 0x2f1   : > { %vm5410_vm12 = vcmp.gt.f32.partialorder %v3533_v39, 0.0  ;;  %v6178_v48 = vmul.f32 -0.51027, %v3533_v39  ;;  %vm5412_vm13 = vcmp.gt.f32.partialorder %v4526_v25, 0.0  ;;  %v6180_v17 = vmul.f32 -0.51027, %v4526_v25 }
 0x2f2   : > { %8835 = vst [vmem:[%s12490_s25 + $0x488] sm:$0xff] %v10957_v45  ;;  %v3535_v9 = vadd.f32 %v16960_v5, %v12376_v62  ;;  %10762 = vst [vmem:[%s12490_s25 + $0x4a8] sm:$0xff] %v11149_v38  ;;  %v1508_v54 = vsel %vm856_vm0, %v1503_v52, %v14364_v29  ;;  %v2819_v6 = vsel %vm2625_vm3, %v2562_v22, %v2176_v12  ;;  %v14389_v23 = vpop.f32.mrb[178].mxu0  ;;  %vm5413_vm15 = vcmp.gt.f32.partialorder %v4528_v24, 0.0  ;;  %v11481_v5 = vld [vmem:[%s11583_s7 + $0x208] sm:$0xff]  }
 0x2f3   : > { %v6946_v30 = vsel %vm5410_vm12, %v3533_v39, %v6178_v48  ;;  %v3537_v8 = vadd.f32 %v13991_v42, %v12363_v61  ;;  %16962 = vst [vmem:[#allocation29_spill] sm:$0xff] %v14387_v47  ;;  %16963 = vst [vmem:[#allocation14_spill] sm:$0xff] %v14389_v23  ;;  %2203 = vrot.lane.b32.xlu0 %v1508_v54, %s11522_s11  ;;  %v6948_v50 = vsel %vm5412_vm13, %v4526_v25, %v6180_v17  ;;  %v14393_v39 = vpop.f32.mrb[178].mxu1  ;;  %v14395_v22 = vpop.f32.mrb[179].mxu0  ;;  %v16967_v25 = vld [vmem:[#allocation2_spill] sm:$0xff]  ;;  %v16968_v48 = vld [vmem:[#allocation3_spill] sm:$0xff] }
 0x2f4   : > { %vm5411_vm14 = vcmp.gt.f32.partialorder %v3535_v9, 0.0  ;;  %v6179_v45 = vmul.f32 -0.51027, %v3535_v9  ;;  %16964 = vst [vmem:[#allocation15_spill] sm:$0xff] %v14393_v39  ;;  %16965 = vst [vmem:[#allocation16_spill] sm:$0xff] %v14395_v22  ;;  %v4530_v52 = vadd.f32 %v13993_v37, %v12365_v33  ;;  %v14399_v55 = vpop.f32.mrb[179].mxu1  ;;  %v3539_v38 = vadd.f32 %v16967_v25, %v12376_v62 }
 0x2f5   : > { %v6181_v59 = vmul.f32 -0.51027, %v4528_v24  ;;  %vm5414_vm4 = vcmp.gt.f32.partialorder %v3537_v8, 0.0  ;;  %v6182_v42 = vmul.f32 -0.51027, %v3537_v8  ;;  %3801 = vmatmul.mubr.bf16.gmra.mrb[0].mxu0 %v2819_v6  ;;  %4794 = vmatmul.mubr.bf16.gmra.mrb[0].mxu1 %v2819_v6  ;;  %16966 = vst [vmem:[#allocation17_spill] sm:$0xff] %v14399_v55  ;;  %v4532_v17 = vadd.f32 %v16968_v48, %v12432_v1 }
 0x2f6   : > { %v6947_v12 = vsel %vm5411_vm14, %v3535_v9, %v6179_v45  ;;  %v2371_v60 = vsel %vm2239_vm1, %v11481_v5, %v1760_v57  ;;  %3810 = vmatprep.mubr.bf16.mxu0 %v16849_v49  ;;  %vm5416_vm5 = vcmp.gt.f32.partialorder %v4530_v52, 0.0  ;;  %4803 = vmatprep.mubr.bf16.mxu1 %v16849_v49  ;;  %v6184_v45 = vmul.f32 -0.51027, %v4530_v52  ;;  %v16970_v5 = vld [vmem:[#allocation20_spill] sm:$0xff]  ;;  %v14420_v55 = vpop.f32.mrb[180].mxu0 }
 0x2f7   : > { %v10958_v22 = vpack.c.bf16 %v6947_v12, %v6946_v30  ;;  %v6949_v37 = vsel %vm5413_vm15, %v4528_v24, %v6181_v59  ;;  %v6950_v6 = vsel %vm5414_vm4, %v3537_v8, %v6182_v42  ;;  %vm5415_vm6 = vcmp.gt.f32.partialorder %v3539_v38, 0.0  ;;  %1989 = vrot.lane.b32.xlu0 %v14345_v43, %s11523_s14  ;;  %v1962_v24 = vpop.permute.xlu0 %1961  ;;  %v2178_v59 = vpop.permute.xlu1 %2177 }
 0x2f8   : > { %v11150_v9 = vpack.c.bf16 %v6949_v37, %v6948_v50  ;;  %v6183_v25 = vmul.f32 -0.51027, %v3539_v38  ;;  %vm5417_vm7 = vcmp.gt.f32.partialorder %v4532_v17, 0.0  ;;  %v6185_v57 = vmul.f32 -0.51027, %v4532_v17  ;;  %v16969_v50 = vld [vmem:[#allocation19_spill] sm:$0xff] }
 0x2f9   : > { %8836 = vst [vmem:[%s12490_s25 + $0x490] sm:$0xff] %v10958_v22  ;;  %v1509_v48 = vshrl.u32 %v14345_v43, 16  ;;  %v1513_v30 = vshll.u32 %v14385_v26, 16  ;;  %v6952_v8 = vsel %vm5416_vm5, %v4530_v52, %v6184_v45  ;;  %v3543_v12 = vadd.f32 %v16969_v50, %v12363_v61  ;;  %v14422_v22 = vpop.f32.mrb[180].mxu1  ;;  %v14427_v52 = vpop.f32.mrb[181].mxu0 }
 0x2fa   : > { %10763 = vst [vmem:[%s12490_s25 + $0x4b0] sm:$0xff] %v11150_v9  ;;  %v6951_v42 = vsel %vm5415_vm6, %v3539_v38, %v6183_v25  ;;  %v4536_v37 = vadd.f32 %v16970_v5, %v12365_v33  ;;  %v6953_v43 = vsel %vm5417_vm7, %v4532_v17, %v6185_v57  ;;  %v14429_v38 = vpop.f32.mrb[181].mxu1  ;;  %v14432_v25 = vpop.f32.mrb[182].mxu0  ;;  %v16971_v57 = vld [vmem:[#allocation4_spill] sm:$0xff]  ;;  %v4540_v5 = vadd.f32 %v14056_v36, %v12365_v33  ;;  %v14461_v36 = vld [vmem:[%s11583_s7 + $0x298] sm:$0xff]  }
 0x2fb   : > { %v10959_v39 = vpack.c.bf16 %v6951_v42, %v6950_v6  ;;  %v1511_v23 = vor.u32 %v1509_v48, %v14364_v29  ;;  %v14425_v47 = vrot.slane %v1513_v30, 1  ;;  %v11151_v9 = vpack.c.bf16 %v6953_v43, %v6952_v8  ;;  %1789 = vrot.lane.b32.xlu0 %v1508_v54, %s11521_s10  ;;  %v14440_v30 = vpop.f32.mrb[182].mxu1  ;;  %v14442_v8 = vpop.f32.mrb[183].mxu0 }
 0x2fc   : > { %vm5418_vm8 = vcmp.gt.f32.partialorder %v3543_v12, 0.0  ;;  %v6186_v45 = vmul.f32 -0.51027, %v3543_v12  ;;  %vm5420_vm9 = vcmp.gt.f32.partialorder %v4536_v37, 0.0  ;;  %v6188_v29 = vmul.f32 -0.51027, %v4536_v37 }
 0x2fd   : > { %8837 = vst [vmem:[%s12490_s25 + $0x498] sm:$0xff] %v10959_v39  ;;  %v1516_v17 = vsel %vm856_vm0, %v1511_v23, %v14425_v47  ;;  %v2564_v6 = vsel %vm2432_vm2, %v2371_v60, %v1962_v24  ;;  %v3545_v48 = vadd.f32 %v16971_v57, %v12376_v62  ;;  %16972 = vst [vmem:[#allocation18_spill] sm:$0xff] %v14442_v8  ;;  %v14451_v60 = vpop.f32.mrb[183].mxu1  ;;  %vm5424_vm13 = vcmp.gt.f32.partialorder %v4540_v5, 0.0  ;;  %v11482_v8 = vld [vmem:[%s11583_s7 + $0x210] sm:$0xff]  }
 0x2fe   : > { %10764 = vst [vmem:[%s12490_s25 + $0x4b8] sm:$0xff] %v11151_v9  ;;  %2205 = vrot.lane.b32.xlu1 %v1516_v17, %s11522_s11  ;;  %v6954_v54 = vsel %vm5418_vm8, %v3543_v12, %v6186_v45  ;;  %v2822_v42 = vsel %vm2625_vm3, %v2564_v6, %v2178_v59  ;;  %v4538_v39 = vadd.f32 %v14049_v32, %v12432_v1  ;;  %16973 = vst [vmem:[#allocation2_spill] sm:$0xff] %v14451_v60  ;;  %v1762_v32 = vpop.permute.xlu0 %1761  ;;  %v16974_v6 = vld [vmem:[#allocation5_spill] sm:$0xff] }
 0x2ff   : > { %v3547_v23 = vadd.f32 %v14051_v40, %v12363_v61  ;;  %v6956_v24 = vsel %vm5420_vm9, %v4536_v37, %v6188_v29  ;;  %vm5419_vm10 = vcmp.gt.f32.partialorder %v3545_v48, 0.0  ;;  %v6187_v50 = vmul.f32 -0.51027, %v3545_v48  ;;  %3811 = vmatmul.mubr.bf16.gmra.mrb[4].mxu0 %v2822_v42  ;;  %4804 = vmatmul.mubr.bf16.gmra.mrb[4].mxu1 %v2822_v42  ;;  %v1964_v42 = vpop.permute.xlu1 %1963 }
 0x300   : > { %vm5421_vm11 = vcmp.gt.f32.partialorder %v4538_v39, 0.0  ;;  %v6189_v59 = vmul.f32 -0.51027, %v4538_v39  ;;  %3820 = vmatprep.mubr.bf16.mxu0 %v16849_v49  ;;  %4813 = vmatprep.mubr.bf16.mxu1 %v16849_v49  ;;  %v6192_v37 = vmul.f32 -0.51027, %v4540_v5  ;;  %v3549_v43 = vadd.f32 %v14061_v16, %v12376_v62 }
 0x301   : > { %vm5422_vm12 = vcmp.gt.f32.partialorder %v3547_v23, 0.0  ;;  %v6190_v12 = vmul.f32 -0.51027, %v3547_v23  ;;  %v6955_v40 = vsel %vm5419_vm10, %v3545_v48, %v6187_v50  ;;  %v4542_v57 = vadd.f32 %v16974_v6, %v12432_v1 }
 0x302   : > { %v10960_v9 = vpack.c.bf16 %v6955_v40, %v6954_v54  ;;  %v6957_v45 = vsel %vm5421_vm11, %v4538_v39, %v6189_v59  ;;  %1991 = vrot.lane.b32.xlu1 %v14385_v26, %s11523_s14  ;;  %v6960_v50 = vsel %vm5424_vm13, %v4540_v5, %v6192_v37  ;;  %vm5423_vm14 = vcmp.gt.f32.partialorder %v3549_v43, 0.0 }
 0x303   : > { %v6958_v29 = vsel %vm5422_vm12, %v3547_v23, %v6190_v12  ;;  %v11152_v48 = vpack.c.bf16 %v6957_v45, %v6956_v24  ;;  %v6191_v60 = vmul.f32 -0.51027, %v3549_v43  ;;  %vm5425_vm15 = vcmp.gt.f32.partialorder %v4542_v57, 0.0  ;;  %v16975_v24 = vld [vmem:[#allocation6_spill] sm:$0xff]  ;;  %v16976_v45 = vld [vmem:[#allocation21_spill] sm:$0xff] }
 0x304   : > { %8838 = vst [vmem:[%s12490_s25 + $0x4c0] sm:$0xff] %v10960_v9  ;;  %v6193_v16 = vmul.f32 -0.51027, %v4542_v57  ;;  %v2373_v54 = vsel %vm2239_vm1, %v11482_v8, %v1762_v32  ;;  %v1517_v39 = vshrl.u32 %v14385_v26, 16  ;;  %v1521_v59 = vshll.u32 %v14461_v36, 16  ;;  %v2180_v8 = vpop.permute.xlu0 %2179 }
 0x305   : > { %10765 = vst [vmem:[%s12490_s25 + $0x4e0] sm:$0xff] %v11152_v48  ;;  %v6959_v23 = vsel %vm5423_vm14, %v3549_v43, %v6191_v60  ;;  %v2566_v12 = vsel %vm2432_vm2, %v2373_v54, %v1964_v42  ;;  %v3553_v5 = vadd.f32 %v16975_v24, %v12363_v61  ;;  %v4546_v6 = vadd.f32 %v16976_v45, %v12365_v33  ;;  %v14482_v43 = vpop.f32.mrb[184].mxu0  ;;  %v14484_v42 = vpop.f32.mrb[184].mxu1  ;;  %v16980_v48 = vld [vmem:[#allocation23_spill] sm:$0xff] }
 0x306   : > { %v10961_v40 = vpack.c.bf16 %v6959_v23, %v6958_v29  ;;  %v6961_v37 = vsel %vm5425_vm15, %v4542_v57, %v6193_v16  ;;  %v1519_v9 = vor.u32 %v1517_v39, %v14425_v47  ;;  %1791 = vrot.lane.b32.xlu1 %v1516_v17, %s11521_s10  ;;  %v14480_v60 = vrot.slane %v1521_v59, 1  ;;  %16977 = vst [vmem:[#allocation3_spill] sm:$0xff] %v14482_v43  ;;  %v16979_v29 = vld [vmem:[#allocation22_spill] sm:$0xff]  ;;  %v1764_v17 = vpop.permute.xlu1 %1763  ;;  %v16982_v59 = vld [vmem:[#allocation24_spill] sm:$0xff] }
 0x307   : > { %v11153_v26 = vpack.c.bf16 %v6961_v37, %v6960_v50  ;;  %vm5426_vm4 = vcmp.gt.f32.partialorder %v3553_v5, 0.0  ;;  %v6194_v32 = vmul.f32 -0.51027, %v3553_v5  ;;  %16978 = vst [vmem:[#allocation19_spill] sm:$0xff] %v14484_v42  ;;  %vm5428_vm5 = vcmp.gt.f32.partialorder %v4546_v6, 0.0  ;;  %v14491_v50 = vpop.f32.mrb[185].mxu0 }
 0x308   : > { %8839 = vst [vmem:[%s12490_s25 + $0x4c8] sm:$0xff] %v10961_v40  ;;  %v6196_v47 = vmul.f32 -0.51027, %v4546_v6  ;;  %v3555_v57 = vadd.f32 %v16979_v29, %v12376_v62  ;;  %v4548_v16 = vadd.f32 %v16980_v48, %v12432_v1  ;;  %16981 = vst [vmem:[#allocation20_spill] sm:$0xff] %v14491_v50  ;;  %v1524_v54 = vsel %vm856_vm0, %v1519_v9, %v14480_v60  ;;  %v14500_v40 = vld [vmem:[%s11583_s7 + $0x2a0] sm:$0xff]   ;;  %v14502_v37 = vpop.f32.mrb[185].mxu1 }
 0x309   : > { %10766 = vst [vmem:[%s12490_s25 + $0x4e8] sm:$0xff] %v11153_v26  ;;  %v6962_v39 = vsel %vm5426_vm4, %v3553_v5, %v6194_v32  ;;  %v2825_v23 = vsel %vm2625_vm3, %v2566_v12, %v2180_v8  ;;  %v3557_v24 = vadd.f32 %v16982_v59, %v12363_v61  ;;  %16983 = vst [vmem:[#allocation4_spill] sm:$0xff] %v14502_v37  ;;  %v14504_v45 = vpop.f32.mrb[186].mxu0  ;;  %2207 = vrot.lane.b32.xlu0 %v1524_v54, %s11522_s11  ;;  %v14507_v5 = vpop.f32.mrb[186].mxu1  ;;  %v16987_v32 = vld [vmem:[#allocation25_spill] sm:$0xff] }
 0x30a   : > { %16984 = vst [vmem:[#allocation5_spill] sm:$0xff] %v14504_v45  ;;  %v6964_v29 = vsel %vm5428_vm5, %v4546_v6, %v6196_v47  ;;  %vm5427_vm6 = vcmp.gt.f32.partialorder %v3555_v57, 0.0  ;;  %v6195_v26 = vmul.f32 -0.51027, %v3555_v57  ;;  %vm5429_vm7 = vcmp.gt.f32.partialorder %v4548_v16, 0.0  ;;  %3821 = vmatmul.mubr.bf16.gmra.mrb[8].mxu0 %v2825_v23  ;;  %16985 = vst [vmem:[#allocation6_spill] sm:$0xff] %v14507_v5  ;;  %4814 = vmatmul.mubr.bf16.gmra.mrb[8].mxu1 %v2825_v23 }
 0x30b   : > { %v14509_v12 = vpop.f32.mrb[187].mxu0  ;;  %v6197_v9 = vmul.f32 -0.51027, %v4548_v16  ;;  %vm5430_vm8 = vcmp.gt.f32.partialorder %v3557_v24, 0.0  ;;  %v6198_v8 = vmul.f32 -0.51027, %v3557_v24  ;;  %v4550_v48 = vadd.f32 %v16987_v32, %v12365_v33  ;;  %3830 = vmatprep.mubr.bf16.mxu0 %v16849_v49  ;;  %4823 = vmatprep.mubr.bf16.mxu1 %v16849_v49 }
 0x30c   : > { %16986 = vst [vmem:[#allocation21_spill] sm:$0xff] %v14509_v12  ;;  %v14514_v59 = vpop.f32.mrb[187].mxu1  ;;  %v6963_v6 = vsel %vm5427_vm6, %v3555_v57, %v6195_v26  ;;  %v16989_v47 = vld [vmem:[#allocation7_spill] sm:$0xff]  ;;  %v16990_v5 = vld [vmem:[#allocation8_spill] sm:$0xff]  ;;  %v11483_v12 = vld [vmem:[%s11583_s7 + $0x218] sm:$0xff]  }
 0x30d   : > { %16988 = vst [vmem:[#allocation22_spill] sm:$0xff] %v14514_v59  ;;  %v3559_v45 = vadd.f32 %v16989_v47, %v12376_v62  ;;  %v4552_v37 = vadd.f32 %v16990_v5, %v12432_v1  ;;  %v2375_v50 = vsel %vm2239_vm1, %v11483_v12, %v1764_v17  ;;  %v10962_v42 = vpack.c.bf16 %v6963_v6, %v6962_v39  ;;  %v1966_v39 = vpop.permute.xlu0 %1965  ;;  %v2182_v12 = vpop.permute.xlu1 %2181 }
 0x30e   : > { %v6965_v23 = vsel %vm5429_vm7, %v4548_v16, %v6197_v9  ;;  %v6966_v32 = vsel %vm5430_vm8, %v3557_v24, %v6198_v8  ;;  %vm5432_vm9 = vcmp.gt.f32.partialorder %v4550_v48, 0.0  ;;  %v6200_v43 = vmul.f32 -0.51027, %v4550_v48  ;;  %1993 = vrot.lane.b32.xlu0 %v14461_v36, %s11523_s14  ;;  %v14534_v8 = vpop.f32.mrb[188].mxu0 }
 0x30f   : > { %v11154_v59 = vpack.c.bf16 %v6965_v23, %v6964_v29  ;;  %vm5431_vm10 = vcmp.gt.f32.partialorder %v3559_v45, 0.0  ;;  %v6199_v57 = vmul.f32 -0.51027, %v3559_v45  ;;  %8840 = vst [vmem:[%s12490_s25 + $0x4d0] sm:$0xff] %v10962_v42  ;;  %vm5433_vm11 = vcmp.gt.f32.partialorder %v4552_v37, 0.0  ;;  %v14536_v42 = vpop.f32.mrb[188].mxu1 }
 0x310   : > { %v6201_v26 = vmul.f32 -0.51027, %v4552_v37  ;;  %v1525_v17 = vshrl.u32 %v14461_v36, 16  ;;  %v1529_v5 = vshll.u32 %v14500_v40, 16  ;;  %v6968_v16 = vsel %vm5432_vm9, %v4550_v48, %v6200_v43  ;;  %v14541_v43 = vpop.f32.mrb[189].mxu0 }
 0x311   : > { %10767 = vst [vmem:[%s12490_s25 + $0x4f0] sm:$0xff] %v11154_v59  ;;  %v6967_v24 = vsel %vm5431_vm10, %v3559_v45, %v6199_v57  ;;  %v3563_v29 = vadd.f32 %v14143_v10, %v12363_v61  ;;  %v4556_v9 = vadd.f32 %v14152_v13, %v12365_v33  ;;  %v14543_v45 = vpop.f32.mrb[189].mxu1  ;;  %v14546_v13 = vpop.f32.mrb[190].mxu0  ;;  %v2568_v59 = vsel %vm2432_vm2, %v2375_v50, %v1966_v39 }
 0x312   : > { %v10963_v6 = vpack.c.bf16 %v6967_v24, %v6966_v32  ;;  %v6969_v36 = vsel %vm5433_vm11, %v4552_v37, %v6201_v26  ;;  %v1527_v47 = vor.u32 %v1525_v17, %v14480_v60  ;;  %v14539_v23 = vrot.slane %v1529_v5, 1  ;;  %1793 = vrot.lane.b32.xlu0 %v1524_v54, %s11521_s10  ;;  %v14554_v57 = vpop.f32.mrb[190].mxu1  ;;  %v14556_v26 = vpop.f32.mrb[191].mxu0  ;;  %v16992_v24 = vld [vmem:[#allocation9_spill] sm:$0xff] }
 0x313   : > { %v11155_v10 = vpack.c.bf16 %v6969_v36, %v6968_v16  ;;  %vm5434_vm12 = vcmp.gt.f32.partialorder %v3563_v29, 0.0  ;;  %v6202_v48 = vmul.f32 -0.51027, %v3563_v29  ;;  %vm5436_vm13 = vcmp.gt.f32.partialorder %v4556_v9, 0.0  ;;  %v14565_v50 = vpop.f32.mrb[191].mxu1 }
 0x314   : > { %8841 = vst [vmem:[%s12490_s25 + $0x4d8] sm:$0xff] %v10963_v6  ;;  %v1532_v37 = vsel %vm856_vm0, %v1527_v47, %v14539_v23  ;;  %v6204_v60 = vmul.f32 -0.51027, %v4556_v9  ;;  %v3565_v32 = vadd.f32 %v14154_v14, %v12376_v62  ;;  %v2828_v17 = vsel %vm2625_vm3, %v2568_v59, %v2182_v12  ;;  %16991 = vst [vmem:[#allocation23_spill] sm:$0xff] %v14565_v50  ;;  %v14575_v47 = vld [vmem:[%s11583_s7 + $0x2a8] sm:$0xff]   ;;  %v11484_v50 = vld [vmem:[%s11583_s7 + $0x220] sm:$0xff]  }
 0x315   : > { %10768 = vst [vmem:[%s12490_s25 + $0x4f8] sm:$0xff] %v11155_v10  ;;  %2209 = vrot.lane.b32.xlu1 %v1532_v37, %s11522_s11  ;;  %v6970_v54 = vsel %vm5434_vm12, %v3563_v29, %v6202_v48  ;;  %v4558_v5 = vadd.f32 %v14157_v20, %v12432_v1  ;;  %v3567_v16 = vadd.f32 %v14159_v44, %v12363_v61  ;;  %v1766_v20 = vpop.permute.xlu0 %1765 }
 0x316   : > { %v6972_v14 = vsel %vm5436_vm13, %v4556_v9, %v6204_v60  ;;  %vm5435_vm14 = vcmp.gt.f32.partialorder %v3565_v32, 0.0  ;;  %v6203_v39 = vmul.f32 -0.51027, %v3565_v32  ;;  %v4560_v6 = vadd.f32 %v16992_v24, %v12365_v33  ;;  %3831 = vmatmul.mubr.bf16.gmra.mrb[12].mxu0 %v2828_v17  ;;  %4824 = vmatmul.mubr.bf16.gmra.mrb[12].mxu1 %v2828_v17  ;;  %v1968_v17 = vpop.permute.xlu1 %1967 }
 0x317   : > { %vm5437_vm15 = vcmp.gt.f32.partialorder %v4558_v5, 0.0  ;;  %v6205_v12 = vmul.f32 -0.51027, %v4558_v5  ;;  %vm5438_vm4 = vcmp.gt.f32.partialorder %v3567_v16, 0.0  ;;  %v6206_v29 = vmul.f32 -0.51027, %v3567_v16  ;;  %3840 = vmatprep.mubr.bf16.mxu0 %v16849_v49  ;;  %4833 = vmatprep.mubr.bf16.mxu1 %v16849_v49 }
 0x318   : > { %v6971_v44 = vsel %vm5435_vm14, %v3565_v32, %v6203_v39  ;;  %vm5440_vm5 = vcmp.gt.f32.partialorder %v4560_v6, 0.0  ;;  %v6208_v9 = vmul.f32 -0.51027, %v4560_v6  ;;  %v3569_v36 = vadd.f32 %v14172_v3, %v12376_v62 }
 0x319   : > { %v10964_v10 = vpack.c.bf16 %v6971_v44, %v6970_v54  ;;  %v6973_v48 = vsel %vm5437_vm15, %v4558_v5, %v6205_v12  ;;  %v6974_v60 = vsel %vm5438_vm4, %v3567_v16, %v6206_v29  ;;  %v4562_v59 = vadd.f32 %v14174_v18, %v12432_v1  ;;  %1995 = vrot.lane.b32.xlu1 %v14500_v40, %s11523_s14 }
 0x31a   : > { %v11156_v32 = vpack.c.bf16 %v6973_v48, %v6972_v14  ;;  %v6976_v39 = vsel %vm5440_vm5, %v4560_v6, %v6208_v9  ;;  %vm5439_vm6 = vcmp.gt.f32.partialorder %v3569_v36, 0.0  ;;  %v6207_v24 = vmul.f32 -0.51027, %v3569_v36 }
 0x31b   : > { %8842 = vst [vmem:[%s12490_s25 + $0x500] sm:$0xff] %v10964_v10  ;;  %vm5441_vm7 = vcmp.gt.f32.partialorder %v4562_v59, 0.0  ;;  %v6209_v3 = vmul.f32 -0.51027, %v4562_v59  ;;  %v2377_v54 = vsel %vm2239_vm1, %v11484_v50, %v1766_v20  ;;  %v1533_v5 = vshrl.u32 %v14500_v40, 16  ;;  %v2184_v50 = vpop.permute.xlu0 %2183  ;;  %v14596_v10 = vpop.f32.mrb[192].mxu0 }
 0x31c   : > { %10769 = vst [vmem:[%s12490_s25 + $0x520] sm:$0xff] %v11156_v32  ;;  %v6975_v16 = vsel %vm5439_vm6, %v3569_v36, %v6207_v24  ;;  %v1537_v18 = vshll.u32 %v14575_v47, 16  ;;  %v2570_v12 = vsel %vm2432_vm2, %v2377_v54, %v1968_v17  ;;  %v3573_v14 = vadd.f32 %v14200_v4, %v12363_v61  ;;  %v14598_v4 = vpop.f32.mrb[192].mxu1  ;;  %v14614_v24 = vld [vmem:[%s11583_s7 + $0x2b0] sm:$0xff]  }
 0x31d   : > { %v10965_v6 = vpack.c.bf16 %v6975_v16, %v6974_v60  ;;  %v6977_v29 = vsel %vm5441_vm7, %v4562_v59, %v6209_v3  ;;  %v1535_v44 = vor.u32 %v1533_v5, %v14539_v23  ;;  %v4566_v9 = vadd.f32 %v14202_v51, %v12365_v33  ;;  %1795 = vrot.lane.b32.xlu1 %v1532_v37, %s11521_s10  ;;  %v1768_v37 = vpop.permute.xlu1 %1767  ;;  %v14605_v60 = vpop.f32.mrb[193].mxu0 }
 0x31e   : > { %v11157_v40 = vpack.c.bf16 %v6977_v29, %v6976_v39  ;;  %v14594_v20 = vrot.slane %v1537_v18, 1  ;;  %vm5442_vm8 = vcmp.gt.f32.partialorder %v3573_v14, 0.0  ;;  %v6210_v36 = vmul.f32 -0.51027, %v3573_v14  ;;  %v14616_v3 = vpop.f32.mrb[193].mxu1 }
 0x31f   : > { %8843 = vst [vmem:[%s12490_s25 + $0x508] sm:$0xff] %v10965_v6  ;;  %vm5444_vm9 = vcmp.gt.f32.partialorder %v4566_v9, 0.0  ;;  %v6212_v23 = vmul.f32 -0.51027, %v4566_v9  ;;  %v3575_v51 = vadd.f32 %v14213_v63, %v12376_v62  ;;  %v4568_v48 = vadd.f32 %v14215_v27, %v12432_v1  ;;  %v14618_v63 = vpop.f32.mrb[194].mxu0  ;;  %v14621_v5 = vpop.f32.mrb[194].mxu1 }
 0x320   : > { %10770 = vst [vmem:[%s12490_s25 + $0x528] sm:$0xff] %v11157_v40  ;;  %v1540_v59 = vsel %vm856_vm0, %v1535_v44, %v14594_v20  ;;  %v6978_v17 = vsel %vm5442_vm8, %v3573_v14, %v6210_v36  ;;  %v2831_v32 = vsel %vm2625_vm3, %v2570_v12, %v2184_v50  ;;  %v3577_v39 = vadd.f32 %v14219_v7, %v12363_v61  ;;  %v14623_v16 = vpop.f32.mrb[195].mxu0  ;;  %v16995_v12 = vld [vmem:[#allocation10_spill] sm:$0xff]  ;;  %v14628_v6 = vpop.f32.mrb[195].mxu1  ;;  %v16997_v44 = vld [vmem:[#allocation11_spill] sm:$0xff] }
 0x321   : > { %2211 = vrot.lane.b32.xlu0 %v1540_v59, %s11522_s11  ;;  %v6980_v27 = vsel %vm5444_vm9, %v4566_v9, %v6212_v23  ;;  %vm5443_vm10 = vcmp.gt.f32.partialorder %v3575_v51, 0.0  ;;  %v6211_v54 = vmul.f32 -0.51027, %v3575_v51  ;;  %vm5445_vm11 = vcmp.gt.f32.partialorder %v4568_v48, 0.0  ;;  %3841 = vmatmul.mubr.bf16.gmra.mrb[16].mxu0 %v2831_v32  ;;  %16993 = vst [vmem:[#allocation24_spill] sm:$0xff] %v14621_v5  ;;  %16994 = vst [vmem:[#allocation25_spill] sm:$0xff] %v14623_v16 }
 0x322   : > { %v6213_v18 = vmul.f32 -0.51027, %v4568_v48  ;;  %vm5446_vm12 = vcmp.gt.f32.partialorder %v3577_v39, 0.0  ;;  %v6214_v7 = vmul.f32 -0.51027, %v3577_v39  ;;  %v4570_v14 = vadd.f32 %v16995_v12, %v12365_v33  ;;  %4834 = vmatmul.mubr.bf16.gmra.mrb[16].mxu1 %v2831_v32  ;;  %3850 = vmatprep.mubr.bf16.mxu0 %v16849_v49  ;;  %16996 = vst [vmem:[#allocation7_spill] sm:$0xff] %v14628_v6 }
 0x323   : > { %v6979_v29 = vsel %vm5443_vm10, %v3575_v51, %v6211_v54  ;;  %v3579_v9 = vadd.f32 %v16997_v44, %v12376_v62  ;;  %v16998_v50 = vld [vmem:[#allocation26_spill] sm:$0xff]  ;;  %v11485_v36 = vld [vmem:[%s11583_s7 + $0x228] sm:$0xff]   ;;  %4843 = vmatprep.mubr.bf16.mxu1 %v16849_v49  ;;  %v1545_v44 = vshll.u32 %v14614_v24, 16 }
 0x324   : > { %v4572_v40 = vadd.f32 %v16998_v50, %v12432_v1  ;;  %v2379_v23 = vsel %vm2239_vm1, %v11485_v36, %v1768_v37  ;;  %v10966_v16 = vpack.c.bf16 %v6979_v29, %v6978_v17  ;;  %v6981_v32 = vsel %vm5445_vm11, %v4568_v48, %v6213_v18  ;;  %v1970_v17 = vpop.permute.xlu0 %1969  ;;  %v2186_v29 = vpop.permute.xlu1 %2185 }
 0x325   : > { %v6982_v12 = vsel %vm5446_vm12, %v3577_v39, %v6214_v7  ;;  %vm5448_vm13 = vcmp.gt.f32.partialorder %v4570_v14, 0.0  ;;  %v11158_v6 = vpack.c.bf16 %v6981_v32, %v6980_v27  ;;  %v6216_v5 = vmul.f32 -0.51027, %v4570_v14  ;;  %1997 = vrot.lane.b32.xlu0 %v14575_v47, %s11523_s14  ;;  %v14648_v7 = vpop.f32.mrb[196].mxu0 }
 0x326   : > { %vm5447_vm14 = vcmp.gt.f32.partialorder %v3579_v9, 0.0  ;;  %v6215_v51 = vmul.f32 -0.51027, %v3579_v9  ;;  %8844 = vst [vmem:[%s12490_s25 + $0x510] sm:$0xff] %v10966_v16  ;;  %vm5449_vm15 = vcmp.gt.f32.partialorder %v4572_v40, 0.0  ;;  %v1541_v37 = vshrl.u32 %v14575_v47, 16 }
 0x327   : > { %v6217_v54 = vmul.f32 -0.51027, %v4572_v40  ;;  %10771 = vst [vmem:[%s12490_s25 + $0x530] sm:$0xff] %v11158_v6  ;;  %v6984_v48 = vsel %vm5448_vm13, %v4570_v14, %v6216_v5  ;;  %v3583_v27 = vadd.f32 %v14253_v21, %v12363_v61  ;;  %v4576_v18 = vadd.f32 %v14255_v31, %v12365_v33  ;;  %v14650_v16 = vpop.f32.mrb[196].mxu1  ;;  %v14655_v5 = vpop.f32.mrb[197].mxu0 }
 0x328   : > { %v6983_v39 = vsel %vm5447_vm14, %v3579_v9, %v6215_v51  ;;  %v1543_v36 = vor.u32 %v1541_v37, %v14594_v20  ;;  %v14653_v32 = vrot.slane %v1545_v44, 1  ;;  %v14657_v14 = vpop.f32.mrb[197].mxu1  ;;  %v14660_v31 = vpop.f32.mrb[198].mxu0  ;;  %v4578_v44 = vadd.f32 %v14273_v2, %v12432_v1 }
 0x329   : > { %v10967_v50 = vpack.c.bf16 %v6983_v39, %v6982_v12  ;;  %v6985_v47 = vsel %vm5449_vm15, %v4572_v40, %v6217_v54  ;;  %vm5450_vm4 = vcmp.gt.f32.partialorder %v3583_v27, 0.0  ;;  %v6218_v6 = vmul.f32 -0.51027, %v3583_v27  ;;  %1797 = vrot.lane.b32.xlu0 %v1540_v59, %s11521_s10  ;;  %v14668_v51 = vpop.f32.mrb[198].mxu1  ;;  %v14670_v54 = vpop.f32.mrb[199].mxu0  ;;  %v17002_v39 = vld [vmem:[#allocation27_spill] sm:$0xff] }
 0x32a   : > { %v11159_v21 = vpack.c.bf16 %v6985_v47, %v6984_v48  ;;  %vm5452_vm5 = vcmp.gt.f32.partialorder %v4576_v18, 0.0  ;;  %v1548_v9 = vsel %vm856_vm0, %v1543_v36, %v14653_v32  ;;  %v6220_v20 = vmul.f32 -0.51027, %v4576_v18  ;;  %16999 = vst [vmem:[#allocation8_spill] sm:$0xff] %v14668_v51  ;;  %17000 = vst [vmem:[#allocation9_spill] sm:$0xff] %v14670_v54  ;;  %v1770_v2 = vpop.permute.xlu0 %1769  ;;  %v17003_v47 = vld [vmem:[#allocation12_spill] sm:$0xff] }
 0x32b   : > { %8845 = vst [vmem:[%s12490_s25 + $0x518] sm:$0xff] %v10967_v50  ;;  %v2572_v40 = vsel %vm2432_vm2, %v2379_v23, %v1970_v17  ;;  %v3585_v12 = vadd.f32 %v14264_v15, %v12376_v62  ;;  %2213 = vrot.lane.b32.xlu1 %v1548_v9, %s11522_s11  ;;  %v6986_v59 = vsel %vm5450_vm4, %v3583_v27, %v6218_v6  ;;  %v14679_v23 = vpop.f32.mrb[199].mxu1  ;;  %vm5453_vm7 = vcmp.gt.f32.partialorder %v4578_v44, 0.0  ;;  %v11486_v51 = vld [vmem:[%s11583_s7 + $0x230] sm:$0xff]  }
 0x32c   : > { %10772 = vst [vmem:[%s12490_s25 + $0x538] sm:$0xff] %v11159_v21  ;;  %v2834_v37 = vsel %vm2625_vm3, %v2572_v40, %v2186_v29  ;;  %v3587_v48 = vadd.f32 %v14275_v35, %v12363_v61  ;;  %17001 = vst [vmem:[#allocation10_spill] sm:$0xff] %v14679_v23  ;;  %v6988_v15 = vsel %vm5452_vm5, %v4576_v18, %v6220_v20  ;;  %v6221_v29 = vmul.f32 -0.51027, %v4578_v44  ;;  %v14689_v21 = vld [vmem:[%s11583_s7 + $0x2b8] sm:$0xff]   ;;  %v1972_v23 = vpop.permute.xlu1 %1971 }
 0x32d   : > { %vm5451_vm6 = vcmp.gt.f32.partialorder %v3585_v12, 0.0  ;;  %v6219_v17 = vmul.f32 -0.51027, %v3585_v12  ;;  %v4580_v50 = vadd.f32 %v17002_v39, %v12365_v33  ;;  %3851 = vmatmul.mubr.bf16.gmra.mrb[20].mxu0 %v2834_v37  ;;  %4844 = vmatmul.mubr.bf16.gmra.mrb[20].mxu1 %v2834_v37  ;;  %v3589_v36 = vadd.f32 %v17003_v47, %v12376_v62  ;;  %v17004_v37 = vld [vmem:[#allocation28_spill] sm:$0xff] }
 0x32e   : > { %vm5454_vm8 = vcmp.gt.f32.partialorder %v3587_v48, 0.0  ;;  %v6222_v27 = vmul.f32 -0.51027, %v3587_v48  ;;  %3860 = vmatprep.mubr.bf16.mxu0 %v16849_v49  ;;  %4853 = vmatprep.mubr.bf16.mxu1 %v16849_v49  ;;  %v6989_v20 = vsel %vm5453_vm7, %v4578_v44, %v6221_v29  ;;  %v4582_v39 = vadd.f32 %v17004_v37, %v12432_v1 }
 0x32f   : > { %v6987_v35 = vsel %vm5451_vm6, %v3585_v12, %v6219_v17  ;;  %vm5456_vm9 = vcmp.gt.f32.partialorder %v4580_v50, 0.0  ;;  %v6224_v18 = vmul.f32 -0.51027, %v4580_v50  ;;  %1999 = vrot.lane.b32.xlu1 %v14614_v24, %s11523_s14  ;;  %v11160_v12 = vpack.c.bf16 %v6989_v20, %v6988_v15 }
 0x330   : > { %v10968_v6 = vpack.c.bf16 %v6987_v35, %v6986_v59  ;;  %v6990_v40 = vsel %vm5454_vm8, %v3587_v48, %v6222_v27  ;;  %vm5455_vm10 = vcmp.gt.f32.partialorder %v3589_v36, 0.0  ;;  %v6223_v54 = vmul.f32 -0.51027, %v3589_v36 }
 0x331   : > { %v6992_v17 = vsel %vm5456_vm9, %v4580_v50, %v6224_v18  ;;  %vm5457_vm11 = vcmp.gt.f32.partialorder %v4582_v39, 0.0  ;;  %v6225_v47 = vmul.f32 -0.51027, %v4582_v39  ;;  %v2381_v59 = vsel %vm2239_vm1, %v11486_v51, %v1770_v2  ;;  %10773 = vst [vmem:[%s12490_s25 + $0x560] sm:$0xff] %v11160_v12  ;;  %v2188_v51 = vpop.permute.xlu0 %2187  ;;  %v14710_v2 = vpop.f32.mrb[200].mxu0 }
 0x332   : > { %8846 = vst [vmem:[%s12490_s25 + $0x540] sm:$0xff] %v10968_v6  ;;  %v1549_v44 = vshrl.u32 %v14614_v24, 16  ;;  %v6991_v48 = vsel %vm5455_vm10, %v3589_v36, %v6223_v54  ;;  %v1553_v29 = vshll.u32 %v14689_v21, 16  ;;  %v2574_v27 = vsel %vm2432_vm2, %v2381_v59, %v1972_v23  ;;  %v14719_v20 = vpop.f32.mrb[201].mxu0 }
 0x333   : > { %v3593_v15 = vadd.f32 %v14304_v53, %v12363_v61  ;;  %v10969_v50 = vpack.c.bf16 %v6991_v48, %v6990_v40  ;;  %v6993_v35 = vsel %vm5457_vm11, %v4582_v39, %v6225_v47  ;;  %v4586_v6 = vadd.f32 %v14306_v19, %v12365_v33  ;;  %1799 = vrot.lane.b32.xlu1 %v1548_v9, %s11521_s10  ;;  %v14712_v53 = vpop.f32.mrb[200].mxu1  ;;  %v1772_v9 = vpop.permute.xlu1 %1771 }
 0x334   : > { %v1551_v18 = vor.u32 %v1549_v44, %v14653_v32  ;;  %v11161_v24 = vpack.c.bf16 %v6993_v35, %v6992_v17  ;;  %v14708_v54 = vrot.slane %v1553_v29, 1  ;;  %v3595_v19 = vadd.f32 %v14311_v0, %v12376_v62  ;;  %v14728_v17 = vld [vmem:[%s11583_s7 + $0x2c0] sm:$0xff]   ;;  %v14730_v47 = vpop.f32.mrb[201].mxu1  ;;  %v14732_v0 = vpop.f32.mrb[202].mxu0 }
 0x335   : > { %vm5458_vm12 = vcmp.gt.f32.partialorder %v3593_v15, 0.0  ;;  %v6226_v23 = vmul.f32 -0.51027, %v3593_v15  ;;  %8847 = vst [vmem:[%s12490_s25 + $0x548] sm:$0xff] %v10969_v50  ;;  %vm5460_vm13 = vcmp.gt.f32.partialorder %v4586_v6, 0.0  ;;  %v4588_v36 = vadd.f32 %v14313_v56, %v12432_v1  ;;  %v14735_v44 = vpop.f32.mrb[202].mxu1 }
 0x336   : > { %v6228_v32 = vmul.f32 -0.51027, %v4586_v6  ;;  %10774 = vst [vmem:[%s12490_s25 + $0x568] sm:$0xff] %v11161_v24  ;;  %v1556_v40 = vsel %vm856_vm0, %v1551_v18, %v14708_v54  ;;  %v2837_v39 = vsel %vm2625_vm3, %v2574_v27, %v2188_v51  ;;  %v3597_v12 = vadd.f32 %v14319_v58, %v12363_v61  ;;  %v14737_v48 = vpop.f32.mrb[203].mxu0  ;;  %v17006_v18 = vld [vmem:[#allocation13_spill] sm:$0xff] }
 0x337   : > { %v6994_v37 = vsel %vm5458_vm12, %v3593_v15, %v6226_v23  ;;  %2215 = vrot.lane.b32.xlu0 %v1556_v40, %s11522_s11  ;;  %vm5459_vm14 = vcmp.gt.f32.partialorder %v3595_v19, 0.0  ;;  %v6227_v59 = vmul.f32 -0.51027, %v3595_v19  ;;  %vm5461_vm15 = vcmp.gt.f32.partialorder %v4588_v36, 0.0  ;;  %3861 = vmatmul.mubr.bf16.gmra.mrb[24].mxu0 %v2837_v39  ;;  %v14742_v15 = vpop.f32.mrb[203].mxu1  ;;  %v11487_v51 = vld [vmem:[%s11583_s7 + $0x238] sm:$0xff]  }
 0x338   : > { %v6996_v56 = vsel %vm5460_vm13, %v4586_v6, %v6228_v32  ;;  %v6229_v29 = vmul.f32 -0.51027, %v4588_v36  ;;  %vm5462_vm4 = vcmp.gt.f32.partialorder %v3597_v12, 0.0  ;;  %v6230_v58 = vmul.f32 -0.51027, %v3597_v12  ;;  %4854 = vmatmul.mubr.bf16.gmra.mrb[24].mxu1 %v2837_v39  ;;  %3870 = vmatprep.mubr.bf16.mxu0 %v16849_v49  ;;  %17005 = vst [vmem:[#allocation11_spill] sm:$0xff] %v14742_v15 }
 0x339   : > { %v4590_v27 = vadd.f32 %v14326_v46, %v12365_v33  ;;  %v6995_v50 = vsel %vm5459_vm14, %v3595_v19, %v6227_v59  ;;  %v3599_v35 = vadd.f32 %v14328_v11, %v12376_v62  ;;  %v4592_v6 = vadd.f32 %v17006_v18, %v12432_v1  ;;  %4863 = vmatprep.mubr.bf16.mxu1 %v16849_v49  ;;  %v14764_v18 = vpop.f32.mrb[204].mxu1 }
 0x33a   : > { %v2383_v24 = vsel %vm2239_vm1, %v11487_v51, %v1772_v9  ;;  %v10970_v23 = vpack.c.bf16 %v6995_v50, %v6994_v37  ;;  %v6997_v46 = vsel %vm5461_vm15, %v4588_v36, %v6229_v29  ;;  %v6998_v32 = vsel %vm5462_vm4, %v3597_v12, %v6230_v58  ;;  %v1974_v37 = vpop.permute.xlu0 %1973  ;;  %v2190_v50 = vpop.permute.xlu1 %2189 }
 0x33b   : > { %vm5464_vm5 = vcmp.gt.f32.partialorder %v4590_v27, 0.0  ;;  %v11162_v39 = vpack.c.bf16 %v6997_v46, %v6996_v56  ;;  %v6232_v15 = vmul.f32 -0.51027, %v4590_v27  ;;  %vm5463_vm6 = vcmp.gt.f32.partialorder %v3599_v35, 0.0  ;;  %2001 = vrot.lane.b32.xlu0 %v14689_v21, %s11523_s14  ;;  %v14762_v58 = vpop.f32.mrb[204].mxu0 }
 0x33c   : > { %v6231_v19 = vmul.f32 -0.51027, %v3599_v35  ;;  %8848 = vst [vmem:[%s12490_s25 + $0x550] sm:$0xff] %v10970_v23  ;;  %vm5465_vm7 = vcmp.gt.f32.partialorder %v4592_v6, 0.0  ;;  %v6233_v11 = vmul.f32 -0.51027, %v4592_v6  ;;  %v3603_v56 = vadd.f32 %v14366_v28, %v12363_v61 }
 0x33d   : > { %v1557_v9 = vshrl.u32 %v14689_v21, 16  ;;  %v1561_v59 = vshll.u32 %v14728_v17, 16  ;;  %10775 = vst [vmem:[%s12490_s25 + $0x570] sm:$0xff] %v11162_v39  ;;  %v7000_v36 = vsel %vm5464_vm5, %v4590_v27, %v6232_v15  ;;  %v4596_v29 = vadd.f32 %v14368_v34, %v12365_v33  ;;  %v14769_v27 = vpop.f32.mrb[205].mxu0  ;;  %v14771_v15 = vpop.f32.mrb[205].mxu1 }
 0x33e   : > { %v6999_v12 = vsel %vm5463_vm6, %v3599_v35, %v6231_v19  ;;  %v7001_v21 = vsel %vm5465_vm7, %v4592_v6, %v6233_v11  ;;  %17007 = vst [vmem:[#allocation26_spill] sm:$0xff] %v14771_v15  ;;  %vm5466_vm8 = vcmp.gt.f32.partialorder %v3603_v56, 0.0  ;;  %v6234_v35 = vmul.f32 -0.51027, %v3603_v56  ;;  %v14774_v34 = vpop.f32.mrb[206].mxu0  ;;  %v14782_v19 = vpop.f32.mrb[206].mxu1 }
 0x33f   : > { %v10971_v51 = vpack.c.bf16 %v6999_v12, %v6998_v32  ;;  %v1559_v23 = vor.u32 %v1557_v9, %v14708_v54  ;;  %v14767_v46 = vrot.slane %v1561_v59, 1  ;;  %v11163_v28 = vpack.c.bf16 %v7001_v21, %v7000_v36  ;;  %1801 = vrot.lane.b32.xlu0 %v1556_v40, %s11521_s10  ;;  %17008 = vst [vmem:[#allocation27_spill] sm:$0xff] %v14774_v34  ;;  %v14784_v11 = vpop.f32.mrb[207].mxu0  ;;  %v17011_v59 = vld [vmem:[#allocation29_spill] sm:$0xff]  ;;  %v17012_v12 = vld [vmem:[#allocation14_spill] sm:$0xff]  ;;  %v17014_v21 = vld [vmem:[#allocation15_spill] sm:$0xff] }
 0x340   : > { %vm5468_vm9 = vcmp.gt.f32.partialorder %v4596_v29, 0.0  ;;  %v6236_v54 = vmul.f32 -0.51027, %v4596_v29  ;;  %v2576_v32 = vsel %vm2432_vm2, %v2383_v24, %v1974_v37  ;;  %v3605_v39 = vadd.f32 %v14376_v41, %v12376_v62  ;;  %17009 = vst [vmem:[#allocation12_spill] sm:$0xff] %v14782_v19  ;;  %17010 = vst [vmem:[#allocation28_spill] sm:$0xff] %v14784_v11  ;;  %v14793_v24 = vpop.f32.mrb[207].mxu1  ;;  %v1976_v19 = vpop.permute.xlu1 %1975 }
 0x341   : > { %8849 = vst [vmem:[%s12490_s25 + $0x558] sm:$0xff] %v10971_v51  ;;  %v1564_v6 = vsel %vm856_vm0, %v1559_v23, %v14767_v46  ;;  %10776 = vst [vmem:[%s12490_s25 + $0x578] sm:$0xff] %v11163_v28  ;;  %v7002_v40 = vsel %vm5466_vm8, %v3603_v56, %v6234_v35  ;;  %v2840_v9 = vsel %vm2625_vm3, %v2576_v32, %v2190_v50  ;;  %v1774_v28 = vpop.permute.xlu0 %1773  ;;  %v11488_v15 = vld [vmem:[%s11583_s7 + $0x240] sm:$0xff]  }
 0x342   : > { %2217 = vrot.lane.b32.xlu1 %v1564_v6, %s11522_s11  ;;  %v4598_v36 = vadd.f32 %v17011_v59, %v12432_v1  ;;  %v3607_v51 = vadd.f32 %v17012_v12, %v12363_v61  ;;  %17013 = vst [vmem:[#allocation13_spill] sm:$0xff] %v14793_v24  ;;  %v7004_v41 = vsel %vm5468_vm9, %v4596_v29, %v6236_v54  ;;  %vm5467_vm10 = vcmp.gt.f32.partialorder %v3605_v39, 0.0  ;;  %v17015_v54 = vld [vmem:[#allocation16_spill] sm:$0xff]  ;;  %v14803_v59 = vld [vmem:[%s11583_s7 + $0x2c8] sm:$0xff]   ;;  %v17016_v24 = vld [vmem:[#allocation17_spill] sm:$0xff] }
 0x343   : > { %v6235_v37 = vmul.f32 -0.51027, %v3605_v39  ;;  %v4600_v23 = vadd.f32 %v17014_v21, %v12365_v33  ;;  %3871 = vmatmul.mubr.bf16.gmra.mrb[28].mxu0 %v2840_v9  ;;  %4864 = vmatmul.mubr.bf16.gmra.mrb[28].mxu1 %v2840_v9  ;;  %v3609_v32 = vadd.f32 %v17015_v54, %v12376_v62  ;;  %v4602_v11 = vadd.f32 %v17016_v24, %v12432_v1 }
 0x344   : > { %vm5469_vm11 = vcmp.gt.f32.partialorder %v4598_v36, 0.0  ;;  %v6237_v50 = vmul.f32 -0.51027, %v4598_v36  ;;  %vm5470_vm12 = vcmp.gt.f32.partialorder %v3607_v51, 0.0  ;;  %v6238_v56 = vmul.f32 -0.51027, %v3607_v51  ;;  %3880 = vmatprep.mubr.bf16.mxu0 %v16849_v49  ;;  %4873 = vmatprep.mubr.bf16.mxu1 %v16849_v49 }
 0x345   : > { %v7003_v35 = vsel %vm5467_vm10, %v3605_v39, %v6235_v37  ;;  %vm5472_vm13 = vcmp.gt.f32.partialorder %v4600_v23, 0.0  ;;  %v6240_v29 = vmul.f32 -0.51027, %v4600_v23  ;;  %vm5471_vm14 = vcmp.gt.f32.partialorder %v3609_v32, 0.0 }
 0x346   : > { %v10972_v9 = vpack.c.bf16 %v7003_v35, %v7002_v40  ;;  %v7005_v12 = vsel %vm5469_vm11, %v4598_v36, %v6237_v50  ;;  %v7006_v21 = vsel %vm5470_vm12, %v3607_v51, %v6238_v56  ;;  %2003 = vrot.lane.b32.xlu1 %v14728_v17, %s11523_s14  ;;  %v6239_v34 = vmul.f32 -0.51027, %v3609_v32 }
 0x347   : > { %v11164_v39 = vpack.c.bf16 %v7005_v12, %v7004_v41  ;;  %v7008_v37 = vsel %vm5472_vm13, %v4600_v23, %v6240_v29  ;;  %vm5473_vm15 = vcmp.gt.f32.partialorder %v4602_v11, 0.0  ;;  %v6241_v54 = vmul.f32 -0.51027, %v4602_v11 }
 0x348   : > { %8850 = vst [vmem:[%s12490_s25 + $0x580] sm:$0xff] %v10972_v9  ;;  %v2385_v40 = vsel %vm2239_vm1, %v11488_v15, %v1774_v28  ;;  %v1565_v36 = vshrl.u32 %v14728_v17, 16  ;;  %v7007_v51 = vsel %vm5471_vm14, %v3609_v32, %v6239_v34  ;;  %v1569_v24 = vshll.u32 %v14803_v59, 16  ;;  %v2192_v15 = vpop.permute.xlu0 %2191  ;;  %v14824_v28 = vpop.f32.mrb[208].mxu0 }
 0x349   : > { %10777 = vst [vmem:[%s12490_s25 + $0x5a0] sm:$0xff] %v11164_v39  ;;  %v2578_v50 = vsel %vm2432_vm2, %v2385_v40, %v1976_v19  ;;  %v3613_v41 = vadd.f32 %v14420_v55, %v12363_v61  ;;  %v10973_v23 = vpack.c.bf16 %v7007_v51, %v7006_v21  ;;  %v7009_v56 = vsel %vm5473_vm15, %v4602_v11, %v6241_v54  ;;  %v14826_v55 = vpop.f32.mrb[208].mxu1  ;;  %v14833_v32 = vpop.f32.mrb[209].mxu0 }
 0x34a   : > { %v1567_v35 = vor.u32 %v1565_v36, %v14767_v46  ;;  %v4606_v29 = vadd.f32 %v14422_v22, %v12365_v33  ;;  %1803 = vrot.lane.b32.xlu1 %v1564_v6, %s11521_s10  ;;  %v11165_v17 = vpack.c.bf16 %v7009_v56, %v7008_v37  ;;  %v14822_v34 = vrot.slane %v1569_v24, 1  ;;  %v1776_v6 = vpop.permute.xlu1 %1775  ;;  %v14842_v37 = vld [vmem:[%s11583_s7 + $0x2d0] sm:$0xff]   ;;  %v14844_v54 = vpop.f32.mrb[209].mxu1  ;;  %v17021_v56 = vld [vmem:[#allocation18_spill] sm:$0xff] }
 0x34b   : > { %vm5474_vm4 = vcmp.gt.f32.partialorder %v3613_v41, 0.0  ;;  %v6242_v19 = vmul.f32 -0.51027, %v3613_v41  ;;  %8851 = vst [vmem:[%s12490_s25 + $0x588] sm:$0xff] %v10973_v23  ;;  %v3615_v22 = vadd.f32 %v14427_v52, %v12376_v62  ;;  %v4608_v11 = vadd.f32 %v14429_v38, %v12432_v1  ;;  %v14846_v52 = vpop.f32.mrb[210].mxu0  ;;  %v14849_v36 = vpop.f32.mrb[210].mxu1 }
 0x34c   : > { %vm5476_vm5 = vcmp.gt.f32.partialorder %v4606_v29, 0.0  ;;  %v6244_v46 = vmul.f32 -0.51027, %v4606_v29  ;;  %10778 = vst [vmem:[%s12490_s25 + $0x5a8] sm:$0xff] %v11165_v17  ;;  %v1572_v9 = vsel %vm856_vm0, %v1567_v35, %v14822_v34  ;;  %v2843_v21 = vsel %vm2625_vm3, %v2578_v50, %v2192_v15  ;;  %17017 = vst [vmem:[#allocation29_spill] sm:$0xff] %v14846_v52  ;;  %v14851_v51 = vpop.f32.mrb[211].mxu0 }
 0x34d   : > { %v7010_v12 = vsel %vm5474_vm4, %v3613_v41, %v6242_v19  ;;  %v3617_v39 = vadd.f32 %v14432_v25, %v12363_v61  ;;  %2219 = vrot.lane.b32.xlu0 %v1572_v9, %s11522_s11  ;;  %vm5475_vm6 = vcmp.gt.f32.partialorder %v3615_v22, 0.0  ;;  %v6243_v40 = vmul.f32 -0.51027, %v3615_v22  ;;  %3881 = vmatmul.mubr.bf16.gmra.mrb[32].mxu0 %v2843_v21  ;;  %17018 = vst [vmem:[#allocation14_spill] sm:$0xff] %v14849_v36  ;;  %v14856_v41 = vpop.f32.mrb[211].mxu1  ;;  %v11489_v17 = vld [vmem:[%s11583_s7 + $0x248] sm:$0xff]  }
 0x34e   : > { %v7012_v38 = vsel %vm5476_vm5, %v4606_v29, %v6244_v46  ;;  %vm5477_vm7 = vcmp.gt.f32.partialorder %v4608_v11, 0.0  ;;  %17019 = vst [vmem:[#allocation15_spill] sm:$0xff] %v14851_v51  ;;  %v6245_v24 = vmul.f32 -0.51027, %v4608_v11  ;;  %v4610_v50 = vadd.f32 %v14440_v30, %v12365_v33  ;;  %4874 = vmatmul.mubr.bf16.gmra.mrb[32].mxu1 %v2843_v21  ;;  %3890 = vmatprep.mubr.bf16.mxu0 %v16849_v49  ;;  %v17022_v29 = vld [vmem:[#allocation2_spill] sm:$0xff] }
 0x34f   : > { %vm5478_vm8 = vcmp.gt.f32.partialorder %v3617_v39, 0.0  ;;  %v6246_v25 = vmul.f32 -0.51027, %v3617_v39  ;;  %17020 = vst [vmem:[#allocation16_spill] sm:$0xff] %v14856_v41  ;;  %v7011_v23 = vsel %vm5475_vm6, %v3615_v22, %v6243_v40  ;;  %v3619_v35 = vadd.f32 %v17021_v56, %v12376_v62  ;;  %4883 = vmatprep.mubr.bf16.mxu1 %v16849_v49 }
 0x350   : > { %v4612_v15 = vadd.f32 %v17022_v29, %v12432_v1  ;;  %v2387_v19 = vsel %vm2239_vm1, %v11489_v17, %v1776_v6  ;;  %v10974_v46 = vpack.c.bf16 %v7011_v23, %v7010_v12  ;;  %v7013_v30 = vsel %vm5477_vm7, %v4608_v11, %v6245_v24  ;;  %v1978_v12 = vpop.permute.xlu0 %1977  ;;  %v2194_v23 = vpop.permute.xlu1 %2193 }
 0x351   : > { %v7014_v21 = vsel %vm5478_vm8, %v3617_v39, %v6246_v25  ;;  %vm5480_vm9 = vcmp.gt.f32.partialorder %v4610_v50, 0.0  ;;  %v11166_v41 = vpack.c.bf16 %v7013_v30, %v7012_v38  ;;  %v6248_v51 = vmul.f32 -0.51027, %v4610_v50  ;;  %2005 = vrot.lane.b32.xlu0 %v14803_v59, %s11523_s14  ;;  %v17023_v38 = vld [vmem:[#allocation3_spill] sm:$0xff]  ;;  %v14876_v17 = vpop.f32.mrb[212].mxu0 }
 0x352   : > { %vm5479_vm10 = vcmp.gt.f32.partialorder %v3619_v35, 0.0  ;;  %v6247_v22 = vmul.f32 -0.51027, %v3619_v35  ;;  %8852 = vst [vmem:[%s12490_s25 + $0x590] sm:$0xff] %v10974_v46  ;;  %vm5481_vm11 = vcmp.gt.f32.partialorder %v4612_v15, 0.0  ;;  %v1573_v6 = vshrl.u32 %v14803_v59, 16 }
 0x353   : > { %v6249_v40 = vmul.f32 -0.51027, %v4612_v15  ;;  %v1577_v56 = vshll.u32 %v14842_v37, 16  ;;  %10779 = vst [vmem:[%s12490_s25 + $0x5b0] sm:$0xff] %v11166_v41  ;;  %v7016_v11 = vsel %vm5480_vm9, %v4610_v50, %v6248_v51  ;;  %v3623_v24 = vadd.f32 %v17023_v38, %v12363_v61  ;;  %v17024_v25 = vld [vmem:[#allocation19_spill] sm:$0xff]  ;;  %v14878_v46 = vpop.f32.mrb[212].mxu1 }
 0x354   : > { %v7015_v39 = vsel %vm5479_vm10, %v3619_v35, %v6247_v22  ;;  %v4616_v29 = vadd.f32 %v17024_v25, %v12365_v33  ;;  %v1575_v36 = vor.u32 %v1573_v6, %v14822_v34  ;;  %v14883_v51 = vpop.f32.mrb[213].mxu0  ;;  %v14885_v50 = vpop.f32.mrb[213].mxu1  ;;  %v17031_v38 = vld [vmem:[#allocation4_spill] sm:$0xff] }
 0x355   : > { %v10975_v30 = vpack.c.bf16 %v7015_v39, %v7014_v21  ;;  %v7017_v59 = vsel %vm5481_vm11, %v4612_v15, %v6249_v40  ;;  %v14881_v52 = vrot.slane %v1577_v56, 1  ;;  %17025 = vst [vmem:[#allocation17_spill] sm:$0xff] %v14883_v51  ;;  %17026 = vst [vmem:[#allocation18_spill] sm:$0xff] %v14885_v50  ;;  %vm5482_vm12 = vcmp.gt.f32.partialorder %v3623_v24, 0.0  ;;  %1805 = vrot.lane.b32.xlu0 %v1572_v9, %s11521_s10  ;;  %v14888_v22 = vpop.f32.mrb[214].mxu0  ;;  %v17028_v40 = vld [vmem:[#allocation20_spill] sm:$0xff] }
 0x356   : > { %v11167_v41 = vpack.c.bf16 %v7017_v59, %v7016_v11  ;;  %v6250_v35 = vmul.f32 -0.51027, %v3623_v24  ;;  %vm5484_vm13 = vcmp.gt.f32.partialorder %v4616_v29, 0.0  ;;  %17027 = vst [vmem:[#allocation2_spill] sm:$0xff] %v14888_v22  ;;  %v6252_v34 = vmul.f32 -0.51027, %v4616_v29  ;;  %v1980_v22 = vpop.permute.xlu1 %1979 }
 0x357   : > { %8853 = vst [vmem:[%s12490_s25 + $0x598] sm:$0xff] %v10975_v30  ;;  %v1580_v15 = vsel %vm856_vm0, %v1575_v36, %v14881_v52  ;;  %v2580_v21 = vsel %vm2432_vm2, %v2387_v19, %v1978_v12  ;;  %v3625_v6 = vadd.f32 %v17028_v40, %v12376_v62  ;;  %v14896_v56 = vpop.f32.mrb[214].mxu1  ;;  %v14898_v11 = vpop.f32.mrb[215].mxu0  ;;  %v4618_v25 = vadd.f32 %v17031_v38, %v12432_v1  ;;  %v17032_v36 = vld [vmem:[#allocation5_spill] sm:$0xff]  ;;  %v11490_v51 = vld [vmem:[%s11583_s7 + $0x250] sm:$0xff]  }
 0x358   : > { %17029 = vst [vmem:[#allocation3_spill] sm:$0xff] %v14896_v56  ;;  %17030 = vst [vmem:[#allocation19_spill] sm:$0xff] %v14898_v11  ;;  %2221 = vrot.lane.b32.xlu1 %v1580_v15, %s11522_s11  ;;  %v7018_v9 = vsel %vm5482_vm12, %v3623_v24, %v6250_v35  ;;  %v2846_v39 = vsel %vm2625_vm3, %v2580_v21, %v2194_v23  ;;  %v3627_v30 = vadd.f32 %v17032_v36, %v12363_v61  ;;  %v14907_v19 = vpop.f32.mrb[215].mxu1  ;;  %v1778_v35 = vpop.permute.xlu0 %1777  ;;  %v14917_v36 = vld [vmem:[%s11583_s7 + $0x2d8] sm:$0xff]   ;;  %v17036_v11 = vld [vmem:[#allocation22_spill] sm:$0xff] }
 0x359   : > { %10780 = vst [vmem:[%s12490_s25 + $0x5b8] sm:$0xff] %v11167_v41  ;;  %17033 = vst [vmem:[#allocation20_spill] sm:$0xff] %v14907_v19  ;;  %v7020_v12 = vsel %vm5484_vm13, %v4616_v29, %v6252_v34  ;;  %vm5483_vm14 = vcmp.gt.f32.partialorder %v3625_v6, 0.0  ;;  %v6251_v59 = vmul.f32 -0.51027, %v3625_v6  ;;  %v17034_v41 = vld [vmem:[#allocation6_spill] sm:$0xff]  ;;  %3891 = vmatmul.mubr.bf16.gmra.mrb[36].mxu0 %v2846_v39  ;;  %4884 = vmatmul.mubr.bf16.gmra.mrb[36].mxu1 %v2846_v39 }
 0x35a   : > { %v4620_v40 = vadd.f32 %v17034_v41, %v12365_v33  ;;  %vm5485_vm15 = vcmp.gt.f32.partialorder %v4618_v25, 0.0  ;;  %v6253_v23 = vmul.f32 -0.51027, %v4618_v25  ;;  %vm5486_vm4 = vcmp.gt.f32.partialorder %v3627_v30, 0.0  ;;  %3900 = vmatprep.mubr.bf16.mxu0 %v16849_v49  ;;  %4893 = vmatprep.mubr.bf16.mxu1 %v16849_v49  ;;  %v17035_v34 = vld [vmem:[#allocation21_spill] sm:$0xff] }
 0x35b   : > { %v6254_v24 = vmul.f32 -0.51027, %v3627_v30  ;;  %v7019_v21 = vsel %vm5483_vm14, %v3625_v6, %v6251_v59  ;;  %v3629_v38 = vadd.f32 %v17035_v34, %v12376_v62  ;;  %v4622_v56 = vadd.f32 %v17036_v11, %v12432_v1 }
 0x35c   : > { %vm5488_vm5 = vcmp.gt.f32.partialorder %v4620_v40, 0.0  ;;  %v6256_v29 = vmul.f32 -0.51027, %v4620_v40  ;;  %v10976_v39 = vpack.c.bf16 %v7019_v21, %v7018_v9  ;;  %v7021_v41 = vsel %vm5485_vm15, %v4618_v25, %v6253_v23  ;;  %2007 = vrot.lane.b32.xlu1 %v14842_v37, %s11523_s14 }
 0x35d   : > { %v7022_v19 = vsel %vm5486_vm4, %v3627_v30, %v6254_v24  ;;  %v11168_v6 = vpack.c.bf16 %v7021_v41, %v7020_v12  ;;  %vm5487_vm6 = vcmp.gt.f32.partialorder %v3629_v38, 0.0  ;;  %v6255_v50 = vmul.f32 -0.51027, %v3629_v38 }
 0x35e   : > { %v7024_v59 = vsel %vm5488_vm5, %v4620_v40, %v6256_v29  ;;  %8854 = vst [vmem:[%s12490_s25 + $0x5c0] sm:$0xff] %v10976_v39  ;;  %vm5489_vm7 = vcmp.gt.f32.partialorder %v4622_v56, 0.0  ;;  %v6257_v34 = vmul.f32 -0.51027, %v4622_v56  ;;  %v2389_v9 = vsel %vm2239_vm1, %v11490_v51, %v1778_v35  ;;  %v2196_v51 = vpop.permute.xlu0 %2195  ;;  %v14938_v35 = vpop.f32.mrb[216].mxu0 }
 0x35f   : > { %v1581_v25 = vshrl.u32 %v14842_v37, 16  ;;  %10781 = vst [vmem:[%s12490_s25 + $0x5e0] sm:$0xff] %v11168_v6  ;;  %v7023_v30 = vsel %vm5487_vm6, %v3629_v38, %v6255_v50  ;;  %v1585_v11 = vshll.u32 %v14917_v36, 16  ;;  %v2582_v23 = vsel %vm2432_vm2, %v2389_v9, %v1980_v22 }
 0x360   : > { %v3633_v12 = vadd.f32 %v14534_v8, %v12363_v61  ;;  %v10977_v40 = vpack.c.bf16 %v7023_v30, %v7022_v19  ;;  %v7025_v24 = vsel %vm5489_vm7, %v4622_v56, %v6257_v34  ;;  %v4626_v29 = vadd.f32 %v14536_v42, %v12365_v33  ;;  %1807 = vrot.lane.b32.xlu1 %v1580_v15, %s11521_s10  ;;  %v14940_v8 = vpop.f32.mrb[216].mxu1  ;;  %v1780_v15 = vpop.permute.xlu1 %1779 }
 0x361   : > { %v1583_v21 = vor.u32 %v1581_v25, %v14881_v52  ;;  %v11169_v37 = vpack.c.bf16 %v7025_v24, %v7024_v59  ;;  %v14936_v50 = vrot.slane %v1585_v11, 1  ;;  %v3635_v42 = vadd.f32 %v14541_v43, %v12376_v62  ;;  %v14947_v19 = vpop.f32.mrb[217].mxu0  ;;  %v14956_v59 = vld [vmem:[%s11583_s7 + $0x2e0] sm:$0xff]   ;;  %v14958_v34 = vpop.f32.mrb[217].mxu1 }
 0x362   : > { %vm5490_vm8 = vcmp.gt.f32.partialorder %v3633_v12, 0.0  ;;  %v6258_v22 = vmul.f32 -0.51027, %v3633_v12  ;;  %8855 = vst [vmem:[%s12490_s25 + $0x5c8] sm:$0xff] %v10977_v40  ;;  %vm5492_vm9 = vcmp.gt.f32.partialorder %v4626_v29, 0.0  ;;  %v4628_v56 = vadd.f32 %v14543_v45, %v12432_v1  ;;  %v14960_v43 = vpop.f32.mrb[218].mxu0 }
 0x363   : > { %v6260_v52 = vmul.f32 -0.51027, %v4626_v29  ;;  %10782 = vst [vmem:[%s12490_s25 + $0x5e8] sm:$0xff] %v11169_v37  ;;  %v1588_v38 = vsel %vm856_vm0, %v1583_v21, %v14936_v50  ;;  %v2849_v41 = vsel %vm2625_vm3, %v2582_v23, %v2196_v51  ;;  %v3637_v6 = vadd.f32 %v14546_v13, %v12363_v61  ;;  %v14963_v25 = vpop.f32.mrb[218].mxu1  ;;  %v14965_v30 = vpop.f32.mrb[219].mxu0  ;;  %v17038_v21 = vld [vmem:[#allocation23_spill] sm:$0xff] }
 0x364   : > { %v7026_v39 = vsel %vm5490_vm8, %v3633_v12, %v6258_v22  ;;  %2223 = vrot.lane.b32.xlu0 %v1588_v38, %s11522_s11  ;;  %vm5491_vm10 = vcmp.gt.f32.partialorder %v3635_v42, 0.0  ;;  %v6259_v9 = vmul.f32 -0.51027, %v3635_v42  ;;  %vm5493_vm11 = vcmp.gt.f32.partialorder %v4628_v56, 0.0  ;;  %3901 = vmatmul.mubr.bf16.gmra.mrb[40].mxu0 %v2849_v41  ;;  %v14970_v12 = vpop.f32.mrb[219].mxu1  ;;  %v11491_v51 = vld [vmem:[%s11583_s7 + $0x258] sm:$0xff]  }
 0x365   : > { %v7028_v45 = vsel %vm5492_vm9, %v4626_v29, %v6260_v52  ;;  %v6261_v11 = vmul.f32 -0.51027, %v4628_v56  ;;  %vm5494_vm12 = vcmp.gt.f32.partialorder %v3637_v6, 0.0  ;;  %v6262_v13 = vmul.f32 -0.51027, %v3637_v6  ;;  %4894 = vmatmul.mubr.bf16.gmra.mrb[40].mxu1 %v2849_v41  ;;  %3910 = vmatprep.mubr.bf16.mxu0 %v16849_v49  ;;  %17037 = vst [vmem:[#allocation4_spill] sm:$0xff] %v14970_v12 }
 0x366   : > { %v4630_v23 = vadd.f32 %v14554_v57, %v12365_v33  ;;  %v7027_v40 = vsel %vm5491_vm10, %v3635_v42, %v6259_v9  ;;  %v3639_v24 = vadd.f32 %v14556_v26, %v12376_v62  ;;  %v4632_v29 = vadd.f32 %v17038_v21, %v12432_v1  ;;  %4903 = vmatprep.mubr.bf16.mxu1 %v16849_v49  ;;  %v14992_v21 = vpop.f32.mrb[220].mxu1 }
 0x367   : > { %v2391_v37 = vsel %vm2239_vm1, %v11491_v51, %v1780_v15  ;;  %v10978_v22 = vpack.c.bf16 %v7027_v40, %v7026_v39  ;;  %v7029_v57 = vsel %vm5493_vm11, %v4628_v56, %v6261_v11  ;;  %v7030_v52 = vsel %vm5494_vm12, %v3637_v6, %v6262_v13  ;;  %v1982_v39 = vpop.permute.xlu0 %1981  ;;  %v2198_v40 = vpop.permute.xlu1 %2197 }
 0x368   : > { %vm5496_vm13 = vcmp.gt.f32.partialorder %v4630_v23, 0.0  ;;  %v11170_v41 = vpack.c.bf16 %v7029_v57, %v7028_v45  ;;  %v6264_v12 = vmul.f32 -0.51027, %v4630_v23  ;;  %vm5495_vm14 = vcmp.gt.f32.partialorder %v3639_v24, 0.0  ;;  %2009 = vrot.lane.b32.xlu0 %v14917_v36, %s11523_s14  ;;  %v14990_v13 = vpop.f32.mrb[220].mxu0 }
 0x369   : > { %v6263_v42 = vmul.f32 -0.51027, %v3639_v24  ;;  %8856 = vst [vmem:[%s12490_s25 + $0x5d0] sm:$0xff] %v10978_v22  ;;  %vm5497_vm15 = vcmp.gt.f32.partialorder %v4632_v29, 0.0  ;;  %v6265_v26 = vmul.f32 -0.51027, %v4632_v29  ;;  %v3643_v45 = vadd.f32 %v14596_v10, %v12363_v61 }
 0x36a   : > { %v1589_v15 = vshrl.u32 %v14917_v36, 16  ;;  %v1593_v9 = vshll.u32 %v14956_v59, 16  ;;  %10783 = vst [vmem:[%s12490_s25 + $0x5f0] sm:$0xff] %v11170_v41  ;;  %v7032_v56 = vsel %vm5496_vm13, %v4630_v23, %v6264_v12  ;;  %v4636_v11 = vadd.f32 %v14598_v4, %v12365_v33  ;;  %v14997_v23 = vpop.f32.mrb[221].mxu0  ;;  %v14999_v12 = vpop.f32.mrb[221].mxu1 }
 0x36b   : > { %v7031_v6 = vsel %vm5495_vm14, %v3639_v24, %v6263_v42  ;;  %v7033_v36 = vsel %vm5497_vm15, %v4632_v29, %v6265_v26  ;;  %vm5498_vm4 = vcmp.gt.f32.partialorder %v3643_v45, 0.0  ;;  %v6266_v24 = vmul.f32 -0.51027, %v3643_v45  ;;  %v15002_v4 = vpop.f32.mrb[222].mxu0  ;;  %v15010_v42 = vpop.f32.mrb[222].mxu1 }
 0x36c   : > { %v10979_v51 = vpack.c.bf16 %v7031_v6, %v7030_v52  ;;  %v1591_v22 = vor.u32 %v1589_v15, %v14936_v50  ;;  %v14995_v57 = vrot.slane %v1593_v9, 1  ;;  %v11171_v10 = vpack.c.bf16 %v7033_v36, %v7032_v56  ;;  %1809 = vrot.lane.b32.xlu0 %v1588_v38, %s11521_s10  ;;  %17039 = vst [vmem:[#allocation5_spill] sm:$0xff] %v15002_v4  ;;  %v15012_v26 = vpop.f32.mrb[223].mxu0  ;;  %v17043_v6 = vld [vmem:[#allocation24_spill] sm:$0xff]  ;;  %v1984_v36 = vpop.permute.xlu1 %1983 }
 0x36d   : > { %vm5500_vm5 = vcmp.gt.f32.partialorder %v4636_v11, 0.0  ;;  %v6268_v50 = vmul.f32 -0.51027, %v4636_v11  ;;  %v2584_v52 = vsel %vm2432_vm2, %v2391_v37, %v1982_v39  ;;  %v3645_v41 = vadd.f32 %v14605_v60, %v12376_v62  ;;  %17040 = vst [vmem:[#allocation6_spill] sm:$0xff] %v15010_v42  ;;  %17041 = vst [vmem:[#allocation21_spill] sm:$0xff] %v15012_v26  ;;  %v15021_v37 = vpop.f32.mrb[223].mxu1 }
 0x36e   : > { %8857 = vst [vmem:[%s12490_s25 + $0x5d8] sm:$0xff] %v10979_v51  ;;  %v1596_v29 = vsel %vm856_vm0, %v1591_v22, %v14995_v57  ;;  %10784 = vst [vmem:[%s12490_s25 + $0x5f8] sm:$0xff] %v11171_v10  ;;  %v7034_v38 = vsel %vm5498_vm4, %v3643_v45, %v6266_v24  ;;  %v2852_v15 = vsel %vm2625_vm3, %v2584_v52, %v2198_v40  ;;  %v17044_v22 = vld [vmem:[#allocation25_spill] sm:$0xff]  ;;  %v15031_v24 = vld [vmem:[%s11583_s7 + $0x2e8] sm:$0xff]  }
 0x36f   : > { %2225 = vrot.lane.b32.xlu1 %v1596_v29, %s11522_s11  ;;  %v4638_v9 = vadd.f32 %v14616_v3, %v12432_v1  ;;  %v3647_v56 = vadd.f32 %v14618_v63, %v12363_v61  ;;  %17042 = vst [vmem:[#allocation22_spill] sm:$0xff] %v15021_v37  ;;  %v7036_v60 = vsel %vm5500_vm5, %v4636_v11, %v6268_v50  ;;  %vm5499_vm6 = vcmp.gt.f32.partialorder %v3645_v41, 0.0  ;;  %v1782_v3 = vpop.permute.xlu0 %1781 }
 0x370   : > { %v6267_v39 = vmul.f32 -0.51027, %v3645_v41  ;;  %v4640_v51 = vadd.f32 %v17043_v6, %v12365_v33  ;;  %3911 = vmatmul.mubr.bf16.gmra.mrb[44].mxu0 %v2852_v15  ;;  %4904 = vmatmul.mubr.bf16.gmra.mrb[44].mxu1 %v2852_v15  ;;  %v3649_v10 = vadd.f32 %v17044_v22, %v12376_v62  ;;  %v17045_v6 = vld [vmem:[#allocation7_spill] sm:$0xff]  ;;  %v11492_v22 = vld [vmem:[%s11583_s7 + $0x260] sm:$0xff]  }
 0x371   : > { %vm5501_vm7 = vcmp.gt.f32.partialorder %v4638_v9, 0.0  ;;  %v6269_v40 = vmul.f32 -0.51027, %v4638_v9  ;;  %vm5502_vm8 = vcmp.gt.f32.partialorder %v3647_v56, 0.0  ;;  %v6270_v45 = vmul.f32 -0.51027, %v3647_v56  ;;  %3920 = vmatprep.mubr.bf16.mxu0 %v16849_v49  ;;  %4913 = vmatprep.mubr.bf16.mxu1 %v16849_v49 }
 0x372   : > { %v7035_v63 = vsel %vm5499_vm6, %v3645_v41, %v6267_v39  ;;  %vm5504_vm9 = vcmp.gt.f32.partialorder %v4640_v51, 0.0  ;;  %v6272_v11 = vmul.f32 -0.51027, %v4640_v51  ;;  %v4642_v37 = vadd.f32 %v17045_v6, %v12432_v1 }
 0x373   : > { %v10980_v50 = vpack.c.bf16 %v7035_v63, %v7034_v38  ;;  %v7037_v52 = vsel %vm5501_vm7, %v4638_v9, %v6269_v40  ;;  %v7038_v15 = vsel %vm5502_vm8, %v3647_v56, %v6270_v45  ;;  %2011 = vrot.lane.b32.xlu1 %v14956_v59, %s11523_s14  ;;  %vm5503_vm10 = vcmp.gt.f32.partialorder %v3649_v10, 0.0 }
 0x374   : > { %v11172_v26 = vpack.c.bf16 %v7037_v52, %v7036_v60  ;;  %v7040_v41 = vsel %vm5504_vm9, %v4640_v51, %v6272_v11  ;;  %v6271_v39 = vmul.f32 -0.51027, %v3649_v10  ;;  %vm5505_vm11 = vcmp.gt.f32.partialorder %v4642_v37, 0.0 }
 0x375   : > { %8858 = vst [vmem:[%s12490_s25 + $0x600] sm:$0xff] %v10980_v50  ;;  %v6273_v42 = vmul.f32 -0.51027, %v4642_v37  ;;  %v2393_v4 = vsel %vm2239_vm1, %v11492_v22, %v1782_v3  ;;  %v1597_v38 = vshrl.u32 %v14956_v59, 16  ;;  %v1601_v56 = vshll.u32 %v15031_v24, 16  ;;  %v2200_v3 = vpop.permute.xlu0 %2199  ;;  %v1784_v59 = vpop.permute.xlu1 %1783  ;;  %v15077_v22 = vld [vmem:[%s11583_s7 + $0x2f0] sm:$0xff]  }
 0x376   : > { %10785 = vst [vmem:[%s12490_s25 + $0x620] sm:$0xff] %v11172_v26  ;;  %v7039_v9 = vsel %vm5503_vm10, %v3649_v10, %v6271_v39  ;;  %v2586_v40 = vsel %vm2432_vm2, %v2393_v4, %v1984_v36  ;;  %v3653_v60 = vadd.f32 %v14648_v7, %v12363_v61  ;;  %v4646_v11 = vadd.f32 %v14650_v16, %v12365_v33  ;;  %v15052_v36 = vpop.f32.mrb[224].mxu0  ;;  %v15054_v7 = vpop.f32.mrb[224].mxu1 }
 0x377   : > { %v10981_v51 = vpack.c.bf16 %v7039_v9, %v7038_v15  ;;  %v7041_v45 = vsel %vm5505_vm11, %v4642_v37, %v6273_v42  ;;  %v1599_v63 = vor.u32 %v1597_v38, %v14995_v57  ;;  %1811 = vrot.lane.b32.xlu1 %v1596_v29, %s11521_s10  ;;  %v15050_v10 = vrot.slane %v1601_v56, 1  ;;  %v15061_v29 = vpop.f32.mrb[225].mxu0  ;;  %v15063_v37 = vpop.f32.mrb[225].mxu1 }
 0x378   : > { %v11173_v26 = vpack.c.bf16 %v7041_v45, %v7040_v41  ;;  %vm5506_vm12 = vcmp.gt.f32.partialorder %v3653_v60, 0.0  ;;  %v6274_v4 = vmul.f32 -0.51027, %v3653_v60  ;;  %vm5508_vm13 = vcmp.gt.f32.partialorder %v4646_v11, 0.0  ;;  %v15071_v41 = vpop.f32.mrb[226].mxu0  ;;  %v17049_v45 = vld [vmem:[#allocation9_spill] sm:$0xff] }
 0x379   : > { %8859 = vst [vmem:[%s12490_s25 + $0x608] sm:$0xff] %v10981_v51  ;;  %v6276_v57 = vmul.f32 -0.51027, %v4646_v11  ;;  %v3655_v16 = vadd.f32 %v14655_v5, %v12376_v62  ;;  %v4648_v42 = vadd.f32 %v14657_v14, %v12432_v1  ;;  %v1604_v50 = vsel %vm856_vm0, %v1599_v63, %v15050_v10  ;;  %v15073_v5 = vpop.f32.mrb[226].mxu1  ;;  %v15079_v38 = vpop.f32.mrb[227].mxu0 }
 0x37a   : > { %10786 = vst [vmem:[%s12490_s25 + $0x628] sm:$0xff] %v11173_v26  ;;  %v7042_v52 = vsel %vm5506_vm12, %v3653_v60, %v6274_v4  ;;  %v2855_v15 = vsel %vm2625_vm3, %v2586_v40, %v2200_v3  ;;  %v3657_v6 = vadd.f32 %v14660_v31, %v12363_v61  ;;  %2227 = vrot.lane.b32.xlu0 %v1604_v50, %s11522_s11  ;;  %17046 = vst [vmem:[#allocation23_spill] sm:$0xff] %v15079_v38  ;;  %v17047_v31 = vld [vmem:[#allocation8_spill] sm:$0xff]  ;;  %v15084_v60 = vpop.f32.mrb[227].mxu1  ;;  %v11493_v26 = vld [vmem:[%s11583_s7 + $0x268] sm:$0xff]  }
 0x37b   : > { %v7044_v14 = vsel %vm5508_vm13, %v4646_v11, %v6276_v57  ;;  %vm5507_vm14 = vcmp.gt.f32.partialorder %v3655_v16, 0.0  ;;  %v6275_v39 = vmul.f32 -0.51027, %v3655_v16  ;;  %vm5509_vm15 = vcmp.gt.f32.partialorder %v4648_v42, 0.0  ;;  %3921 = vmatmul.mubr.bf16.gmra.mrb[48].mxu0 %v2855_v15  ;;  %4914 = vmatmul.mubr.bf16.gmra.mrb[48].mxu1 %v2855_v15  ;;  %17048 = vst [vmem:[#allocation24_spill] sm:$0xff] %v15084_v60  ;;  %v17050_v11 = vld [vmem:[#allocation10_spill] sm:$0xff] }
 0x37c   : > { %v6277_v9 = vmul.f32 -0.51027, %v4648_v42  ;;  %vm5510_vm4 = vcmp.gt.f32.partialorder %v3657_v6, 0.0  ;;  %v6278_v56 = vmul.f32 -0.51027, %v3657_v6  ;;  %v4650_v40 = vadd.f32 %v17047_v31, %v12365_v33  ;;  %3930 = vmatprep.mubr.bf16.mxu0 %v16849_v49  ;;  %4923 = vmatprep.mubr.bf16.mxu1 %v16849_v49 }
 0x37d   : > { %v7043_v51 = vsel %vm5507_vm14, %v3655_v16, %v6275_v39  ;;  %v3659_v63 = vadd.f32 %v17049_v45, %v12376_v62  ;;  %v4652_v3 = vadd.f32 %v17050_v11, %v12432_v1  ;;  %v2395_v4 = vsel %vm2239_vm1, %v11493_v26, %v1784_v59  ;;  %v15106_v11 = vpop.f32.mrb[228].mxu1 }
 0x37e   : > { %v10982_v57 = vpack.c.bf16 %v7043_v51, %v7042_v52  ;;  %v7045_v15 = vsel %vm5509_vm15, %v4648_v42, %v6277_v9  ;;  %v7046_v31 = vsel %vm5510_vm4, %v3657_v6, %v6278_v56  ;;  %vm5512_vm5 = vcmp.gt.f32.partialorder %v4650_v40, 0.0  ;;  %2013 = vrot.lane.b32.xlu0 %v15031_v24, %s11523_s14  ;;  %v1986_v52 = vpop.permute.xlu0 %1985  ;;  %v2202_v51 = vpop.permute.xlu1 %2201 }
 0x37f   : > { %v11174_v60 = vpack.c.bf16 %v7045_v15, %v7044_v14  ;;  %v6280_v38 = vmul.f32 -0.51027, %v4650_v40  ;;  %vm5511_vm6 = vcmp.gt.f32.partialorder %v3659_v63, 0.0  ;;  %v6279_v16 = vmul.f32 -0.51027, %v3659_v63  ;;  %v15104_v56 = vpop.f32.mrb[228].mxu0 }
 0x380   : > { %8860 = vst [vmem:[%s12490_s25 + $0x610] sm:$0xff] %v10982_v57  ;;  %vm5513_vm7 = vcmp.gt.f32.partialorder %v4652_v3, 0.0  ;;  %v6281_v39 = vmul.f32 -0.51027, %v4652_v3  ;;  %v1605_v59 = vshrl.u32 %v15031_v24, 16  ;;  %v1609_v45 = vshll.u32 %v15077_v22, 16 }
 0x381   : > { %10787 = vst [vmem:[%s12490_s25 + $0x630] sm:$0xff] %v11174_v60  ;;  %v7048_v42 = vsel %vm5512_vm5, %v4650_v40, %v6280_v38  ;;  %v7047_v6 = vsel %vm5511_vm6, %v3659_v63, %v6279_v16  ;;  %v3663_v14 = vadd.f32 %v14710_v2, %v12363_v61  ;;  %v4656_v9 = vadd.f32 %v14712_v53, %v12365_v33  ;;  %v15111_v38 = vpop.f32.mrb[229].mxu0  ;;  %v15113_v40 = vpop.f32.mrb[229].mxu1 }
 0x382   : > { %v10983_v26 = vpack.c.bf16 %v7047_v6, %v7046_v31  ;;  %v7049_v24 = vsel %vm5513_vm7, %v4652_v3, %v6281_v39  ;;  %v1607_v57 = vor.u32 %v1605_v59, %v15050_v10  ;;  %v15109_v15 = vrot.slane %v1609_v45, 1  ;;  %1813 = vrot.lane.b32.xlu0 %v1604_v50, %s11521_s10  ;;  %v15116_v53 = vpop.f32.mrb[230].mxu0  ;;  %v15124_v16 = vpop.f32.mrb[230].mxu1 }
 0x383   : > { %v11175_v2 = vpack.c.bf16 %v7049_v24, %v7048_v42  ;;  %vm5514_vm8 = vcmp.gt.f32.partialorder %v3663_v14, 0.0  ;;  %v6282_v60 = vmul.f32 -0.51027, %v3663_v14  ;;  %vm5516_vm9 = vcmp.gt.f32.partialorder %v4656_v9, 0.0  ;;  %v15126_v39 = vpop.f32.mrb[231].mxu0  ;;  %v15145_v24 = vld [vmem:[%s11583_s7 + $0x2f8] sm:$0xff]  }
 0x384   : > { %8861 = vst [vmem:[%s12490_s25 + $0x618] sm:$0xff] %v10983_v26  ;;  %v1612_v63 = vsel %vm856_vm0, %v1607_v57, %v15109_v15  ;;  %v6284_v10 = vmul.f32 -0.51027, %v4656_v9  ;;  %v2588_v3 = vsel %vm2432_vm2, %v2395_v4, %v1986_v52  ;;  %v3665_v31 = vadd.f32 %v14719_v20, %v12376_v62  ;;  %17051 = vst [vmem:[#allocation25_spill] sm:$0xff] %v15126_v39  ;;  %v15135_v4 = vpop.f32.mrb[231].mxu1  ;;  %v1988_v26 = vpop.permute.xlu1 %1987 }
 0x385   : > { %10788 = vst [vmem:[%s12490_s25 + $0x638] sm:$0xff] %v11175_v2  ;;  %2229 = vrot.lane.b32.xlu1 %v1612_v63, %s11522_s11  ;;  %v7050_v50 = vsel %vm5514_vm8, %v3663_v14, %v6282_v60  ;;  %v2858_v59 = vsel %vm2625_vm3, %v2588_v3, %v2202_v51  ;;  %v4658_v45 = vadd.f32 %v14730_v47, %v12432_v1  ;;  %17052 = vst [vmem:[#allocation7_spill] sm:$0xff] %v15135_v4  ;;  %v1786_v47 = vpop.permute.xlu0 %1785 }
 0x386   : > { %v3667_v42 = vadd.f32 %v14732_v0, %v12363_v61  ;;  %v7052_v20 = vsel %vm5516_vm9, %v4656_v9, %v6284_v10  ;;  %vm5515_vm10 = vcmp.gt.f32.partialorder %v3665_v31, 0.0  ;;  %v6283_v52 = vmul.f32 -0.51027, %v3665_v31  ;;  %3931 = vmatmul.mubr.bf16.gmra.mrb[52].mxu0 %v2858_v59  ;;  %4924 = vmatmul.mubr.bf16.gmra.mrb[52].mxu1 %v2858_v59  ;;  %v17053_v10 = vld [vmem:[#allocation11_spill] sm:$0xff] }
 0x387   : > { %v4660_v6 = vadd.f32 %v14735_v44, %v12365_v33  ;;  %vm5517_vm11 = vcmp.gt.f32.partialorder %v4658_v45, 0.0  ;;  %v6285_v51 = vmul.f32 -0.51027, %v4658_v45  ;;  %3940 = vmatprep.mubr.bf16.mxu0 %v16849_v49  ;;  %4933 = vmatprep.mubr.bf16.mxu1 %v16849_v49  ;;  %v3669_v44 = vadd.f32 %v14737_v48, %v12376_v62  ;;  %v11494_v48 = vld [vmem:[%s11583_s7 + $0x270] sm:$0xff]  }
 0x388   : > { %vm5518_vm12 = vcmp.gt.f32.partialorder %v3667_v42, 0.0  ;;  %v6286_v14 = vmul.f32 -0.51027, %v3667_v42  ;;  %v7051_v0 = vsel %vm5515_vm10, %v3665_v31, %v6283_v52  ;;  %v4662_v3 = vadd.f32 %v17053_v10, %v12432_v1 }
 0x389   : > { %vm5520_vm13 = vcmp.gt.f32.partialorder %v4660_v6, 0.0  ;;  %v6288_v9 = vmul.f32 -0.51027, %v4660_v6  ;;  %v10984_v57 = vpack.c.bf16 %v7051_v0, %v7050_v50  ;;  %v7053_v2 = vsel %vm5517_vm11, %v4658_v45, %v6285_v51  ;;  %2015 = vrot.lane.b32.xlu1 %v15077_v22, %s11523_s14 }
 0x38a   : > { %v7054_v60 = vsel %vm5518_vm12, %v3667_v42, %v6286_v14  ;;  %v11176_v59 = vpack.c.bf16 %v7053_v2, %v7052_v20  ;;  %vm5519_vm14 = vcmp.gt.f32.partialorder %v3669_v44, 0.0  ;;  %v6287_v52 = vmul.f32 -0.51027, %v3669_v44 }
 0x38b   : > { %v7056_v31 = vsel %vm5520_vm13, %v4660_v6, %v6288_v9  ;;  %8862 = vst [vmem:[%s12490_s25 + $0x640] sm:$0xff] %v10984_v57  ;;  %vm5521_vm15 = vcmp.gt.f32.partialorder %v4662_v3, 0.0  ;;  %v6289_v4 = vmul.f32 -0.51027, %v4662_v3  ;;  %v2397_v39 = vsel %vm2239_vm1, %v11494_v48, %v1786_v47  ;;  %v2204_v47 = vpop.permute.xlu0 %2203 }
 0x38c   : > { %v1613_v50 = vshrl.u32 %v15077_v22, 16  ;;  %10789 = vst [vmem:[%s12490_s25 + $0x660] sm:$0xff] %v11176_v59  ;;  %v7055_v45 = vsel %vm5519_vm14, %v3669_v44, %v6287_v52  ;;  %v1617_v42 = vshll.u32 %v15145_v24, 16  ;;  %v2590_v51 = vsel %vm2432_vm2, %v2397_v39, %v1988_v26  ;;  %v1788_v22 = vpop.permute.xlu1 %1787  ;;  %v15166_v26 = vpop.f32.mrb[232].mxu0 }
 0x38d   : > { %v3673_v20 = vadd.f32 %v14762_v58, %v12363_v61  ;;  %v10985_v6 = vpack.c.bf16 %v7055_v45, %v7054_v60  ;;  %v7057_v14 = vsel %vm5521_vm15, %v4662_v3, %v6289_v4  ;;  %v4666_v9 = vadd.f32 %v14764_v18, %v12365_v33  ;;  %1815 = vrot.lane.b32.xlu1 %v1612_v63, %s11521_s10  ;;  %v15168_v58 = vpop.f32.mrb[232].mxu1  ;;  %v17054_v4 = vld [vmem:[#allocation26_spill] sm:$0xff]  ;;  %v15175_v63 = vpop.f32.mrb[233].mxu0 }
 0x38e   : > { %v1615_v0 = vor.u32 %v1613_v50, %v15109_v15  ;;  %v11177_v44 = vpack.c.bf16 %v7057_v14, %v7056_v31  ;;  %v15164_v57 = vrot.slane %v1617_v42, 1  ;;  %v3675_v18 = vadd.f32 %v14769_v27, %v12376_v62  ;;  %v15177_v60 = vpop.f32.mrb[233].mxu1  ;;  %v17055_v31 = vld [vmem:[#allocation27_spill] sm:$0xff]  ;;  %v15185_v48 = vpop.f32.mrb[234].mxu0  ;;  %v15191_v42 = vld [vmem:[%s11583_s7 + $0x300] sm:$0xff]   ;;  %v17059_v14 = vld [vmem:[#allocation12_spill] sm:$0xff] }
 0x38f   : > { %vm5522_vm4 = vcmp.gt.f32.partialorder %v3673_v20, 0.0  ;;  %v6290_v39 = vmul.f32 -0.51027, %v3673_v20  ;;  %8863 = vst [vmem:[%s12490_s25 + $0x648] sm:$0xff] %v10985_v6  ;;  %vm5524_vm5 = vcmp.gt.f32.partialorder %v4666_v9, 0.0  ;;  %v4668_v2 = vadd.f32 %v17054_v4, %v12432_v1  ;;  %17056 = vst [vmem:[#allocation8_spill] sm:$0xff] %v15185_v48 }
 0x390   : > { %v6292_v15 = vmul.f32 -0.51027, %v4666_v9  ;;  %10790 = vst [vmem:[%s12490_s25 + $0x668] sm:$0xff] %v11177_v44  ;;  %v1620_v10 = vsel %vm856_vm0, %v1615_v0, %v15164_v57  ;;  %v2861_v59 = vsel %vm2625_vm3, %v2590_v51, %v2204_v47  ;;  %v3677_v52 = vadd.f32 %v17055_v31, %v12363_v61  ;;  %v15187_v27 = vpop.f32.mrb[234].mxu1  ;;  %v17061_v44 = vld [vmem:[#allocation28_spill] sm:$0xff]  ;;  %v11495_v31 = vld [vmem:[%s11583_s7 + $0x278] sm:$0xff]  }
 0x391   : > { %v7058_v3 = vsel %vm5522_vm4, %v3673_v20, %v6290_v39  ;;  %17057 = vst [vmem:[#allocation9_spill] sm:$0xff] %v15187_v27  ;;  %2231 = vrot.lane.b32.xlu0 %v1620_v10, %s11522_s11  ;;  %vm5523_vm6 = vcmp.gt.f32.partialorder %v3675_v18, 0.0  ;;  %v6291_v45 = vmul.f32 -0.51027, %v3675_v18  ;;  %vm5525_vm7 = vcmp.gt.f32.partialorder %v4668_v2, 0.0  ;;  %3941 = vmatmul.mubr.bf16.gmra.mrb[56].mxu0 %v2861_v59  ;;  %v15193_v20 = vpop.f32.mrb[235].mxu0 }
 0x392   : > { %v7060_v50 = vsel %vm5524_vm5, %v4666_v9, %v6292_v15  ;;  %17058 = vst [vmem:[#allocation10_spill] sm:$0xff] %v15193_v20  ;;  %v6293_v51 = vmul.f32 -0.51027, %v4668_v2  ;;  %vm5526_vm8 = vcmp.gt.f32.partialorder %v3677_v52, 0.0  ;;  %v6294_v6 = vmul.f32 -0.51027, %v3677_v52  ;;  %4934 = vmatmul.mubr.bf16.gmra.mrb[56].mxu1 %v2861_v59  ;;  %3950 = vmatprep.mubr.bf16.mxu0 %v16849_v49 }
 0x393   : > { %v4670_v0 = vadd.f32 %v17059_v14, %v12365_v33  ;;  %v15198_v47 = vpop.f32.mrb[235].mxu1  ;;  %v7059_v9 = vsel %vm5523_vm6, %v3675_v18, %v6291_v45  ;;  %v3679_v39 = vadd.f32 %v17061_v44, %v12376_v62  ;;  %v17062_v15 = vld [vmem:[#allocation13_spill] sm:$0xff]  ;;  %v2399_v20 = vsel %vm2239_vm1, %v11495_v31, %v1788_v22  ;;  %4943 = vmatprep.mubr.bf16.mxu1 %v16849_v49 }
 0x394   : > { %17060 = vst [vmem:[#allocation11_spill] sm:$0xff] %v15198_v47  ;;  %v4672_v4 = vadd.f32 %v17062_v15, %v12432_v1  ;;  %v10986_v27 = vpack.c.bf16 %v7059_v9, %v7058_v3  ;;  %v7061_v59 = vsel %vm5525_vm7, %v4668_v2, %v6293_v51  ;;  %v7062_v14 = vsel %vm5526_vm8, %v3677_v52, %v6294_v6  ;;  %v1990_v3 = vpop.permute.xlu0 %1989  ;;  %v2206_v9 = vpop.permute.xlu1 %2205 }
 0x395   : > { %vm5528_vm9 = vcmp.gt.f32.partialorder %v4670_v0, 0.0  ;;  %v11178_v47 = vpack.c.bf16 %v7061_v59, %v7060_v50  ;;  %v6296_v48 = vmul.f32 -0.51027, %v4670_v0  ;;  %vm5527_vm10 = vcmp.gt.f32.partialorder %v3679_v39, 0.0  ;;  %2017 = vrot.lane.b32.xlu0 %v15145_v24, %s11523_s14  ;;  %v15218_v6 = vpop.f32.mrb[236].mxu0 }
 0x396   : > { %v6295_v18 = vmul.f32 -0.51027, %v3679_v39  ;;  %8864 = vst [vmem:[%s12490_s25 + $0x650] sm:$0xff] %v10986_v27  ;;  %vm5529_vm11 = vcmp.gt.f32.partialorder %v4672_v4, 0.0  ;;  %v6297_v45 = vmul.f32 -0.51027, %v4672_v4  ;;  %v3683_v50 = vadd.f32 %v14824_v28, %v12363_v61 }
 0x397   : > { %v1621_v22 = vshrl.u32 %v15145_v24, 16  ;;  %v2027_v44 = vshll.u32 %v15191_v42, 16  ;;  %10791 = vst [vmem:[%s12490_s25 + $0x670] sm:$0xff] %v11178_v47  ;;  %v7064_v2 = vsel %vm5528_vm9, %v4670_v0, %v6296_v48  ;;  %v4676_v51 = vadd.f32 %v14826_v55, %v12365_v33  ;;  %v15220_v27 = vpop.f32.mrb[236].mxu1  ;;  %v15227_v48 = vpop.f32.mrb[237].mxu0 }
 0x398   : > { %v7063_v52 = vsel %vm5527_vm10, %v3679_v39, %v6295_v18  ;;  %v7065_v24 = vsel %vm5529_vm11, %v4672_v4, %v6297_v45  ;;  %v15229_v0 = vpop.f32.mrb[237].mxu1  ;;  %vm5530_vm12 = vcmp.gt.f32.partialorder %v3683_v50, 0.0  ;;  %v6298_v47 = vmul.f32 -0.51027, %v3683_v50  ;;  %v15232_v55 = vpop.f32.mrb[238].mxu0 }
 0x399   : > { %v10987_v15 = vpack.c.bf16 %v7063_v52, %v7062_v14  ;;  %v15223_v31 = vor.u32 %v1621_v22, %v15164_v57  ;;  %v15225_v59 = vrot.slane %v2027_v44, 1  ;;  %17063 = vst [vmem:[#allocation26_spill] sm:$0xff] %v15229_v0  ;;  %v11179_v28 = vpack.c.bf16 %v7065_v24, %v7064_v2  ;;  %1817 = vrot.lane.b32.xlu0 %v1620_v10, %s11521_s10  ;;  %v15241_v18 = vpop.f32.mrb[238].mxu1  ;;  %v15243_v45 = vpop.f32.mrb[239].mxu0  ;;  %v17067_v2 = vld [vmem:[#allocation29_spill] sm:$0xff] }
 0x39a   : > { %vm5532_vm13 = vcmp.gt.f32.partialorder %v4676_v51, 0.0  ;;  %17064 = vst [vmem:[#allocation27_spill] sm:$0xff] %v15232_v55  ;;  %v6300_v39 = vmul.f32 -0.51027, %v4676_v51  ;;  %v2592_v4 = vsel %vm2432_vm2, %v2399_v20, %v1990_v3  ;;  %v3685_v14 = vadd.f32 %v14833_v32, %v12376_v62  ;;  %17065 = vst [vmem:[#allocation12_spill] sm:$0xff] %v15241_v18  ;;  %v15252_v20 = vpop.f32.mrb[239].mxu1 }
 0x39b   : > { %8865 = vst [vmem:[%s12490_s25 + $0x658] sm:$0xff] %v10987_v15  ;;  %v2030_v57 = vsel %vm856_vm0, %v15223_v31, %v15225_v59  ;;  %17066 = vst [vmem:[#allocation28_spill] sm:$0xff] %v15243_v45  ;;  %v7066_v10 = vsel %vm5530_vm12, %v3683_v50, %v6298_v47  ;;  %v2864_v22 = vsel %vm2625_vm3, %v2592_v4, %v2206_v9  ;;  %v17069_v15 = vld [vmem:[#allocation14_spill] sm:$0xff]  ;;  %v15262_v4 = vld [vmem:[%s11583_s7 + $0x308] sm:$0xff]  }
 0x39c   : > { %10792 = vst [vmem:[%s12490_s25 + $0x678] sm:$0xff] %v11179_v28  ;;  %2233 = vrot.lane.b32.xlu1 %v2030_v57, %s11522_s11  ;;  %v4678_v44 = vadd.f32 %v14844_v54, %v12432_v1  ;;  %v3687_v52 = vadd.f32 %v17067_v2, %v12363_v61  ;;  %17068 = vst [vmem:[#allocation13_spill] sm:$0xff] %v15252_v20  ;;  %v7068_v32 = vsel %vm5532_vm13, %v4676_v51, %v6300_v39  ;;  %v1790_v54 = vpop.permute.xlu0 %1789  ;;  %v1992_v28 = vpop.permute.xlu1 %1991  ;;  %v17070_v57 = vld [vmem:[#allocation15_spill] sm:$0xff]  ;;  %v17071_v20 = vld [vmem:[#allocation16_spill] sm:$0xff] }
 0x39d   : > { %vm5531_vm14 = vcmp.gt.f32.partialorder %v3685_v14, 0.0  ;;  %v6299_v3 = vmul.f32 -0.51027, %v3685_v14  ;;  %v4680_v24 = vadd.f32 %v17069_v15, %v12365_v33  ;;  %3951 = vmatmul.mubr.bf16.gmra.mrb[60].mxu0 %v2864_v22  ;;  %4944 = vmatmul.mubr.bf16.gmra.mrb[60].mxu1 %v2864_v22  ;;  %v3689_v39 = vadd.f32 %v17070_v57, %v12376_v62  ;;  %v11496_v55 = vld [vmem:[%s11583_s7 + $0x280] sm:$0xff]  }
 0x39e   : > { %vm5533_vm15 = vcmp.gt.f32.partialorder %v4678_v44, 0.0  ;;  %v6301_v9 = vmul.f32 -0.51027, %v4678_v44  ;;  %vm5534_vm4 = vcmp.gt.f32.partialorder %v3687_v52, 0.0  ;;  %v6302_v50 = vmul.f32 -0.51027, %v3687_v52  ;;  %3960 = vmatprep.mubr.bf16.mxu0 %v16849_v49  ;;  %4953 = vmatprep.mubr.bf16.mxu1 %v16849_v49 }
 0x39f   : > { %v7067_v51 = vsel %vm5531_vm14, %v3685_v14, %v6299_v3  ;;  %vm5536_vm5 = vcmp.gt.f32.partialorder %v4680_v24, 0.0  ;;  %v6304_v47 = vmul.f32 -0.51027, %v4680_v24  ;;  %v4682_v45 = vadd.f32 %v17071_v20, %v12432_v1 }
 0x3a0   : > { %v10988_v22 = vpack.c.bf16 %v7067_v51, %v7066_v10  ;;  %v7069_v2 = vsel %vm5533_vm15, %v4678_v44, %v6301_v9  ;;  %v7070_v15 = vsel %vm5534_vm4, %v3687_v52, %v6302_v50  ;;  %2019 = vrot.lane.b32.xlu1 %v15191_v42, %s11523_s14  ;;  %vm5535_vm6 = vcmp.gt.f32.partialorder %v3689_v39, 0.0 }
 0x3a1   : > { %v11180_v18 = vpack.c.bf16 %v7069_v2, %v7068_v32  ;;  %v7072_v14 = vsel %vm5536_vm5, %v4680_v24, %v6304_v47  ;;  %v6303_v3 = vmul.f32 -0.51027, %v3689_v39  ;;  %vm5537_vm7 = vcmp.gt.f32.partialorder %v4682_v45, 0.0 }
 0x3a2   : > { %8866 = vst [vmem:[%s12490_s25 + $0x680] sm:$0xff] %v10988_v22  ;;  %v6305_v57 = vmul.f32 -0.51027, %v4682_v45  ;;  %v2401_v0 = vsel %vm2239_vm1, %v11496_v55, %v1790_v54  ;;  %v2031_v10 = vshrl.u32 %v15191_v42, 16  ;;  %v2035_v52 = vshll.u32 %v15262_v4, 16  ;;  %v2208_v55 = vpop.permute.xlu0 %2207 }
 0x3a3   : > { %10793 = vst [vmem:[%s12490_s25 + $0x6a0] sm:$0xff] %v11180_v18  ;;  %v7071_v44 = vsel %vm5535_vm6, %v3689_v39, %v6303_v3  ;;  %v2594_v20 = vsel %vm2432_vm2, %v2401_v0, %v1992_v28  ;;  %v3693_v32 = vadd.f32 %v14876_v17, %v12363_v61  ;;  %v4686_v51 = vadd.f32 %v14878_v46, %v12365_v33  ;;  %v11427_v42 = vld [vmem:[%s11583_s7 + $0x300] ss:$0 sps:$4 sm:$0x11]   ;;  %v1792_v18 = vpop.permute.xlu1 %1791  ;;  %v15283_v0 = vpop.f32.mrb[240].mxu0 }
 0x3a4   : > { %v10989_v24 = vpack.c.bf16 %v7071_v44, %v7070_v15  ;;  %v7073_v9 = vsel %vm5537_vm7, %v4682_v45, %v6305_v57  ;;  %v2033_v50 = vor.u32 %v2031_v10, %v15225_v59  ;;  %v15281_v47 = vrot.slane %v2035_v52, 1  ;;  %v15285_v28 = vpop.f32.mrb[240].mxu1  ;;  %v17072_v59 = vld [vmem:[#allocation17_spill] sm:$0xff]  ;;  %v17073_v46 = vld [vmem:[#allocation18_spill] sm:$0xff]  ;;  %v15292_v2 = vpop.f32.mrb[241].mxu0 }
 0x3a5   : > { %v11181_v54 = vpack.c.bf16 %v7073_v9, %v7072_v14  ;;  %vm5538_vm8 = vcmp.gt.f32.partialorder %v3693_v32, 0.0  ;;  %v6306_v39 = vmul.f32 -0.51027, %v3693_v32  ;;  %vm5540_vm9 = vcmp.gt.f32.partialorder %v4686_v51, 0.0  ;;  %v15294_v15 = vpop.f32.mrb[241].mxu1  ;;  %v17075_v10 = vld [vmem:[#allocation2_spill] sm:$0xff] }
 0x3a6   : > { %8867 = vst [vmem:[%s12490_s25 + $0x688] sm:$0xff] %v10989_v24  ;;  %v6308_v17 = vmul.f32 -0.51027, %v4686_v51  ;;  %v3695_v45 = vadd.f32 %v17072_v59, %v12376_v62  ;;  %v4688_v22 = vadd.f32 %v17073_v46, %v12432_v1  ;;  %17074 = vst [vmem:[#allocation29_spill] sm:$0xff] %v15294_v15  ;;  %v2038_v14 = vsel %vm856_vm0, %v2033_v50, %v15281_v47  ;;  %v15302_v52 = vpop.f32.mrb[242].mxu0  ;;  %v15304_v24 = vpop.f32.mrb[242].mxu1 }
 0x3a7   : > { %10794 = vst [vmem:[%s12490_s25 + $0x6a8] sm:$0xff] %v11181_v54  ;;  %v7074_v3 = vsel %vm5538_vm8, %v3693_v32, %v6306_v39  ;;  %v2867_v57 = vsel %vm2625_vm3, %v2594_v20, %v2208_v55  ;;  %v3697_v44 = vadd.f32 %v17075_v10, %v12363_v61  ;;  %17076 = vst [vmem:[#allocation14_spill] sm:$0xff] %v15302_v52  ;;  %2235 = vrot.lane.b32.xlu0 %v2038_v14, %s11522_s11  ;;  %v15307_v54 = vpop.f32.mrb[243].mxu0  ;;  %v17079_v50 = vld [vmem:[#allocation3_spill] sm:$0xff]  ;;  %v15312_v39 = vpop.f32.mrb[243].mxu1  ;;  %v17082_v10 = vld [vmem:[#allocation20_spill] sm:$0xff] }
 0x3a8   : > { %17077 = vst [vmem:[#allocation15_spill] sm:$0xff] %v15304_v24  ;;  %v7076_v9 = vsel %vm5540_vm9, %v4686_v51, %v6308_v17  ;;  %vm5539_vm10 = vcmp.gt.f32.partialorder %v3695_v45, 0.0  ;;  %v6307_v59 = vmul.f32 -0.51027, %v3695_v45  ;;  %vm5541_vm11 = vcmp.gt.f32.partialorder %v4688_v22, 0.0  ;;  %3961 = vmatmul.mubr.bf16.gmra.mrb[64].mxu0 %v2867_v57  ;;  %17078 = vst [vmem:[#allocation16_spill] sm:$0xff] %v15307_v54  ;;  %4954 = vmatmul.mubr.bf16.gmra.mrb[64].mxu1 %v2867_v57 }
 0x3a9   : > { %v6309_v32 = vmul.f32 -0.51027, %v4688_v22  ;;  %vm5542_vm12 = vcmp.gt.f32.partialorder %v3697_v44, 0.0  ;;  %v6310_v20 = vmul.f32 -0.51027, %v3697_v44  ;;  %v4690_v55 = vadd.f32 %v17079_v50, %v12365_v33  ;;  %3970 = vmatprep.mubr.bf16.mxu0 %v16849_v49  ;;  %17080 = vst [vmem:[#allocation17_spill] sm:$0xff] %v15312_v39  ;;  %4963 = vmatprep.mubr.bf16.mxu1 %v16849_v49 }
 0x3aa   : > { %v7075_v51 = vsel %vm5539_vm10, %v3695_v45, %v6307_v59  ;;  %v1625_v17 = vshll.u32 %v11427_v42, 16  ;;  %v17081_v46 = vld [vmem:[#allocation19_spill] sm:$0xff]  ;;  %v4692_v54 = vadd.f32 %v17082_v10, %v12432_v1  ;;  %v11428_v24 = vld [vmem:[%s11583_s7 + $0x310] ss:$0 sps:$4 sm:$0x11]  }
 0x3ab   : > { %v3699_v14 = vadd.f32 %v17081_v46, %v12376_v62  ;;  %v10990_v52 = vpack.c.bf16 %v7075_v51, %v7074_v3  ;;  %v7077_v57 = vsel %vm5541_vm11, %v4688_v22, %v6309_v32  ;;  %v7078_v50 = vsel %vm5542_vm12, %v3697_v44, %v6310_v20  ;;  %2021 = vrot.lane.b32.xlu0 %v15262_v4, %s11523_s14  ;;  %v11497_v46 = vld [vmem:[%s11583_s7 + $0x288] sm:$0xff]   ;;  %v1994_v3 = vpop.permute.xlu0 %1993  ;;  %v2210_v51 = vpop.permute.xlu1 %2209 }
 0x3ac   : > { %vm5544_vm13 = vcmp.gt.f32.partialorder %v4690_v55, 0.0  ;;  %v11182_v39 = vpack.c.bf16 %v7077_v57, %v7076_v9  ;;  %v6312_v15 = vmul.f32 -0.51027, %v4690_v55  ;;  %v1627_v45 = vrot.slane %v1625_v17, 1  ;;  %v15330_v20 = vpop.f32.mrb[244].mxu0  ;;  %v15332_v17 = vpop.f32.mrb[244].mxu1 }
 0x3ad   : > { %vm5543_vm14 = vcmp.gt.f32.partialorder %v3699_v14, 0.0  ;;  %8868 = vst [vmem:[%s12490_s25 + $0x690] sm:$0xff] %v10990_v52  ;;  %v6311_v42 = vmul.f32 -0.51027, %v3699_v14  ;;  %vm5545_vm15 = vcmp.gt.f32.partialorder %v4692_v54, 0.0  ;;  %v2403_v10 = vsel %vm2239_vm1, %v11497_v46, %v1792_v18 }
 0x3ae   : > { %v6313_v59 = vmul.f32 -0.51027, %v4692_v54  ;;  %10795 = vst [vmem:[%s12490_s25 + $0x6b0] sm:$0xff] %v11182_v39  ;;  %v7080_v22 = vsel %vm5544_vm13, %v4690_v55, %v6312_v15  ;;  %v1628_v44 = vsel %vm856_vm0, %v15223_v31, %v1627_v45  ;;  %v2039_v9 = vshrl.u32 %v15262_v4, 16  ;;  %v15340_v55 = vpop.f32.mrb[245].mxu0  ;;  %v15342_v4 = vpop.f32.mrb[245].mxu1 }
 0x3af   : > { %v2043_v32 = vshll.u32 %v11428_v24, 16  ;;  %1819 = vrot.lane.b32.xlu1 %v1628_v44, %s11521_s10  ;;  %v7079_v52 = vsel %vm5543_vm14, %v3699_v14, %v6311_v42  ;;  %v3703_v15 = vadd.f32 %v14938_v35, %v12363_v61  ;;  %v4696_v31 = vadd.f32 %v14940_v8, %v12365_v33  ;;  %v15345_v46 = vpop.f32.mrb[246].mxu0  ;;  %v1996_v42 = vpop.permute.xlu1 %1995 }
 0x3b0   : > { %v7081_v18 = vsel %vm5545_vm15, %v4692_v54, %v6313_v59  ;;  %v10991_v24 = vpack.c.bf16 %v7079_v52, %v7078_v50  ;;  %v2041_v57 = vor.u32 %v2039_v9, %v15281_v47  ;;  %v2596_v8 = vsel %vm2432_vm2, %v2403_v10, %v1994_v3  ;;  %v15355_v59 = vpop.f32.mrb[246].mxu1  ;;  %v1794_v3 = vpop.permute.xlu0 %1793 }
 0x3b1   : > { %v11183_v39 = vpack.c.bf16 %v7081_v18, %v7080_v22  ;;  %v2045_v45 = vrot.slane %v2043_v32, 1  ;;  %vm5546_vm4 = vcmp.gt.f32.partialorder %v3703_v15, 0.0  ;;  %v6314_v54 = vmul.f32 -0.51027, %v3703_v15  ;;  %v15357_v22 = vpop.f32.mrb[247].mxu0  ;;  %v15363_v10 = vpop.f32.mrb[247].mxu1 }
 0x3b2   : > { %vm5548_vm5 = vcmp.gt.f32.partialorder %v4696_v31, 0.0  ;;  %v6316_v14 = vmul.f32 -0.51027, %v4696_v31  ;;  %8869 = vst [vmem:[%s12490_s25 + $0x698] sm:$0xff] %v10991_v24  ;;  %v3705_v50 = vadd.f32 %v14947_v19, %v12376_v62  ;;  %v4698_v47 = vadd.f32 %v14958_v34, %v12432_v1  ;;  %v17083_v24 = vld [vmem:[#allocation4_spill] sm:$0xff] }
 0x3b3   : > { %10796 = vst [vmem:[%s12490_s25 + $0x6b8] sm:$0xff] %v11183_v39  ;;  %v2046_v35 = vsel %vm856_vm0, %v2041_v57, %v2045_v45  ;;  %v7082_v44 = vsel %vm5546_vm4, %v3703_v15, %v6314_v54  ;;  %v2870_v32 = vsel %vm2625_vm3, %v2596_v8, %v2210_v51  ;;  %v3707_v52 = vadd.f32 %v14960_v43, %v12363_v61  ;;  %v11498_v57 = vld [vmem:[%s11583_s7 + $0x290] sm:$0xff]   ;;  %v15375_v8 = vpop.permute.xlu1 %1795 }
 0x3b4   : > { %2237 = vrot.lane.b32.xlu1 %v2046_v35, %s11522_s11  ;;  %v7084_v9 = vsel %vm5548_vm5, %v4696_v31, %v6316_v14  ;;  %vm5547_vm0 = vcmp.gt.f32.partialorder %v3705_v50, 0.0  ;;  %v6315_v19 = vmul.f32 -0.51027, %v3705_v50  ;;  %vm5549_vm6 = vcmp.gt.f32.partialorder %v4698_v47, 0.0  ;;  %3971 = vmatmul.mubr.bf16.gmra.mrb[68].mxu0 %v2870_v32 }
 0x3b5   : > { %v6317_v34 = vmul.f32 -0.51027, %v4698_v47  ;;  %4964 = vmatmul.mubr.bf16.gmra.mrb[68].mxu1 %v2870_v32  ;;  %vm5550_vm7 = vcmp.gt.f32.partialorder %v3707_v52, 0.0  ;;  %v6318_v18 = vmul.f32 -0.51027, %v3707_v52  ;;  %v4700_v15 = vadd.f32 %v14963_v25, %v12365_v33  ;;  %3980 = vmatprep.mubr.bf16.mxu0 %v16849_v49 }
 0x3b6   : > { %v3709_v51 = vadd.f32 %v14965_v30, %v12376_v62  ;;  %4973 = vmatprep.mubr.bf16.mxu1 %v16849_v49  ;;  %v7083_v43 = vsel %vm5547_vm0, %v3705_v50, %v6315_v19  ;;  %v4702_v39 = vadd.f32 %v17083_v24, %v12432_v1  ;;  %v2405_v45 = vsel %vm2239_vm1, %v11498_v57, %v1794_v3  ;;  %v2212_v3 = vpop.permute.xlu0 %2211 }
 0x3b7   : > { %v7085_v31 = vsel %vm5549_vm6, %v4698_v47, %v6317_v34  ;;  %v10992_v54 = vpack.c.bf16 %v7083_v43, %v7082_v44  ;;  %v7086_v25 = vsel %vm5550_vm7, %v3707_v52, %v6318_v18  ;;  %vm5552_vm8 = vcmp.gt.f32.partialorder %v4700_v15, 0.0 }
 0x3b8   : > { %v11184_v14 = vpack.c.bf16 %v7085_v31, %v7084_v9  ;;  %v6320_v35 = vmul.f32 -0.51027, %v4700_v15  ;;  %vm5551_vm9 = vcmp.gt.f32.partialorder %v3709_v51, 0.0  ;;  %v6319_v30 = vmul.f32 -0.51027, %v3709_v51  ;;  %v15388_v31 = vpop.f32.mrb[248].mxu0 }
 0x3b9   : > { %vm5553_vm10 = vcmp.gt.f32.partialorder %v4702_v39, 0.0  ;;  %8870 = vst [vmem:[%s12490_s25 + $0x6c0] sm:$0xff] %v10992_v54  ;;  %v6321_v50 = vmul.f32 -0.51027, %v4702_v39  ;;  %v2598_v47 = vsel %vm2432_vm2, %v2405_v45, %v1996_v42  ;;  %v3713_v32 = vadd.f32 %v14990_v13, %v12363_v61  ;;  %v15390_v13 = vpop.f32.mrb[248].mxu1 }
 0x3ba   : > { %10797 = vst [vmem:[%s12490_s25 + $0x6e0] sm:$0xff] %v11184_v14  ;;  %v4706_v44 = vadd.f32 %v14992_v21, %v12365_v33  ;;  %v7088_v9 = vsel %vm5552_vm8, %v4700_v15, %v6320_v35  ;;  %v7087_v52 = vsel %vm5551_vm9, %v3709_v51, %v6319_v30  ;;  %v3715_v19 = vadd.f32 %v14997_v23, %v12376_v62  ;;  %v15392_v51 = vpop.f32.mrb[249].mxu0  ;;  %v15394_v23 = vpop.f32.mrb[249].mxu1  ;;  %v17084_v14 = vld [vmem:[#allocation5_spill] sm:$0xff]  ;;  %v17085_v35 = vld [vmem:[#allocation6_spill] sm:$0xff] }
 0x3bb   : > { %v4708_v34 = vadd.f32 %v14999_v12, %v12432_v1  ;;  %v10993_v18 = vpack.c.bf16 %v7087_v52, %v7086_v25  ;;  %v7089_v43 = vsel %vm5553_vm10, %v4702_v39, %v6321_v50  ;;  %vm5554_vm11 = vcmp.gt.f32.partialorder %v3713_v32, 0.0  ;;  %v15397_v57 = vpop.f32.mrb[250].mxu0  ;;  %v2214_v50 = vpop.permute.xlu1 %2213 }
 0x3bc   : > { %v6322_v42 = vmul.f32 -0.51027, %v3713_v32  ;;  %v11185_v21 = vpack.c.bf16 %v7089_v43, %v7088_v9  ;;  %vm5556_vm12 = vcmp.gt.f32.partialorder %v4706_v44, 0.0  ;;  %v6324_v15 = vmul.f32 -0.51027, %v4706_v44  ;;  %v15405_v9 = vpop.f32.mrb[250].mxu1 }
 0x3bd   : > { %vm5555_vm13 = vcmp.gt.f32.partialorder %v3715_v19, 0.0  ;;  %8871 = vst [vmem:[%s12490_s25 + $0x6c8] sm:$0xff] %v10993_v18  ;;  %v6323_v24 = vmul.f32 -0.51027, %v3715_v19  ;;  %vm5557_vm14 = vcmp.gt.f32.partialorder %v4708_v34, 0.0  ;;  %v2873_v54 = vsel %vm2625_vm3, %v2598_v47, %v2212_v3  ;;  %v17086_v18 = vld [vmem:[#allocation21_spill] sm:$0xff] }
 0x3be   : > { %v7090_v12 = vsel %vm5554_vm11, %v3713_v32, %v6322_v42  ;;  %v6325_v39 = vmul.f32 -0.51027, %v4708_v34  ;;  %10798 = vst [vmem:[%s12490_s25 + $0x6e8] sm:$0xff] %v11185_v21  ;;  %v7092_v45 = vsel %vm5556_vm12, %v4706_v44, %v6324_v15  ;;  %v3717_v25 = vadd.f32 %v17084_v14, %v12363_v61  ;;  %v17087_v42 = vld [vmem:[#allocation22_spill] sm:$0xff]  ;;  %3981 = vmatmul.mubr.bf16.gmra.mrb[72].mxu0 %v2873_v54  ;;  %v15412_v47 = vpop.f32.mrb[251].mxu0  ;;  %v15414_v3 = vpop.f32.mrb[251].mxu1 }
 0x3bf   : > { %v4710_v30 = vadd.f32 %v17085_v35, %v12365_v33  ;;  %v7091_v32 = vsel %vm5555_vm13, %v3715_v19, %v6323_v24  ;;  %v3719_v43 = vadd.f32 %v17086_v18, %v12376_v62  ;;  %v4712_v44 = vadd.f32 %v17087_v42, %v12432_v1  ;;  %17088 = vst [vmem:[#allocation18_spill] sm:$0xff] %v15414_v3  ;;  %v1998_v19 = vpop.permute.xlu0 %1997  ;;  %v2000_v42 = vpop.permute.xlu1 %1999 }
 0x3c0   : > { %v7093_v52 = vsel %vm5557_vm14, %v4708_v34, %v6325_v39  ;;  %v10994_v21 = vpack.c.bf16 %v7091_v32, %v7090_v12  ;;  %vm5558_vm15 = vcmp.gt.f32.partialorder %v3717_v25, 0.0  ;;  %v6326_v14 = vmul.f32 -0.51027, %v3717_v25  ;;  %4974 = vmatmul.mubr.bf16.gmra.mrb[72].mxu1 %v2873_v54  ;;  %3990 = vmatprep.mubr.bf16.mxu0 %v16849_v49  ;;  %v11499_v12 = vld [vmem:[%s11583_s7 + $0x298] sm:$0xff]  }
 0x3c1   : > { %v11186_v15 = vpack.c.bf16 %v7093_v52, %v7092_v45  ;;  %vm5560_vm4 = vcmp.gt.f32.partialorder %v4710_v30, 0.0  ;;  %v6328_v34 = vmul.f32 -0.51027, %v4710_v30  ;;  %vm5559_vm5 = vcmp.gt.f32.partialorder %v3719_v43, 0.0  ;;  %4983 = vmatprep.mubr.bf16.mxu1 %v16849_v49 }
 0x3c2   : > { %v6327_v24 = vmul.f32 -0.51027, %v3719_v43  ;;  %8872 = vst [vmem:[%s12490_s25 + $0x6d0] sm:$0xff] %v10994_v21  ;;  %v7094_v39 = vsel %vm5558_vm15, %v3717_v25, %v6326_v14  ;;  %vm5561_vm0 = vcmp.gt.f32.partialorder %v4712_v44, 0.0  ;;  %v6329_v35 = vmul.f32 -0.51027, %v4712_v44 }
 0x3c3   : > { %10799 = vst [vmem:[%s12490_s25 + $0x6f0] sm:$0xff] %v11186_v15  ;;  %v2407_v45 = vsel %vm2239_vm1, %v11499_v12, %v15375_v8  ;;  %v7096_v32 = vsel %vm5560_vm4, %v4710_v30, %v6328_v34  ;;  %v3723_v52 = vadd.f32 %v15052_v36, %v12363_v61  ;;  %v4716_v18 = vadd.f32 %v15054_v7, %v12365_v33  ;;  %v15430_v14 = vpop.f32.mrb[252].mxu0  ;;  %v15432_v8 = vpop.f32.mrb[252].mxu1 }
 0x3c4   : > { %v7095_v54 = vsel %vm5559_vm5, %v3719_v43, %v6327_v24  ;;  %v7097_v21 = vsel %vm5561_vm0, %v4712_v44, %v6329_v35  ;;  %v2600_v25 = vsel %vm2432_vm2, %v2407_v45, %v1998_v19  ;;  %v3725_v15 = vadd.f32 %v15061_v29, %v12376_v62  ;;  %v15434_v36 = vpop.f32.mrb[253].mxu0  ;;  %v15436_v7 = vpop.f32.mrb[253].mxu1 }
 0x3c5   : > { %v10995_v3 = vpack.c.bf16 %v7095_v54, %v7094_v39  ;;  %v11187_v30 = vpack.c.bf16 %v7097_v21, %v7096_v32  ;;  %vm5562_vm6 = vcmp.gt.f32.partialorder %v3723_v52, 0.0  ;;  %v6330_v43 = vmul.f32 -0.51027, %v3723_v52  ;;  %17089 = vst [vmem:[#allocation2_spill] sm:$0xff] %v15434_v36  ;;  %17090 = vst [vmem:[#allocation3_spill] sm:$0xff] %v15436_v7  ;;  %v1798_v29 = vpop.permute.xlu0 %1797  ;;  %v15440_v24 = vpop.f32.mrb[254].mxu0 }
 0x3c6   : > { %vm5564_vm7 = vcmp.gt.f32.partialorder %v4716_v18, 0.0  ;;  %v6332_v44 = vmul.f32 -0.51027, %v4716_v18  ;;  %v2876_v19 = vsel %vm2625_vm3, %v2600_v25, %v2214_v50  ;;  %vm5563_vm8 = vcmp.gt.f32.partialorder %v3725_v15, 0.0  ;;  %17091 = vst [vmem:[#allocation19_spill] sm:$0xff] %v15440_v24  ;;  %v15451_v50 = vpop.f32.mrb[255].mxu0 }
 0x3c7   : > { %8873 = vst [vmem:[%s12490_s25 + $0x6d8] sm:$0xff] %v10995_v3  ;;  %v6331_v34 = vmul.f32 -0.51027, %v3725_v15  ;;  %10800 = vst [vmem:[%s12490_s25 + $0x6f8] sm:$0xff] %v11187_v30  ;;  %v7098_v39 = vsel %vm5562_vm6, %v3723_v52, %v6330_v43  ;;  %v4718_v35 = vadd.f32 %v15063_v37, %v12432_v1  ;;  %v3727_v12 = vadd.f32 %v15071_v41, %v12363_v61  ;;  %v15449_v3 = vpop.f32.mrb[254].mxu1  ;;  %v17094_v52 = vld [vmem:[#allocation23_spill] sm:$0xff] }
 0x3c8   : > { %v4720_v45 = vadd.f32 %v15073_v5, %v12365_v33  ;;  %3991 = vmatmul.mubr.bf16.gmra.mrb[76].mxu0 %v2876_v19  ;;  %17092 = vst [vmem:[#allocation20_spill] sm:$0xff] %v15449_v3  ;;  %17093 = vst [vmem:[#allocation4_spill] sm:$0xff] %v15451_v50  ;;  %v7100_v32 = vsel %vm5564_vm7, %v4716_v18, %v6332_v44  ;;  %v3729_v21 = vadd.f32 %v17094_v52, %v12376_v62  ;;  %v17095_v37 = vld [vmem:[#allocation24_spill] sm:$0xff]  ;;  %v15458_v41 = vpop.f32.mrb[255].mxu1  ;;  %v15465_v3 = vpop.f32.mrb[0].mxu0 }
 0x3c9   : > { %v7099_v54 = vsel %vm5563_vm8, %v3725_v15, %v6331_v34  ;;  %v4722_v25 = vadd.f32 %v17095_v37, %v12432_v1  ;;  %4984 = vmatmul.mubr.bf16.gmra.mrb[76].mxu1 %v2876_v19  ;;  %17096 = vst [vmem:[#allocation5_spill] sm:$0xff] %v15458_v41  ;;  %vm5565_vm9 = vcmp.gt.f32.partialorder %v4718_v35, 0.0  ;;  %v6333_v5 = vmul.f32 -0.51027, %v4718_v35  ;;  %4000 = vmatprep.mubr.bf16.mxu0 %v16849_v49  ;;  %v1800_v34 = vpop.permute.xlu1 %1799  ;;  %v11500_v37 = vld [vmem:[%s11583_s7 + $0x2a0] sm:$0xff]   ;;  %v2216_v50 = vpop.permute.xlu0 %2215 }
 0x3ca   : > { %v10996_v30 = vpack.c.bf16 %v7099_v54, %v7098_v39  ;;  %vm5566_vm10 = vcmp.gt.f32.partialorder %v3727_v12, 0.0  ;;  %4993 = vmatprep.mubr.bf16.mxu1 %v16849_v49  ;;  %v6334_v18 = vmul.f32 -0.51027, %v3727_v12  ;;  %vm5568_vm11 = vcmp.gt.f32.partialorder %v4720_v45, 0.0 }
 0x3cb   : > { %v6336_v15 = vmul.f32 -0.51027, %v4720_v45  ;;  %vm5567_vm12 = vcmp.gt.f32.partialorder %v3729_v21, 0.0  ;;  %v7101_v43 = vsel %vm5565_vm9, %v4718_v35, %v6333_v5  ;;  %v6335_v44 = vmul.f32 -0.51027, %v3729_v21 }
 0x3cc   : > { %8874 = vst [vmem:[%s12490_s25 + $0x700] sm:$0xff] %v10996_v30  ;;  %vm5569_vm13 = vcmp.gt.f32.partialorder %v4722_v25, 0.0  ;;  %v6337_v19 = vmul.f32 -0.51027, %v4722_v25  ;;  %v11188_v39 = vpack.c.bf16 %v7101_v43, %v7100_v32  ;;  %v7102_v54 = vsel %vm5566_vm10, %v3727_v12, %v6334_v18  ;;  %v15470_v30 = vpop.f32.mrb[0].mxu1  ;;  %v15472_v32 = vpop.f32.mrb[1].mxu0 }
 0x3cd   : > { %v7104_v52 = vsel %vm5568_vm11, %v4720_v45, %v6336_v15  ;;  %v2409_v41 = vsel %vm2239_vm1, %v11500_v37, %v1798_v29  ;;  %v7103_v24 = vsel %vm5567_vm12, %v3729_v21, %v6335_v44  ;;  %v3733_v35 = vadd.f32 %v15104_v56, %v12363_v61  ;;  %v2002_v37 = vpop.permute.xlu0 %2001 }
 0x3ce   : > { %v7105_v7 = vsel %vm5569_vm13, %v4722_v25, %v6337_v19  ;;  %v2602_v36 = vsel %vm2432_vm2, %v2409_v41, %v2000_v42  ;;  %10801 = vst [vmem:[%s12490_s25 + $0x720] sm:$0xff] %v11188_v39  ;;  %v10997_v12 = vpack.c.bf16 %v7103_v24, %v7102_v54  ;;  %v4726_v29 = vadd.f32 %v15106_v11, %v12365_v33  ;;  %v15479_v25 = vpop.f32.mrb[1].mxu1  ;;  %v15481_v42 = vpop.f32.mrb[2].mxu0  ;;  %v17097_v19 = vld [vmem:[#allocation25_spill] sm:$0xff] }
 0x3cf   : > { %v11189_v45 = vpack.c.bf16 %v7105_v7, %v7104_v52  ;;  %v3735_v21 = vadd.f32 %v15111_v38, %v12376_v62  ;;  %vm5570_vm14 = vcmp.gt.f32.partialorder %v3733_v35, 0.0  ;;  %v6338_v56 = vmul.f32 -0.51027, %v3733_v35  ;;  %v15486_v18 = vpop.f32.mrb[2].mxu1  ;;  %v15488_v7 = vpop.f32.mrb[3].mxu0 }
 0x3d0   : > { %v4728_v41 = vadd.f32 %v15113_v40, %v12432_v1  ;;  %v2879_v5 = vsel %vm2625_vm3, %v2602_v36, %v2216_v50  ;;  %8875 = vst [vmem:[%s12490_s25 + $0x708] sm:$0xff] %v10997_v12  ;;  %vm5572_vm15 = vcmp.gt.f32.partialorder %v4726_v29, 0.0  ;;  %v6340_v11 = vmul.f32 -0.51027, %v4726_v29  ;;  %v15496_v36 = vpop.f32.mrb[3].mxu1 }
 0x3d1   : > { %10802 = vst [vmem:[%s12490_s25 + $0x728] sm:$0xff] %v11189_v45  ;;  %vm5571_vm4 = vcmp.gt.f32.partialorder %v3735_v21, 0.0  ;;  %v6339_v38 = vmul.f32 -0.51027, %v3735_v21  ;;  %4001 = vmatmul.mubr.bf16.gmra.mrb[80].mxu0 %v2879_v5  ;;  %4994 = vmatmul.mubr.bf16.gmra.mrb[80].mxu1 %v2879_v5  ;;  %v7106_v24 = vsel %vm5570_vm14, %v3733_v35, %v6338_v56  ;;  %v3737_v40 = vadd.f32 %v15116_v53, %v12363_v61  ;;  %v2218_v45 = vpop.permute.xlu1 %2217  ;;  %v11501_v5 = vld [vmem:[%s11583_s7 + $0x2a8] sm:$0xff]  }
 0x3d2   : > { %vm5573_vm5 = vcmp.gt.f32.partialorder %v4728_v41, 0.0  ;;  %v6341_v15 = vmul.f32 -0.51027, %v4728_v41  ;;  %4010 = vmatprep.mubr.bf16.mxu0 %v16849_v49  ;;  %5003 = vmatprep.mubr.bf16.mxu1 %v16849_v49  ;;  %v7108_v50 = vsel %vm5572_vm15, %v4726_v29, %v6340_v11  ;;  %v4730_v44 = vadd.f32 %v15124_v16, %v12365_v33  ;;  %v17098_v16 = vld [vmem:[#allocation7_spill] sm:$0xff] }
 0x3d3   : > { %v7107_v43 = vsel %vm5571_vm4, %v3735_v21, %v6339_v38  ;;  %v3739_v39 = vadd.f32 %v17097_v19, %v12376_v62  ;;  %vm5574_vm0 = vcmp.gt.f32.partialorder %v3737_v40, 0.0  ;;  %v6342_v53 = vmul.f32 -0.51027, %v3737_v40 }
 0x3d4   : > { %v10998_v54 = vpack.c.bf16 %v7107_v43, %v7106_v24  ;;  %v7109_v52 = vsel %vm5573_vm5, %v4728_v41, %v6341_v15  ;;  %vm5576_vm6 = vcmp.gt.f32.partialorder %v4730_v44, 0.0  ;;  %v6344_v12 = vmul.f32 -0.51027, %v4730_v44 }
 0x3d5   : > { %v11190_v35 = vpack.c.bf16 %v7109_v52, %v7108_v50  ;;  %vm5575_vm7 = vcmp.gt.f32.partialorder %v3739_v39, 0.0  ;;  %v7110_v29 = vsel %vm5574_vm0, %v3737_v40, %v6342_v53  ;;  %v6343_v21 = vmul.f32 -0.51027, %v3739_v39  ;;  %v15513_v50 = vpop.f32.mrb[4].mxu0  ;;  %v15515_v40 = vpop.f32.mrb[4].mxu1 }
 0x3d6   : > { %8876 = vst [vmem:[%s12490_s25 + $0x710] sm:$0xff] %v10998_v54  ;;  %v4732_v56 = vadd.f32 %v17098_v16, %v12432_v1  ;;  %v2411_v11 = vsel %vm2239_vm1, %v11501_v5, %v1800_v34  ;;  %v7112_v38 = vsel %vm5576_vm6, %v4730_v44, %v6344_v12  ;;  %v3743_v41 = vadd.f32 %v15166_v26, %v12363_v61  ;;  %v15518_v34 = vpop.f32.mrb[5].mxu0  ;;  %v15520_v44 = vpop.f32.mrb[5].mxu1  ;;  %v17103_v16 = vld [vmem:[#allocation8_spill] sm:$0xff] }
 0x3d7   : > { %10803 = vst [vmem:[%s12490_s25 + $0x730] sm:$0xff] %v11190_v35  ;;  %v4736_v24 = vadd.f32 %v15168_v58, %v12365_v33  ;;  %v2604_v15 = vsel %vm2432_vm2, %v2411_v11, %v2002_v37  ;;  %v7111_v43 = vsel %vm5575_vm7, %v3739_v39, %v6343_v21  ;;  %17099 = vst [vmem:[#allocation6_spill] sm:$0xff] %v15520_v44  ;;  %v15522_v58 = vpop.f32.mrb[6].mxu0  ;;  %v15530_v12 = vpop.f32.mrb[6].mxu1 }
 0x3d8   : > { %vm5577_vm8 = vcmp.gt.f32.partialorder %v4732_v56, 0.0  ;;  %v6345_v19 = vmul.f32 -0.51027, %v4732_v56  ;;  %v2882_v54 = vsel %vm2625_vm3, %v2604_v15, %v2218_v45  ;;  %v10999_v26 = vpack.c.bf16 %v7111_v43, %v7110_v29  ;;  %17100 = vst [vmem:[#allocation21_spill] sm:$0xff] %v15522_v58  ;;  %17101 = vst [vmem:[#allocation22_spill] sm:$0xff] %v15530_v12  ;;  %v15532_v45 = vpop.f32.mrb[7].mxu0  ;;  %v2004_v43 = vpop.permute.xlu1 %2003 }
 0x3d9   : > { %vm5578_vm9 = vcmp.gt.f32.partialorder %v3743_v41, 0.0  ;;  %v6346_v52 = vmul.f32 -0.51027, %v3743_v41  ;;  %vm5580_vm10 = vcmp.gt.f32.partialorder %v4736_v24, 0.0  ;;  %4011 = vmatmul.mubr.bf16.gmra.mrb[84].mxu0 %v2882_v54  ;;  %5004 = vmatmul.mubr.bf16.gmra.mrb[84].mxu1 %v2882_v54  ;;  %v6348_v37 = vmul.f32 -0.51027, %v4736_v24 }
 0x3da   : > { %v7113_v53 = vsel %vm5577_vm8, %v4732_v56, %v6345_v19  ;;  %v3745_v39 = vadd.f32 %v15175_v63, %v12376_v62  ;;  %v4738_v35 = vadd.f32 %v15177_v60, %v12432_v1  ;;  %4020 = vmatprep.mubr.bf16.mxu0 %v16849_v49  ;;  %5013 = vmatprep.mubr.bf16.mxu1 %v16849_v49  ;;  %v17104_v63 = vld [vmem:[#allocation9_spill] sm:$0xff]  ;;  %v15540_v60 = vpop.f32.mrb[7].mxu1 }
 0x3db   : > { %17102 = vst [vmem:[#allocation23_spill] sm:$0xff] %v15532_v45  ;;  %8877 = vst [vmem:[%s12490_s25 + $0x718] sm:$0xff] %v10999_v26  ;;  %v11191_v29 = vpack.c.bf16 %v7113_v53, %v7112_v38  ;;  %v7114_v21 = vsel %vm5578_vm9, %v3743_v41, %v6346_v52  ;;  %v3747_v56 = vadd.f32 %v17103_v16, %v12363_v61  ;;  %v1802_v41 = vpop.permute.xlu0 %1801  ;;  %v17106_v52 = vld [vmem:[#allocation10_spill] sm:$0xff]  ;;  %v17107_v16 = vld [vmem:[#allocation11_spill] sm:$0xff] }
 0x3dc   : > { %v4740_v5 = vadd.f32 %v17104_v63, %v12365_v33  ;;  %17105 = vst [vmem:[#allocation24_spill] sm:$0xff] %v15540_v60  ;;  %v7116_v11 = vsel %vm5580_vm10, %v4736_v24, %v6348_v37  ;;  %vm5579_vm11 = vcmp.gt.f32.partialorder %v3745_v39, 0.0  ;;  %v6347_v15 = vmul.f32 -0.51027, %v3745_v39  ;;  %v11502_v45 = vld [vmem:[%s11583_s7 + $0x2b0] sm:$0xff]  }
 0x3dd   : > { %vm5581_vm12 = vcmp.gt.f32.partialorder %v4738_v35, 0.0  ;;  %10804 = vst [vmem:[%s12490_s25 + $0x738] sm:$0xff] %v11191_v29  ;;  %v6349_v19 = vmul.f32 -0.51027, %v4738_v35  ;;  %vm5582_vm13 = vcmp.gt.f32.partialorder %v3747_v56, 0.0  ;;  %v3749_v53 = vadd.f32 %v17106_v52, %v12376_v62 }
 0x3de   : > { %v6350_v38 = vmul.f32 -0.51027, %v3747_v56  ;;  %vm5584_vm14 = vcmp.gt.f32.partialorder %v4740_v5, 0.0  ;;  %v7115_v54 = vsel %vm5579_vm11, %v3745_v39, %v6347_v15  ;;  %v6352_v26 = vmul.f32 -0.51027, %v4740_v5 }
 0x3df   : > { %v4742_v24 = vadd.f32 %v17107_v16, %v12432_v1  ;;  %v11000_v37 = vpack.c.bf16 %v7115_v54, %v7114_v21  ;;  %v7117_v63 = vsel %vm5581_vm12, %v4738_v35, %v6349_v19  ;;  %v2413_v29 = vsel %vm2239_vm1, %v11502_v45, %v1802_v41  ;;  %v17108_v21 = vld [vmem:[#allocation26_spill] sm:$0xff] }
 0x3e0   : > { %v7118_v60 = vsel %vm5582_vm13, %v3747_v56, %v6350_v38  ;;  %v11192_v12 = vpack.c.bf16 %v7117_v63, %v7116_v11  ;;  %v7120_v58 = vsel %vm5584_vm14, %v4740_v5, %v6352_v26  ;;  %vm5583_vm15 = vcmp.gt.f32.partialorder %v3749_v53, 0.0  ;;  %v1804_v5 = vpop.permute.xlu1 %1803  ;;  %v15561_v11 = vpop.f32.mrb[8].mxu0 }
 0x3e1   : > { %v6351_v44 = vmul.f32 -0.51027, %v3749_v53  ;;  %8878 = vst [vmem:[%s12490_s25 + $0x740] sm:$0xff] %v11000_v37  ;;  %vm5585_vm4 = vcmp.gt.f32.partialorder %v4742_v24, 0.0  ;;  %v6353_v39 = vmul.f32 -0.51027, %v4742_v24  ;;  %v2606_v15 = vsel %vm2432_vm2, %v2413_v29, %v2004_v43 }
 0x3e2   : > { %v3753_v52 = vadd.f32 %v15218_v6, %v12363_v61  ;;  %10805 = vst [vmem:[%s12490_s25 + $0x760] sm:$0xff] %v11192_v12  ;;  %v4746_v35 = vadd.f32 %v15220_v27, %v12365_v33  ;;  %v3755_v45 = vadd.f32 %v15227_v48, %v12376_v62  ;;  %v4748_v56 = vadd.f32 %v17108_v21, %v12432_v1  ;;  %v2220_v12 = vpop.permute.xlu0 %2219  ;;  %v15565_v48 = vpop.f32.mrb[9].mxu0  ;;  %v17110_v29 = vld [vmem:[#allocation12_spill] sm:$0xff] }
 0x3e3   : > { %v7119_v16 = vsel %vm5583_vm15, %v3749_v53, %v6351_v44  ;;  %v7121_v43 = vsel %vm5585_vm4, %v4742_v24, %v6353_v39  ;;  %v15563_v44 = vpop.f32.mrb[8].mxu1  ;;  %v15570_v53 = vpop.f32.mrb[10].mxu0  ;;  %v2885_v37 = vsel %vm2625_vm3, %v2606_v15, %v2220_v12  ;;  %v4750_v39 = vadd.f32 %v17110_v29, %v12365_v33 }
 0x3e4   : > { %v11001_v19 = vpack.c.bf16 %v7119_v16, %v7118_v60  ;;  %vm5586_vm5 = vcmp.gt.f32.partialorder %v3753_v52, 0.0  ;;  %v6354_v6 = vmul.f32 -0.51027, %v3753_v52  ;;  %v11193_v38 = vpack.c.bf16 %v7121_v43, %v7120_v58  ;;  %v15567_v41 = vpop.f32.mrb[9].mxu1  ;;  %v17109_v58 = vld [vmem:[#allocation27_spill] sm:$0xff]  ;;  %v15580_v21 = vpop.f32.mrb[11].mxu0  ;;  %4021 = vmatmul.mubr.bf16.gmra.mrb[88].mxu0 %v2885_v37  ;;  %5014 = vmatmul.mubr.bf16.gmra.mrb[88].mxu1 %v2885_v37 }
 0x3e5   : > { %vm5588_vm0 = vcmp.gt.f32.partialorder %v4746_v35, 0.0  ;;  %v6356_v27 = vmul.f32 -0.51027, %v4746_v35  ;;  %vm5587_vm6 = vcmp.gt.f32.partialorder %v3755_v45, 0.0  ;;  %v6355_v26 = vmul.f32 -0.51027, %v3755_v45  ;;  %4030 = vmatprep.mubr.bf16.mxu0 %v16849_v49  ;;  %5023 = vmatprep.mubr.bf16.mxu1 %v16849_v49 }
 0x3e6   : > { %8879 = vst [vmem:[%s12490_s25 + $0x748] sm:$0xff] %v11001_v19  ;;  %v7122_v54 = vsel %vm5586_vm5, %v3753_v52, %v6354_v6  ;;  %vm5589_vm7 = vcmp.gt.f32.partialorder %v4748_v56, 0.0  ;;  %v6357_v60 = vmul.f32 -0.51027, %v4748_v56  ;;  %10806 = vst [vmem:[%s12490_s25 + $0x768] sm:$0xff] %v11193_v38  ;;  %v3757_v63 = vadd.f32 %v17109_v58, %v12363_v61  ;;  %v15578_v16 = vpop.f32.mrb[10].mxu1  ;;  %v2006_v29 = vpop.permute.xlu0 %2005 }
 0x3e7   : > { %v7124_v24 = vsel %vm5588_vm0, %v4746_v35, %v6356_v27  ;;  %17111 = vst [vmem:[#allocation25_spill] sm:$0xff] %v15580_v21  ;;  %v7123_v52 = vsel %vm5587_vm6, %v3755_v45, %v6355_v26  ;;  %v17112_v43 = vld [vmem:[#allocation28_spill] sm:$0xff]  ;;  %v17113_v35 = vld [vmem:[#allocation13_spill] sm:$0xff]  ;;  %v15587_v15 = vpop.f32.mrb[11].mxu1  ;;  %v2222_v45 = vpop.permute.xlu1 %2221  ;;  %vm5592_vm9 = vcmp.gt.f32.partialorder %v4750_v39, 0.0 }
 0x3e8   : > { %v7125_v19 = vsel %vm5589_vm7, %v4748_v56, %v6357_v60  ;;  %v3759_v6 = vadd.f32 %v17112_v43, %v12376_v62  ;;  %v4752_v38 = vadd.f32 %v17113_v35, %v12432_v1  ;;  %17114 = vst [vmem:[#allocation7_spill] sm:$0xff] %v15587_v15  ;;  %v11002_v12 = vpack.c.bf16 %v7123_v52, %v7122_v54 }
 0x3e9   : > { %v11194_v27 = vpack.c.bf16 %v7125_v19, %v7124_v24  ;;  %vm5590_vm8 = vcmp.gt.f32.partialorder %v3757_v63, 0.0  ;;  %v6358_v58 = vmul.f32 -0.51027, %v3757_v63  ;;  %v6360_v56 = vmul.f32 -0.51027, %v4750_v39  ;;  %v11503_v24 = vld [vmem:[%s11583_s7 + $0x2b8] sm:$0xff]  }
 0x3ea   : > { %vm5591_vm10 = vcmp.gt.f32.partialorder %v3759_v6, 0.0  ;;  %v6359_v26 = vmul.f32 -0.51027, %v3759_v6  ;;  %8880 = vst [vmem:[%s12490_s25 + $0x750] sm:$0xff] %v11002_v12  ;;  %vm5593_vm11 = vcmp.gt.f32.partialorder %v4752_v38, 0.0  ;;  %v2415_v52 = vsel %vm2239_vm1, %v11503_v24, %v1804_v5  ;;  %v17120_v24 = vld [vmem:[#allocation15_spill] sm:$0xff] }
 0x3eb   : > { %10807 = vst [vmem:[%s12490_s25 + $0x770] sm:$0xff] %v11194_v27  ;;  %v7126_v60 = vsel %vm5590_vm8, %v3757_v63, %v6358_v58  ;;  %v6361_v54 = vmul.f32 -0.51027, %v4752_v38  ;;  %v7128_v37 = vsel %vm5592_vm9, %v4750_v39, %v6360_v56  ;;  %v3763_v43 = vadd.f32 %v15283_v0, %v12363_v61  ;;  %v2008_v27 = vpop.permute.xlu1 %2007  ;;  %v15602_v39 = vpop.f32.mrb[12].mxu0 }
 0x3ec   : > { %v7127_v19 = vsel %vm5591_vm10, %v3759_v6, %v6359_v26  ;;  %v4756_v35 = vadd.f32 %v15285_v28, %v12365_v33  ;;  %v2608_v12 = vsel %vm2432_vm2, %v2415_v52, %v2006_v29  ;;  %v3765_v63 = vadd.f32 %v15292_v2, %v12376_v62  ;;  %17115 = vst [vmem:[#allocation8_spill] sm:$0xff] %v15602_v39  ;;  %v15604_v6 = vpop.f32.mrb[12].mxu1  ;;  %v1806_v29 = vpop.permute.xlu0 %1805 }
 0x3ed   : > { %v11003_v15 = vpack.c.bf16 %v7127_v19, %v7126_v60  ;;  %v7129_v21 = vsel %vm5593_vm11, %v4752_v38, %v6361_v54  ;;  %vm5594_vm12 = vcmp.gt.f32.partialorder %v3763_v43, 0.0  ;;  %v6362_v5 = vmul.f32 -0.51027, %v3763_v43  ;;  %17116 = vst [vmem:[#allocation9_spill] sm:$0xff] %v15604_v6  ;;  %v15608_v56 = vpop.f32.mrb[13].mxu0  ;;  %v17119_v60 = vld [vmem:[#allocation14_spill] sm:$0xff] }
 0x3ee   : > { %v11195_v58 = vpack.c.bf16 %v7129_v21, %v7128_v37  ;;  %vm5596_vm13 = vcmp.gt.f32.partialorder %v4756_v35, 0.0  ;;  %v6364_v0 = vmul.f32 -0.51027, %v4756_v35  ;;  %v2888_v28 = vsel %vm2625_vm3, %v2608_v12, %v2222_v45  ;;  %17117 = vst [vmem:[#allocation10_spill] sm:$0xff] %v15608_v56  ;;  %v17118_v21 = vld [vmem:[#allocation29_spill] sm:$0xff]  ;;  %v17122_v19 = vld [vmem:[#allocation16_spill] sm:$0xff] }
 0x3ef   : > { %8881 = vst [vmem:[%s12490_s25 + $0x758] sm:$0xff] %v11003_v15  ;;  %vm5595_vm14 = vcmp.gt.f32.partialorder %v3765_v63, 0.0  ;;  %v6363_v38 = vmul.f32 -0.51027, %v3765_v63  ;;  %v7130_v2 = vsel %vm5594_vm12, %v3763_v43, %v6362_v5  ;;  %v4758_v26 = vadd.f32 %v17118_v21, %v12432_v1  ;;  %4031 = vmatmul.mubr.bf16.gmra.mrb[92].mxu0 %v2888_v28  ;;  %v15617_v15 = vpop.f32.mrb[13].mxu1  ;;  %v17123_v43 = vld [vmem:[#allocation17_spill] sm:$0xff]  ;;  %5024 = vmatmul.mubr.bf16.gmra.mrb[92].mxu1 %v2888_v28 }
 0x3f0   : > { %10808 = vst [vmem:[%s12490_s25 + $0x778] sm:$0xff] %v11195_v58  ;;  %v3767_v54 = vadd.f32 %v17119_v60, %v12363_v61  ;;  %v4760_v52 = vadd.f32 %v17120_v24, %v12365_v33  ;;  %17121 = vst [vmem:[#allocation11_spill] sm:$0xff] %v15617_v15  ;;  %v7132_v45 = vsel %vm5596_vm13, %v4756_v35, %v6364_v0  ;;  %v15624_v5 = vpop.f32.mrb[14].mxu0  ;;  %v15626_v21 = vpop.f32.mrb[14].mxu1  ;;  %4040 = vmatprep.mubr.bf16.mxu0 %v16849_v49  ;;  %v11504_v15 = vld [vmem:[%s11583_s7 + $0x2c0] sm:$0xff]  }
 0x3f1   : > { %v7131_v37 = vsel %vm5595_vm14, %v3765_v63, %v6363_v38  ;;  %v3769_v12 = vadd.f32 %v17122_v19, %v12376_v62  ;;  %v4762_v58 = vadd.f32 %v17123_v43, %v12432_v1  ;;  %17124 = vst [vmem:[#allocation26_spill] sm:$0xff] %v15624_v5  ;;  %17125 = vst [vmem:[#allocation27_spill] sm:$0xff] %v15626_v21  ;;  %vm5597_vm15 = vcmp.gt.f32.partialorder %v4758_v26, 0.0  ;;  %v15630_v35 = vpop.f32.mrb[15].mxu0  ;;  %v15632_v63 = vpop.f32.mrb[15].mxu1 }
 0x3f2   : > { %v11004_v60 = vpack.c.bf16 %v7131_v37, %v7130_v2  ;;  %v6365_v24 = vmul.f32 -0.51027, %v4758_v26  ;;  %vm5598_vm4 = vcmp.gt.f32.partialorder %v3767_v54, 0.0  ;;  %5033 = vmatprep.mubr.bf16.mxu1 %v16849_v49  ;;  %17126 = vst [vmem:[#allocation12_spill] sm:$0xff] %v15630_v35  ;;  %17127 = vst [vmem:[#allocation28_spill] sm:$0xff] %v15632_v63  ;;  %vm5600_vm5 = vcmp.gt.f32.partialorder %v4760_v52, 0.0  ;;  %v1808_v19 = vpop.permute.xlu1 %1807  ;;  %v2224_v63 = vpop.permute.xlu0 %2223 }
 0x3f3   : > { %v6366_v0 = vmul.f32 -0.51027, %v3767_v54  ;;  %v6368_v28 = vmul.f32 -0.51027, %v4760_v52  ;;  %vm5599_vm0 = vcmp.gt.f32.partialorder %v3769_v12, 0.0  ;;  %vm5601_vm6 = vcmp.gt.f32.partialorder %v4762_v58, 0.0 }
 0x3f4   : > { %8882 = vst [vmem:[%s12490_s25 + $0x780] sm:$0xff] %v11004_v60  ;;  %v7133_v38 = vsel %vm5597_vm15, %v4758_v26, %v6365_v24  ;;  %v6367_v2 = vmul.f32 -0.51027, %v3769_v12  ;;  %v6369_v37 = vmul.f32 -0.51027, %v4762_v58  ;;  %v2417_v35 = vsel %vm2239_vm1, %v11504_v15, %v1806_v29 }
 0x3f5   : > { %v11196_v43 = vpack.c.bf16 %v7133_v38, %v7132_v45  ;;  %v7134_v21 = vsel %vm5598_vm4, %v3767_v54, %v6366_v0  ;;  %v7136_v5 = vsel %vm5600_vm5, %v4760_v52, %v6368_v28  ;;  %v2610_v60 = vsel %vm2432_vm2, %v2417_v35, %v2008_v27  ;;  %v15661_v35 = vpop.f32.mrb[16].mxu1 }
 0x3f6   : > { %v7135_v56 = vsel %vm5599_vm0, %v3769_v12, %v6367_v2  ;;  %v7137_v6 = vsel %vm5601_vm6, %v4762_v58, %v6369_v37  ;;  %v3773_v26 = vadd.f32 %v15330_v20, %v12363_v61  ;;  %v4766_v54 = vadd.f32 %v15332_v17, %v12365_v33  ;;  %v2226_v12 = vpop.permute.xlu1 %2225  ;;  %v15665_v38 = vpop.f32.mrb[17].mxu1 }
 0x3f7   : > { %10809 = vst [vmem:[%s12490_s25 + $0x7a0] sm:$0xff] %v11196_v43  ;;  %v11005_v24 = vpack.c.bf16 %v7135_v56, %v7134_v21  ;;  %v11197_v39 = vpack.c.bf16 %v7137_v6, %v7136_v5  ;;  %v3775_v52 = vadd.f32 %v15340_v55, %v12376_v62  ;;  %v4768_v15 = vadd.f32 %v15342_v4, %v12432_v1  ;;  %v2010_v6 = vpop.permute.xlu0 %2009  ;;  %v15655_v4 = vpop.f32.mrb[16].mxu0 }
 0x3f8   : > { %vm5602_vm7 = vcmp.gt.f32.partialorder %v3773_v26, 0.0  ;;  %v6370_v29 = vmul.f32 -0.51027, %v3773_v26  ;;  %v2891_v45 = vsel %vm2625_vm3, %v2610_v60, %v2224_v63  ;;  %vm5604_vm8 = vcmp.gt.f32.partialorder %v4766_v54, 0.0  ;;  %v15663_v63 = vpop.f32.mrb[17].mxu0  ;;  %v15669_v43 = vpop.f32.mrb[18].mxu1 }
 0x3f9   : > { %8883 = vst [vmem:[%s12490_s25 + $0x788] sm:$0xff] %v11005_v24  ;;  %10810 = vst [vmem:[%s12490_s25 + $0x7a8] sm:$0xff] %v11197_v39  ;;  %v6372_v20 = vmul.f32 -0.51027, %v4766_v54  ;;  %vm5603_vm9 = vcmp.gt.f32.partialorder %v3775_v52, 0.0  ;;  %4041 = vmatmul.mubr.bf16.gmra.mrb[96].mxu0 %v2891_v45  ;;  %5034 = vmatmul.mubr.bf16.gmra.mrb[96].mxu1 %v2891_v45  ;;  %vm5605_vm10 = vcmp.gt.f32.partialorder %v4768_v15, 0.0  ;;  %v3777_v55 = vadd.f32 %v15345_v46, %v12363_v61 }
 0x3fa   : > { %v6371_v27 = vmul.f32 -0.51027, %v3775_v52  ;;  %v7138_v17 = vsel %vm5602_vm7, %v3773_v26, %v6370_v29  ;;  %v6373_v56 = vmul.f32 -0.51027, %v4768_v15  ;;  %4050 = vmatprep.mubr.bf16.mxu0 %v16849_v49  ;;  %5043 = vmatprep.mubr.bf16.mxu1 %v16849_v49  ;;  %v4770_v5 = vadd.f32 %v15355_v59, %v12365_v33  ;;  %v15667_v2 = vpop.f32.mrb[18].mxu0  ;;  %v15678_v29 = vpop.f32.mrb[19].mxu1 }
 0x3fb   : > { %v7140_v39 = vsel %vm5604_vm8, %v4766_v54, %v6372_v20  ;;  %v3779_v21 = vadd.f32 %v15357_v22, %v12376_v62  ;;  %vm5606_vm11 = vcmp.gt.f32.partialorder %v3777_v55, 0.0  ;;  %v6374_v28 = vmul.f32 -0.51027, %v3777_v55  ;;  %v15671_v22 = vpop.f32.mrb[19].mxu0  ;;  %v11505_v54 = vld [vmem:[%s11583_s7 + $0x2c8] sm:$0xff]  }
 0x3fc   : > { %v7139_v58 = vsel %vm5603_vm9, %v3775_v52, %v6371_v27  ;;  %v7141_v0 = vsel %vm5605_vm10, %v4768_v15, %v6373_v56  ;;  %vm5608_vm12 = vcmp.gt.f32.partialorder %v4770_v5, 0.0  ;;  %v6376_v59 = vmul.f32 -0.51027, %v4770_v5 }
 0x3fd   : > { %v11006_v46 = vpack.c.bf16 %v7139_v58, %v7138_v17  ;;  %v11198_v37 = vpack.c.bf16 %v7141_v0, %v7140_v39  ;;  %vm5607_vm13 = vcmp.gt.f32.partialorder %v3779_v21, 0.0  ;;  %v7142_v60 = vsel %vm5606_vm11, %v3777_v55, %v6374_v28 }
 0x3fe   : > { %v6375_v26 = vmul.f32 -0.51027, %v3779_v21  ;;  %v4772_v24 = vadd.f32 %v15363_v10, %v12432_v1  ;;  %v2419_v52 = vsel %vm2239_vm1, %v11505_v54, %v1808_v19  ;;  %v7144_v15 = vsel %vm5608_vm12, %v4770_v5, %v6376_v59  ;;  %v1810_v59 = vpop.permute.xlu0 %1809 }
 0x3ff   : > { %8884 = vst [vmem:[%s12490_s25 + $0x790] sm:$0xff] %v11006_v46  ;;  %10811 = vst [vmem:[%s12490_s25 + $0x7b0] sm:$0xff] %v11198_v37  ;;  %v3783_v45 = vadd.f32 %v15388_v31, %v12363_v61  ;;  %v4776_v20 = vadd.f32 %v15390_v13, %v12365_v33  ;;  %v2612_v27 = vsel %vm2432_vm2, %v2419_v52, %v2010_v6 }
 0x400   : > { %v7143_v17 = vsel %vm5607_vm13, %v3779_v21, %v6375_v26  ;;  %vm5609_vm14 = vcmp.gt.f32.partialorder %v4772_v24, 0.0  ;;  %v6377_v56 = vmul.f32 -0.51027, %v4772_v24  ;;  %v2894_v10 = vsel %vm2625_vm3, %v2612_v27, %v2226_v12  ;;  %v11506_v27 = vld [vmem:[%s11583_s7 + $0x2d0] sm:$0xff]  }
 0x401   : > { %v11007_v55 = vpack.c.bf16 %v7143_v17, %v7142_v60  ;;  %vm5610_vm15 = vcmp.gt.f32.partialorder %v3783_v45, 0.0  ;;  %v6378_v19 = vmul.f32 -0.51027, %v3783_v45  ;;  %vm5612_vm4 = vcmp.gt.f32.partialorder %v4776_v20, 0.0  ;;  %4051 = vmatmul.mubr.bf16.gmra.mrb[100].mxu0 %v2894_v10  ;;  %5044 = vmatmul.mubr.bf16.gmra.mrb[100].mxu1 %v2894_v10  ;;  %v2012_v60 = vpop.permute.xlu1 %2011 }
 0x402   : > { %v7145_v39 = vsel %vm5609_vm14, %v4772_v24, %v6377_v56  ;;  %v6380_v58 = vmul.f32 -0.51027, %v4776_v20  ;;  %v3785_v31 = vadd.f32 %v15392_v51, %v12376_v62  ;;  %v4778_v13 = vadd.f32 %v15394_v23, %v12432_v1  ;;  %4060 = vmatprep.mubr.bf16.mxu0 %v16849_v49  ;;  %5053 = vmatprep.mubr.bf16.mxu1 %v16849_v49  ;;  %v15698_v51 = vpop.f32.mrb[20].mxu0  ;;  %v15700_v23 = vpop.f32.mrb[20].mxu1  ;;  %v17128_v24 = vld [vmem:[#allocation18_spill] sm:$0xff] }
 0x403   : > { %8885 = vst [vmem:[%s12490_s25 + $0x798] sm:$0xff] %v11007_v55  ;;  %v11199_v6 = vpack.c.bf16 %v7145_v39, %v7144_v15  ;;  %v7146_v12 = vsel %vm5610_vm15, %v3783_v45, %v6378_v19  ;;  %v3787_v5 = vadd.f32 %v15397_v57, %v12363_v61  ;;  %v4780_v21 = vadd.f32 %v15405_v9, %v12365_v33  ;;  %v15707_v52 = vpop.f32.mrb[21].mxu0  ;;  %v15712_v56 = vpop.f32.mrb[21].mxu1 }
 0x404   : > { %v7148_v46 = vsel %vm5612_vm4, %v4776_v20, %v6380_v58  ;;  %vm5611_vm5 = vcmp.gt.f32.partialorder %v3785_v31, 0.0  ;;  %v6379_v0 = vmul.f32 -0.51027, %v3785_v31  ;;  %vm5613_vm0 = vcmp.gt.f32.partialorder %v4778_v13, 0.0  ;;  %v15714_v10 = vpop.f32.mrb[22].mxu0  ;;  %v15717_v39 = vpop.f32.mrb[22].mxu1 }
 0x405   : > { %10812 = vst [vmem:[%s12490_s25 + $0x7b8] sm:$0xff] %v11199_v6  ;;  %v6381_v28 = vmul.f32 -0.51027, %v4778_v13  ;;  %vm5614_vm6 = vcmp.gt.f32.partialorder %v3787_v5, 0.0  ;;  %v6382_v37 = vmul.f32 -0.51027, %v3787_v5  ;;  %v3789_v9 = vadd.f32 %v15412_v47, %v12376_v62 }
 0x406   : > { %vm5616_vm7 = vcmp.gt.f32.partialorder %v4780_v21, 0.0  ;;  %v7147_v57 = vsel %vm5611_vm5, %v3785_v31, %v6379_v0  ;;  %v6384_v26 = vmul.f32 -0.51027, %v4780_v21  ;;  %v4782_v54 = vadd.f32 %v17128_v24, %v12432_v1  ;;  %v15719_v58 = vpop.f32.mrb[23].mxu0 }
 0x407   : > { %v11008_v15 = vpack.c.bf16 %v7147_v57, %v7146_v12  ;;  %v7149_v45 = vsel %vm5613_vm0, %v4778_v13, %v6381_v28  ;;  %v7150_v20 = vsel %vm5614_vm6, %v3787_v5, %v6382_v37  ;;  %v2421_v17 = vsel %vm2239_vm1, %v11506_v27, %v1810_v59  ;;  %v15725_v12 = vpop.f32.mrb[23].mxu1  ;;  %v17130_v28 = vld [vmem:[#allocation3_spill] sm:$0xff] }
 0x408   : > { %v11200_v55 = vpack.c.bf16 %v7149_v45, %v7148_v46  ;;  %v7152_v47 = vsel %vm5616_vm7, %v4780_v21, %v6384_v26  ;;  %vm5615_vm8 = vcmp.gt.f32.partialorder %v3789_v9, 0.0  ;;  %v6383_v19 = vmul.f32 -0.51027, %v3789_v9  ;;  %v17129_v46 = vld [vmem:[#allocation2_spill] sm:$0xff]  ;;  %v1812_v26 = vpop.permute.xlu1 %1811 }
 0x409   : > { %8886 = vst [vmem:[%s12490_s25 + $0x7c0] sm:$0xff] %v11008_v15  ;;  %vm5617_vm9 = vcmp.gt.f32.partialorder %v4782_v54, 0.0  ;;  %v6385_v31 = vmul.f32 -0.51027, %v4782_v54  ;;  %v2614_v13 = vsel %vm2432_vm2, %v2421_v17, %v2012_v60  ;;  %v3793_v6 = vadd.f32 %v15430_v14, %v12363_v61  ;;  %v2228_v14 = vpop.permute.xlu0 %2227 }
 0x40a   : > { %10813 = vst [vmem:[%s12490_s25 + $0x7e0] sm:$0xff] %v11200_v55  ;;  %v7151_v5 = vsel %vm5615_vm8, %v3789_v9, %v6383_v19  ;;  %v4786_v21 = vadd.f32 %v15432_v8, %v12365_v33  ;;  %v3795_v0 = vadd.f32 %v17129_v46, %v12376_v62  ;;  %v4788_v37 = vadd.f32 %v17130_v28, %v12432_v1  ;;  %v17132_v55 = vld [vmem:[#allocation20_spill] sm:$0xff] }
 0x40b   : > { %v11009_v59 = vpack.c.bf16 %v7151_v5, %v7150_v20  ;;  %v7153_v60 = vsel %vm5617_vm9, %v4782_v54, %v6385_v31  ;;  %vm5618_vm10 = vcmp.gt.f32.partialorder %v3793_v6, 0.0  ;;  %v6386_v57 = vmul.f32 -0.51027, %v3793_v6  ;;  %v17131_v20 = vld [vmem:[#allocation19_spill] sm:$0xff]  ;;  %v17133_v5 = vld [vmem:[#allocation4_spill] sm:$0xff] }
 0x40c   : > { %v11201_v24 = vpack.c.bf16 %v7153_v60, %v7152_v47  ;;  %vm5620_vm11 = vcmp.gt.f32.partialorder %v4786_v21, 0.0  ;;  %v6388_v15 = vmul.f32 -0.51027, %v4786_v21  ;;  %vm5619_vm12 = vcmp.gt.f32.partialorder %v3795_v0, 0.0 }
 0x40d   : > { %8887 = vst [vmem:[%s12490_s25 + $0x7c8] sm:$0xff] %v11009_v59  ;;  %v7154_v9 = vsel %vm5618_vm10, %v3793_v6, %v6386_v57  ;;  %v6387_v8 = vmul.f32 -0.51027, %v3795_v0  ;;  %vm5621_vm13 = vcmp.gt.f32.partialorder %v4788_v37, 0.0  ;;  %v6389_v45 = vmul.f32 -0.51027, %v4788_v37  ;;  %v2014_v57 = vpop.permute.xlu0 %2013 }
 0x40e   : > { %10814 = vst [vmem:[%s12490_s25 + $0x7e8] sm:$0xff] %v11201_v24  ;;  %v7156_v27 = vsel %vm5620_vm11, %v4786_v21, %v6388_v15  ;;  %v2897_v17 = vsel %vm2625_vm3, %v2614_v13, %v2228_v14  ;;  %v3797_v54 = vadd.f32 %v17131_v20, %v12363_v61  ;;  %v4790_v19 = vadd.f32 %v17132_v55, %v12365_v33  ;;  %v17134_v6 = vld [vmem:[#allocation5_spill] sm:$0xff]  ;;  %v15745_v59 = vpop.f32.mrb[24].mxu0  ;;  %v2230_v24 = vpop.permute.xlu1 %2229 }
 0x40f   : > { %v7155_v31 = vsel %vm5619_vm12, %v3795_v0, %v6387_v8  ;;  %v7157_v47 = vsel %vm5621_vm13, %v4788_v37, %v6389_v45  ;;  %v3799_v46 = vadd.f32 %v17133_v5, %v12376_v62  ;;  %v4792_v28 = vadd.f32 %v17134_v6, %v12432_v1  ;;  %4061 = vmatmul.mubr.bf16.gmra.mrb[104].mxu0 %v2897_v17  ;;  %v15748_v0 = vpop.f32.mrb[24].mxu1  ;;  %v11507_v8 = vld [vmem:[%s11583_s7 + $0x2d8] sm:$0xff]  }
 0x410   : > { %v11010_v13 = vpack.c.bf16 %v7155_v31, %v7154_v9  ;;  %v11202_v21 = vpack.c.bf16 %v7157_v47, %v7156_v27  ;;  %vm5622_vm14 = vcmp.gt.f32.partialorder %v3797_v54, 0.0  ;;  %v6390_v60 = vmul.f32 -0.51027, %v3797_v54  ;;  %5054 = vmatmul.mubr.bf16.gmra.mrb[104].mxu1 %v2897_v17  ;;  %4070 = vmatprep.mubr.bf16.mxu0 %v16849_v49  ;;  %v15755_v27 = vpop.f32.mrb[25].mxu0  ;;  %v15757_v17 = vpop.f32.mrb[25].mxu1 }
 0x411   : > { %vm5624_vm15 = vcmp.gt.f32.partialorder %v4790_v19, 0.0  ;;  %v6392_v37 = vmul.f32 -0.51027, %v4790_v19  ;;  %vm5623_vm4 = vcmp.gt.f32.partialorder %v3799_v46, 0.0  ;;  %v6391_v14 = vmul.f32 -0.51027, %v3799_v46  ;;  %5063 = vmatprep.mubr.bf16.mxu1 %v16849_v49 }
 0x412   : > { %8888 = vst [vmem:[%s12490_s25 + $0x7d0] sm:$0xff] %v11010_v13  ;;  %10815 = vst [vmem:[%s12490_s25 + $0x7f0] sm:$0xff] %v11202_v21  ;;  %v7158_v15 = vsel %vm5622_vm14, %v3797_v54, %v6390_v60  ;;  %vm5625_vm5 = vcmp.gt.f32.partialorder %v4792_v28, 0.0  ;;  %v6393_v9 = vmul.f32 -0.51027, %v4792_v28  ;;  %v2423_v45 = vsel %vm2239_vm1, %v11507_v8, %v1812_v26  ;;  %v15763_v5 = vpop.f32.mrb[26].mxu0  ;;  %v2016_v60 = vpop.permute.xlu1 %2015 }
 0x413   : > { %v7160_v20 = vsel %vm5624_vm15, %v4790_v19, %v6392_v37  ;;  %v7159_v55 = vsel %vm5623_vm4, %v3799_v46, %v6391_v14  ;;  %v3803_v31 = vadd.f32 %v15465_v3, %v12363_v61  ;;  %v4796_v47 = vadd.f32 %v15470_v30, %v12365_v33  ;;  %v15765_v54 = vpop.f32.mrb[26].mxu1  ;;  %v15770_v46 = vpop.f32.mrb[27].mxu0 }
 0x414   : > { %v11011_v6 = vpack.c.bf16 %v7159_v55, %v7158_v15  ;;  %v7161_v13 = vsel %vm5625_vm5, %v4792_v28, %v6393_v9  ;;  %v2616_v26 = vsel %vm2432_vm2, %v2423_v45, %v2014_v57  ;;  %v3805_v19 = vadd.f32 %v15472_v32, %v12376_v62  ;;  %v15772_v30 = vpop.f32.mrb[27].mxu1  ;;  %v1814_v15 = vpop.permute.xlu0 %1813 }
 0x415   : > { %v11203_v21 = vpack.c.bf16 %v7161_v13, %v7160_v20  ;;  %vm5626_vm0 = vcmp.gt.f32.partialorder %v3803_v31, 0.0  ;;  %v6394_v3 = vmul.f32 -0.51027, %v3803_v31  ;;  %vm5628_vm6 = vcmp.gt.f32.partialorder %v4796_v47, 0.0 }
 0x416   : > { %8889 = vst [vmem:[%s12490_s25 + $0x7d8] sm:$0xff] %v11011_v6  ;;  %v6396_v37 = vmul.f32 -0.51027, %v4796_v47  ;;  %v2900_v14 = vsel %vm2625_vm3, %v2616_v26, %v2230_v24  ;;  %vm5627_vm7 = vcmp.gt.f32.partialorder %v3805_v19, 0.0  ;;  %v6395_v28 = vmul.f32 -0.51027, %v3805_v19 }
 0x417   : > { %10816 = vst [vmem:[%s12490_s25 + $0x7f8] sm:$0xff] %v11203_v21  ;;  %v7162_v57 = vsel %vm5626_vm0, %v3803_v31, %v6394_v3  ;;  %v4798_v32 = vadd.f32 %v15479_v25, %v12432_v1  ;;  %v3807_v9 = vadd.f32 %v15481_v42, %v12363_v61  ;;  %v4800_v8 = vadd.f32 %v15486_v18, %v12365_v33  ;;  %v15790_v13 = vpop.f32.mrb[28].mxu0  ;;  %v11508_v3 = vld [vmem:[%s11583_s7 + $0x2e0] sm:$0xff]  }
 0x418   : > { %4071 = vmatmul.mubr.bf16.gmra.mrb[108].mxu0 %v2900_v14  ;;  %v7164_v45 = vsel %vm5628_vm6, %v4796_v47, %v6396_v37  ;;  %v7163_v20 = vsel %vm5627_vm7, %v3805_v19, %v6395_v28  ;;  %v3809_v24 = vadd.f32 %v15488_v7, %v12376_v62  ;;  %v4802_v55 = vadd.f32 %v15496_v36, %v12432_v1  ;;  %v1816_v36 = vpop.permute.xlu1 %1815  ;;  %v15794_v28 = vpop.f32.mrb[28].mxu1 }
 0x419   : > { %5064 = vmatmul.mubr.bf16.gmra.mrb[108].mxu1 %v2900_v14  ;;  %v11012_v31 = vpack.c.bf16 %v7163_v20, %v7162_v57  ;;  %vm5629_vm8 = vcmp.gt.f32.partialorder %v4798_v32, 0.0  ;;  %v6397_v25 = vmul.f32 -0.51027, %v4798_v32  ;;  %vm5630_vm9 = vcmp.gt.f32.partialorder %v3807_v9, 0.0  ;;  %4080 = vmatprep.mubr.bf16.mxu0 %v16849_v49  ;;  %v2232_v14 = vpop.permute.xlu0 %2231 }
 0x41a   : > { %5073 = vmatprep.mubr.bf16.mxu1 %v16849_v49  ;;  %v6398_v42 = vmul.f32 -0.51027, %v3807_v9  ;;  %vm5632_vm10 = vcmp.gt.f32.partialorder %v4800_v8, 0.0  ;;  %v6400_v18 = vmul.f32 -0.51027, %v4800_v8  ;;  %vm5631_vm11 = vcmp.gt.f32.partialorder %v3809_v24, 0.0 }
 0x41b   : > { %8890 = vst [vmem:[%s12490_s25 + $0x800] sm:$0xff] %v11012_v31  ;;  %v7165_v47 = vsel %vm5629_vm8, %v4798_v32, %v6397_v25  ;;  %v6399_v7 = vmul.f32 -0.51027, %v3809_v24  ;;  %vm5633_vm12 = vcmp.gt.f32.partialorder %v4802_v55, 0.0  ;;  %v6401_v6 = vmul.f32 -0.51027, %v4802_v55 }
 0x41c   : > { %v11204_v26 = vpack.c.bf16 %v7165_v47, %v7164_v45  ;;  %v7166_v19 = vsel %vm5630_vm9, %v3807_v9, %v6398_v42  ;;  %v7168_v21 = vsel %vm5632_vm10, %v4800_v8, %v6400_v18  ;;  %v2425_v37 = vsel %vm2239_vm1, %v11508_v3, %v1814_v15  ;;  %v15799_v25 = vpop.f32.mrb[29].mxu0  ;;  %v15801_v45 = vpop.f32.mrb[29].mxu1  ;;  %v17135_v42 = vld [vmem:[#allocation6_spill] sm:$0xff] }
 0x41d   : > { %v7167_v57 = vsel %vm5631_vm11, %v3809_v24, %v6399_v7  ;;  %v7169_v20 = vsel %vm5633_vm12, %v4802_v55, %v6401_v6  ;;  %v2618_v32 = vsel %vm2432_vm2, %v2425_v37, %v2016_v60  ;;  %v3813_v31 = vadd.f32 %v15513_v50, %v12363_v61  ;;  %v15808_v55 = vpop.f32.mrb[30].mxu0  ;;  %v15810_v60 = vpop.f32.mrb[30].mxu1 }
 0x41e   : > { %10817 = vst [vmem:[%s12490_s25 + $0x820] sm:$0xff] %v11204_v26  ;;  %v11013_v9 = vpack.c.bf16 %v7167_v57, %v7166_v19  ;;  %v11205_v8 = vpack.c.bf16 %v7169_v20, %v7168_v21  ;;  %v4806_v15 = vadd.f32 %v15515_v40, %v12365_v33  ;;  %v3815_v24 = vadd.f32 %v15518_v34, %v12376_v62  ;;  %v15815_v7 = vpop.f32.mrb[31].mxu0  ;;  %v15817_v6 = vpop.f32.mrb[31].mxu1  ;;  %v17138_v21 = vld [vmem:[#allocation21_spill] sm:$0xff]  ;;  %v17139_v20 = vld [vmem:[#allocation22_spill] sm:$0xff] }
 0x41f   : > { %vm5634_vm13 = vcmp.gt.f32.partialorder %v3813_v31, 0.0  ;;  %v6402_v50 = vmul.f32 -0.51027, %v3813_v31  ;;  %v4808_v18 = vadd.f32 %v17135_v42, %v12432_v1  ;;  %v2903_v47 = vsel %vm2625_vm3, %v2618_v32, %v2232_v14  ;;  %17136 = vst [vmem:[#allocation13_spill] sm:$0xff] %v15815_v7  ;;  %17137 = vst [vmem:[#allocation29_spill] sm:$0xff] %v15817_v6  ;;  %v2018_v37 = vpop.permute.xlu0 %2017  ;;  %v2234_v6 = vpop.permute.xlu1 %2233 }
 0x420   : > { %8891 = vst [vmem:[%s12490_s25 + $0x808] sm:$0xff] %v11013_v9  ;;  %10818 = vst [vmem:[%s12490_s25 + $0x828] sm:$0xff] %v11205_v8  ;;  %vm5636_vm14 = vcmp.gt.f32.partialorder %v4806_v15, 0.0  ;;  %v6404_v40 = vmul.f32 -0.51027, %v4806_v15  ;;  %vm5635_vm15 = vcmp.gt.f32.partialorder %v3815_v24, 0.0  ;;  %4081 = vmatmul.mubr.bf16.gmra.mrb[112].mxu0 %v2903_v47  ;;  %v3817_v3 = vadd.f32 %v17138_v21, %v12363_v61 }
 0x421   : > { %v6403_v34 = vmul.f32 -0.51027, %v3815_v24  ;;  %5074 = vmatmul.mubr.bf16.gmra.mrb[112].mxu1 %v2903_v47  ;;  %v7170_v26 = vsel %vm5634_vm13, %v3813_v31, %v6402_v50  ;;  %vm5637_vm4 = vcmp.gt.f32.partialorder %v4808_v18, 0.0  ;;  %v6405_v19 = vmul.f32 -0.51027, %v4808_v18  ;;  %4090 = vmatprep.mubr.bf16.mxu0 %v16849_v49  ;;  %v17140_v9 = vld [vmem:[#allocation23_spill] sm:$0xff] }
 0x422   : > { %5083 = vmatprep.mubr.bf16.mxu1 %v16849_v49  ;;  %v7172_v14 = vsel %vm5636_vm14, %v4806_v15, %v6404_v40  ;;  %v4810_v32 = vadd.f32 %v17139_v20, %v12365_v33  ;;  %v3819_v31 = vadd.f32 %v17140_v9, %v12376_v62  ;;  %vm5638_vm5 = vcmp.gt.f32.partialorder %v3817_v3, 0.0  ;;  %v17141_v40 = vld [vmem:[#allocation24_spill] sm:$0xff]  ;;  %v11509_v20 = vld [vmem:[%s11583_s7 + $0x2e8] sm:$0xff]   ;;  %v15834_v9 = vpop.f32.mrb[32].mxu0 }
 0x423   : > { %v7171_v57 = vsel %vm5635_vm15, %v3815_v24, %v6403_v34  ;;  %v7173_v50 = vsel %vm5637_vm4, %v4808_v18, %v6405_v19  ;;  %v6406_v42 = vmul.f32 -0.51027, %v3817_v3  ;;  %v4812_v34 = vadd.f32 %v17141_v40, %v12432_v1 }
 0x424   : > { %v11014_v8 = vpack.c.bf16 %v7171_v57, %v7170_v26  ;;  %v11206_v47 = vpack.c.bf16 %v7173_v50, %v7172_v14  ;;  %vm5640_vm0 = vcmp.gt.f32.partialorder %v4810_v32, 0.0  ;;  %v6408_v21 = vmul.f32 -0.51027, %v4810_v32  ;;  %v15844_v57 = vpop.f32.mrb[33].mxu0 }
 0x425   : > { %vm5639_vm6 = vcmp.gt.f32.partialorder %v3819_v31, 0.0  ;;  %v7174_v15 = vsel %vm5638_vm5, %v3817_v3, %v6406_v42  ;;  %v6407_v24 = vmul.f32 -0.51027, %v3819_v31  ;;  %v2427_v7 = vsel %vm2239_vm1, %v11509_v20, %v1816_v36  ;;  %v15842_v3 = vpop.f32.mrb[32].mxu1  ;;  %v1818_v42 = vpop.permute.xlu0 %1817 }
 0x426   : > { %8892 = vst [vmem:[%s12490_s25 + $0x810] sm:$0xff] %v11014_v8  ;;  %10819 = vst [vmem:[%s12490_s25 + $0x830] sm:$0xff] %v11206_v47  ;;  %v7176_v18 = vsel %vm5640_vm0, %v4810_v32, %v6408_v21  ;;  %v3823_v26 = vadd.f32 %v15561_v11, %v12363_v61  ;;  %v4816_v19 = vadd.f32 %v15563_v44, %v12365_v33  ;;  %vm5641_vm7 = vcmp.gt.f32.partialorder %v4812_v34, 0.0  ;;  %v15848_v32 = vpop.f32.mrb[33].mxu1  ;;  %v15850_v44 = vpop.f32.mrb[34].mxu0 }
 0x427   : > { %v2620_v14 = vsel %vm2432_vm2, %v2427_v7, %v2018_v37  ;;  %v7175_v8 = vsel %vm5639_vm6, %v3819_v31, %v6407_v24  ;;  %v6409_v36 = vmul.f32 -0.51027, %v4812_v34  ;;  %17142 = vst [vmem:[#allocation14_spill] sm:$0xff] %v15848_v32  ;;  %17143 = vst [vmem:[#allocation15_spill] sm:$0xff] %v15850_v44  ;;  %v15852_v7 = vpop.f32.mrb[34].mxu1  ;;  %v4818_v21 = vadd.f32 %v15567_v41, %v12432_v1 }
 0x428   : > { %v2906_v50 = vsel %vm2625_vm3, %v2620_v14, %v2234_v6  ;;  %v11015_v47 = vpack.c.bf16 %v7175_v8, %v7174_v15  ;;  %vm5642_vm8 = vcmp.gt.f32.partialorder %v3823_v26, 0.0  ;;  %v6410_v11 = vmul.f32 -0.51027, %v3823_v26  ;;  %17144 = vst [vmem:[#allocation16_spill] sm:$0xff] %v15852_v7  ;;  %v15860_v15 = vpop.f32.mrb[35].mxu0  ;;  %v15862_v24 = vpop.f32.mrb[35].mxu1 }
 0x429   : > { %vm5644_vm9 = vcmp.gt.f32.partialorder %v4816_v19, 0.0  ;;  %4091 = vmatmul.mubr.bf16.gmra.mrb[116].mxu0 %v2906_v50  ;;  %5084 = vmatmul.mubr.bf16.gmra.mrb[116].mxu1 %v2906_v50  ;;  %v7177_v37 = vsel %vm5641_vm7, %v4812_v34, %v6409_v36  ;;  %v6412_v31 = vmul.f32 -0.51027, %v4816_v19  ;;  %v3825_v6 = vadd.f32 %v15565_v48, %v12376_v62  ;;  %17145 = vst [vmem:[#allocation17_spill] sm:$0xff] %v15860_v15  ;;  %v17147_v50 = vld [vmem:[#allocation25_spill] sm:$0xff] }
 0x42a   : > { %4100 = vmatprep.mubr.bf16.mxu0 %v16849_v49  ;;  %5093 = vmatprep.mubr.bf16.mxu1 %v16849_v49  ;;  %17146 = vst [vmem:[#allocation18_spill] sm:$0xff] %v15862_v24  ;;  %8893 = vst [vmem:[%s12490_s25 + $0x818] sm:$0xff] %v11015_v47  ;;  %v11207_v40 = vpack.c.bf16 %v7177_v37, %v7176_v18  ;;  %v7178_v34 = vsel %vm5642_vm8, %v3823_v26, %v6410_v11  ;;  %vm5645_vm11 = vcmp.gt.f32.partialorder %v4818_v21, 0.0  ;;  %v17148_v47 = vld [vmem:[#allocation7_spill] sm:$0xff]  ;;  %v2020_v11 = vpop.permute.xlu1 %2019  ;;  %v11510_v24 = vld [vmem:[%s11583_s7 + $0x2f0] sm:$0xff]  }
 0x42b   : > { %v3827_v20 = vadd.f32 %v15570_v53, %v12363_v61  ;;  %v4820_v48 = vadd.f32 %v15578_v16, %v12365_v33  ;;  %v7180_v41 = vsel %vm5644_vm9, %v4816_v19, %v6412_v31  ;;  %vm5643_vm10 = vcmp.gt.f32.partialorder %v3825_v6, 0.0 }
 0x42c   : > { %v6411_v14 = vmul.f32 -0.51027, %v3825_v6  ;;  %10820 = vst [vmem:[%s12490_s25 + $0x838] sm:$0xff] %v11207_v40  ;;  %v6413_v8 = vmul.f32 -0.51027, %v4818_v21  ;;  %v3829_v53 = vadd.f32 %v17147_v50, %v12376_v62  ;;  %v4822_v16 = vadd.f32 %v17148_v47, %v12432_v1  ;;  %v17149_v47 = vld [vmem:[#allocation8_spill] sm:$0xff] }
 0x42d   : > { %vm5646_vm12 = vcmp.gt.f32.partialorder %v3827_v20, 0.0  ;;  %v6414_v36 = vmul.f32 -0.51027, %v3827_v20  ;;  %vm5648_vm13 = vcmp.gt.f32.partialorder %v4820_v48, 0.0  ;;  %v6416_v26 = vmul.f32 -0.51027, %v4820_v48 }
 0x42e   : > { %v7179_v18 = vsel %vm5643_vm10, %v3825_v6, %v6411_v14  ;;  %v7181_v37 = vsel %vm5645_vm11, %v4818_v21, %v6413_v8  ;;  %v2429_v40 = vsel %vm2239_vm1, %v11510_v24, %v1818_v42  ;;  %vm5647_vm14 = vcmp.gt.f32.partialorder %v3829_v53, 0.0  ;;  %v2236_v6 = vpop.permute.xlu0 %2235  ;;  %v15884_v21 = vpop.f32.mrb[36].mxu1  ;;  %v17150_v42 = vld [vmem:[#allocation9_spill] sm:$0xff]  ;;  %v17152_v8 = vld [vmem:[#allocation11_spill] sm:$0xff] }
 0x42f   : > { %v11016_v19 = vpack.c.bf16 %v7179_v18, %v7178_v34  ;;  %v7182_v31 = vsel %vm5646_vm12, %v3827_v20, %v6414_v36  ;;  %v11208_v15 = vpack.c.bf16 %v7181_v37, %v7180_v41  ;;  %v7184_v7 = vsel %vm5648_vm13, %v4820_v48, %v6416_v26  ;;  %v15882_v34 = vpop.f32.mrb[36].mxu0  ;;  %v17151_v48 = vld [vmem:[#allocation10_spill] sm:$0xff]  ;;  %v15895_v26 = vpop.f32.mrb[37].mxu1 }
 0x430   : > { %v6415_v44 = vmul.f32 -0.51027, %v3829_v53  ;;  %vm5649_vm15 = vcmp.gt.f32.partialorder %v4822_v16, 0.0  ;;  %v6417_v14 = vmul.f32 -0.51027, %v4822_v16  ;;  %v2622_v50 = vsel %vm2432_vm2, %v2429_v40, %v2020_v11  ;;  %v15893_v18 = vpop.f32.mrb[37].mxu0 }
 0x431   : > { %8894 = vst [vmem:[%s12490_s25 + $0x840] sm:$0xff] %v11016_v19  ;;  %v3833_v32 = vadd.f32 %v17149_v47, %v12363_v61  ;;  %10821 = vst [vmem:[%s12490_s25 + $0x860] sm:$0xff] %v11208_v15  ;;  %v4826_v24 = vadd.f32 %v17150_v42, %v12365_v33  ;;  %v3835_v41 = vadd.f32 %v17151_v48, %v12376_v62 }
 0x432   : > { %v7183_v20 = vsel %vm5647_vm14, %v3829_v53, %v6415_v44  ;;  %v4828_v36 = vadd.f32 %v17152_v8, %v12432_v1  ;;  %17153 = vst [vmem:[#allocation2_spill] sm:$0xff] %v15895_v26  ;;  %v7185_v19 = vsel %vm5649_vm15, %v4822_v16, %v6417_v14  ;;  %v15897_v44 = vpop.f32.mrb[38].mxu0  ;;  %v15899_v53 = vpop.f32.mrb[38].mxu1 }
 0x433   : > { %v11017_v11 = vpack.c.bf16 %v7183_v20, %v7182_v31  ;;  %vm5650_vm4 = vcmp.gt.f32.partialorder %v3833_v32, 0.0  ;;  %v6418_v15 = vmul.f32 -0.51027, %v3833_v32  ;;  %17154 = vst [vmem:[#allocation3_spill] sm:$0xff] %v15897_v44  ;;  %17155 = vst [vmem:[#allocation19_spill] sm:$0xff] %v15899_v53  ;;  %v11209_v37 = vpack.c.bf16 %v7185_v19, %v7184_v7  ;;  %v15901_v47 = vpop.f32.mrb[39].mxu0  ;;  %v1820_v31 = vpop.permute.xlu1 %1819 }
 0x434   : > { %vm5652_vm5 = vcmp.gt.f32.partialorder %v4826_v24, 0.0  ;;  %v6420_v40 = vmul.f32 -0.51027, %v4826_v24  ;;  %vm5651_vm0 = vcmp.gt.f32.partialorder %v3835_v41, 0.0  ;;  %17156 = vst [vmem:[#allocation20_spill] sm:$0xff] %v15901_v47  ;;  %v15903_v42 = vpop.f32.mrb[39].mxu1  ;;  %v2909_v20 = vsel %vm2625_vm3, %v2622_v50, %v2236_v6 }
 0x435   : > { %17157 = vst [vmem:[#allocation4_spill] sm:$0xff] %v15903_v42  ;;  %8895 = vst [vmem:[%s12490_s25 + $0x848] sm:$0xff] %v11017_v11  ;;  %v7186_v48 = vsel %vm5650_vm4, %v3833_v32, %v6418_v15  ;;  %v6419_v8 = vmul.f32 -0.51027, %v3835_v41  ;;  %vm5653_vm6 = vcmp.gt.f32.partialorder %v4828_v36, 0.0  ;;  %v17158_v53 = vld [vmem:[#allocation26_spill] sm:$0xff]  ;;  %4101 = vmatmul.mubr.bf16.gmra.mrb[120].mxu0 %v2909_v20  ;;  %5094 = vmatmul.mubr.bf16.gmra.mrb[120].mxu1 %v2909_v20 }
 0x436   : > { %v6421_v16 = vmul.f32 -0.51027, %v4828_v36  ;;  %10822 = vst [vmem:[%s12490_s25 + $0x868] sm:$0xff] %v11209_v37  ;;  %v7188_v14 = vsel %vm5652_vm5, %v4826_v24, %v6420_v40  ;;  %v3837_v7 = vadd.f32 %v17158_v53, %v12363_v61  ;;  %v17159_v19 = vld [vmem:[#allocation27_spill] sm:$0xff]  ;;  %v17160_v42 = vld [vmem:[#allocation12_spill] sm:$0xff]  ;;  %4110 = vmatprep.mubr.bf16.mxu0 %v16849_v49  ;;  %5103 = vmatprep.mubr.bf16.mxu1 %v16849_v49 }
 0x437   : > { %v4830_v44 = vadd.f32 %v17159_v19, %v12365_v33  ;;  %v7187_v26 = vsel %vm5651_vm0, %v3835_v41, %v6419_v8  ;;  %v3839_v32 = vadd.f32 %v17160_v42, %v12376_v62  ;;  %v17161_v11 = vld [vmem:[#allocation28_spill] sm:$0xff]  ;;  %v3843_v8 = vadd.f32 %v15655_v4, %v12363_v61 }
 0x438   : > { %v7189_v47 = vsel %vm5653_vm6, %v4828_v36, %v6421_v16  ;;  %v4832_v15 = vadd.f32 %v17161_v11, %v12432_v1  ;;  %v11018_v24 = vpack.c.bf16 %v7187_v26, %v7186_v48  ;;  %vm5654_vm7 = vcmp.gt.f32.partialorder %v3837_v7, 0.0  ;;  %v2022_v36 = vpop.permute.xlu0 %2021  ;;  %v11511_v26 = vld [vmem:[%s11583_s7 + $0x2f8] sm:$0xff]   ;;  %v15929_v11 = vpop.f32.mrb[40].mxu0 }
 0x439   : > { %v11210_v37 = vpack.c.bf16 %v7189_v47, %v7188_v14  ;;  %v6422_v6 = vmul.f32 -0.51027, %v3837_v7  ;;  %vm5656_vm8 = vcmp.gt.f32.partialorder %v4830_v44, 0.0  ;;  %v6424_v50 = vmul.f32 -0.51027, %v4830_v44  ;;  %v2238_v14 = vpop.permute.xlu1 %2237  ;;  %v15933_v4 = vpop.f32.mrb[41].mxu0 }
 0x43a   : > { %vm5655_vm9 = vcmp.gt.f32.partialorder %v3839_v32, 0.0  ;;  %v6423_v41 = vmul.f32 -0.51027, %v3839_v32  ;;  %8896 = vst [vmem:[%s12490_s25 + $0x850] sm:$0xff] %v11018_v24  ;;  %vm5657_vm10 = vcmp.gt.f32.partialorder %v4832_v15, 0.0  ;;  %v2431_v47 = vsel %vm2239_vm1, %v11511_v26, %v1820_v31 }
 0x43b   : > { %10823 = vst [vmem:[%s12490_s25 + $0x870] sm:$0xff] %v11210_v37  ;;  %v7190_v53 = vsel %vm5654_vm7, %v3837_v7, %v6422_v6  ;;  %v6425_v40 = vmul.f32 -0.51027, %v4832_v15  ;;  %v7192_v42 = vsel %vm5656_vm8, %v4830_v44, %v6424_v50  ;;  %v4836_v16 = vadd.f32 %v15661_v35, %v12365_v33 }
 0x43c   : > { %v7191_v48 = vsel %vm5655_vm9, %v3839_v32, %v6423_v41  ;;  %v2624_v7 = vsel %vm2432_vm2, %v2431_v47, %v2022_v36  ;;  %v3845_v19 = vadd.f32 %v15663_v63, %v12376_v62  ;;  %vm5658_vm1 = vcmp.gt.f32.partialorder %v3843_v8, 0.0  ;;  %v15931_v32 = vpop.f32.mrb[40].mxu1  ;;  %v15946_v36 = vpop.f32.mrb[42].mxu0 }
 0x43d   : > { %v11019_v20 = vpack.c.bf16 %v7191_v48, %v7190_v53  ;;  %v7193_v49 = vsel %vm5657_vm10, %v4832_v15, %v6425_v40  ;;  %v6426_v31 = vmul.f32 -0.51027, %v3843_v8  ;;  %vm5660_vm11 = vcmp.gt.f32.partialorder %v4836_v16, 0.0  ;;  %v15937_v37 = vpop.f32.mrb[41].mxu1 }
 0x43e   : > { %v11211_v44 = vpack.c.bf16 %v7193_v49, %v7192_v42  ;;  %v6428_v35 = vmul.f32 -0.51027, %v4836_v16  ;;  %v2912_v15 = vsel %vm2625_vm3, %v2624_v7, %v2238_v14  ;;  %vm5659_vm12 = vcmp.gt.f32.partialorder %v3845_v19, 0.0  ;;  %v15948_v53 = vpop.f32.mrb[42].mxu1 }
 0x43f   : > { %8897 = vst [vmem:[%s12490_s25 + $0x858] sm:$0xff] %v11019_v20  ;;  %v6427_v24 = vmul.f32 -0.51027, %v3845_v19  ;;  %v7194_v63 = vsel %vm5658_vm1, %v3843_v8, %v6426_v31  ;;  %v4838_v6 = vadd.f32 %v15665_v38, %v12432_v1  ;;  %v3847_v50 = vadd.f32 %v15667_v2, %v12363_v61  ;;  %4111 = vmatmul.mubr.bf16.gmra.mrb[124].mxu0 %v2912_v15  ;;  %v15955_v2 = vpop.f32.mrb[43].mxu0  ;;  %v15957_v42 = vpop.f32.mrb[43].mxu1 }
 0x440   : > { %10824 = vst [vmem:[%s12490_s25 + $0x878] sm:$0xff] %v11211_v44  ;;  %v4840_v41 = vadd.f32 %v15669_v43, %v12365_v33  ;;  %v7196_v40 = vsel %vm5660_vm11, %v4836_v16, %v6428_v35  ;;  %v3849_v47 = vadd.f32 %v15671_v22, %v12376_v62  ;;  %v4842_v38 = vadd.f32 %v15678_v29, %v12432_v1 }
 0x441   : > { %v7195_v26 = vsel %vm5659_vm12, %v3845_v19, %v6427_v24  ;;  %5104 = vmatmul.mubr.bf16.gmra.mrb[124].mxu1 %v2912_v15  ;;  %vm5661_vm2 = vcmp.gt.f32.partialorder %v4838_v6, 0.0  ;;  %v6429_v48 = vmul.f32 -0.51027, %v4838_v6  ;;  %vm5662_vm3 = vcmp.gt.f32.partialorder %v3847_v50, 0.0 }
 0x442   : > { %v11020_v43 = vpack.c.bf16 %v7195_v26, %v7194_v63  ;;  %v6430_v8 = vmul.f32 -0.51027, %v3847_v50  ;;  %vm5664_vm13 = vcmp.gt.f32.partialorder %v4840_v41, 0.0  ;;  %v6432_v16 = vmul.f32 -0.51027, %v4840_v41 }
 0x443   : > { %vm5663_vm14 = vcmp.gt.f32.partialorder %v3849_v47, 0.0  ;;  %v7197_v14 = vsel %vm5661_vm2, %v4838_v6, %v6429_v48  ;;  %v6431_v22 = vmul.f32 -0.51027, %v3849_v47  ;;  %vm5665_vm15 = vcmp.gt.f32.partialorder %v4842_v38, 0.0  ;;  %v15975_v26 = vpop.f32.mrb[44].mxu0 }
 0x444   : > { %8898 = vst [vmem:[%s12490_s25 + $0x880] sm:$0xff] %v11020_v43  ;;  %v6433_v20 = vmul.f32 -0.51027, %v4842_v38  ;;  %v11212_v29 = vpack.c.bf16 %v7197_v14, %v7196_v40  ;;  %v7198_v49 = vsel %vm5662_vm3, %v3847_v50, %v6430_v8  ;;  %v7200_v7 = vsel %vm5664_vm13, %v4840_v41, %v6432_v16 }
 0x445   : > { %v3853_v19 = vadd.f32 %v15698_v51, %v12363_v61  ;;  %v7199_v44 = vsel %vm5663_vm14, %v3849_v47, %v6431_v22  ;;  %v4846_v35 = vadd.f32 %v15700_v23, %v12365_v33  ;;  %v3855_v15 = vadd.f32 %v15707_v52, %v12376_v62  ;;  %v15977_v47 = vpop.f32.mrb[44].mxu1 }
 0x446   : > { %v7201_v31 = vsel %vm5665_vm15, %v4842_v38, %v6433_v20  ;;  %10825 = vst [vmem:[%s12490_s25 + $0x8a0] sm:$0xff] %v11212_v29  ;;  %v11021_v24 = vpack.c.bf16 %v7199_v44, %v7198_v49  ;;  %v4848_v40 = vadd.f32 %v15712_v56, %v12432_v1  ;;  %v3857_v23 = vadd.f32 %v15714_v10, %v12363_v61  ;;  %v15983_v56 = vpop.f32.mrb[45].mxu0  ;;  %v15985_v16 = vpop.f32.mrb[45].mxu1 }
 0x447   : > { %v11213_v63 = vpack.c.bf16 %v7201_v31, %v7200_v7  ;;  %vm5666_vm4 = vcmp.gt.f32.partialorder %v3853_v19, 0.0  ;;  %v6434_v6 = vmul.f32 -0.51027, %v3853_v19  ;;  %vm5668_vm5 = vcmp.gt.f32.partialorder %v4846_v35, 0.0  ;;  %v15987_v14 = vpop.f32.mrb[46].mxu0  ;;  %v15989_v22 = vpop.f32.mrb[46].mxu1 }
 0x448   : > { %v6436_v50 = vmul.f32 -0.51027, %v4846_v35  ;;  %vm5667_vm0 = vcmp.gt.f32.partialorder %v3855_v15, 0.0  ;;  %v6435_v41 = vmul.f32 -0.51027, %v3855_v15  ;;  %8899 = vst [vmem:[%s12490_s25 + $0x888] sm:$0xff] %v11021_v24  ;;  %v4850_v52 = vadd.f32 %v15717_v39, %v12365_v33 }
 0x449   : > { %10826 = vst [vmem:[%s12490_s25 + $0x8a8] sm:$0xff] %v11213_v63  ;;  %v7202_v51 = vsel %vm5666_vm4, %v3853_v19, %v6434_v6  ;;  %v3859_v48 = vadd.f32 %v15719_v58, %v12376_v62  ;;  %v4852_v8 = vadd.f32 %v15725_v12, %v12432_v1  ;;  %vm5669_vm6 = vcmp.gt.f32.partialorder %v4848_v40, 0.0  ;;  %v15992_v7 = vpop.f32.mrb[47].mxu0 }
 0x44a   : > { %v7204_v38 = vsel %vm5668_vm5, %v4846_v35, %v6436_v50  ;;  %v7203_v43 = vsel %vm5667_vm0, %v3855_v15, %v6435_v41  ;;  %v6437_v39 = vmul.f32 -0.51027, %v4848_v40  ;;  %vm5670_vm7 = vcmp.gt.f32.partialorder %v3857_v23, 0.0  ;;  %v15996_v15 = vpop.f32.mrb[47].mxu1 }
 0x44b   : > { %v11022_v10 = vpack.c.bf16 %v7203_v43, %v7202_v51  ;;  %v6438_v20 = vmul.f32 -0.51027, %v3857_v23  ;;  %vm5672_vm8 = vcmp.gt.f32.partialorder %v4850_v52, 0.0  ;;  %v6440_v29 = vmul.f32 -0.51027, %v4850_v52 }
 0x44c   : > { %vm5671_vm9 = vcmp.gt.f32.partialorder %v3859_v48, 0.0  ;;  %v7205_v58 = vsel %vm5669_vm6, %v4848_v40, %v6437_v39  ;;  %v6439_v12 = vmul.f32 -0.51027, %v3859_v48  ;;  %vm5673_vm10 = vcmp.gt.f32.partialorder %v4852_v8, 0.0 }
 0x44d   : > { %8900 = vst [vmem:[%s12490_s25 + $0x890] sm:$0xff] %v11022_v10  ;;  %v6441_v49 = vmul.f32 -0.51027, %v4852_v8  ;;  %v11214_v19 = vpack.c.bf16 %v7205_v58, %v7204_v38  ;;  %v7206_v44 = vsel %vm5670_vm7, %v3857_v23, %v6438_v20  ;;  %v7208_v31 = vsel %vm5672_vm8, %v4850_v52, %v6440_v29 }
 0x44e   : > { %v3863_v35 = vadd.f32 %v15745_v59, %v12363_v61  ;;  %v7207_v24 = vsel %vm5671_vm9, %v3859_v48, %v6439_v12  ;;  %v4856_v6 = vadd.f32 %v15748_v0, %v12365_v33  ;;  %v3865_v50 = vadd.f32 %v15755_v27, %v12376_v62  ;;  %v16015_v39 = vpop.f32.mrb[48].mxu0  ;;  %v16017_v29 = vpop.f32.mrb[48].mxu1 }
 0x44f   : > { %v7209_v63 = vsel %vm5673_vm10, %v4852_v8, %v6441_v49  ;;  %10827 = vst [vmem:[%s12490_s25 + $0x8b0] sm:$0xff] %v11214_v19  ;;  %v11023_v41 = vpack.c.bf16 %v7207_v24, %v7206_v44  ;;  %v4858_v38 = vadd.f32 %v15757_v17, %v12432_v1  ;;  %v3867_v0 = vadd.f32 %v15763_v5, %v12363_v61  ;;  %v16019_v5 = vpop.f32.mrb[49].mxu0  ;;  %v16022_v49 = vpop.f32.mrb[49].mxu1 }
 0x450   : > { %v11215_v51 = vpack.c.bf16 %v7209_v63, %v7208_v31  ;;  %vm5674_vm1 = vcmp.gt.f32.partialorder %v3863_v35, 0.0  ;;  %v6442_v40 = vmul.f32 -0.51027, %v3863_v35  ;;  %vm5676_vm11 = vcmp.gt.f32.partialorder %v4856_v6, 0.0  ;;  %v16026_v24 = vpop.f32.mrb[50].mxu0  ;;  %v16028_v63 = vpop.f32.mrb[50].mxu1 }
 0x451   : > { %v6444_v23 = vmul.f32 -0.51027, %v4856_v6  ;;  %vm5675_vm12 = vcmp.gt.f32.partialorder %v3865_v50, 0.0  ;;  %v6443_v59 = vmul.f32 -0.51027, %v3865_v50  ;;  %8901 = vst [vmem:[%s12490_s25 + $0x898] sm:$0xff] %v11023_v41  ;;  %v4860_v27 = vadd.f32 %v15765_v54, %v12365_v33 }
 0x452   : > { %10828 = vst [vmem:[%s12490_s25 + $0x8b8] sm:$0xff] %v11215_v51  ;;  %v7210_v52 = vsel %vm5674_vm1, %v3863_v35, %v6442_v40  ;;  %v3869_v8 = vadd.f32 %v15770_v46, %v12376_v62  ;;  %v4862_v10 = vadd.f32 %v15772_v30, %v12432_v1  ;;  %vm5677_vm2 = vcmp.gt.f32.partialorder %v4858_v38, 0.0  ;;  %v16034_v40 = vpop.f32.mrb[51].mxu0 }
 0x453   : > { %v7212_v43 = vsel %vm5676_vm11, %v4856_v6, %v6444_v23  ;;  %v7211_v48 = vsel %vm5675_vm12, %v3865_v50, %v6443_v59  ;;  %v6445_v17 = vmul.f32 -0.51027, %v4858_v38  ;;  %vm5678_vm3 = vcmp.gt.f32.partialorder %v3867_v0, 0.0  ;;  %v16036_v23 = vpop.f32.mrb[51].mxu1 }
 0x454   : > { %v11024_v20 = vpack.c.bf16 %v7211_v48, %v7210_v52  ;;  %v6446_v54 = vmul.f32 -0.51027, %v3867_v0  ;;  %vm5680_vm13 = vcmp.gt.f32.partialorder %v4860_v27, 0.0  ;;  %v6448_v58 = vmul.f32 -0.51027, %v4860_v27 }
 0x455   : > { %vm5679_vm14 = vcmp.gt.f32.partialorder %v3869_v8, 0.0  ;;  %v7213_v12 = vsel %vm5677_vm2, %v4858_v38, %v6445_v17  ;;  %v6447_v46 = vmul.f32 -0.51027, %v3869_v8  ;;  %vm5681_vm15 = vcmp.gt.f32.partialorder %v4862_v10, 0.0  ;;  %v17163_v17 = vld [vmem:[#allocation29_spill] sm:$0xff] }
 0x456   : > { %8902 = vst [vmem:[%s12490_s25 + $0x8c0] sm:$0xff] %v11024_v20  ;;  %v6449_v30 = vmul.f32 -0.51027, %v4862_v10  ;;  %v11216_v19 = vpack.c.bf16 %v7213_v12, %v7212_v43  ;;  %v7214_v44 = vsel %vm5678_vm3, %v3867_v0, %v6446_v54  ;;  %v7216_v31 = vsel %vm5680_vm13, %v4860_v27, %v6448_v58 }
 0x457   : > { %v3873_v35 = vadd.f32 %v15790_v13, %v12363_v61  ;;  %v7215_v6 = vsel %vm5679_vm14, %v3869_v8, %v6447_v46  ;;  %v4866_v41 = vadd.f32 %v15794_v28, %v12365_v33  ;;  %v3875_v51 = vadd.f32 %v15799_v25, %v12376_v62 }
 0x458   : > { %v7217_v50 = vsel %vm5681_vm15, %v4862_v10, %v6449_v30  ;;  %10829 = vst [vmem:[%s12490_s25 + $0x8e0] sm:$0xff] %v11216_v19  ;;  %v11025_v13 = vpack.c.bf16 %v7215_v6, %v7214_v44  ;;  %v4868_v28 = vadd.f32 %v15801_v45, %v12432_v1  ;;  %v3877_v25 = vadd.f32 %v15808_v55, %v12363_v61  ;;  %v17162_v10 = vld [vmem:[#allocation13_spill] sm:$0xff] }
 0x459   : > { %v11217_v59 = vpack.c.bf16 %v7217_v50, %v7216_v31  ;;  %vm5682_vm4 = vcmp.gt.f32.partialorder %v3873_v35, 0.0  ;;  %v6450_v52 = vmul.f32 -0.51027, %v3873_v35  ;;  %vm5684_vm5 = vcmp.gt.f32.partialorder %v4866_v41, 0.0  ;;  %v16052_v19 = vpop.f32.mrb[52].mxu0  ;;  %v16056_v50 = vpop.f32.mrb[52].mxu1 }
 0x45a   : > { %v6452_v38 = vmul.f32 -0.51027, %v4866_v41  ;;  %vm5683_vm0 = vcmp.gt.f32.partialorder %v3875_v51, 0.0  ;;  %v6451_v0 = vmul.f32 -0.51027, %v3875_v51  ;;  %8903 = vst [vmem:[%s12490_s25 + $0x8c8] sm:$0xff] %v11025_v13  ;;  %v4870_v43 = vadd.f32 %v15810_v60, %v12365_v33 }
 0x45b   : > { %10830 = vst [vmem:[%s12490_s25 + $0x8e8] sm:$0xff] %v11217_v59  ;;  %v7218_v27 = vsel %vm5682_vm4, %v3873_v35, %v6450_v52  ;;  %v3879_v20 = vadd.f32 %v17162_v10, %v12376_v62  ;;  %v4872_v54 = vadd.f32 %v17163_v17, %v12432_v1  ;;  %vm5685_vm6 = vcmp.gt.f32.partialorder %v4868_v28, 0.0 }
 0x45c   : > { %v7220_v48 = vsel %vm5684_vm5, %v4866_v41, %v6452_v38  ;;  %v7219_v8 = vsel %vm5683_vm0, %v3875_v51, %v6451_v0  ;;  %v6453_v12 = vmul.f32 -0.51027, %v4868_v28  ;;  %vm5686_vm7 = vcmp.gt.f32.partialorder %v3877_v25, 0.0  ;;  %v16058_v41 = vpop.f32.mrb[53].mxu0  ;;  %v16064_v38 = vpop.f32.mrb[53].mxu1 }
 0x45d   : > { %v11026_v58 = vpack.c.bf16 %v7219_v8, %v7218_v27  ;;  %v6454_v46 = vmul.f32 -0.51027, %v3877_v25  ;;  %vm5688_vm8 = vcmp.gt.f32.partialorder %v4870_v43, 0.0  ;;  %v6456_v45 = vmul.f32 -0.51027, %v4870_v43  ;;  %v16066_v0 = vpop.f32.mrb[54].mxu0 }
 0x45e   : > { %vm5687_vm9 = vcmp.gt.f32.partialorder %v3879_v20, 0.0  ;;  %v7221_v55 = vsel %vm5685_vm6, %v4868_v28, %v6453_v12  ;;  %v6455_v30 = vmul.f32 -0.51027, %v3879_v20  ;;  %vm5689_vm10 = vcmp.gt.f32.partialorder %v4872_v54, 0.0  ;;  %v17164_v8 = vld [vmem:[#allocation14_spill] sm:$0xff] }
 0x45f   : > { %8904 = vst [vmem:[%s12490_s25 + $0x8d0] sm:$0xff] %v11026_v58  ;;  %v6457_v60 = vmul.f32 -0.51027, %v4872_v54  ;;  %v11218_v44 = vpack.c.bf16 %v7221_v55, %v7220_v48  ;;  %v7222_v31 = vsel %vm5686_vm7, %v3877_v25, %v6454_v46  ;;  %v7224_v35 = vsel %vm5688_vm8, %v4870_v43, %v6456_v45  ;;  %v16069_v25 = vpop.f32.mrb[54].mxu1  ;;  %v16071_v43 = vpop.f32.mrb[55].mxu0  ;;  %v17167_v55 = vld [vmem:[#allocation17_spill] sm:$0xff] }
 0x460   : > { %v3883_v6 = vadd.f32 %v15834_v9, %v12363_v61  ;;  %v7223_v51 = vsel %vm5687_vm9, %v3879_v20, %v6455_v30  ;;  %v4876_v59 = vadd.f32 %v15842_v3, %v12365_v33  ;;  %v3885_v52 = vadd.f32 %v15844_v57, %v12376_v62  ;;  %v17165_v20 = vld [vmem:[#allocation15_spill] sm:$0xff]  ;;  %v16081_v12 = vpop.f32.mrb[55].mxu1 }
 0x461   : > { %v7225_v13 = vsel %vm5689_vm10, %v4872_v54, %v6457_v60  ;;  %10831 = vst [vmem:[%s12490_s25 + $0x8f0] sm:$0xff] %v11218_v44  ;;  %v11027_v9 = vpack.c.bf16 %v7223_v51, %v7222_v31  ;;  %v4878_v10 = vadd.f32 %v17164_v8, %v12432_v1  ;;  %v3887_v17 = vadd.f32 %v17165_v20, %v12363_v61  ;;  %v17166_v54 = vld [vmem:[#allocation16_spill] sm:$0xff]  ;;  %v17168_v60 = vld [vmem:[#allocation18_spill] sm:$0xff] }
 0x462   : > { %v11219_v27 = vpack.c.bf16 %v7225_v13, %v7224_v35  ;;  %vm5690_vm1 = vcmp.gt.f32.partialorder %v3883_v6, 0.0  ;;  %v6458_v28 = vmul.f32 -0.51027, %v3883_v6  ;;  %vm5692_vm11 = vcmp.gt.f32.partialorder %v4876_v59, 0.0 }
 0x463   : > { %v6460_v48 = vmul.f32 -0.51027, %v4876_v59  ;;  %vm5691_vm12 = vcmp.gt.f32.partialorder %v3885_v52, 0.0  ;;  %v6459_v3 = vmul.f32 -0.51027, %v3885_v52  ;;  %8905 = vst [vmem:[%s12490_s25 + $0x8d8] sm:$0xff] %v11027_v9  ;;  %v4880_v58 = vadd.f32 %v17166_v54, %v12365_v33 }
 0x464   : > { %10832 = vst [vmem:[%s12490_s25 + $0x8f8] sm:$0xff] %v11219_v27  ;;  %v7226_v57 = vsel %vm5690_vm1, %v3883_v6, %v6458_v28  ;;  %v3889_v30 = vadd.f32 %v17167_v55, %v12376_v62  ;;  %v4882_v44 = vadd.f32 %v17168_v60, %v12432_v1  ;;  %vm5693_vm2 = vcmp.gt.f32.partialorder %v4878_v10, 0.0  ;;  %v17169_v60 = vld [vmem:[#allocation2_spill] sm:$0xff] }
 0x465   : > { %v7228_v46 = vsel %vm5692_vm11, %v4876_v59, %v6460_v48  ;;  %v7227_v45 = vsel %vm5691_vm12, %v3885_v52, %v6459_v3  ;;  %v6461_v35 = vmul.f32 -0.51027, %v4878_v10  ;;  %vm5694_vm3 = vcmp.gt.f32.partialorder %v3887_v17, 0.0  ;;  %v16090_v3 = vpop.f32.mrb[56].mxu0  ;;  %v16096_v54 = vpop.f32.mrb[56].mxu1 }
 0x466   : > { %v11028_v31 = vpack.c.bf16 %v7227_v45, %v7226_v57  ;;  %v6462_v6 = vmul.f32 -0.51027, %v3887_v17  ;;  %vm5696_vm13 = vcmp.gt.f32.partialorder %v4880_v58, 0.0  ;;  %v6464_v51 = vmul.f32 -0.51027, %v4880_v58  ;;  %v16101_v45 = vpop.f32.mrb[57].mxu1 }
 0x467   : > { %vm5695_vm14 = vcmp.gt.f32.partialorder %v3889_v30, 0.0  ;;  %v7229_v13 = vsel %vm5693_vm2, %v4878_v10, %v6461_v35  ;;  %v6463_v9 = vmul.f32 -0.51027, %v3889_v30  ;;  %vm5697_vm15 = vcmp.gt.f32.partialorder %v4882_v44, 0.0 }
 0x468   : > { %8906 = vst [vmem:[%s12490_s25 + $0x900] sm:$0xff] %v11028_v31  ;;  %v6465_v59 = vmul.f32 -0.51027, %v4882_v44  ;;  %v11220_v52 = vpack.c.bf16 %v7229_v13, %v7228_v46  ;;  %v7230_v27 = vsel %vm5694_vm3, %v3887_v17, %v6462_v6  ;;  %v7232_v28 = vsel %vm5696_vm13, %v4880_v58, %v6464_v51  ;;  %v16098_v46 = vpop.f32.mrb[57].mxu0  ;;  %v17170_v31 = vld [vmem:[#allocation3_spill] sm:$0xff]  ;;  %v16113_v13 = vpop.f32.mrb[58].mxu1 }
 0x469   : > { %v3893_v48 = vadd.f32 %v15882_v34, %v12363_v61  ;;  %v7231_v57 = vsel %vm5695_vm14, %v3889_v30, %v6463_v9  ;;  %v4886_v20 = vadd.f32 %v15884_v21, %v12365_v33  ;;  %v3895_v10 = vadd.f32 %v15893_v18, %v12376_v62  ;;  %v16103_v55 = vpop.f32.mrb[58].mxu0  ;;  %v17171_v6 = vld [vmem:[#allocation19_spill] sm:$0xff] }
 0x46a   : > { %v7233_v8 = vsel %vm5697_vm15, %v4882_v44, %v6465_v59  ;;  %10833 = vst [vmem:[%s12490_s25 + $0x920] sm:$0xff] %v11220_v52  ;;  %v11029_v17 = vpack.c.bf16 %v7231_v57, %v7230_v27  ;;  %v4888_v44 = vadd.f32 %v17169_v60, %v12432_v1  ;;  %v3897_v35 = vadd.f32 %v17170_v31, %v12363_v61  ;;  %v16115_v9 = vpop.f32.mrb[59].mxu0  ;;  %v17172_v27 = vld [vmem:[#allocation20_spill] sm:$0xff] }
 0x46b   : > { %v11221_v58 = vpack.c.bf16 %v7233_v8, %v7232_v28  ;;  %vm5698_vm4 = vcmp.gt.f32.partialorder %v3893_v48, 0.0  ;;  %v6466_v34 = vmul.f32 -0.51027, %v3893_v48  ;;  %vm5700_vm5 = vcmp.gt.f32.partialorder %v4886_v20, 0.0  ;;  %v16121_v8 = vpop.f32.mrb[59].mxu1 }
 0x46c   : > { %v6468_v30 = vmul.f32 -0.51027, %v4886_v20  ;;  %vm5699_vm0 = vcmp.gt.f32.partialorder %v3895_v10, 0.0  ;;  %v6467_v21 = vmul.f32 -0.51027, %v3895_v10  ;;  %8907 = vst [vmem:[%s12490_s25 + $0x908] sm:$0xff] %v11029_v17  ;;  %v4890_v51 = vadd.f32 %v17171_v6, %v12365_v33 }
 0x46d   : > { %10834 = vst [vmem:[%s12490_s25 + $0x928] sm:$0xff] %v11221_v58  ;;  %v7234_v18 = vsel %vm5698_vm4, %v3893_v48, %v6466_v34  ;;  %v3899_v28 = vadd.f32 %v17172_v27, %v12376_v62  ;;  %v17173_v48 = vld [vmem:[#allocation4_spill] sm:$0xff]  ;;  %vm5701_vm6 = vcmp.gt.f32.partialorder %v4888_v44, 0.0  ;;  %v6469_v58 = vmul.f32 -0.51027, %v4888_v44 }
 0x46e   : > { %v7236_v59 = vsel %vm5700_vm5, %v4886_v20, %v6468_v30  ;;  %v7235_v52 = vsel %vm5699_vm0, %v3895_v10, %v6467_v21  ;;  %v4892_v57 = vadd.f32 %v17173_v48, %v12432_v1  ;;  %vm5702_vm7 = vcmp.gt.f32.partialorder %v3897_v35, 0.0 }
 0x46f   : > { %v11030_v17 = vpack.c.bf16 %v7235_v52, %v7234_v18  ;;  %v6470_v34 = vmul.f32 -0.51027, %v3897_v35  ;;  %vm5704_vm8 = vcmp.gt.f32.partialorder %v4890_v51, 0.0  ;;  %v6472_v60 = vmul.f32 -0.51027, %v4890_v51 }
 0x470   : > { %vm5703_vm9 = vcmp.gt.f32.partialorder %v3899_v28, 0.0  ;;  %v7237_v20 = vsel %vm5701_vm6, %v4888_v44, %v6469_v58  ;;  %v6471_v10 = vmul.f32 -0.51027, %v3899_v28  ;;  %vm5705_vm10 = vcmp.gt.f32.partialorder %v4892_v57, 0.0 }
 0x471   : > { %8908 = vst [vmem:[%s12490_s25 + $0x910] sm:$0xff] %v11030_v17  ;;  %v6473_v30 = vmul.f32 -0.51027, %v4892_v57  ;;  %v11222_v21 = vpack.c.bf16 %v7237_v20, %v7236_v59  ;;  %v7238_v31 = vsel %vm5702_vm7, %v3897_v35, %v6470_v34  ;;  %v7240_v6 = vsel %vm5704_vm8, %v4890_v51, %v6472_v60  ;;  %v16131_v35 = vpop.f32.mrb[60].mxu0  ;;  %v16133_v51 = vpop.f32.mrb[60].mxu1 }
 0x472   : > { %v3903_v27 = vadd.f32 %v15929_v11, %v12363_v61  ;;  %v7239_v18 = vsel %vm5703_vm9, %v3899_v28, %v6471_v10  ;;  %v4896_v48 = vadd.f32 %v15931_v32, %v12365_v33  ;;  %v3905_v17 = vadd.f32 %v15933_v4, %v12376_v62  ;;  %v16143_v60 = vpop.f32.mrb[61].mxu0  ;;  %v16145_v20 = vpop.f32.mrb[61].mxu1 }
 0x473   : > { %v7241_v52 = vsel %vm5705_vm10, %v4892_v57, %v6473_v30  ;;  %10835 = vst [vmem:[%s12490_s25 + $0x930] sm:$0xff] %v11222_v21  ;;  %v11031_v44 = vpack.c.bf16 %v7239_v18, %v7238_v31  ;;  %v4898_v32 = vadd.f32 %v15937_v37, %v12432_v1  ;;  %v3907_v4 = vadd.f32 %v15946_v36, %v12363_v61  ;;  %v16151_v37 = vpop.f32.mrb[62].mxu0 }
 0x474   : > { %v11223_v58 = vpack.c.bf16 %v7241_v52, %v7240_v6  ;;  %vm5706_vm1 = vcmp.gt.f32.partialorder %v3903_v27, 0.0  ;;  %v6474_v59 = vmul.f32 -0.51027, %v3903_v27  ;;  %vm5708_vm11 = vcmp.gt.f32.partialorder %v4896_v48, 0.0  ;;  %v16153_v6 = vpop.f32.mrb[62].mxu1 }
 0x475   : > { %v6476_v11 = vmul.f32 -0.51027, %v4896_v48  ;;  %vm5707_vm12 = vcmp.gt.f32.partialorder %v3905_v17, 0.0  ;;  %v6475_v28 = vmul.f32 -0.51027, %v3905_v17  ;;  %8909 = vst [vmem:[%s12490_s25 + $0x918] sm:$0xff] %v11031_v44  ;;  %v4900_v34 = vadd.f32 %v15948_v53, %v12365_v33 }
 0x476   : > { %10836 = vst [vmem:[%s12490_s25 + $0x938] sm:$0xff] %v11223_v58  ;;  %v7242_v57 = vsel %vm5706_vm1, %v3903_v27, %v6474_v59  ;;  %v3909_v21 = vadd.f32 %v15955_v2, %v12376_v62  ;;  %v4902_v31 = vadd.f32 %v15957_v42, %v12432_v1  ;;  %vm5709_vm2 = vcmp.gt.f32.partialorder %v4898_v32, 0.0  ;;  %v16155_v27 = vpop.f32.mrb[63].mxu0  ;;  %v16157_v18 = vpop.f32.mrb[63].mxu1 }
 0x477   : > { %v7244_v10 = vsel %vm5708_vm11, %v4896_v48, %v6476_v11  ;;  %v7243_v30 = vsel %vm5707_vm12, %v3905_v17, %v6475_v28  ;;  %v6477_v53 = vmul.f32 -0.51027, %v4898_v32  ;;  %vm5710_vm3 = vcmp.gt.f32.partialorder %v3907_v4, 0.0 }
 0x478   : > { %v11032_v36 = vpack.c.bf16 %v7243_v30, %v7242_v57  ;;  %v6478_v52 = vmul.f32 -0.51027, %v3907_v4  ;;  %vm5712_vm13 = vcmp.gt.f32.partialorder %v4900_v34, 0.0  ;;  %v6480_v48 = vmul.f32 -0.51027, %v4900_v34 }
 0x479   : > { %vm5711_vm14 = vcmp.gt.f32.partialorder %v3909_v21, 0.0  ;;  %v7245_v2 = vsel %vm5709_vm2, %v4898_v32, %v6477_v53  ;;  %v6479_v42 = vmul.f32 -0.51027, %v3909_v21  ;;  %vm5713_vm15 = vcmp.gt.f32.partialorder %v4902_v31, 0.0 }
 0x47a   : > { %8910 = vst [vmem:[%s12490_s25 + $0x940] sm:$0xff] %v11032_v36  ;;  %v6481_v17 = vmul.f32 -0.51027, %v4902_v31  ;;  %v11224_v44 = vpack.c.bf16 %v7245_v2, %v7244_v10  ;;  %v7246_v58 = vsel %vm5710_vm3, %v3907_v4, %v6478_v52  ;;  %v7248_v59 = vsel %vm5712_vm13, %v4900_v34, %v6480_v48 }
 0x47b   : > { %v3913_v11 = vadd.f32 %v15975_v26, %v12363_v61  ;;  %v7247_v28 = vsel %vm5711_vm14, %v3909_v21, %v6479_v42  ;;  %v4906_v30 = vadd.f32 %v15977_v47, %v12365_v33  ;;  %v3915_v36 = vadd.f32 %v15983_v56, %v12376_v62 }
 0x47c   : > { %v7249_v57 = vsel %vm5713_vm15, %v4902_v31, %v6481_v17  ;;  %10837 = vst [vmem:[%s12490_s25 + $0x960] sm:$0xff] %v11224_v44  ;;  %v11033_v32 = vpack.c.bf16 %v7247_v28, %v7246_v58  ;;  %v4908_v21 = vadd.f32 %v15985_v16, %v12432_v1  ;;  %v3917_v47 = vadd.f32 %v15987_v14, %v12363_v61  ;;  %v16175_v31 = vpop.f32.mrb[64].mxu0  ;;  %v16181_v17 = vpop.f32.mrb[64].mxu1 }
 0x47d   : > { %v11225_v53 = vpack.c.bf16 %v7249_v57, %v7248_v59  ;;  %vm5714_vm4 = vcmp.gt.f32.partialorder %v3913_v11, 0.0  ;;  %v6482_v10 = vmul.f32 -0.51027, %v3913_v11  ;;  %vm5716_vm5 = vcmp.gt.f32.partialorder %v4906_v30, 0.0  ;;  %v16183_v16 = vpop.f32.mrb[65].mxu0 }
 0x47e   : > { %v6484_v4 = vmul.f32 -0.51027, %v4906_v30  ;;  %vm5715_vm0 = vcmp.gt.f32.partialorder %v3915_v36, 0.0  ;;  %v6483_v34 = vmul.f32 -0.51027, %v3915_v36  ;;  %8911 = vst [vmem:[%s12490_s25 + $0x948] sm:$0xff] %v11033_v32  ;;  %v4910_v56 = vadd.f32 %v15989_v22, %v12365_v33 }
 0x47f   : > { %10838 = vst [vmem:[%s12490_s25 + $0x968] sm:$0xff] %v11225_v53  ;;  %v7250_v26 = vsel %vm5714_vm4, %v3913_v11, %v6482_v10  ;;  %v3919_v2 = vadd.f32 %v15992_v7, %v12376_v62  ;;  %v4912_v42 = vadd.f32 %v15996_v15, %v12432_v1  ;;  %vm5717_vm6 = vcmp.gt.f32.partialorder %v4908_v21, 0.0  ;;  %v16185_v22 = vpop.f32.mrb[65].mxu1  ;;  %v16187_v58 = vpop.f32.mrb[66].mxu0 }
 0x480   : > { %v7252_v52 = vsel %vm5716_vm5, %v4906_v30, %v6484_v4  ;;  %v7251_v48 = vsel %vm5715_vm0, %v3915_v36, %v6483_v34  ;;  %v6485_v14 = vmul.f32 -0.51027, %v4908_v21  ;;  %vm5718_vm7 = vcmp.gt.f32.partialorder %v3917_v47, 0.0  ;;  %v16190_v57 = vpop.f32.mrb[66].mxu1  ;;  %v16194_v10 = vpop.f32.mrb[67].mxu0 }
 0x481   : > { %v11034_v44 = vpack.c.bf16 %v7251_v48, %v7250_v26  ;;  %v6486_v59 = vmul.f32 -0.51027, %v3917_v47  ;;  %vm5720_vm8 = vcmp.gt.f32.partialorder %v4910_v56, 0.0  ;;  %v6488_v11 = vmul.f32 -0.51027, %v4910_v56  ;;  %v16196_v4 = vpop.f32.mrb[67].mxu1 }
 0x482   : > { %vm5719_vm9 = vcmp.gt.f32.partialorder %v3919_v2, 0.0  ;;  %v7253_v7 = vsel %vm5717_vm6, %v4908_v21, %v6485_v14  ;;  %v6487_v15 = vmul.f32 -0.51027, %v3919_v2  ;;  %vm5721_vm10 = vcmp.gt.f32.partialorder %v4912_v42, 0.0 }
 0x483   : > { %8912 = vst [vmem:[%s12490_s25 + $0x950] sm:$0xff] %v11034_v44  ;;  %v6489_v28 = vmul.f32 -0.51027, %v4912_v42  ;;  %v11226_v30 = vpack.c.bf16 %v7253_v7, %v7252_v52  ;;  %v7254_v36 = vsel %vm5718_vm7, %v3917_v47, %v6486_v59  ;;  %v7256_v32 = vsel %vm5720_vm8, %v4910_v56, %v6488_v11 }
 0x484   : > { %v3923_v53 = vadd.f32 %v16015_v39, %v12363_v61  ;;  %v7255_v34 = vsel %vm5719_vm9, %v3919_v2, %v6487_v15  ;;  %v4916_v21 = vadd.f32 %v16017_v29, %v12365_v33  ;;  %v3925_v48 = vadd.f32 %v16019_v5, %v12376_v62 }
 0x485   : > { %v7257_v26 = vsel %vm5721_vm10, %v4912_v42, %v6489_v28  ;;  %10839 = vst [vmem:[%s12490_s25 + $0x970] sm:$0xff] %v11226_v30  ;;  %v11035_v47 = vpack.c.bf16 %v7255_v34, %v7254_v36  ;;  %v4918_v2 = vadd.f32 %v16022_v49, %v12432_v1  ;;  %v3927_v29 = vadd.f32 %v16026_v24, %v12363_v61 }
 0x486   : > { %v11227_v56 = vpack.c.bf16 %v7257_v26, %v7256_v32  ;;  %vm5722_vm1 = vcmp.gt.f32.partialorder %v3923_v53, 0.0  ;;  %v6490_v52 = vmul.f32 -0.51027, %v3923_v53  ;;  %vm5724_vm11 = vcmp.gt.f32.partialorder %v4916_v21, 0.0 }
 0x487   : > { %v6492_v39 = vmul.f32 -0.51027, %v4916_v21  ;;  %vm5723_vm12 = vcmp.gt.f32.partialorder %v3925_v48, 0.0  ;;  %v6491_v44 = vmul.f32 -0.51027, %v3925_v48  ;;  %8913 = vst [vmem:[%s12490_s25 + $0x958] sm:$0xff] %v11035_v47  ;;  %v4920_v5 = vadd.f32 %v16028_v63, %v12365_v33 }
 0x488   : > { %10840 = vst [vmem:[%s12490_s25 + $0x978] sm:$0xff] %v11227_v56  ;;  %v7258_v14 = vsel %vm5722_vm1, %v3923_v53, %v6490_v52  ;;  %v3929_v11 = vadd.f32 %v16034_v40, %v12376_v62  ;;  %v4922_v7 = vadd.f32 %v16036_v23, %v12432_v1  ;;  %vm5725_vm2 = vcmp.gt.f32.partialorder %v4918_v2, 0.0  ;;  %v16216_v32 = vpop.f32.mrb[68].mxu0  ;;  %v16220_v26 = vpop.f32.mrb[68].mxu1 }
 0x489   : > { %v7260_v42 = vsel %vm5724_vm11, %v4916_v21, %v6492_v39  ;;  %v7259_v59 = vsel %vm5723_vm12, %v3925_v48, %v6491_v44  ;;  %v6493_v28 = vmul.f32 -0.51027, %v4918_v2  ;;  %vm5726_vm3 = vcmp.gt.f32.partialorder %v3927_v29, 0.0  ;;  %v16222_v21 = vpop.f32.mrb[69].mxu0  ;;  %v16228_v39 = vpop.f32.mrb[69].mxu1 }
 0x48a   : > { %v11036_v15 = vpack.c.bf16 %v7259_v59, %v7258_v14  ;;  %v6494_v30 = vmul.f32 -0.51027, %v3927_v29  ;;  %vm5728_vm13 = vcmp.gt.f32.partialorder %v4920_v5, 0.0  ;;  %v6496_v49 = vmul.f32 -0.51027, %v4920_v5  ;;  %v16230_v44 = vpop.f32.mrb[70].mxu0 }
 0x48b   : > { %vm5727_vm14 = vcmp.gt.f32.partialorder %v3929_v11, 0.0  ;;  %v7261_v24 = vsel %vm5725_vm2, %v4918_v2, %v6493_v28  ;;  %v6495_v36 = vmul.f32 -0.51027, %v3929_v11  ;;  %vm5729_vm15 = vcmp.gt.f32.partialorder %v4922_v7, 0.0 }
 0x48c   : > { %8914 = vst [vmem:[%s12490_s25 + $0x980] sm:$0xff] %v11036_v15  ;;  %v6497_v63 = vmul.f32 -0.51027, %v4922_v7  ;;  %v11228_v40 = vpack.c.bf16 %v7261_v24, %v7260_v42  ;;  %v7262_v53 = vsel %vm5726_vm3, %v3927_v29, %v6494_v30  ;;  %v7264_v34 = vsel %vm5728_vm13, %v4920_v5, %v6496_v49  ;;  %v16233_v29 = vpop.f32.mrb[70].mxu1  ;;  %v16235_v5 = vpop.f32.mrb[71].mxu0 }
 0x48d   : > { %v3933_v23 = vadd.f32 %v16052_v19, %v12363_v61  ;;  %v7263_v48 = vsel %vm5727_vm14, %v3929_v11, %v6495_v36  ;;  %v4926_v56 = vadd.f32 %v16056_v50, %v12365_v33  ;;  %v3935_v52 = vadd.f32 %v16058_v41, %v12376_v62  ;;  %v16245_v15 = vpop.f32.mrb[71].mxu1 }
 0x48e   : > { %v7265_v47 = vsel %vm5729_vm15, %v4922_v7, %v6497_v63  ;;  %10841 = vst [vmem:[%s12490_s25 + $0x9a0] sm:$0xff] %v11228_v40  ;;  %v11037_v19 = vpack.c.bf16 %v7263_v48, %v7262_v53  ;;  %v4928_v59 = vadd.f32 %v16064_v38, %v12432_v1  ;;  %v3937_v11 = vadd.f32 %v16066_v0, %v12363_v61 }
 0x48f   : > { %v11229_v14 = vpack.c.bf16 %v7265_v47, %v7264_v34  ;;  %vm5730_vm4 = vcmp.gt.f32.partialorder %v3933_v23, 0.0  ;;  %v6498_v2 = vmul.f32 -0.51027, %v3933_v23  ;;  %vm5732_vm5 = vcmp.gt.f32.partialorder %v4926_v56, 0.0 }
 0x490   : > { %v6500_v42 = vmul.f32 -0.51027, %v4926_v56  ;;  %vm5731_vm0 = vcmp.gt.f32.partialorder %v3935_v52, 0.0  ;;  %v6499_v50 = vmul.f32 -0.51027, %v3935_v52  ;;  %8915 = vst [vmem:[%s12490_s25 + $0x988] sm:$0xff] %v11037_v19  ;;  %v4930_v7 = vadd.f32 %v16069_v25, %v12365_v33 }
 0x491   : > { %10842 = vst [vmem:[%s12490_s25 + $0x9a8] sm:$0xff] %v11229_v14  ;;  %v7266_v41 = vsel %vm5730_vm4, %v3933_v23, %v6498_v2  ;;  %v3939_v49 = vadd.f32 %v16071_v43, %v12376_v62  ;;  %v4932_v24 = vadd.f32 %v16081_v12, %v12432_v1  ;;  %vm5733_vm6 = vcmp.gt.f32.partialorder %v4928_v59, 0.0  ;;  %v16254_v48 = vpop.f32.mrb[72].mxu0 }
 0x492   : > { %v7268_v28 = vsel %vm5732_vm5, %v4926_v56, %v6500_v42  ;;  %v7267_v30 = vsel %vm5731_vm0, %v3935_v52, %v6499_v50  ;;  %v6501_v38 = vmul.f32 -0.51027, %v4928_v59  ;;  %vm5734_vm7 = vcmp.gt.f32.partialorder %v3937_v11, 0.0  ;;  %v16262_v2 = vpop.f32.mrb[73].mxu0 }
 0x493   : > { %v11038_v36 = vpack.c.bf16 %v7267_v30, %v7266_v41  ;;  %v6502_v63 = vmul.f32 -0.51027, %v3937_v11  ;;  %vm5736_vm8 = vcmp.gt.f32.partialorder %v4930_v7, 0.0  ;;  %v6504_v0 = vmul.f32 -0.51027, %v4930_v7  ;;  %v16260_v14 = vpop.f32.mrb[72].mxu1 }
 0x494   : > { %vm5735_vm9 = vcmp.gt.f32.partialorder %v3939_v49, 0.0  ;;  %v7269_v25 = vsel %vm5733_vm6, %v4928_v59, %v6501_v38  ;;  %v6503_v40 = vmul.f32 -0.51027, %v3939_v49  ;;  %vm5737_vm10 = vcmp.gt.f32.partialorder %v4932_v24, 0.0  ;;  %v16265_v41 = vpop.f32.mrb[73].mxu1  ;;  %v16267_v59 = vpop.f32.mrb[74].mxu0 }
 0x495   : > { %8916 = vst [vmem:[%s12490_s25 + $0x990] sm:$0xff] %v11038_v36  ;;  %v6505_v53 = vmul.f32 -0.51027, %v4932_v24  ;;  %v11230_v34 = vpack.c.bf16 %v7269_v25, %v7268_v28  ;;  %v7270_v23 = vsel %vm5734_vm7, %v3937_v11, %v6502_v63  ;;  %v7272_v43 = vsel %vm5736_vm8, %v4930_v7, %v6504_v0 }
 0x496   : > { %v3943_v12 = vadd.f32 %v16090_v3, %v12363_v61  ;;  %v7271_v47 = vsel %vm5735_vm9, %v3939_v49, %v6503_v40  ;;  %v4936_v52 = vadd.f32 %v16096_v54, %v12365_v33  ;;  %v3945_v19 = vadd.f32 %v16098_v46, %v12376_v62  ;;  %v16277_v49 = vpop.f32.mrb[74].mxu1 }
 0x497   : > { %v7273_v56 = vsel %vm5737_vm10, %v4932_v24, %v6505_v53  ;;  %10843 = vst [vmem:[%s12490_s25 + $0x9b0] sm:$0xff] %v11230_v34  ;;  %v11039_v42 = vpack.c.bf16 %v7271_v47, %v7270_v23  ;;  %v4938_v7 = vadd.f32 %v16101_v45, %v12432_v1  ;;  %v3947_v28 = vadd.f32 %v16103_v55, %v12363_v61  ;;  %v16279_v24 = vpop.f32.mrb[75].mxu0  ;;  %v16285_v45 = vpop.f32.mrb[75].mxu1 }
 0x498   : > { %v11231_v50 = vpack.c.bf16 %v7273_v56, %v7272_v43  ;;  %vm5738_vm1 = vcmp.gt.f32.partialorder %v3943_v12, 0.0  ;;  %v6506_v3 = vmul.f32 -0.51027, %v3943_v12  ;;  %vm5740_vm11 = vcmp.gt.f32.partialorder %v4936_v52, 0.0 }
 0x499   : > { %v6508_v11 = vmul.f32 -0.51027, %v4936_v52  ;;  %vm5739_vm12 = vcmp.gt.f32.partialorder %v3945_v19, 0.0  ;;  %v6507_v54 = vmul.f32 -0.51027, %v3945_v19  ;;  %8917 = vst [vmem:[%s12490_s25 + $0x998] sm:$0xff] %v11039_v42  ;;  %v4940_v30 = vadd.f32 %v16113_v13, %v12365_v33 }
 0x49a   : > { %10844 = vst [vmem:[%s12490_s25 + $0x9b8] sm:$0xff] %v11231_v50  ;;  %v7274_v46 = vsel %vm5738_vm1, %v3943_v12, %v6506_v3  ;;  %v3949_v63 = vadd.f32 %v16115_v9, %v12376_v62  ;;  %v4942_v0 = vadd.f32 %v16121_v8, %v12432_v1  ;;  %vm5741_vm2 = vcmp.gt.f32.partialorder %v4938_v7, 0.0 }
 0x49b   : > { %v7276_v36 = vsel %vm5740_vm11, %v4936_v52, %v6508_v11  ;;  %v7275_v38 = vsel %vm5739_vm12, %v3945_v19, %v6507_v54  ;;  %v6509_v55 = vmul.f32 -0.51027, %v4938_v7  ;;  %vm5742_vm3 = vcmp.gt.f32.partialorder %v3947_v28, 0.0  ;;  %v16288_v9 = vpop.f32.mrb[76].mxu0 }
 0x49c   : > { %v11040_v25 = vpack.c.bf16 %v7275_v38, %v7274_v46  ;;  %v6510_v13 = vmul.f32 -0.51027, %v3947_v28  ;;  %vm5744_vm13 = vcmp.gt.f32.partialorder %v4940_v30, 0.0  ;;  %v6512_v40 = vmul.f32 -0.51027, %v4940_v30  ;;  %v16292_v56 = vpop.f32.mrb[76].mxu1 }
 0x49d   : > { %vm5743_vm14 = vcmp.gt.f32.partialorder %v3949_v63, 0.0  ;;  %v7277_v53 = vsel %vm5741_vm2, %v4938_v7, %v6509_v55  ;;  %v6511_v34 = vmul.f32 -0.51027, %v3949_v63  ;;  %vm5745_vm15 = vcmp.gt.f32.partialorder %v4942_v0, 0.0  ;;  %v16294_v52 = vpop.f32.mrb[77].mxu0  ;;  %v16300_v11 = vpop.f32.mrb[77].mxu1 }
 0x49e   : > { %8918 = vst [vmem:[%s12490_s25 + $0x9c0] sm:$0xff] %v11040_v25  ;;  %v6513_v23 = vmul.f32 -0.51027, %v4942_v0  ;;  %v11232_v43 = vpack.c.bf16 %v7277_v53, %v7276_v36  ;;  %v7278_v8 = vsel %vm5742_vm3, %v3947_v28, %v6510_v13  ;;  %v7280_v12 = vsel %vm5744_vm13, %v4940_v30, %v6512_v40  ;;  %v16302_v54 = vpop.f32.mrb[78].mxu0  ;;  %v16305_v28 = vpop.f32.mrb[78].mxu1 }
 0x49f   : > { %v3953_v47 = vadd.f32 %v16131_v35, %v12363_v61  ;;  %v7279_v19 = vsel %vm5743_vm14, %v3949_v63, %v6511_v34  ;;  %v4946_v50 = vadd.f32 %v16133_v51, %v12365_v33  ;;  %v3955_v3 = vadd.f32 %v16143_v60, %v12376_v62  ;;  %v16307_v30 = vpop.f32.mrb[79].mxu0  ;;  %v16317_v25 = vpop.f32.mrb[79].mxu1 }
 0x4a0   : > { %v7281_v42 = vsel %vm5745_vm15, %v4942_v0, %v6513_v23  ;;  %10845 = vst [vmem:[%s12490_s25 + $0x9e0] sm:$0xff] %v11232_v43  ;;  %v11041_v35 = vpack.c.bf16 %v7279_v19, %v7278_v8  ;;  %v4948_v38 = vadd.f32 %v16145_v20, %v12432_v1  ;;  %v3957_v63 = vadd.f32 %v16151_v37, %v12363_v61 }
 0x4a1   : > { %v11233_v46 = vpack.c.bf16 %v7281_v42, %v7280_v12  ;;  %vm5746_vm4 = vcmp.gt.f32.partialorder %v3953_v47, 0.0  ;;  %v6514_v7 = vmul.f32 -0.51027, %v3953_v47  ;;  %vm5748_vm5 = vcmp.gt.f32.partialorder %v4946_v50, 0.0 }
 0x4a2   : > { %v6516_v36 = vmul.f32 -0.51027, %v4946_v50  ;;  %vm5747_vm0 = vcmp.gt.f32.partialorder %v3955_v3, 0.0  ;;  %v6515_v51 = vmul.f32 -0.51027, %v3955_v3  ;;  %8919 = vst [vmem:[%s12490_s25 + $0x9c8] sm:$0xff] %v11041_v35  ;;  %v4950_v0 = vadd.f32 %v16153_v6, %v12365_v33 }
 0x4a3   : > { %10846 = vst [vmem:[%s12490_s25 + $0x9e8] sm:$0xff] %v11233_v46  ;;  %v7282_v60 = vsel %vm5746_vm4, %v3953_v47, %v6514_v7  ;;  %v3959_v40 = vadd.f32 %v16155_v27, %v12376_v62  ;;  %v4952_v53 = vadd.f32 %v16157_v18, %v12432_v1  ;;  %vm5749_vm6 = vcmp.gt.f32.partialorder %v4948_v38, 0.0 }
 0x4a4   : > { %v7284_v55 = vsel %vm5748_vm5, %v4946_v50, %v6516_v36  ;;  %v7283_v13 = vsel %vm5747_vm0, %v3955_v3, %v6515_v51  ;;  %v6517_v20 = vmul.f32 -0.51027, %v4948_v38  ;;  %vm5750_vm7 = vcmp.gt.f32.partialorder %v3957_v63, 0.0  ;;  %v16324_v12 = vpop.f32.mrb[80].mxu0  ;;  %v16328_v42 = vpop.f32.mrb[80].mxu1 }
 0x4a5   : > { %v11042_v34 = vpack.c.bf16 %v7283_v13, %v7282_v60  ;;  %v6518_v23 = vmul.f32 -0.51027, %v3957_v63  ;;  %vm5752_vm8 = vcmp.gt.f32.partialorder %v4950_v0, 0.0  ;;  %v6520_v37 = vmul.f32 -0.51027, %v4950_v0  ;;  %v16330_v50 = vpop.f32.mrb[81].mxu0 }
 0x4a6   : > { %vm5751_vm9 = vcmp.gt.f32.partialorder %v3959_v40, 0.0  ;;  %v7285_v6 = vsel %vm5749_vm6, %v4948_v38, %v6517_v20  ;;  %v6519_v43 = vmul.f32 -0.51027, %v3959_v40  ;;  %vm5753_vm10 = vcmp.gt.f32.partialorder %v4952_v53, 0.0  ;;  %v16336_v36 = vpop.f32.mrb[81].mxu1  ;;  %v16338_v51 = vpop.f32.mrb[82].mxu0 }
 0x4a7   : > { %8920 = vst [vmem:[%s12490_s25 + $0x9d0] sm:$0xff] %v11042_v34  ;;  %v6521_v8 = vmul.f32 -0.51027, %v4952_v53  ;;  %v11234_v27 = vpack.c.bf16 %v7285_v6, %v7284_v55  ;;  %v7286_v47 = vsel %vm5750_vm7, %v3957_v63, %v6518_v23  ;;  %v7288_v19 = vsel %vm5752_vm8, %v4950_v0, %v6520_v37  ;;  %v16341_v63 = vpop.f32.mrb[82].mxu1  ;;  %v16343_v0 = vpop.f32.mrb[83].mxu0 }
 0x4a8   : > { %v3963_v18 = vadd.f32 %v16175_v31, %v12363_v61  ;;  %v7287_v3 = vsel %vm5751_vm9, %v3959_v40, %v6519_v43  ;;  %v4956_v46 = vadd.f32 %v16181_v17, %v12365_v33  ;;  %v3965_v7 = vadd.f32 %v16183_v16, %v12376_v62  ;;  %v16353_v34 = vpop.f32.mrb[83].mxu1 }
 0x4a9   : > { %v7289_v35 = vsel %vm5753_vm10, %v4952_v53, %v6521_v8  ;;  %10847 = vst [vmem:[%s12490_s25 + $0x9f0] sm:$0xff] %v11234_v27  ;;  %v11043_v31 = vpack.c.bf16 %v7287_v3, %v7286_v47  ;;  %v4958_v13 = vadd.f32 %v16185_v22, %v12432_v1  ;;  %v3967_v40 = vadd.f32 %v16187_v58, %v12363_v61 }
 0x4aa   : > { %v11235_v60 = vpack.c.bf16 %v7289_v35, %v7288_v19  ;;  %vm5754_vm1 = vcmp.gt.f32.partialorder %v3963_v18, 0.0  ;;  %v6522_v38 = vmul.f32 -0.51027, %v3963_v18  ;;  %vm5756_vm11 = vcmp.gt.f32.partialorder %v4956_v46, 0.0 }
 0x4ab   : > { %v6524_v55 = vmul.f32 -0.51027, %v4956_v46  ;;  %vm5755_vm12 = vcmp.gt.f32.partialorder %v3965_v7, 0.0  ;;  %v6523_v17 = vmul.f32 -0.51027, %v3965_v7  ;;  %8921 = vst [vmem:[%s12490_s25 + $0x9d8] sm:$0xff] %v11043_v31  ;;  %v4960_v53 = vadd.f32 %v16190_v57, %v12365_v33 }
 0x4ac   : > { %10848 = vst [vmem:[%s12490_s25 + $0x9f8] sm:$0xff] %v11235_v60  ;;  %v7290_v16 = vsel %vm5754_vm1, %v3963_v18, %v6522_v38  ;;  %v3969_v37 = vadd.f32 %v16194_v10, %v12376_v62  ;;  %v4962_v6 = vadd.f32 %v16196_v4, %v12432_v1  ;;  %vm5757_vm2 = vcmp.gt.f32.partialorder %v4958_v13, 0.0  ;;  %v16360_v19 = vpop.f32.mrb[84].mxu0  ;;  %v16364_v35 = vpop.f32.mrb[84].mxu1 }
 0x4ad   : > { %v7292_v20 = vsel %vm5756_vm11, %v4956_v46, %v6524_v55  ;;  %v7291_v23 = vsel %vm5755_vm12, %v3965_v7, %v6523_v17  ;;  %v6525_v22 = vmul.f32 -0.51027, %v4958_v13  ;;  %vm5758_vm3 = vcmp.gt.f32.partialorder %v3967_v40, 0.0  ;;  %v16366_v46 = vpop.f32.mrb[85].mxu0  ;;  %v16372_v55 = vpop.f32.mrb[85].mxu1 }
 0x4ae   : > { %v11044_v43 = vpack.c.bf16 %v7291_v23, %v7290_v16  ;;  %v6526_v8 = vmul.f32 -0.51027, %v3967_v40  ;;  %vm5760_vm13 = vcmp.gt.f32.partialorder %v4960_v53, 0.0  ;;  %v6528_v58 = vmul.f32 -0.51027, %v4960_v53  ;;  %v16374_v17 = vpop.f32.mrb[86].mxu0 }
 0x4af   : > { %vm5759_vm14 = vcmp.gt.f32.partialorder %v3969_v37, 0.0  ;;  %v7293_v57 = vsel %vm5757_vm2, %v4958_v13, %v6525_v22  ;;  %v6527_v27 = vmul.f32 -0.51027, %v3969_v37  ;;  %vm5761_vm15 = vcmp.gt.f32.partialorder %v4962_v6, 0.0 }
 0x4b0   : > { %8922 = vst [vmem:[%s12490_s25 + $0xa00] sm:$0xff] %v11044_v43  ;;  %v6529_v47 = vmul.f32 -0.51027, %v4962_v6  ;;  %v11236_v10 = vpack.c.bf16 %v7293_v57, %v7292_v20  ;;  %v7294_v18 = vsel %vm5758_vm3, %v3967_v40, %v6526_v8  ;;  %v7296_v3 = vsel %vm5760_vm13, %v4960_v53, %v6528_v58  ;;  %v16377_v40 = vpop.f32.mrb[86].mxu1  ;;  %v16379_v53 = vpop.f32.mrb[87].mxu0 }
 0x4b1   : > { %v3973_v4 = vadd.f32 %v16216_v32, %v12363_v61  ;;  %v7295_v7 = vsel %vm5759_vm14, %v3969_v37, %v6527_v27  ;;  %v4966_v60 = vadd.f32 %v16220_v26, %v12365_v33  ;;  %v3975_v38 = vadd.f32 %v16222_v21, %v12376_v62  ;;  %v16389_v43 = vpop.f32.mrb[87].mxu1 }
 0x4b2   : > { %v7297_v31 = vsel %vm5761_vm15, %v4962_v6, %v6529_v47  ;;  %10849 = vst [vmem:[%s12490_s25 + $0xa20] sm:$0xff] %v11236_v10  ;;  %v11045_v32 = vpack.c.bf16 %v7295_v7, %v7294_v18  ;;  %v4968_v23 = vadd.f32 %v16228_v39, %v12432_v1  ;;  %v3977_v37 = vadd.f32 %v16230_v44, %v12363_v61 }
 0x4b3   : > { %v11237_v16 = vpack.c.bf16 %v7297_v31, %v7296_v3  ;;  %vm5762_vm4 = vcmp.gt.f32.partialorder %v3973_v4, 0.0  ;;  %v6530_v13 = vmul.f32 -0.51027, %v3973_v4  ;;  %vm5764_vm5 = vcmp.gt.f32.partialorder %v4966_v60, 0.0 }
 0x4b4   : > { %v6532_v20 = vmul.f32 -0.51027, %v4966_v60  ;;  %vm5763_vm0 = vcmp.gt.f32.partialorder %v3975_v38, 0.0  ;;  %v6531_v26 = vmul.f32 -0.51027, %v3975_v38  ;;  %8923 = vst [vmem:[%s12490_s25 + $0xa08] sm:$0xff] %v11045_v32  ;;  %v4970_v6 = vadd.f32 %v16233_v29, %v12365_v33 }
 0x4b5   : > { %10850 = vst [vmem:[%s12490_s25 + $0xa28] sm:$0xff] %v11237_v16  ;;  %v7298_v21 = vsel %vm5762_vm4, %v3973_v4, %v6530_v13  ;;  %v3979_v58 = vadd.f32 %v16235_v5, %v12376_v62  ;;  %v4972_v57 = vadd.f32 %v16245_v15, %v12432_v1  ;;  %vm5765_vm6 = vcmp.gt.f32.partialorder %v4968_v23, 0.0 }
 0x4b6   : > { %v7300_v22 = vsel %vm5764_vm5, %v4966_v60, %v6532_v20  ;;  %v7299_v8 = vsel %vm5763_vm0, %v3975_v38, %v6531_v26  ;;  %v6533_v39 = vmul.f32 -0.51027, %v4968_v23  ;;  %vm5766_vm7 = vcmp.gt.f32.partialorder %v3977_v37, 0.0 }
 0x4b7   : > { %v11046_v27 = vpack.c.bf16 %v7299_v8, %v7298_v21  ;;  %v6534_v47 = vmul.f32 -0.51027, %v3977_v37  ;;  %vm5768_vm8 = vcmp.gt.f32.partialorder %v4970_v6, 0.0  ;;  %v6536_v44 = vmul.f32 -0.51027, %v4970_v6 }
 0x4b8   : > { %vm5767_vm9 = vcmp.gt.f32.partialorder %v3979_v58, 0.0  ;;  %v7301_v29 = vsel %vm5765_vm6, %v4968_v23, %v6533_v39  ;;  %v6535_v10 = vmul.f32 -0.51027, %v3979_v58  ;;  %vm5769_vm10 = vcmp.gt.f32.partialorder %v4972_v57, 0.0  ;;  %v16411_v23 = vpop.f32.mrb[88].mxu0 }
 0x4b9   : > { %8924 = vst [vmem:[%s12490_s25 + $0xa10] sm:$0xff] %v11046_v27  ;;  %v6537_v18 = vmul.f32 -0.51027, %v4972_v57  ;;  %v11238_v3 = vpack.c.bf16 %v7301_v29, %v7300_v22  ;;  %v7302_v4 = vsel %vm5766_vm7, %v3977_v37, %v6534_v47  ;;  %v7304_v5 = vsel %vm5768_vm8, %v4970_v6, %v6536_v44  ;;  %v16413_v37 = vpop.f32.mrb[88].mxu1 }
 0x4ba   : > { %v3983_v15 = vadd.f32 %v16254_v48, %v12363_v61  ;;  %v7303_v7 = vsel %vm5767_vm9, %v3979_v58, %v6535_v10  ;;  %v4976_v60 = vadd.f32 %v16260_v14, %v12365_v33  ;;  %v3985_v38 = vadd.f32 %v16262_v2, %v12376_v62 }
 0x4bb   : > { %v7305_v31 = vsel %vm5769_vm10, %v4972_v57, %v6537_v18  ;;  %10851 = vst [vmem:[%s12490_s25 + $0xa30] sm:$0xff] %v11238_v3  ;;  %v11047_v32 = vpack.c.bf16 %v7303_v7, %v7302_v4  ;;  %v4978_v21 = vadd.f32 %v16265_v41, %v12432_v1  ;;  %v3987_v14 = vadd.f32 %v16267_v59, %v12363_v61  ;;  %v16419_v41 = vpop.f32.mrb[89].mxu0  ;;  %v16421_v57 = vpop.f32.mrb[89].mxu1 }
 0x4bc   : > { %v11239_v16 = vpack.c.bf16 %v7305_v31, %v7304_v5  ;;  %vm5770_vm1 = vcmp.gt.f32.partialorder %v3983_v15, 0.0  ;;  %v6538_v13 = vmul.f32 -0.51027, %v3983_v15  ;;  %vm5772_vm11 = vcmp.gt.f32.partialorder %v4976_v60, 0.0  ;;  %v16423_v27 = vpop.f32.mrb[90].mxu0  ;;  %v16425_v39 = vpop.f32.mrb[90].mxu1 }
 0x4bd   : > { %v6540_v20 = vmul.f32 -0.51027, %v4976_v60  ;;  %vm5771_vm12 = vcmp.gt.f32.partialorder %v3985_v38, 0.0  ;;  %v6539_v26 = vmul.f32 -0.51027, %v3985_v38  ;;  %8925 = vst [vmem:[%s12490_s25 + $0xa18] sm:$0xff] %v11047_v32  ;;  %v4980_v2 = vadd.f32 %v16277_v49, %v12365_v33 }
 0x4be   : > { %10852 = vst [vmem:[%s12490_s25 + $0xa38] sm:$0xff] %v11239_v16  ;;  %v7306_v48 = vsel %vm5770_vm1, %v3983_v15, %v6538_v13  ;;  %v3989_v8 = vadd.f32 %v16279_v24, %v12376_v62  ;;  %v4982_v58 = vadd.f32 %v16285_v45, %v12432_v1  ;;  %vm5773_vm2 = vcmp.gt.f32.partialorder %v4978_v21, 0.0  ;;  %v16428_v10 = vpop.f32.mrb[91].mxu0  ;;  %v16432_v15 = vpop.f32.mrb[91].mxu1 }
 0x4bf   : > { %v7308_v6 = vsel %vm5772_vm11, %v4976_v60, %v6540_v20  ;;  %v7307_v22 = vsel %vm5771_vm12, %v3985_v38, %v6539_v26  ;;  %v6541_v49 = vmul.f32 -0.51027, %v4978_v21  ;;  %vm5774_vm3 = vcmp.gt.f32.partialorder %v3987_v14, 0.0 }
 0x4c0   : > { %v11048_v59 = vpack.c.bf16 %v7307_v22, %v7306_v48  ;;  %v6542_v47 = vmul.f32 -0.51027, %v3987_v14  ;;  %vm5776_vm13 = vcmp.gt.f32.partialorder %v4980_v2, 0.0  ;;  %v6544_v44 = vmul.f32 -0.51027, %v4980_v2 }
 0x4c1   : > { %vm5775_vm14 = vcmp.gt.f32.partialorder %v3989_v8, 0.0  ;;  %v7309_v24 = vsel %vm5773_vm2, %v4978_v21, %v6541_v49  ;;  %v6543_v45 = vmul.f32 -0.51027, %v3989_v8  ;;  %vm5777_vm15 = vcmp.gt.f32.partialorder %v4982_v58, 0.0 }
 0x4c2   : > { %8926 = vst [vmem:[%s12490_s25 + $0xa40] sm:$0xff] %v11048_v59  ;;  %v6545_v29 = vmul.f32 -0.51027, %v4982_v58  ;;  %v11240_v18 = vpack.c.bf16 %v7309_v24, %v7308_v6  ;;  %v7310_v3 = vsel %vm5774_vm3, %v3987_v14, %v6542_v47  ;;  %v7312_v4 = vsel %vm5776_vm13, %v4980_v2, %v6544_v44  ;;  %v16439_v20 = vpop.f32.mrb[92].mxu0  ;;  %v16449_v14 = vpop.f32.mrb[92].mxu1 }
 0x4c3   : > { %v3993_v5 = vadd.f32 %v16288_v9, %v12363_v61  ;;  %v7311_v7 = vsel %vm5775_vm14, %v3989_v8, %v6543_v45  ;;  %v4986_v60 = vadd.f32 %v16292_v56, %v12365_v33  ;;  %v3995_v38 = vadd.f32 %v16294_v52, %v12376_v62  ;;  %v16451_v2 = vpop.f32.mrb[93].mxu0 }
 0x4c4   : > { %v7313_v31 = vsel %vm5777_vm15, %v4982_v58, %v6545_v29  ;;  %10853 = vst [vmem:[%s12490_s25 + $0xa60] sm:$0xff] %v11240_v18  ;;  %v11049_v32 = vpack.c.bf16 %v7311_v7, %v7310_v3  ;;  %v4988_v56 = vadd.f32 %v16300_v11, %v12432_v1  ;;  %v3997_v52 = vadd.f32 %v16302_v54, %v12363_v61  ;;  %v16457_v11 = vpop.f32.mrb[93].mxu1  ;;  %v16459_v59 = vpop.f32.mrb[94].mxu0 }
 0x4c5   : > { %v11241_v16 = vpack.c.bf16 %v7313_v31, %v7312_v4  ;;  %vm5778_vm4 = vcmp.gt.f32.partialorder %v3993_v5, 0.0  ;;  %v6546_v13 = vmul.f32 -0.51027, %v3993_v5  ;;  %vm5780_vm5 = vcmp.gt.f32.partialorder %v4986_v60, 0.0  ;;  %v16461_v49 = vpop.f32.mrb[94].mxu1  ;;  %v16463_v47 = vpop.f32.mrb[95].mxu0 }
 0x4c6   : > { %v6548_v9 = vmul.f32 -0.51027, %v4986_v60  ;;  %vm5779_vm0 = vcmp.gt.f32.partialorder %v3995_v38, 0.0  ;;  %v6547_v26 = vmul.f32 -0.51027, %v3995_v38  ;;  %8927 = vst [vmem:[%s12490_s25 + $0xa48] sm:$0xff] %v11049_v32  ;;  %v4990_v21 = vadd.f32 %v16305_v28, %v12365_v33 }
 0x4c7   : > { %10854 = vst [vmem:[%s12490_s25 + $0xa68] sm:$0xff] %v11241_v16  ;;  %v7314_v48 = vsel %vm5778_vm4, %v3993_v5, %v6546_v13  ;;  %v3999_v8 = vadd.f32 %v16307_v30, %v12376_v62  ;;  %v4992_v58 = vadd.f32 %v16317_v25, %v12432_v1  ;;  %vm5781_vm6 = vcmp.gt.f32.partialorder %v4988_v56, 0.0  ;;  %v16466_v29 = vpop.f32.mrb[95].mxu1 }
 0x4c8   : > { %v7316_v6 = vsel %vm5780_vm5, %v4986_v60, %v6548_v9  ;;  %v7315_v22 = vsel %vm5779_vm0, %v3995_v38, %v6547_v26  ;;  %v6549_v28 = vmul.f32 -0.51027, %v4988_v56  ;;  %vm5782_vm7 = vcmp.gt.f32.partialorder %v3997_v52, 0.0 }
 0x4c9   : > { %v11050_v54 = vpack.c.bf16 %v7315_v22, %v7314_v48  ;;  %v6550_v44 = vmul.f32 -0.51027, %v3997_v52  ;;  %vm5784_vm8 = vcmp.gt.f32.partialorder %v4990_v21, 0.0  ;;  %v6552_v24 = vmul.f32 -0.51027, %v4990_v21 }
 0x4ca   : > { %vm5783_vm9 = vcmp.gt.f32.partialorder %v3999_v8, 0.0  ;;  %v7317_v30 = vsel %vm5781_vm6, %v4988_v56, %v6549_v28  ;;  %v6551_v25 = vmul.f32 -0.51027, %v3999_v8  ;;  %vm5785_vm10 = vcmp.gt.f32.partialorder %v4992_v58, 0.0 }
 0x4cb   : > { %8928 = vst [vmem:[%s12490_s25 + $0xa50] sm:$0xff] %v11050_v54  ;;  %v6553_v45 = vmul.f32 -0.51027, %v4992_v58  ;;  %v11242_v18 = vpack.c.bf16 %v7317_v30, %v7316_v6  ;;  %v7318_v3 = vsel %vm5782_vm7, %v3997_v52, %v6550_v44  ;;  %v7320_v4 = vsel %vm5784_vm8, %v4990_v21, %v6552_v24 }
 0x4cc   : > { %v4003_v5 = vadd.f32 %v16324_v12, %v12363_v61  ;;  %v7319_v7 = vsel %vm5783_vm9, %v3999_v8, %v6551_v25  ;;  %v4996_v60 = vadd.f32 %v16328_v42, %v12365_v33  ;;  %v4005_v38 = vadd.f32 %v16330_v50, %v12376_v62  ;;  %v16475_v9 = vpop.f32.mrb[96].mxu0  ;;  %v16477_v26 = vpop.f32.mrb[96].mxu1 }
 0x4cd   : > { %v7321_v31 = vsel %vm5785_vm10, %v4992_v58, %v6553_v45  ;;  %10855 = vst [vmem:[%s12490_s25 + $0xa70] sm:$0xff] %v11242_v18  ;;  %v11051_v32 = vpack.c.bf16 %v7319_v7, %v7318_v3  ;;  %v4998_v42 = vadd.f32 %v16336_v36, %v12432_v1  ;;  %v4007_v50 = vadd.f32 %v16338_v51, %v12363_v61  ;;  %v16487_v21 = vpop.f32.mrb[97].mxu0  ;;  %v16489_v6 = vpop.f32.mrb[97].mxu1 }
 0x4ce   : > { %v11243_v16 = vpack.c.bf16 %v7321_v31, %v7320_v4  ;;  %vm5786_vm1 = vcmp.gt.f32.partialorder %v4003_v5, 0.0  ;;  %v6554_v13 = vmul.f32 -0.51027, %v4003_v5  ;;  %vm5788_vm11 = vcmp.gt.f32.partialorder %v4996_v60, 0.0  ;;  %v16495_v36 = vpop.f32.mrb[98].mxu0  ;;  %v16497_v28 = vpop.f32.mrb[98].mxu1 }
 0x4cf   : > { %v6556_v12 = vmul.f32 -0.51027, %v4996_v60  ;;  %vm5787_vm12 = vcmp.gt.f32.partialorder %v4005_v38, 0.0  ;;  %v6555_v48 = vmul.f32 -0.51027, %v4005_v38  ;;  %8929 = vst [vmem:[%s12490_s25 + $0xa58] sm:$0xff] %v11051_v32  ;;  %v5000_v52 = vadd.f32 %v16341_v63, %v12365_v33 }
 0x4d0   : > { %10856 = vst [vmem:[%s12490_s25 + $0xa78] sm:$0xff] %v11243_v16  ;;  %v7322_v56 = vsel %vm5786_vm1, %v4003_v5, %v6554_v13  ;;  %v4009_v58 = vadd.f32 %v16343_v0, %v12376_v62  ;;  %v5002_v54 = vadd.f32 %v16353_v34, %v12432_v1  ;;  %vm5789_vm2 = vcmp.gt.f32.partialorder %v4998_v42, 0.0  ;;  %v16499_v44 = vpop.f32.mrb[99].mxu0  ;;  %v16501_v24 = vpop.f32.mrb[99].mxu1 }
 0x4d1   : > { %v7324_v22 = vsel %vm5788_vm11, %v4996_v60, %v6556_v12  ;;  %v7323_v8 = vsel %vm5787_vm12, %v4005_v38, %v6555_v48  ;;  %v6557_v63 = vmul.f32 -0.51027, %v4998_v42  ;;  %vm5790_vm3 = vcmp.gt.f32.partialorder %v4007_v50, 0.0 }
 0x4d2   : > { %v11052_v51 = vpack.c.bf16 %v7323_v8, %v7322_v56  ;;  %v6558_v30 = vmul.f32 -0.51027, %v4007_v50  ;;  %vm5792_vm13 = vcmp.gt.f32.partialorder %v5000_v52, 0.0  ;;  %v6560_v25 = vmul.f32 -0.51027, %v5000_v52 }
 0x4d3   : > { %vm5791_vm14 = vcmp.gt.f32.partialorder %v4009_v58, 0.0  ;;  %v7325_v0 = vsel %vm5789_vm2, %v4998_v42, %v6557_v63  ;;  %v6559_v34 = vmul.f32 -0.51027, %v4009_v58  ;;  %vm5793_vm15 = vcmp.gt.f32.partialorder %v5002_v54, 0.0 }
 0x4d4   : > { %8930 = vst [vmem:[%s12490_s25 + $0xa80] sm:$0xff] %v11052_v51  ;;  %v6561_v45 = vmul.f32 -0.51027, %v5002_v54  ;;  %v11244_v18 = vpack.c.bf16 %v7325_v0, %v7324_v22  ;;  %v7326_v3 = vsel %vm5790_vm3, %v4007_v50, %v6558_v30  ;;  %v7328_v4 = vsel %vm5792_vm13, %v5000_v52, %v6560_v25  ;;  %v16510_v32 = vpop.f32.mrb[100].mxu0  ;;  %v16512_v16 = vpop.f32.mrb[100].mxu1 }
 0x4d5   : > { %v4013_v5 = vadd.f32 %v16360_v19, %v12363_v61  ;;  %v7327_v7 = vsel %vm5791_vm14, %v4009_v58, %v6559_v34  ;;  %v5006_v60 = vadd.f32 %v16364_v35, %v12365_v33  ;;  %v4015_v38 = vadd.f32 %v16366_v46, %v12376_v62  ;;  %v16515_v19 = vpop.f32.mrb[101].mxu0  ;;  %v16517_v56 = vpop.f32.mrb[101].mxu1 }
 0x4d6   : > { %v7329_v31 = vsel %vm5793_vm15, %v5002_v54, %v6561_v45  ;;  %10857 = vst [vmem:[%s12490_s25 + $0xaa0] sm:$0xff] %v11244_v18  ;;  %v11053_v13 = vpack.c.bf16 %v7327_v7, %v7326_v3  ;;  %v5008_v50 = vadd.f32 %v16372_v55, %v12432_v1  ;;  %v4017_v52 = vadd.f32 %v16374_v17, %v12363_v61  ;;  %v16527_v8 = vpop.f32.mrb[102].mxu0  ;;  %v16529_v58 = vpop.f32.mrb[102].mxu1 }
 0x4d7   : > { %v11245_v12 = vpack.c.bf16 %v7329_v31, %v7328_v4  ;;  %vm5794_vm4 = vcmp.gt.f32.partialorder %v4013_v5, 0.0  ;;  %v6562_v48 = vmul.f32 -0.51027, %v4013_v5  ;;  %vm5796_vm5 = vcmp.gt.f32.partialorder %v5006_v60, 0.0  ;;  %v16535_v55 = vpop.f32.mrb[103].mxu0  ;;  %v16537_v25 = vpop.f32.mrb[103].mxu1 }
 0x4d8   : > { %v6564_v42 = vmul.f32 -0.51027, %v5006_v60  ;;  %vm5795_vm0 = vcmp.gt.f32.partialorder %v4015_v38, 0.0  ;;  %v6563_v35 = vmul.f32 -0.51027, %v4015_v38  ;;  %8931 = vst [vmem:[%s12490_s25 + $0xa88] sm:$0xff] %v11053_v13  ;;  %v5010_v22 = vadd.f32 %v16377_v40, %v12365_v33 }
 0x4d9   : > { %10858 = vst [vmem:[%s12490_s25 + $0xaa8] sm:$0xff] %v11245_v12  ;;  %v7330_v46 = vsel %vm5794_vm4, %v4013_v5, %v6562_v48  ;;  %v4019_v63 = vadd.f32 %v16379_v53, %v12376_v62  ;;  %v5012_v30 = vadd.f32 %v16389_v43, %v12432_v1  ;;  %vm5797_vm6 = vcmp.gt.f32.partialorder %v5008_v50, 0.0 }
 0x4da   : > { %v7332_v54 = vsel %vm5796_vm5, %v5006_v60, %v6564_v42  ;;  %v7331_v51 = vsel %vm5795_vm0, %v4015_v38, %v6563_v35  ;;  %v6565_v40 = vmul.f32 -0.51027, %v5008_v50  ;;  %vm5798_vm7 = vcmp.gt.f32.partialorder %v4017_v52, 0.0 }
 0x4db   : > { %v11054_v17 = vpack.c.bf16 %v7331_v51, %v7330_v46  ;;  %v6566_v0 = vmul.f32 -0.51027, %v4017_v52  ;;  %vm5800_vm8 = vcmp.gt.f32.partialorder %v5010_v22, 0.0  ;;  %v6568_v34 = vmul.f32 -0.51027, %v5010_v22 }
 0x4dc   : > { %vm5799_vm9 = vcmp.gt.f32.partialorder %v4019_v63, 0.0  ;;  %v7333_v45 = vsel %vm5797_vm6, %v5008_v50, %v6565_v40  ;;  %v6567_v18 = vmul.f32 -0.51027, %v4019_v63  ;;  %vm5801_vm10 = vcmp.gt.f32.partialorder %v5012_v30, 0.0 }
 0x4dd   : > { %8932 = vst [vmem:[%s12490_s25 + $0xa90] sm:$0xff] %v11054_v17  ;;  %v6569_v53 = vmul.f32 -0.51027, %v5012_v30  ;;  %v11246_v3 = vpack.c.bf16 %v7333_v45, %v7332_v54  ;;  %v7334_v43 = vsel %vm5798_vm7, %v4017_v52, %v6566_v0  ;;  %v7336_v4 = vsel %vm5800_vm8, %v5010_v22, %v6568_v34 }
 0x4de   : > { %v4023_v5 = vadd.f32 %v16411_v23, %v12363_v61  ;;  %v7335_v7 = vsel %vm5799_vm9, %v4019_v63, %v6567_v18  ;;  %v5016_v60 = vadd.f32 %v16413_v37, %v12365_v33  ;;  %v4025_v38 = vadd.f32 %v16419_v41, %v12376_v62 }
 0x4df   : > { %v7337_v31 = vsel %vm5801_vm10, %v5012_v30, %v6569_v53  ;;  %10859 = vst [vmem:[%s12490_s25 + $0xab0] sm:$0xff] %v11246_v3  ;;  %v11055_v13 = vpack.c.bf16 %v7335_v7, %v7334_v43  ;;  %v5018_v46 = vadd.f32 %v16421_v57, %v12432_v1  ;;  %v4027_v37 = vadd.f32 %v16423_v27, %v12363_v61 }
 0x4e0   : > { %v11247_v12 = vpack.c.bf16 %v7337_v31, %v7336_v4  ;;  %vm5802_vm1 = vcmp.gt.f32.partialorder %v4023_v5, 0.0  ;;  %v6570_v48 = vmul.f32 -0.51027, %v4023_v5  ;;  %vm5804_vm11 = vcmp.gt.f32.partialorder %v5016_v60, 0.0 }
 0x4e1   : > { %v6572_v42 = vmul.f32 -0.51027, %v5016_v60  ;;  %vm5803_vm12 = vcmp.gt.f32.partialorder %v4025_v38, 0.0  ;;  %v6571_v35 = vmul.f32 -0.51027, %v4025_v38  ;;  %8933 = vst [vmem:[%s12490_s25 + $0xa98] sm:$0xff] %v11055_v13  ;;  %v5020_v41 = vadd.f32 %v16425_v39, %v12365_v33 }
 0x4e2   : > { %10860 = vst [vmem:[%s12490_s25 + $0xab8] sm:$0xff] %v11247_v12  ;;  %v7338_v23 = vsel %vm5802_vm1, %v4023_v5, %v6570_v48  ;;  %v4029_v22 = vadd.f32 %v16428_v10, %v12376_v62  ;;  %v5022_v54 = vadd.f32 %v16432_v15, %v12432_v1  ;;  %vm5805_vm2 = vcmp.gt.f32.partialorder %v5018_v46, 0.0  ;;  %v16559_v57 = vpop.f32.mrb[104].mxu0 }
 0x4e3   : > { %v7340_v50 = vsel %vm5804_vm11, %v5016_v60, %v6572_v42  ;;  %v7339_v52 = vsel %vm5803_vm12, %v4025_v38, %v6571_v35  ;;  %v6573_v63 = vmul.f32 -0.51027, %v5018_v46  ;;  %vm5806_vm3 = vcmp.gt.f32.partialorder %v4027_v37, 0.0  ;;  %v16562_v10 = vpop.f32.mrb[104].mxu1  ;;  %v16566_v18 = vpop.f32.mrb[105].mxu0 }
 0x4e4   : > { %v11056_v51 = vpack.c.bf16 %v7339_v52, %v7338_v23  ;;  %v6574_v30 = vmul.f32 -0.51027, %v4027_v37  ;;  %vm5808_vm13 = vcmp.gt.f32.partialorder %v5020_v41, 0.0  ;;  %v6576_v27 = vmul.f32 -0.51027, %v5020_v41  ;;  %v16568_v53 = vpop.f32.mrb[105].mxu1 }
 0x4e5   : > { %vm5807_vm14 = vcmp.gt.f32.partialorder %v4029_v22, 0.0  ;;  %v7341_v39 = vsel %vm5805_vm2, %v5018_v46, %v6573_v63  ;;  %v6575_v17 = vmul.f32 -0.51027, %v4029_v22  ;;  %vm5809_vm15 = vcmp.gt.f32.partialorder %v5022_v54, 0.0  ;;  %v16574_v7 = vpop.f32.mrb[106].mxu0  ;;  %v16576_v31 = vpop.f32.mrb[106].mxu1 }
 0x4e6   : > { %8934 = vst [vmem:[%s12490_s25 + $0xac0] sm:$0xff] %v11056_v51  ;;  %v6577_v40 = vmul.f32 -0.51027, %v5022_v54  ;;  %v11248_v0 = vpack.c.bf16 %v7341_v39, %v7340_v50  ;;  %v7342_v15 = vsel %vm5806_vm3, %v4027_v37, %v6574_v30  ;;  %v7344_v34 = vsel %vm5808_vm13, %v5020_v41, %v6576_v27  ;;  %v16579_v13 = vpop.f32.mrb[107].mxu0  ;;  %v16581_v12 = vpop.f32.mrb[107].mxu1 }
 0x4e7   : > { %v4033_v45 = vadd.f32 %v16439_v20, %v12363_v61  ;;  %v7343_v3 = vsel %vm5807_vm14, %v4029_v22, %v6575_v17  ;;  %v5026_v4 = vadd.f32 %v16449_v14, %v12365_v33  ;;  %v4035_v5 = vadd.f32 %v16451_v2, %v12376_v62 }
 0x4e8   : > { %v7345_v43 = vsel %vm5809_vm15, %v5022_v54, %v6577_v40  ;;  %10861 = vst [vmem:[%s12490_s25 + $0xae0] sm:$0xff] %v11248_v0  ;;  %v11057_v20 = vpack.c.bf16 %v7343_v3, %v7342_v15  ;;  %v5028_v42 = vadd.f32 %v16457_v11, %v12432_v1  ;;  %v4037_v35 = vadd.f32 %v16459_v59, %v12363_v61 }
 0x4e9   : > { %v11249_v60 = vpack.c.bf16 %v7345_v43, %v7344_v34  ;;  %vm5810_vm4 = vcmp.gt.f32.partialorder %v4033_v45, 0.0  ;;  %v6578_v38 = vmul.f32 -0.51027, %v4033_v45  ;;  %vm5812_vm5 = vcmp.gt.f32.partialorder %v5026_v4, 0.0 }
 0x4ea   : > { %v6580_v48 = vmul.f32 -0.51027, %v5026_v4  ;;  %vm5811_vm0 = vcmp.gt.f32.partialorder %v4035_v5, 0.0  ;;  %v6579_v14 = vmul.f32 -0.51027, %v4035_v5  ;;  %8935 = vst [vmem:[%s12490_s25 + $0xac8] sm:$0xff] %v11057_v20  ;;  %v5030_v23 = vadd.f32 %v16461_v49, %v12365_v33 }
 0x4eb   : > { %10862 = vst [vmem:[%s12490_s25 + $0xae8] sm:$0xff] %v11249_v60  ;;  %v7346_v2 = vsel %vm5810_vm4, %v4033_v45, %v6578_v38  ;;  %v4039_v41 = vadd.f32 %v16463_v47, %v12376_v62  ;;  %v5032_v50 = vadd.f32 %v16466_v29, %v12432_v1  ;;  %v16595_v52 = vpop.f32.mrb[108].mxu0  ;;  %vm5813_vm6 = vcmp.gt.f32.partialorder %v5028_v42, 0.0 }
 0x4ec   : > { %v7348_v46 = vsel %vm5812_vm5, %v5026_v4, %v6580_v48  ;;  %v7347_v37 = vsel %vm5811_vm0, %v4035_v5, %v6579_v14  ;;  %v6581_v11 = vmul.f32 -0.51027, %v5028_v42  ;;  %vm5814_vm7 = vcmp.gt.f32.partialorder %v4037_v35, 0.0  ;;  %v16597_v54 = vpop.f32.mrb[108].mxu1  ;;  %v16599_v59 = vpop.f32.mrb[109].mxu0 }
 0x4ed   : > { %v11058_v22 = vpack.c.bf16 %v7347_v37, %v7346_v2  ;;  %v6582_v49 = vmul.f32 -0.51027, %v4037_v35  ;;  %vm5816_vm8 = vcmp.gt.f32.partialorder %v5030_v23, 0.0  ;;  %v6584_v51 = vmul.f32 -0.51027, %v5030_v23  ;;  %v16602_v30 = vpop.f32.mrb[109].mxu1 }
 0x4ee   : > { %vm5815_vm9 = vcmp.gt.f32.partialorder %v4039_v41, 0.0  ;;  %v7349_v63 = vsel %vm5813_vm6, %v5028_v42, %v6581_v11  ;;  %v6583_v47 = vmul.f32 -0.51027, %v4039_v41  ;;  %vm5817_vm10 = vcmp.gt.f32.partialorder %v5032_v50, 0.0  ;;  %v16606_v0 = vpop.f32.mrb[110].mxu0  ;;  %v16608_v15 = vpop.f32.mrb[110].mxu1 }
 0x4ef   : > { %8936 = vst [vmem:[%s12490_s25 + $0xad0] sm:$0xff] %v11058_v22  ;;  %v6585_v29 = vmul.f32 -0.51027, %v5032_v50  ;;  %v11250_v27 = vpack.c.bf16 %v7349_v63, %v7348_v46  ;;  %v7350_v39 = vsel %vm5814_vm7, %v4037_v35, %v6582_v49  ;;  %v7352_v17 = vsel %vm5816_vm8, %v5030_v23, %v6584_v51  ;;  %v16614_v4 = vpop.f32.mrb[111].mxu0  ;;  %v16616_v5 = vpop.f32.mrb[111].mxu1 }
 0x4f0   : > { %v4043_v40 = vadd.f32 %v16475_v9, %v12363_v61  ;;  %v7351_v34 = vsel %vm5815_vm9, %v4039_v41, %v6583_v47  ;;  %v5036_v3 = vadd.f32 %v16477_v26, %v12365_v33  ;;  %v4045_v43 = vadd.f32 %v16487_v21, %v12376_v62 }
 0x4f1   : > { %v7353_v45 = vsel %vm5817_vm10, %v5032_v50, %v6585_v29  ;;  %10863 = vst [vmem:[%s12490_s25 + $0xaf0] sm:$0xff] %v11250_v27  ;;  %v11059_v9 = vpack.c.bf16 %v7351_v34, %v7350_v39  ;;  %v5038_v26 = vadd.f32 %v16489_v6, %v12432_v1  ;;  %v4047_v21 = vadd.f32 %v16495_v36, %v12363_v61 }
 0x4f2   : > { %v11251_v20 = vpack.c.bf16 %v7353_v45, %v7352_v17  ;;  %vm5818_vm1 = vcmp.gt.f32.partialorder %v4043_v40, 0.0  ;;  %v6586_v60 = vmul.f32 -0.51027, %v4043_v40  ;;  %vm5820_vm11 = vcmp.gt.f32.partialorder %v5036_v3, 0.0 }
 0x4f3   : > { %v6588_v38 = vmul.f32 -0.51027, %v5036_v3  ;;  %vm5819_vm12 = vcmp.gt.f32.partialorder %v4045_v43, 0.0  ;;  %v6587_v48 = vmul.f32 -0.51027, %v4045_v43  ;;  %8937 = vst [vmem:[%s12490_s25 + $0xad8] sm:$0xff] %v11059_v9  ;;  %v5040_v2 = vadd.f32 %v16497_v28, %v12365_v33 }
 0x4f4   : > { %10864 = vst [vmem:[%s12490_s25 + $0xaf8] sm:$0xff] %v11251_v20  ;;  %v7354_v14 = vsel %vm5818_vm1, %v4043_v40, %v6586_v60  ;;  %v4049_v23 = vadd.f32 %v16499_v44, %v12376_v62  ;;  %v5042_v46 = vadd.f32 %v16501_v24, %v12432_v1  ;;  %v16631_v37 = vpop.f32.mrb[112].mxu0  ;;  %v16633_v41 = vpop.f32.mrb[112].mxu1  ;;  %vm5821_vm2 = vcmp.gt.f32.partialorder %v5038_v26, 0.0 }
 0x4f5   : > { %v7356_v42 = vsel %vm5820_vm11, %v5036_v3, %v6588_v38  ;;  %v7355_v35 = vsel %vm5819_vm12, %v4045_v43, %v6587_v48  ;;  %v6589_v50 = vmul.f32 -0.51027, %v5038_v26  ;;  %vm5822_vm3 = vcmp.gt.f32.partialorder %v4047_v21, 0.0  ;;  %v16635_v36 = vpop.f32.mrb[113].mxu0  ;;  %v16637_v28 = vpop.f32.mrb[113].mxu1 }
 0x4f6   : > { %v11060_v6 = vpack.c.bf16 %v7355_v35, %v7354_v14  ;;  %v6590_v22 = vmul.f32 -0.51027, %v4047_v21  ;;  %vm5824_vm13 = vcmp.gt.f32.partialorder %v5040_v2, 0.0  ;;  %v6592_v11 = vmul.f32 -0.51027, %v5040_v2  ;;  %v16640_v51 = vpop.f32.mrb[114].mxu0 }
 0x4f7   : > { %vm5823_vm14 = vcmp.gt.f32.partialorder %v4049_v23, 0.0  ;;  %v7357_v44 = vsel %vm5821_vm2, %v5038_v26, %v6589_v50  ;;  %v6591_v24 = vmul.f32 -0.51027, %v4049_v23  ;;  %vm5825_vm15 = vcmp.gt.f32.partialorder %v5042_v46, 0.0  ;;  %v16644_v39 = vpop.f32.mrb[114].mxu1  ;;  %v16646_v17 = vpop.f32.mrb[115].mxu0 }
 0x4f8   : > { %8938 = vst [vmem:[%s12490_s25 + $0xb00] sm:$0xff] %v11060_v6  ;;  %v6593_v49 = vmul.f32 -0.51027, %v5042_v46  ;;  %v11252_v63 = vpack.c.bf16 %v7357_v44, %v7356_v42  ;;  %v7358_v47 = vsel %vm5822_vm3, %v4047_v21, %v6590_v22  ;;  %v7360_v29 = vsel %vm5824_vm13, %v5040_v2, %v6592_v11  ;;  %v16652_v43 = vpop.f32.mrb[115].mxu1 }
 0x4f9   : > { %v4053_v27 = vadd.f32 %v16510_v32, %v12363_v61  ;;  %v7359_v40 = vsel %vm5823_vm14, %v4049_v23, %v6591_v24  ;;  %v5046_v45 = vadd.f32 %v16512_v16, %v12365_v33  ;;  %v4055_v3 = vadd.f32 %v16515_v19, %v12376_v62 }
 0x4fa   : > { %v7361_v34 = vsel %vm5825_vm15, %v5042_v46, %v6593_v49  ;;  %10865 = vst [vmem:[%s12490_s25 + $0xb20] sm:$0xff] %v11252_v63  ;;  %v11061_v9 = vpack.c.bf16 %v7359_v40, %v7358_v47  ;;  %v5048_v16 = vadd.f32 %v16517_v56, %v12432_v1  ;;  %v4057_v19 = vadd.f32 %v16527_v8, %v12363_v61 }
 0x4fb   : > { %v11253_v20 = vpack.c.bf16 %v7361_v34, %v7360_v29  ;;  %vm5826_vm4 = vcmp.gt.f32.partialorder %v4053_v27, 0.0  ;;  %v6594_v32 = vmul.f32 -0.51027, %v4053_v27  ;;  %vm5828_vm5 = vcmp.gt.f32.partialorder %v5046_v45, 0.0 }
 0x4fc   : > { %v6596_v60 = vmul.f32 -0.51027, %v5046_v45  ;;  %vm5827_vm0 = vcmp.gt.f32.partialorder %v4055_v3, 0.0  ;;  %v6595_v38 = vmul.f32 -0.51027, %v4055_v3  ;;  %8939 = vst [vmem:[%s12490_s25 + $0xb08] sm:$0xff] %v11061_v9  ;;  %v5050_v14 = vadd.f32 %v16529_v58, %v12365_v33 }
 0x4fd   : > { %10866 = vst [vmem:[%s12490_s25 + $0xb28] sm:$0xff] %v11253_v20  ;;  %v7362_v48 = vsel %vm5826_vm4, %v4053_v27, %v6594_v32  ;;  %v16663_v26 = vpop.f32.mrb[116].mxu0  ;;  %v16665_v21 = vpop.f32.mrb[116].mxu1  ;;  %v4059_v35 = vadd.f32 %v16535_v55, %v12376_v62  ;;  %v5052_v23 = vadd.f32 %v16537_v25, %v12432_v1  ;;  %vm5829_vm6 = vcmp.gt.f32.partialorder %v5048_v16, 0.0 }
 0x4fe   : > { %v7364_v2 = vsel %vm5828_vm5, %v5046_v45, %v6596_v60  ;;  %v7363_v42 = vsel %vm5827_vm0, %v4055_v3, %v6595_v38  ;;  %v16671_v56 = vpop.f32.mrb[117].mxu0  ;;  %v16673_v46 = vpop.f32.mrb[117].mxu1  ;;  %v6597_v58 = vmul.f32 -0.51027, %v5048_v16  ;;  %vm5830_vm7 = vcmp.gt.f32.partialorder %v4057_v19, 0.0 }
 0x4ff   : > { %v11062_v8 = vpack.c.bf16 %v7363_v42, %v7362_v48  ;;  %v16675_v6 = vpop.f32.mrb[118].mxu0  ;;  %v16677_v50 = vpop.f32.mrb[118].mxu1  ;;  %v6598_v22 = vmul.f32 -0.51027, %v4057_v19  ;;  %vm5832_vm8 = vcmp.gt.f32.partialorder %v5050_v14, 0.0  ;;  %vm5831_vm9 = vcmp.gt.f32.partialorder %v4059_v35, 0.0 }
 0x500   : > { %v6600_v11 = vmul.f32 -0.51027, %v5050_v14  ;;  %v7365_v55 = vsel %vm5829_vm6, %v5048_v16, %v6597_v58  ;;  %v6599_v25 = vmul.f32 -0.51027, %v4059_v35  ;;  %vm5833_vm10 = vcmp.gt.f32.partialorder %v5052_v23, 0.0  ;;  %v16680_v24 = vpop.f32.mrb[119].mxu0 }
 0x501   : > { %8940 = vst [vmem:[%s12490_s25 + $0xb10] sm:$0xff] %v11062_v8  ;;  %v6601_v44 = vmul.f32 -0.51027, %v5052_v23  ;;  %v11254_v49 = vpack.c.bf16 %v7365_v55, %v7364_v2  ;;  %v7366_v63 = vsel %vm5830_vm7, %v4057_v19, %v6598_v22  ;;  %v4063_v29 = vadd.f32 %v16559_v57, %v12363_v61  ;;  %v16684_v27 = vpop.f32.mrb[119].mxu1 }
 0x502   : > { %v7368_v47 = vsel %vm5832_vm8, %v5050_v14, %v6600_v11  ;;  %v7367_v40 = vsel %vm5831_vm9, %v4059_v35, %v6599_v25  ;;  %v5056_v45 = vadd.f32 %v16562_v10, %v12365_v33  ;;  %v4065_v3 = vadd.f32 %v16566_v18, %v12376_v62 }
 0x503   : > { %v7369_v34 = vsel %vm5833_vm10, %v5052_v23, %v6601_v44  ;;  %10867 = vst [vmem:[%s12490_s25 + $0xb30] sm:$0xff] %v11254_v49  ;;  %v11063_v9 = vpack.c.bf16 %v7367_v40, %v7366_v63  ;;  %vm5834_vm1 = vcmp.gt.f32.partialorder %v4063_v29, 0.0  ;;  %v6602_v32 = vmul.f32 -0.51027, %v4063_v29 }
 0x504   : > { %v11255_v20 = vpack.c.bf16 %v7369_v34, %v7368_v47  ;;  %vm5836_vm11 = vcmp.gt.f32.partialorder %v5056_v45, 0.0  ;;  %v6604_v60 = vmul.f32 -0.51027, %v5056_v45  ;;  %vm5835_vm12 = vcmp.gt.f32.partialorder %v4065_v3, 0.0 }
 0x505   : > { %v6603_v57 = vmul.f32 -0.51027, %v4065_v3  ;;  %8941 = vst [vmem:[%s12490_s25 + $0xb18] sm:$0xff] %v11063_v9  ;;  %v7370_v38 = vsel %vm5834_vm1, %v4063_v29, %v6602_v32  ;;  %v5058_v48 = vadd.f32 %v16568_v53, %v12432_v1  ;;  %v4067_v10 = vadd.f32 %v16574_v7, %v12363_v61 }
 0x506   : > { %10868 = vst [vmem:[%s12490_s25 + $0xb38] sm:$0xff] %v11255_v20  ;;  %v5060_v18 = vadd.f32 %v16576_v31, %v12365_v33  ;;  %v7372_v16 = vsel %vm5836_vm11, %v5056_v45, %v6604_v60  ;;  %v4069_v14 = vadd.f32 %v16579_v13, %v12376_v62  ;;  %v5062_v2 = vadd.f32 %v16581_v12, %v12432_v1 }
 0x507   : > { %v7371_v19 = vsel %vm5835_vm12, %v4065_v3, %v6603_v57  ;;  %vm5837_vm2 = vcmp.gt.f32.partialorder %v5058_v48, 0.0  ;;  %v6605_v35 = vmul.f32 -0.51027, %v5058_v48  ;;  %vm5838_vm3 = vcmp.gt.f32.partialorder %v4067_v10, 0.0 }
 0x508   : > { %v11064_v42 = vpack.c.bf16 %v7371_v19, %v7370_v38  ;;  %v6606_v23 = vmul.f32 -0.51027, %v4067_v10  ;;  %vm5840_vm13 = vcmp.gt.f32.partialorder %v5060_v18, 0.0  ;;  %v6608_v53 = vmul.f32 -0.51027, %v5060_v18  ;;  %v16706_v11 = vpop.f32.mrb[120].mxu0 }
 0x509   : > { %vm5839_vm14 = vcmp.gt.f32.partialorder %v4069_v14, 0.0  ;;  %v7373_v7 = vsel %vm5837_vm2, %v5058_v48, %v6605_v35  ;;  %v6607_v31 = vmul.f32 -0.51027, %v4069_v14  ;;  %vm5841_vm15 = vcmp.gt.f32.partialorder %v5062_v2, 0.0  ;;  %v16712_v63 = vpop.f32.mrb[120].mxu1  ;;  %v16714_v47 = vpop.f32.mrb[121].mxu0 }
 0x50a   : > { %8942 = vst [vmem:[%s12490_s25 + $0xb40] sm:$0xff] %v11064_v42  ;;  %v6609_v8 = vmul.f32 -0.51027, %v5062_v2  ;;  %v11256_v58 = vpack.c.bf16 %v7373_v7, %v7372_v16  ;;  %v7374_v22 = vsel %vm5838_vm3, %v4067_v10, %v6606_v23  ;;  %v7376_v13 = vsel %vm5840_vm13, %v5060_v18, %v6608_v53  ;;  %v16717_v34 = vpop.f32.mrb[121].mxu1  ;;  %v16719_v45 = vpop.f32.mrb[122].mxu0 }
 0x50b   : > { %v4073_v12 = vadd.f32 %v16595_v52, %v12363_v61  ;;  %v7375_v55 = vsel %vm5839_vm14, %v4069_v14, %v6607_v31  ;;  %v5066_v44 = vadd.f32 %v16597_v54, %v12365_v33  ;;  %v4075_v49 = vadd.f32 %v16599_v59, %v12376_v62  ;;  %v16729_v60 = vpop.f32.mrb[122].mxu1  ;;  %v16731_v57 = vpop.f32.mrb[123].mxu0 }
 0x50c   : > { %v7377_v25 = vsel %vm5841_vm15, %v5062_v2, %v6609_v8  ;;  %10869 = vst [vmem:[%s12490_s25 + $0xb60] sm:$0xff] %v11256_v58  ;;  %v11065_v29 = vpack.c.bf16 %v7375_v55, %v7374_v22  ;;  %v5068_v9 = vadd.f32 %v16602_v30, %v12432_v1  ;;  %v4077_v20 = vadd.f32 %v16606_v0, %v12363_v61  ;;  %v16737_v30 = vpop.f32.mrb[123].mxu1 }
 0x50d   : > { %v11257_v40 = vpack.c.bf16 %v7377_v25, %v7376_v13  ;;  %vm5842_vm4 = vcmp.gt.f32.partialorder %v4073_v12, 0.0  ;;  %v6610_v52 = vmul.f32 -0.51027, %v4073_v12  ;;  %vm5844_vm5 = vcmp.gt.f32.partialorder %v5066_v44, 0.0 }
 0x50e   : > { %v6612_v3 = vmul.f32 -0.51027, %v5066_v44  ;;  %vm5843_vm0 = vcmp.gt.f32.partialorder %v4075_v49, 0.0  ;;  %v6611_v54 = vmul.f32 -0.51027, %v4075_v49  ;;  %8943 = vst [vmem:[%s12490_s25 + $0xb48] sm:$0xff] %v11065_v29  ;;  %v5070_v32 = vadd.f32 %v16608_v15, %v12365_v33 }
 0x50f   : > { %10870 = vst [vmem:[%s12490_s25 + $0xb68] sm:$0xff] %v11257_v40  ;;  %v7378_v59 = vsel %vm5842_vm4, %v4073_v12, %v6610_v52  ;;  %v4079_v10 = vadd.f32 %v16614_v4, %v12376_v62  ;;  %v5072_v18 = vadd.f32 %v16616_v5, %v12432_v1  ;;  %vm5845_vm6 = vcmp.gt.f32.partialorder %v5068_v9, 0.0 }
 0x510   : > { %v7380_v38 = vsel %vm5844_vm5, %v5066_v44, %v6612_v3  ;;  %v7379_v48 = vsel %vm5843_vm0, %v4075_v49, %v6611_v54  ;;  %v6613_v0 = vmul.f32 -0.51027, %v5068_v9  ;;  %vm5846_vm7 = vcmp.gt.f32.partialorder %v4077_v20, 0.0 }
 0x511   : > { %v11066_v16 = vpack.c.bf16 %v7379_v48, %v7378_v59  ;;  %v6614_v15 = vmul.f32 -0.51027, %v4077_v20  ;;  %vm5848_vm8 = vcmp.gt.f32.partialorder %v5070_v32, 0.0  ;;  %v6616_v19 = vmul.f32 -0.51027, %v5070_v32 }
 0x512   : > { %vm5847_vm9 = vcmp.gt.f32.partialorder %v4079_v10, 0.0  ;;  %v7381_v14 = vsel %vm5845_vm6, %v5068_v9, %v6613_v0  ;;  %v6615_v2 = vmul.f32 -0.51027, %v4079_v10  ;;  %vm5849_vm10 = vcmp.gt.f32.partialorder %v5072_v18, 0.0  ;;  %v16740_v4 = vpop.f32.mrb[124].mxu0 }
 0x513   : > { %8944 = vst [vmem:[%s12490_s25 + $0xb50] sm:$0xff] %v11066_v16  ;;  %v6617_v42 = vmul.f32 -0.51027, %v5072_v18  ;;  %v11258_v35 = vpack.c.bf16 %v7381_v14, %v7380_v38  ;;  %v7382_v5 = vsel %vm5846_vm7, %v4077_v20, %v6614_v15  ;;  %v7384_v23 = vsel %vm5848_vm8, %v5070_v32, %v6616_v19  ;;  %v16746_v31 = vpop.f32.mrb[125].mxu0 }
 0x514   : > { %v4083_v53 = vadd.f32 %v16631_v37, %v12363_v61  ;;  %v16744_v7 = vpop.f32.mrb[124].mxu1  ;;  %v7383_v8 = vsel %vm5847_vm9, %v4079_v10, %v6615_v2  ;;  %v5076_v22 = vadd.f32 %v16633_v41, %v12365_v33  ;;  %v4085_v13 = vadd.f32 %v16635_v36, %v12376_v62  ;;  %v16754_v55 = vpop.f32.mrb[126].mxu0 }
 0x515   : > { %v7385_v58 = vsel %vm5849_vm10, %v5072_v18, %v6617_v42  ;;  %v16752_v12 = vpop.f32.mrb[125].mxu1  ;;  %10871 = vst [vmem:[%s12490_s25 + $0xb70] sm:$0xff] %v11258_v35  ;;  %v11067_v37 = vpack.c.bf16 %v7383_v8, %v7382_v5  ;;  %v16759_v29 = vpop.f32.mrb[127].mxu0  ;;  %v5078_v52 = vadd.f32 %v16637_v28, %v12432_v1  ;;  %v4087_v3 = vadd.f32 %v16640_v51, %v12363_v61 }
 0x516   : > { %v11259_v25 = vpack.c.bf16 %v7385_v58, %v7384_v23  ;;  %vm5850_vm1 = vcmp.gt.f32.partialorder %v4083_v53, 0.0  ;;  %v6618_v44 = vmul.f32 -0.51027, %v4083_v53  ;;  %v16757_v49 = vpop.f32.mrb[126].mxu1  ;;  %vm5852_vm11 = vcmp.gt.f32.partialorder %v5076_v22, 0.0 }
 0x517   : > { %v6620_v40 = vmul.f32 -0.51027, %v5076_v22  ;;  %vm5851_vm12 = vcmp.gt.f32.partialorder %v4085_v13, 0.0  ;;  %v6619_v41 = vmul.f32 -0.51027, %v4085_v13  ;;  %8945 = vst [vmem:[%s12490_s25 + $0xb58] sm:$0xff] %v11067_v37  ;;  %v5080_v54 = vadd.f32 %v16644_v39, %v12365_v33 }
 0x518   : > { %10872 = vst [vmem:[%s12490_s25 + $0xb78] sm:$0xff] %v11259_v25  ;;  %v7386_v36 = vsel %vm5850_vm1, %v4083_v53, %v6618_v44  ;;  %v16769_v59 = vpop.f32.mrb[127].mxu1  ;;  %v4089_v32 = vadd.f32 %v16646_v17, %v12376_v62  ;;  %v5082_v38 = vadd.f32 %v16652_v43, %v12432_v1  ;;  %vm5853_vm2 = vcmp.gt.f32.partialorder %v5078_v52, 0.0 }
 0x519   : > { %v7388_v9 = vsel %vm5852_vm11, %v5076_v22, %v6620_v40  ;;  %v7387_v20 = vsel %vm5851_vm12, %v4085_v13, %v6619_v41  ;;  %v6621_v28 = vmul.f32 -0.51027, %v5078_v52  ;;  %vm5854_vm3 = vcmp.gt.f32.partialorder %v4087_v3, 0.0 }
 0x51a   : > { %v11068_v48 = vpack.c.bf16 %v7387_v20, %v7386_v36  ;;  %v6622_v10 = vmul.f32 -0.51027, %v4087_v3  ;;  %vm5856_vm13 = vcmp.gt.f32.partialorder %v5080_v54, 0.0  ;;  %v6624_v51 = vmul.f32 -0.51027, %v5080_v54 }
 0x51b   : > { %vm5855_vm14 = vcmp.gt.f32.partialorder %v4089_v32, 0.0  ;;  %v7389_v39 = vsel %vm5853_vm2, %v5078_v52, %v6621_v28  ;;  %v6623_v18 = vmul.f32 -0.51027, %v4089_v32  ;;  %vm5857_vm15 = vcmp.gt.f32.partialorder %v5082_v38, 0.0 }
 0x51c   : > { %8946 = vst [vmem:[%s12490_s25 + $0xb80] sm:$0xff] %v11068_v48  ;;  %v6625_v16 = vmul.f32 -0.51027, %v5082_v38  ;;  %v11260_v0 = vpack.c.bf16 %v7389_v39, %v7388_v9  ;;  %v7390_v15 = vsel %vm5854_vm3, %v4087_v3, %v6622_v10  ;;  %v7392_v17 = vsel %vm5856_vm13, %v5080_v54, %v6624_v51 }
 0x51d   : > { %v4093_v43 = vadd.f32 %v16663_v26, %v12363_v61  ;;  %v7391_v19 = vsel %vm5855_vm14, %v4089_v32, %v6623_v18  ;;  %v5086_v2 = vadd.f32 %v16665_v21, %v12365_v33  ;;  %v4095_v42 = vadd.f32 %v16671_v56, %v12376_v62 }
 0x51e   : > { %v7393_v14 = vsel %vm5857_vm15, %v5082_v38, %v6625_v16  ;;  %10873 = vst [vmem:[%s12490_s25 + $0xba0] sm:$0xff] %v11260_v0  ;;  %v11069_v35 = vpack.c.bf16 %v7391_v19, %v7390_v15  ;;  %v5088_v58 = vadd.f32 %v16673_v46, %v12432_v1  ;;  %v4097_v21 = vadd.f32 %v16675_v6, %v12363_v61 }
 0x51f   : > { %v11261_v5 = vpack.c.bf16 %v7393_v14, %v7392_v17  ;;  %vm5858_vm4 = vcmp.gt.f32.partialorder %v4093_v43, 0.0  ;;  %v6626_v23 = vmul.f32 -0.51027, %v4093_v43  ;;  %vm5860_vm5 = vcmp.gt.f32.partialorder %v5086_v2, 0.0 }
 0x520   : > { %v6628_v53 = vmul.f32 -0.51027, %v5086_v2  ;;  %vm5859_vm0 = vcmp.gt.f32.partialorder %v4095_v42, 0.0  ;;  %v6627_v8 = vmul.f32 -0.51027, %v4095_v42  ;;  %8947 = vst [vmem:[%s12490_s25 + $0xb88] sm:$0xff] %v11069_v35  ;;  %v5090_v56 = vadd.f32 %v16677_v50, %v12365_v33 }
 0x521   : > { %10874 = vst [vmem:[%s12490_s25 + $0xba8] sm:$0xff] %v11261_v5  ;;  %v7394_v26 = vsel %vm5858_vm4, %v4093_v43, %v6626_v23  ;;  %v4099_v37 = vadd.f32 %v16680_v24, %v12376_v62  ;;  %v5092_v25 = vadd.f32 %v16684_v27, %v12432_v1  ;;  %vm5861_vm6 = vcmp.gt.f32.partialorder %v5088_v58, 0.0 }
 0x522   : > { %v7396_v22 = vsel %vm5860_vm5, %v5086_v2, %v6628_v53  ;;  %v7395_v13 = vsel %vm5859_vm0, %v4095_v42, %v6627_v8  ;;  %v6629_v40 = vmul.f32 -0.51027, %v5088_v58  ;;  %vm5862_vm7 = vcmp.gt.f32.partialorder %v4097_v21, 0.0 }
 0x523   : > { %v11070_v44 = vpack.c.bf16 %v7395_v13, %v7394_v26  ;;  %v6630_v41 = vmul.f32 -0.51027, %v4097_v21  ;;  %vm5864_vm8 = vcmp.gt.f32.partialorder %v5090_v56, 0.0  ;;  %v6632_v46 = vmul.f32 -0.51027, %v5090_v56 }
 0x524   : > { %vm5863_vm9 = vcmp.gt.f32.partialorder %v4099_v37, 0.0  ;;  %v7397_v6 = vsel %vm5861_vm6, %v5088_v58, %v6629_v40  ;;  %v6631_v50 = vmul.f32 -0.51027, %v4099_v37  ;;  %vm5865_vm10 = vcmp.gt.f32.partialorder %v5092_v25, 0.0 }
 0x525   : > { %8948 = vst [vmem:[%s12490_s25 + $0xb90] sm:$0xff] %v11070_v44  ;;  %v6633_v36 = vmul.f32 -0.51027, %v5092_v25  ;;  %v11262_v52 = vpack.c.bf16 %v7397_v6, %v7396_v22  ;;  %v7398_v3 = vsel %vm5862_vm7, %v4097_v21, %v6630_v41  ;;  %v7400_v24 = vsel %vm5864_vm8, %v5090_v56, %v6632_v46 }
 0x526   : > { %v4103_v27 = vadd.f32 %v16706_v11, %v12363_v61  ;;  %v7399_v54 = vsel %vm5863_vm9, %v4099_v37, %v6631_v50  ;;  %v5096_v20 = vadd.f32 %v16712_v63, %v12365_v33  ;;  %v4105_v32 = vadd.f32 %v16714_v47, %v12376_v62 }
 0x527   : > { %v7401_v9 = vsel %vm5865_vm10, %v5092_v25, %v6633_v36  ;;  %10875 = vst [vmem:[%s12490_s25 + $0xbb0] sm:$0xff] %v11262_v52  ;;  %v11071_v38 = vpack.c.bf16 %v7399_v54, %v7398_v3  ;;  %v5098_v39 = vadd.f32 %v16717_v34, %v12432_v1  ;;  %v4107_v63 = vadd.f32 %v16719_v45, %v12363_v61 }
 0x528   : > { %v11263_v48 = vpack.c.bf16 %v7401_v9, %v7400_v24  ;;  %vm5866_vm1 = vcmp.gt.f32.partialorder %v4103_v27, 0.0  ;;  %v6634_v28 = vmul.f32 -0.51027, %v4103_v27  ;;  %vm5868_vm11 = vcmp.gt.f32.partialorder %v5096_v20, 0.0 }
 0x529   : > { %v6636_v10 = vmul.f32 -0.51027, %v5096_v20  ;;  %vm5867_vm12 = vcmp.gt.f32.partialorder %v4105_v32, 0.0  ;;  %v6635_v51 = vmul.f32 -0.51027, %v4105_v32  ;;  %8949 = vst [vmem:[%s12490_s25 + $0xb98] sm:$0xff] %v11071_v38  ;;  %v5100_v47 = vadd.f32 %v16729_v60, %v12365_v33 }
 0x52a   : > { %10876 = vst [vmem:[%s12490_s25 + $0xbb8] sm:$0xff] %v11263_v48  ;;  %v7402_v11 = vsel %vm5866_vm1, %v4103_v27, %v6634_v28  ;;  %v4109_v0 = vadd.f32 %v16731_v57, %v12376_v62  ;;  %v5102_v15 = vadd.f32 %v16737_v30, %v12432_v1  ;;  %vm5869_vm2 = vcmp.gt.f32.partialorder %v5098_v39, 0.0 }
 0x52b   : > { %v7404_v18 = vsel %vm5868_vm11, %v5096_v20, %v6636_v10  ;;  %v7403_v16 = vsel %vm5867_vm12, %v4105_v32, %v6635_v51  ;;  %v6637_v43 = vmul.f32 -0.51027, %v5098_v39  ;;  %vm5870_vm3 = vcmp.gt.f32.partialorder %v4107_v63, 0.0 }
 0x52c   : > { %v11072_v17 = vpack.c.bf16 %v7403_v16, %v7402_v11  ;;  %v6638_v19 = vmul.f32 -0.51027, %v4107_v63  ;;  %vm5872_vm13 = vcmp.gt.f32.partialorder %v5100_v47, 0.0  ;;  %v6640_v34 = vmul.f32 -0.51027, %v5100_v47 }
 0x52d   : > { %vm5871_vm14 = vcmp.gt.f32.partialorder %v4109_v0, 0.0  ;;  %v7405_v45 = vsel %vm5869_vm2, %v5098_v39, %v6637_v43  ;;  %v6639_v60 = vmul.f32 -0.51027, %v4109_v0  ;;  %vm5873_vm15 = vcmp.gt.f32.partialorder %v5102_v15, 0.0 }
 0x52e   : > { %8950 = vst [vmem:[%s12490_s25 + $0xbc0] sm:$0xff] %v11072_v17  ;;  %v6641_v14 = vmul.f32 -0.51027, %v5102_v15  ;;  %v11264_v2 = vpack.c.bf16 %v7405_v45, %v7404_v18  ;;  %v7406_v42 = vsel %vm5870_vm3, %v4107_v63, %v6638_v19  ;;  %v7408_v57 = vsel %vm5872_vm13, %v5100_v47, %v6640_v34 }
 0x52f   : > { %v4113_v30 = vadd.f32 %v16740_v4, %v12363_v61  ;;  %v7407_v35 = vsel %vm5871_vm14, %v4109_v0, %v6639_v60  ;;  %v5106_v23 = vadd.f32 %v16744_v7, %v12365_v33  ;;  %v4115_v53 = vadd.f32 %v16746_v31, %v12376_v62 }
 0x530   : > { %v7409_v5 = vsel %vm5873_vm15, %v5102_v15, %v6641_v14  ;;  %10877 = vst [vmem:[%s12490_s25 + $0xbe0] sm:$0xff] %v11264_v2  ;;  %v11073_v8 = vpack.c.bf16 %v7407_v35, %v7406_v42  ;;  %v5108_v22 = vadd.f32 %v16752_v12, %v12432_v1  ;;  %v4117_v7 = vadd.f32 %v16754_v55, %v12363_v61 }
 0x531   : > { %v11265_v26 = vpack.c.bf16 %v7409_v5, %v7408_v57  ;;  %vm5874_vm4 = vcmp.gt.f32.partialorder %v4113_v30, 0.0  ;;  %v6642_v58 = vmul.f32 -0.51027, %v4113_v30  ;;  %vm5876_vm5 = vcmp.gt.f32.partialorder %v5106_v23, 0.0 }
 0x532   : > { %v6644_v21 = vmul.f32 -0.51027, %v5106_v23  ;;  %vm5875_vm0 = vcmp.gt.f32.partialorder %v4115_v53, 0.0  ;;  %v6643_v56 = vmul.f32 -0.51027, %v4115_v53  ;;  %8951 = vst [vmem:[%s12490_s25 + $0xbc8] sm:$0xff] %v11073_v8  ;;  %v5110_v31 = vadd.f32 %v16757_v49, %v12365_v33 }
 0x533   : > { %10878 = vst [vmem:[%s12490_s25 + $0xbe8] sm:$0xff] %v11265_v26  ;;  %v7410_v4 = vsel %vm5874_vm4, %v4113_v30, %v6642_v58  ;;  %v4119_v25 = vadd.f32 %v16759_v29, %v12376_v62  ;;  %v5112_v44 = vadd.f32 %v16769_v59, %v12432_v1  ;;  %vm5877_vm6 = vcmp.gt.f32.partialorder %v5108_v22, 0.0 }
 0x534   : > { %v7412_v13 = vsel %vm5876_vm5, %v5106_v23, %v6644_v21  ;;  %v7411_v37 = vsel %vm5875_vm0, %v4115_v53, %v6643_v56  ;;  %v6645_v41 = vmul.f32 -0.51027, %v5108_v22  ;;  %vm5878_vm7 = vcmp.gt.f32.partialorder %v4117_v7, 0.0 }
 0x535   : > { %v11074_v40 = vpack.c.bf16 %v7411_v37, %v7410_v4  ;;  %v6646_v12 = vmul.f32 -0.51027, %v4117_v7  ;;  %vm5880_vm8 = vcmp.gt.f32.partialorder %v5110_v31, 0.0  ;;  %v6648_v61 = vmul.f32 -0.51027, %v5110_v31 }
 0x536   : > { %vm5879_vm9 = vcmp.gt.f32.partialorder %v4119_v25, 0.0  ;;  %v7413_v33 = vsel %vm5877_vm6, %v5108_v22, %v6645_v41  ;;  %v6647_v55 = vmul.f32 -0.51027, %v4119_v25  ;;  %vm5881_vm10 = vcmp.gt.f32.partialorder %v5112_v44, 0.0 }
 0x537   : > { %8952 = vst [vmem:[%s12490_s25 + $0xbd0] sm:$0xff] %v11074_v40  ;;  %v6649_v49 = vmul.f32 -0.51027, %v5112_v44  ;;  %v11266_v62 = vpack.c.bf16 %v7413_v33, %v7412_v13  ;;  %v7414_v29 = vsel %vm5878_vm7, %v4117_v7, %v6646_v12  ;;  %v7416_v46 = vsel %vm5880_vm8, %v5110_v31, %v6648_v61 }
 0x538   : > { %v7415_v1 = vsel %vm5879_vm9, %v4119_v25, %v6647_v55 }
 0x539   : > { %v7417_v59 = vsel %vm5881_vm10, %v5112_v44, %v6649_v49  ;;  %10879 = vst [vmem:[%s12490_s25 + $0xbf0] sm:$0xff] %v11266_v62  ;;  %v11075_v6 = vpack.c.bf16 %v7415_v1, %v7414_v29 }
 0x53a   : > { %v11267_v50 = vpack.c.bf16 %v7417_v59, %v7416_v46 }
 0x53b   : > { %8953 = vst [vmem:[%s12490_s25 + $0xbd8] sm:$0xff] %v11075_v6 }
 0x53c   : > { %10880 = vst [vmem:[%s12490_s25 + $0xbf8] sm:$0xff] %v11267_v50 }
 0x53d PF: > { %s13_s12 = sadd.s32 1, %s11518_s12  }
 0x53e   : > { %p10_p5 = scmp.ge.s32.totalorder %s13_s12, 4  }
 0x540   :  { %12 = sbr.rel (!%p10_p5) target bundleno = 1 (0x1), region = 63 }

</bundles_post_ra>
